<compile_context>
chip_gen: v7x
topology: tpu7x:2x2x1
jax: 0.10.0
libtpu: 0.0.40
codegen_flags: <defaults>
</compile_context>

<pallas_src>
import functools

import jax
import jax.numpy as jnp
from jax import lax
from jax.experimental import pallas as pl
from jax.experimental.pallas import tpu as pltpu


# ----------------------------------------------------------------------------
# Kernel: one grid step nearest-resamples `bt` whole images with one matmul.
# ----------------------------------------------------------------------------
def _interp_kernel(x_ref, sel_ref, o_ref, *, precision):
    # x_ref   : (bt, H*W)     flattened source images (input dtype), lane-dense
    # sel_ref : (H*W, OH*OW)  one-hot selection columns (compute dtype), resident
    # o_ref   : (bt, OH*OW)   flattened resampled images, lane-dense stores
    x = x_ref[...].astype(sel_ref.dtype)          # no-op on the float fast paths
    out = jnp.dot(x, sel_ref[...], precision=precision,
                  preferred_element_type=jnp.float32)
    o_ref[...] = out.astype(o_ref.dtype)


# ----------------------------------------------------------------------------
# Tiling helpers
# ----------------------------------------------------------------------------
def _round_up(x: int, m: int) -> int:
    return ((x + m - 1) // m) * m


def _sublane_pack(dtype) -> int:
    # Sublane packing factor: 8 for 32-bit, 16 for 16-bit, 32 for 8-bit dtypes.
    return max(8, 32 // max(jnp.dtype(dtype).itemsize, 1))


def _vmem_capacity_bytes() -> int:
    # Generation-aware VMEM query; conservative (v7x per-TC) fallback.
    try:
        return int(pltpu.get_tpu_info().vmem_capacity_bytes)
    except Exception:
        return 64 * 1024 * 1024


def _pick_batch_tile(nc: int, per_image_bytes: int, pack: int,
                     block_budget_bytes: int) -> int:
    """Sublane-aligned batch tile; need NOT divide nc (ragged tail is masked)."""
    cap = max(pack, (block_budget_bytes // max(per_image_bytes, 1)) // pack * pack)
    if nc <= pack:
        return nc                                  # tiny input: one full-dim block
    bt = min(cap, (nc // pack) * pack)             # pack-aligned and <= nc
    if pl.cdiv(nc, bt) < 2:
        # Keep >= 2 grid steps so both v7x TensorCores get work (harmless on 1-TC parts).
        bt = min(bt, _round_up(pl.cdiv(nc, 2), pack))
    return max(bt, pack)


# ----------------------------------------------------------------------------
# Wrapper: Interpolation(target_size)(x) for 4-D NCHW input, mode='nearest'.
# ----------------------------------------------------------------------------
@functools.partial(jax.jit, static_argnames=("target_size", "f32_exact"))
def interpolation_forward(x: jnp.ndarray, target_size, f32_exact: bool = True):
    if x.ndim != 4:
        raise ValueError("Interpolation expects a 4-D NCHW input")
    N, C, H, W = x.shape
    if isinstance(target_size, int):
        OH = OW = int(target_size)
    else:
        OH, OW = (int(s) for s in target_size)
    NC, HW, OHOW = N * C, H * W, OH * OW

    if x.dtype == jnp.bfloat16:
        compute_dtype, precision = jnp.bfloat16, None       # one-hot matmul is bit-exact
    else:
        # f32 / f16 / int inputs: select in f32 with fp32 contract precision.
        # TODO(synk): integer inputs are exact only for |x| < 2**24 (no integer MXU
        # datapath on v7x); a non-MXU gather path would be needed beyond that.
        compute_dtype = jnp.float32
        precision = lax.Precision.HIGHEST if f32_exact else None

    # PyTorch mode='nearest': src = floor(dst * in / out), clamped.
    # TODO(synk): torch uses a float scale (in/out); the exact-integer form here can
    # differ by one index in rare very-large-size cases.
    hsrc = jnp.minimum((jnp.arange(OH) * H) // OH, H - 1)
    wsrc = jnp.minimum((jnp.arange(OW) * W) // OW, W - 1)
    flat_src = (hsrc[:, None] * W + wsrc[None, :]).reshape(-1)            # (OH*OW,)
    sel = (flat_src[None, :] == jnp.arange(HW)[:, None]).astype(compute_dtype)

    x_flat = x.reshape(NC, HW)

    isz = jnp.dtype(x.dtype).itemsize
    csz = jnp.dtype(compute_dtype).itemsize
    pack = _sublane_pack(x.dtype)
    sel_bytes = HW * OHOW * csz

    vmem_cap = _vmem_capacity_bytes()
    budget = min(int(vmem_cap * 0.5), 96 * 1024 * 1024)     # ~32 MiB v7x, ~64 MiB v5e/v6e
    block_budget = max(budget - 2 * sel_bytes - (2 << 20), 4 * 1024 * 1024)
    # Per-image VMEM: double-buffered in/out blocks + f32/compute-dtype temporaries.
    per_image = 2 * (HW + OHOW) * isz + (HW + OHOW) * 4 + HW * csz
    bt = _pick_batch_tile(NC, per_image, pack, block_budget)

    need = bt * per_image + 2 * sel_bytes
    vmem_limit = int(min(vmem_cap * 0.9, max(need + (4 << 20), 32 * 1024 * 1024)))

    cost = pl.CostEstimate(
        flops=0, transcendentals=0,                          # pure data movement
        bytes_accessed=NC * (HW + OHOW) * isz + sel_bytes)

    kernel = functools.partial(_interp_kernel, precision=precision)
    out_flat = pl.pallas_call(
        kernel,
        out_shape=jax.ShapeDtypeStruct((NC, OHOW), x.dtype),
        grid=(pl.cdiv(NC, bt),),
        in_specs=[
            pl.BlockSpec((bt, HW), lambda i: (i, 0)),        # bt whole images, lane-dense
            pl.BlockSpec((HW, OHOW), lambda i: (0, 0)),      # constant selector, resident
        ],
        out_specs=pl.BlockSpec((bt, OHOW), lambda i: (i, 0)),  # lane-dense stores
        compiler_params=pltpu.CompilerParams(
            dimension_semantics=("parallel",),
            vmem_limit_bytes=vmem_limit),
        cost_estimate=cost,
    )(x_flat, sel)

    return out_flat.reshape(N, C, OH, OW)


# ----------------------------------------------------------------------------
# Pure-JAX reference and test driver
# ----------------------------------------------------------------------------
def _reference_nearest(x, target_size):
    N, C, H, W = x.shape
    OH, OW = (target_size, target_size) if isinstance(target_size, int) else target_size
    hsrc = jnp.minimum((jnp.arange(OH) * H) // OH, H - 1)
    wsrc = jnp.minimum((jnp.arange(OW) * W) // OW, W - 1)
    return x[:, :, hsrc, :][:, :, :, wsrc]


def _run(x, target_size):
    try:
        out = interpolation_forward(x, target_size)
        jax.block_until_ready(out)
        return out
    except Exception:
        # TODO(synk): fallback for toolchains without fp32 contract precision on the
        # Pallas dot; f32 selection then matches torch only to MXU-pass accuracy.
        out = interpolation_forward(x, target_size, f32_exact=False)
        jax.block_until_ready(out)
        return out


if __name__ == "__main__":
    key = jax.random.PRNGKey(0)
    k1, k2 = jax.random.split(key)

    x_f32 = jax.random.normal(k1, (2, 4, 16, 16), dtype=jnp.float32)
    x_odd = jax.random.normal(k2, (2, 3, 16, 16), dtype=jnp.float32)
    x_bf16 = x_f32.astype(jnp.bfloat16)

    cases = [
        (x_f32, (32, 32)),    # 2x upsample
        (x_odd, (8, 12)),     # downsample, mixed ratios, NC not a multiple of 8
        (x_bf16, (32, 24)),   # bf16 fast path, mixed ratios
    ]

    for xi, tsz in cases:
        out = _run(xi, tsz)
        ref = _reference_nearest(xi, tsz)
        assert out.shape == ref.shape, (out.shape, ref.shape)
        assert out.dtype == xi.dtype, (out.dtype, xi.dtype)
        # Lenient tolerance: robust to MXU f32 pass-count differences, yet any
        # wrong gather would be off by O(1) and still fail.
        assert bool(jnp.allclose(out.astype(jnp.float32), ref.astype(jnp.float32),
                                 rtol=1e-2, atol=1e-2)), f"mismatch for {tsz}"

    print("KERNEL_OK")
</pallas_src>

<mosaic_0001>
module attributes {stable_mosaic.version = 11 : i64} {
  func.func @_interp_kernel(%arg0: i32, %arg1: memref<8x256xf32, #tpu.memory_space<vmem>>, %arg2: memref<256x1024xf32, #tpu.memory_space<vmem>>, %arg3: memref<8x1024xf32, #tpu.memory_space<vmem>>) attributes {dimension_semantics = [#tpu.dimension_semantics<parallel>], iteration_bounds = array<i64: 1>, scalar_prefetch = 0 : i64, scratch_operands = 0 : i64, tpu.core_type = #tpu.core_type<tc>, window_params = [{transform_indices = @transform_0, window_bounds = array<i64: 8, 256>}, {pipeline_mode = #tpu.pipeline_mode<synchronous>, transform_indices = @transform_1, window_bounds = array<i64: 256, 1024>}, {transform_indices = @transform_2, window_bounds = array<i64: 8, 1024>}]} {
    %c0 = arith.constant 0 : index
    %c0_0 = arith.constant 0 : index
    %0 = vector.load %arg1[%c0, %c0_0] : memref<8x256xf32, #tpu.memory_space<vmem>>, vector<8x256xf32>
    %c0_1 = arith.constant 0 : index
    %c0_2 = arith.constant 0 : index
    %1 = vector.load %arg2[%c0_1, %c0_2] : memref<256x1024xf32, #tpu.memory_space<vmem>>, vector<256x1024xf32>
    %cst = arith.constant dense<0.000000e+00> : vector<8x1024xf32>
    %2 = tpu.matmul %0, %1, %cst {dimension_numbers = #tpu.dot_dimension_numbers<[1], [0], [0], [1], [0, 0, 1, 1], [], []>, precision = #tpu.contract_precision<fp32>} : vector<8x256xf32>, vector<256x1024xf32>, vector<8x1024xf32> -> vector<8x1024xf32>
    %c0_3 = arith.constant 0 : index
    %c0_4 = arith.constant 0 : index
    %3 = vector.load %arg3[%c0_3, %c0_4] : memref<8x1024xf32, #tpu.memory_space<vmem>>, vector<8x1024xf32>
    tpu.vector_store %arg3[%c0_3, %c0_4], %2 {strides = array<i32>} : memref<8x1024xf32, #tpu.memory_space<vmem>>, vector<8x1024xf32>,
    return
  }
  func.func @transform_0(%arg0: i32) -> (i32, i32) {
    %c0_i32 = arith.constant 0 : i32
    %c0_i32_0 = arith.constant 0 : i32
    return %arg0, %c0_i32 : i32, i32
  }
  func.func @transform_1(%arg0: i32) -> (i32, i32) {
    %c0_i32 = arith.constant 0 : i32
    %c0_i32_0 = arith.constant 0 : i32
    %c0_i32_1 = arith.constant 0 : i32
    return %c0_i32, %c0_i32_0 : i32, i32
  }
  func.func @transform_2(%arg0: i32) -> (i32, i32) {
    %c0_i32 = arith.constant 0 : i32
    %c0_i32_0 = arith.constant 0 : i32
    return %arg0, %c0_i32 : i32, i32
  }
}

module attributes {stable_mosaic.version = 11 : i64} {
  func.func @_interp_kernel(%arg0: i32, %arg1: memref<8x256xf32, #tpu.memory_space<vmem>>, %arg2: memref<256x1024xf32, #tpu.memory_space<vmem>>, %arg3: memref<8x1024xf32, #tpu.memory_space<vmem>>) attributes {dimension_semantics = [#tpu.dimension_semantics<parallel>], iteration_bounds = array<i64: 1>, scalar_prefetch = 0 : i64, scratch_operands = 0 : i64, tpu.core_type = #tpu.core_type<tc>, window_params = [{transform_indices = @transform_0, window_bounds = array<i64: 8, 256>}, {pipeline_mode = #tpu.pipeline_mode<synchronous>, transform_indices = @transform_1, window_bounds = array<i64: 256, 1024>}, {transform_indices = @transform_2, window_bounds = array<i64: 8, 1024>}]} {
    %c0 = arith.constant 0 : index
    %c0_0 = arith.constant 0 : index
    %0 = vector.load %arg1[%c0, %c0_0] : memref<8x256xf32, #tpu.memory_space<vmem>>, vector<8x256xf32>
    %c0_1 = arith.constant 0 : index
    %c0_2 = arith.constant 0 : index
    %1 = vector.load %arg2[%c0_1, %c0_2] : memref<256x1024xf32, #tpu.memory_space<vmem>>, vector<256x1024xf32>
    %cst = arith.constant dense<0.000000e+00> : vector<8x1024xf32>
    %2 = tpu.matmul %0, %1, %cst {dimension_numbers = #tpu.dot_dimension_numbers<[1], [0], [0], [1], [0, 0, 1, 1], [], []>} : vector<8x256xf32>, vector<256x1024xf32>, vector<8x1024xf32> -> vector<8x1024xf32>
    %c0_3 = arith.constant 0 : index
    %c0_4 = arith.constant 0 : index
    %3 = vector.load %arg3[%c0_3, %c0_4] : memref<8x1024xf32, #tpu.memory_space<vmem>>, vector<8x1024xf32>
    tpu.vector_store %arg3[%c0_3, %c0_4], %2 {strides = array<i32>} : memref<8x1024xf32, #tpu.memory_space<vmem>>, vector<8x1024xf32>,
    return
  }
  func.func @transform_0(%arg0: i32) -> (i32, i32) {
    %c0_i32 = arith.constant 0 : i32
    %c0_i32_0 = arith.constant 0 : i32
    return %arg0, %c0_i32 : i32, i32
  }
  func.func @transform_1(%arg0: i32) -> (i32, i32) {
    %c0_i32 = arith.constant 0 : i32
    %c0_i32_0 = arith.constant 0 : i32
    %c0_i32_1 = arith.constant 0 : i32
    return %c0_i32, %c0_i32_0 : i32, i32
  }
  func.func @transform_2(%arg0: i32) -> (i32, i32) {
    %c0_i32 = arith.constant 0 : i32
    %c0_i32_0 = arith.constant 0 : i32
    return %arg0, %c0_i32 : i32, i32
  }
}

</mosaic_0001>

<bundles_post_ra>
// kernel: interpolation_forward.1
= control target key start
LH: loop header
LB: loop body
LE: loop exit
PB: predicated region body
PF: predicated region fallthrough
CT: control target
= control target key end

     0   :  { %s11313_s1 = inlined_call_operand.vmem [shape: f32[256,1024], index: 1, kind: input, shape index: {}]   ;;  %s11314_s0 = inlined_call_operand.vmem [shape: f32[8,256], index: 0, kind: input, shape index: {}]   ;;  %s11315_s2 = inlined_call_operand.vmem [shape: f32[8,1024], index: 2, kind: output, shape index: {}]  }
   0x1   :  { %v14_v0 = vld [vmem:[%s11313_s1 + $0x8] sm:$0xff]  ;;  %v16_v2 = vld [vmem:[%s11313_s1 + $0x18] sm:$0xff]  ;;  %v13_v7 = vld [vmem:[%s11313_s1] sm:$0xff] }
   0x2   :  { %v22_v1 = vld [vmem:[%s11313_s1 + $0x48] sm:$0xff]  ;;  %v269_v3 = vand.u32 4294901760, %v14_v0  ;;  %v24_v5 = vld [vmem:[%s11313_s1 + $0x58] sm:$0xff]  ;;  %v1553_v6 = vand.u32 4294901760, %v16_v2  ;;  %v21_v8 = vld [vmem:[%s11313_s1 + $0x40] sm:$0xff]  ;;  %v271_v10 = vand.u32 4294901760, %v13_v7 }
   0x3   :  { %v273_v4 = vand.u32 4294901760, %v22_v1  ;;  %v1557_v9 = vand.u32 4294901760, %v24_v5  ;;  %v275_v11 = vand.u32 4294901760, %v21_v8  ;;  %v15_v12 = vld [vmem:[%s11313_s1 + $0x10] sm:$0xff]  ;;  %v30_v14 = vld [vmem:[%s11313_s1 + $0x88] sm:$0xff]  ;;  %v32_v20 = vld [vmem:[%s11313_s1 + $0x98] sm:$0xff] }
   0x4   :  { %v23_v13 = vld [vmem:[%s11313_s1 + $0x50] sm:$0xff]  ;;  %v7037_v16 = vsub.f32 %v14_v0, %v269_v3  ;;  %v7041_v18 = vsub.f32 %v16_v2, %v1553_v6  ;;  %v38_v19 = vld [vmem:[%s11313_s1 + $0xc8] sm:$0xff]  ;;  %v40_v21 = vld [vmem:[%s11313_s1 + $0xd8] sm:$0xff]  ;;  %v7058_v25 = vsub.f32 %v13_v7, %v271_v10  ;;  %v1555_v28 = vand.u32 4294901760, %v15_v12 }
   0x5   :  { %v7035_v15 = vpack.c.bf16 %v273_v4, %v269_v3  ;;  %v7039_v17 = vsub.f32 %v22_v1, %v273_v4  ;;  %v7052_v22 = vpack.c.bf16 %v1557_v9, %v1553_v6  ;;  %v7054_v23 = vsub.f32 %v24_v5, %v1557_v9  ;;  %v29_v26 = vld [vmem:[%s11313_s1 + $0x80] sm:$0xff]  ;;  %v31_v36 = vld [vmem:[%s11313_s1 + $0x90] sm:$0xff]  ;;  %v46_v42 = vld [vmem:[%s11313_s1 + $0x108] sm:$0xff] }
   0x6   :  { %12195 = vst [vmem:[#allocation3_spill] sm:$0xff] %v7037_v16  ;;  %12197 = vst [vmem:[#allocation5_spill] sm:$0xff] %v7041_v18  ;;  %v7056_v24 = vpack.c.bf16 %v275_v11, %v271_v10  ;;  %v7064_v27 = vsub.f32 %v21_v8, %v275_v11  ;;  %v1559_v29 = vand.u32 4294901760, %v23_v13  ;;  %v277_v30 = vand.u32 4294901760, %v30_v14  ;;  %v37_v31 = vld [vmem:[%s11313_s1 + $0xc0] sm:$0xff]  ;;  %v39_v37 = vld [vmem:[%s11313_s1 + $0xd0] sm:$0xff] }
   0x7   :  { %12194 = vst [vmem:[#allocation2_spill] sm:$0xff] %v7035_v15  ;;  %12196 = vst [vmem:[#allocation4_spill] sm:$0xff] %v7039_v17  ;;  %5418 = vmatprep.subr.bf16.mxu0 %v7035_v15  ;;  %5802 = vmatprep.subr.bf16.mxu1 %v7052_v22  ;;  %v281_v32 = vand.u32 4294901760, %v38_v19  ;;  %v1561_v33 = vand.u32 4294901760, %v32_v20  ;;  %v1565_v34 = vand.u32 4294901760, %v40_v21  ;;  %v279_v35 = vand.u32 4294901760, %v29_v26 }
   0x8   :  { %12198 = vst [vmem:[#allocation6_spill] sm:$0xff] %v7052_v22  ;;  %12199 = vst [vmem:[#allocation7_spill] sm:$0xff] %v7054_v23  ;;  %5420 = vmatpush1.bf16.msra.mxu0 %v7056_v24  ;;  %v7077_v38 = vpack.c.bf16 %v1559_v29, %v1555_v28  ;;  %v7079_v39 = vsub.f32 %v15_v12, %v1555_v28  ;;  %v7081_v40 = vsub.f32 %v23_v13, %v1559_v29  ;;  %v54_v43 = vld [vmem:[%s11313_s1 + $0x148] sm:$0xff]  ;;  %v48_v44 = vld [vmem:[%s11313_s1 + $0x118] sm:$0xff] }
   0x9   :  { %12200 = vst [vmem:[#allocation8_spill] sm:$0xff] %v7056_v24  ;;  %12201 = vst [vmem:[#allocation9_spill] sm:$0xff] %v7058_v25  ;;  %v7083_v41 = vsub.f32 %v30_v14, %v277_v30  ;;  %v7094_v45 = vpack.c.bf16 %v281_v32, %v277_v30  ;;  %v7096_v46 = vsub.f32 %v38_v19, %v281_v32  ;;  %v56_v49 = vld [vmem:[%s11313_s1 + $0x158] sm:$0xff]  ;;  %v283_v51 = vand.u32 4294901760, %v37_v31  ;;  %v45_v58 = vld [vmem:[%s11313_s1 + $0x100] sm:$0xff] }
   0xa   :  { %12202 = vst [vmem:[#allocation10_spill] sm:$0xff] %v7064_v27  ;;  %12203 = vst [vmem:[#allocation11_spill] sm:$0xff] %v7077_v38  ;;  %v7098_v47 = vpack.c.bf16 %v1565_v34, %v1561_v33  ;;  %v7100_v48 = vsub.f32 %v32_v20, %v1561_v33  ;;  %5804 = vmatpush1.bf16.msra.mxu1 %v7077_v38  ;;  %v7106_v50 = vsub.f32 %v40_v21, %v1565_v34  ;;  %v53_v59 = vld [vmem:[%s11313_s1 + $0x140] sm:$0xff]  ;;  %v47_v0 = vld [vmem:[%s11313_s1 + $0x110] sm:$0xff] }
   0xb   :  { %12204 = vst [vmem:[#allocation12_spill] sm:$0xff] %v7079_v39  ;;  %12205 = vst [vmem:[#allocation13_spill] sm:$0xff] %v7081_v40  ;;  %v7108_v52 = vsub.f32 %v29_v26, %v279_v35  ;;  %v1563_v53 = vand.u32 4294901760, %v31_v36  ;;  %5422 = vmatprep.subr.bf16.mxu0 %v7094_v45  ;;  %v1567_v54 = vand.u32 4294901760, %v39_v37  ;;  %v285_v55 = vand.u32 4294901760, %v46_v42  ;;  %v55_v1 = vld [vmem:[%s11313_s1 + $0x150] sm:$0xff] }
   0xc   :  { %12206 = vst [vmem:[#allocation14_spill] sm:$0xff] %v7083_v41  ;;  %12207 = vst [vmem:[#allocation15_spill] sm:$0xff] %v7094_v45  ;;  %5806 = vmatprep.subr.bf16.mxu1 %v7098_v47  ;;  %v289_v56 = vand.u32 4294901760, %v54_v43  ;;  %v1569_v57 = vand.u32 4294901760, %v48_v44  ;;  %v7118_v60 = vpack.c.bf16 %v283_v51, %v279_v35  ;;  %v7120_v61 = vsub.f32 %v37_v31, %v283_v51  ;;  %v62_v2 = vld [vmem:[%s11313_s1 + $0x188] sm:$0xff]  ;;  %v64_v8 = vld [vmem:[%s11313_s1 + $0x198] sm:$0xff] }
   0xd   :  { %12208 = vst [vmem:[#allocation16_spill] sm:$0xff] %v7096_v46  ;;  %12209 = vst [vmem:[#allocation17_spill] sm:$0xff] %v7098_v47  ;;  %v7122_v62 = vsub.f32 %v31_v36, %v1563_v53  ;;  %v1573_v63 = vand.u32 4294901760, %v56_v49  ;;  %v7133_v3 = vpack.c.bf16 %v1567_v54, %v1563_v53  ;;  %v7135_v4 = vsub.f32 %v39_v37, %v1567_v54  ;;  %v70_v7 = vld [vmem:[%s11313_s1 + $0x1c8] sm:$0xff]  ;;  %v72_v9 = vld [vmem:[%s11313_s1 + $0x1d8] sm:$0xff] }
   0xe   :  { %12210 = vst [vmem:[#allocation18_spill] sm:$0xff] %v7100_v48  ;;  %12211 = vst [vmem:[#allocation19_spill] sm:$0xff] %v7106_v50  ;;  %v7137_v5 = vpack.c.bf16 %v289_v56, %v285_v55  ;;  %v7139_v6 = vsub.f32 %v46_v42, %v285_v55  ;;  %5424 = vmatpush1.bf16.msra.mxu0 %v7118_v60  ;;  %v7151_v10 = vsub.f32 %v54_v43, %v289_v56  ;;  %v61_v31 = vld [vmem:[%s11313_s1 + $0x180] sm:$0xff]  ;;  %v63_v37 = vld [vmem:[%s11313_s1 + $0x190] sm:$0xff] }
   0xf   :  { %12212 = vst [vmem:[#allocation20_spill] sm:$0xff] %v7108_v52  ;;  %12213 = vst [vmem:[#allocation21_spill] sm:$0xff] %v7118_v60  ;;  %v7153_v11 = vpack.c.bf16 %v1573_v63, %v1569_v57  ;;  %v7155_v12 = vsub.f32 %v48_v44, %v1569_v57  ;;  %v7157_v13 = vsub.f32 %v56_v49, %v1573_v63  ;;  %5808 = vmatpush1.bf16.msra.mxu1 %v7133_v3  ;;  %v69_v36 = vld [vmem:[%s11313_s1 + $0x1c0] sm:$0xff]  ;;  %v71_v42 = vld [vmem:[%s11313_s1 + $0x1d0] sm:$0xff] }
  0x10   :  { %12214 = vst [vmem:[#allocation22_spill] sm:$0xff] %v7120_v61  ;;  %12215 = vst [vmem:[#allocation23_spill] sm:$0xff] %v7122_v62  ;;  %5426 = vmatprep.subr.bf16.mxu0 %v7137_v5  ;;  %v287_v14 = vand.u32 4294901760, %v45_v58  ;;  %v291_v19 = vand.u32 4294901760, %v53_v59  ;;  %v1571_v20 = vand.u32 4294901760, %v47_v0  ;;  %v1575_v21 = vand.u32 4294901760, %v55_v1 }
  0x11   :  { %12216 = vst [vmem:[#allocation24_spill] sm:$0xff] %v7133_v3  ;;  %12217 = vst [vmem:[#allocation25_spill] sm:$0xff] %v7135_v4  ;;  %5810 = vmatprep.subr.bf16.mxu1 %v7153_v11  ;;  %v293_v26 = vand.u32 4294901760, %v62_v2  ;;  %v297_v28 = vand.u32 4294901760, %v70_v7  ;;  %v1577_v29 = vand.u32 4294901760, %v64_v8  ;;  %v1581_v30 = vand.u32 4294901760, %v72_v9 }
  0x12   :  { %12218 = vst [vmem:[#allocation26_spill] sm:$0xff] %v7137_v5  ;;  %12219 = vst [vmem:[#allocation27_spill] sm:$0xff] %v7139_v6  ;;  %v7165_v32 = vpack.c.bf16 %v291_v19, %v287_v14  ;;  %v7167_v33 = vsub.f32 %v45_v58, %v287_v14  ;;  %v7169_v34 = vsub.f32 %v53_v59, %v291_v19  ;;  %v78_v53 = vld [vmem:[%s11313_s1 + $0x208] sm:$0xff]  ;;  %v80_v55 = vld [vmem:[%s11313_s1 + $0x218] sm:$0xff]  ;;  %v295_v59 = vand.u32 4294901760, %v61_v31 }
  0x13   :  { %12220 = vst [vmem:[#allocation28_spill] sm:$0xff] %v7151_v10  ;;  %12221 = vst [vmem:[#allocation29_spill] sm:$0xff] %v7153_v11  ;;  %v7171_v35 = vpack.c.bf16 %v1575_v21, %v1571_v20  ;;  %v7182_v43 = vsub.f32 %v47_v0, %v1571_v20  ;;  %v7184_v44 = vsub.f32 %v55_v1, %v1575_v21  ;;  %v86_v54 = vld [vmem:[%s11313_s1 + $0x248] sm:$0xff]  ;;  %v299_v0 = vand.u32 4294901760, %v69_v36  ;;  %v88_v14 = vld [vmem:[%s11313_s1 + $0x258] sm:$0xff] }
  0x14   :  { %12222 = vst [vmem:[#allocation30_spill] sm:$0xff] %v7155_v12  ;;  %12223 = vst [vmem:[#allocation31_spill] sm:$0xff] %v7157_v13  ;;  %v7186_v49 = vpack.c.bf16 %v297_v28, %v293_v26  ;;  %v7188_v51 = vsub.f32 %v62_v2, %v293_v26  ;;  %5428 = vmatpush1.bf16.msra.mxu0 %v7165_v32  ;;  %v7201_v56 = vsub.f32 %v70_v7, %v297_v28  ;;  %v77_v21 = vld [vmem:[%s11313_s1 + $0x200] sm:$0xff]  ;;  %v79_v26 = vld [vmem:[%s11313_s1 + $0x210] sm:$0xff] }
  0x15   :  { %12224 = vst [vmem:[#allocation32_spill] sm:$0xff] %v7165_v32  ;;  %12225 = vst [vmem:[#allocation33_spill] sm:$0xff] %v7167_v33  ;;  %5812 = vmatpush1.bf16.msra.mxu1 %v7171_v35  ;;  %v7203_v57 = vpack.c.bf16 %v1581_v30, %v1577_v29  ;;  %v7205_v58 = vsub.f32 %v64_v8, %v1577_v29  ;;  %v7208_v63 = vsub.f32 %v72_v9, %v1581_v30  ;;  %v85_v9 = vld [vmem:[%s11313_s1 + $0x240] sm:$0xff]  ;;  %v95_v47 = vld [vmem:[%s11313_s1 + $0x290] sm:$0xff] }
  0x16   :  { %12226 = vst [vmem:[#allocation34_spill] sm:$0xff] %v7169_v34  ;;  %12227 = vst [vmem:[#allocation35_spill] sm:$0xff] %v7171_v35  ;;  %5430 = vmatprep.subr.bf16.mxu0 %v7186_v49  ;;  %v1579_v1 = vand.u32 4294901760, %v63_v37  ;;  %v1583_v2 = vand.u32 4294901760, %v71_v42  ;;  %v7214_v7 = vsub.f32 %v61_v31, %v295_v59  ;;  %v301_v19 = vand.u32 4294901760, %v78_v53  ;;  %v94_v35 = vld [vmem:[%s11313_s1 + $0x288] sm:$0xff] }
  0x17   :  { %12228 = vst [vmem:[#allocation36_spill] sm:$0xff] %v7182_v43  ;;  %12229 = vst [vmem:[#allocation37_spill] sm:$0xff] %v7184_v44  ;;  %5814 = vmatprep.subr.bf16.mxu1 %v7203_v57  ;;  %v305_v20 = vand.u32 4294901760, %v86_v54  ;;  %v1585_v8 = vand.u32 4294901760, %v80_v55  ;;  %v7225_v28 = vpack.c.bf16 %v299_v0, %v295_v59  ;;  %v7227_v29 = vsub.f32 %v69_v36, %v299_v0  ;;  %v110_v38 = vld [vmem:[%s11313_s1 + $0x308] sm:$0xff] }
  0x18   :  { %12230 = vst [vmem:[#allocation38_spill] sm:$0xff] %v7186_v49  ;;  %12231 = vst [vmem:[#allocation39_spill] sm:$0xff] %v7188_v51  ;;  %v7229_v30 = vpack.c.bf16 %v1583_v2, %v1579_v1  ;;  %v7231_v31 = vsub.f32 %v63_v37, %v1579_v1  ;;  %v102_v49 = vld [vmem:[%s11313_s1 + $0x2c8] sm:$0xff]  ;;  %v7242_v59 = vsub.f32 %v71_v42, %v1583_v2  ;;  %v1589_v1 = vand.u32 4294901760, %v88_v14 }
  0x19   :  { %12232 = vst [vmem:[#allocation40_spill] sm:$0xff] %v7201_v56  ;;  %12233 = vst [vmem:[#allocation41_spill] sm:$0xff] %v7203_v57  ;;  %v87_v57 = vld [vmem:[%s11313_s1 + $0x250] sm:$0xff]  ;;  %v7244_v36 = vpack.c.bf16 %v305_v20, %v301_v19  ;;  %v7246_v0 = vsub.f32 %v78_v53, %v301_v19  ;;  %v7248_v37 = vsub.f32 %v86_v54, %v305_v20  ;;  %5432 = vmatpush1.bf16.msra.mxu0 %v7225_v28  ;;  %v96_v53 = vld [vmem:[%s11313_s1 + $0x298] sm:$0xff] }
  0x1a   :  { %12234 = vst [vmem:[#allocation42_spill] sm:$0xff] %v7205_v58  ;;  %12235 = vst [vmem:[#allocation43_spill] sm:$0xff] %v7208_v63  ;;  %5816 = vmatpush1.bf16.msra.mxu1 %v7229_v30  ;;  %v7252_v32 = vsub.f32 %v80_v55, %v1585_v8  ;;  %v303_v11 = vand.u32 4294901760, %v77_v21  ;;  %v307_v3 = vand.u32 4294901760, %v85_v9  ;;  %v1587_v5 = vand.u32 4294901760, %v79_v26  ;;  %v104_v54 = vld [vmem:[%s11313_s1 + $0x2d8] sm:$0xff] }
  0x1b   :  { %12236 = vst [vmem:[#allocation44_spill] sm:$0xff] %v7214_v7  ;;  %12237 = vst [vmem:[#allocation45_spill] sm:$0xff] %v7225_v28  ;;  %5434 = vmatprep.subr.bf16.mxu0 %v7244_v36  ;;  %v1591_v42 = vand.u32 4294901760, %v87_v57  ;;  %v309_v2 = vand.u32 4294901760, %v94_v35  ;;  %v313_v60 = vand.u32 4294901760, %v102_v49  ;;  %v7261_v19 = vpack.c.bf16 %v1589_v1, %v1585_v8  ;;  %v101_v28 = vld [vmem:[%s11313_s1 + $0x2c0] sm:$0xff] }
  0x1c   :  { %12238 = vst [vmem:[#allocation46_spill] sm:$0xff] %v7227_v29  ;;  %12239 = vst [vmem:[#allocation47_spill] sm:$0xff] %v7229_v30  ;;  %v7263_v55 = vsub.f32 %v88_v14, %v1589_v1  ;;  %v7265_v20 = vpack.c.bf16 %v307_v3, %v303_v11  ;;  %v7267_v30 = vsub.f32 %v77_v21, %v303_v11  ;;  %v103_v21 = vld [vmem:[%s11313_s1 + $0x2d0] sm:$0xff]  ;;  %v118_v45 = vld [vmem:[%s11313_s1 + $0x348] sm:$0xff]  ;;  %v315_v24 = vand.u32 4294901760, %v101_v28 }
  0x1d   :  { %12240 = vst [vmem:[#allocation48_spill] sm:$0xff] %v7231_v31  ;;  %12241 = vst [vmem:[#allocation49_spill] sm:$0xff] %v7242_v59  ;;  %v7278_v8 = vsub.f32 %v85_v9, %v307_v3  ;;  %v7280_v14 = vpack.c.bf16 %v1591_v42, %v1587_v5  ;;  %v7282_v1 = vsub.f32 %v79_v26, %v1587_v5  ;;  %5818 = vmatprep.subr.bf16.mxu1 %v7261_v19 }
  0x1e   :  { %12242 = vst [vmem:[#allocation50_spill] sm:$0xff] %v7244_v36  ;;  %12243 = vst [vmem:[#allocation51_spill] sm:$0xff] %v7246_v0  ;;  %v93_v36 = vld [vmem:[%s11313_s1 + $0x280] sm:$0xff]  ;;  %v7284_v11 = vsub.f32 %v87_v57, %v1591_v42  ;;  %5436 = vmatpush1.bf16.msra.mxu0 %v7265_v20  ;;  %v7297_v3 = vpack.c.bf16 %v313_v60, %v309_v2  ;;  %v7299_v5 = vsub.f32 %v94_v35, %v309_v2  ;;  %v112_v35 = vld [vmem:[%s11313_s1 + $0x318] sm:$0xff] }
  0x1f   :  { %12244 = vst [vmem:[#allocation52_spill] sm:$0xff] %v7248_v37  ;;  %12245 = vst [vmem:[#allocation53_spill] sm:$0xff] %v7252_v32  ;;  %v7301_v57 = vsub.f32 %v102_v49, %v313_v60  ;;  %v1593_v9 = vand.u32 4294901760, %v96_v53  ;;  %5820 = vmatpush1.bf16.msra.mxu1 %v7280_v14  ;;  %v1597_v26 = vand.u32 4294901760, %v104_v54  ;;  %v311_v42 = vand.u32 4294901760, %v93_v36  ;;  %v120_v60 = vld [vmem:[%s11313_s1 + $0x358] sm:$0xff] }
  0x20   :  { %12246 = vst [vmem:[#allocation54_spill] sm:$0xff] %v7261_v19  ;;  %12247 = vst [vmem:[#allocation55_spill] sm:$0xff] %v7263_v55  ;;  %v1595_v22 = vand.u32 4294901760, %v95_v47  ;;  %5438 = vmatprep.subr.bf16.mxu0 %v7297_v3  ;;  %v1599_v19 = vand.u32 4294901760, %v103_v21 }
  0x21   :  { %12248 = vst [vmem:[#allocation56_spill] sm:$0xff] %v7265_v20  ;;  %12249 = vst [vmem:[#allocation57_spill] sm:$0xff] %v7267_v30  ;;  %v7305_v15 = vsub.f32 %v96_v53, %v1593_v9  ;;  %v321_v20 = vand.u32 4294901760, %v118_v45  ;;  %v7313_v49 = vpack.c.bf16 %v1597_v26, %v1593_v9  ;;  %v7315_v2 = vsub.f32 %v104_v54, %v1597_v26  ;;  %v109_v53 = vld [vmem:[%s11313_s1 + $0x300] sm:$0xff] }
  0x22   :  { %12250 = vst [vmem:[#allocation58_spill] sm:$0xff] %v7278_v8  ;;  %12251 = vst [vmem:[#allocation59_spill] sm:$0xff] %v7280_v14  ;;  %v7317_v14 = vpack.c.bf16 %v315_v24, %v311_v42  ;;  %v7330_v9 = vsub.f32 %v101_v28, %v315_v24  ;;  %v7332_v54 = vpack.c.bf16 %v1599_v19, %v1595_v22  ;;  %v1601_v28 = vand.u32 4294901760, %v112_v35 }
  0x23   :  { %12252 = vst [vmem:[#allocation60_spill] sm:$0xff] %v7282_v1  ;;  %12253 = vst [vmem:[#allocation61_spill] sm:$0xff] %v7284_v11  ;;  %v317_v11 = vand.u32 4294901760, %v110_v38  ;;  %v7334_v26 = vsub.f32 %v95_v47, %v1595_v22  ;;  %5822 = vmatprep.subr.bf16.mxu1 %v7313_v49  ;;  %v7353_v47 = vsub.f32 %v118_v45, %v321_v20  ;;  %v136_v45 = vld [vmem:[%s11313_s1 + $0x3d8] sm:$0xff] }
  0x24   :  { %12254 = vst [vmem:[#allocation62_spill] sm:$0xff] %v7297_v3  ;;  %12255 = vst [vmem:[#allocation63_spill] sm:$0xff] %v7299_v5  ;;  %v7319_v3 = vsub.f32 %v93_v36, %v311_v42  ;;  %v7336_v36 = vsub.f32 %v103_v21, %v1599_v19  ;;  %v119_v42 = vld [vmem:[%s11313_s1 + $0x350] sm:$0xff]  ;;  %5440 = vmatpush1.bf16.msra.mxu0 %v7317_v14  ;;  %5824 = vmatpush1.bf16.msra.mxu1 %v7332_v54  ;;  %v1605_v19 = vand.u32 4294901760, %v120_v60 }
  0x25   :  { %12256 = vst [vmem:[#allocation64_spill] sm:$0xff] %v7301_v57  ;;  %12257 = vst [vmem:[#allocation65_spill] sm:$0xff] %v7305_v15  ;;  %v117_v15 = vld [vmem:[%s11313_s1 + $0x340] sm:$0xff]  ;;  %v111_v57 = vld [vmem:[%s11313_s1 + $0x310] sm:$0xff]  ;;  %v7349_v22 = vpack.c.bf16 %v321_v20, %v317_v11  ;;  %v7351_v24 = vsub.f32 %v110_v38, %v317_v11  ;;  %v319_v21 = vand.u32 4294901760, %v109_v53 }
  0x26   :  { %12258 = vst [vmem:[#allocation66_spill] sm:$0xff] %v7313_v49  ;;  %12259 = vst [vmem:[#allocation67_spill] sm:$0xff] %v7315_v2  ;;  %v134_v2 = vld [vmem:[%s11313_s1 + $0x3c8] sm:$0xff]  ;;  %v1607_v49 = vand.u32 4294901760, %v119_v42  ;;  %v128_v38 = vld [vmem:[%s11313_s1 + $0x398] sm:$0xff]  ;;  %v7365_v20 = vpack.c.bf16 %v1605_v19, %v1601_v28  ;;  %v7367_v11 = vsub.f32 %v120_v60, %v1605_v19 }
  0x27   :  { %12260 = vst [vmem:[#allocation68_spill] sm:$0xff] %v7317_v14  ;;  %12261 = vst [vmem:[#allocation69_spill] sm:$0xff] %v7319_v3  ;;  %v126_v3 = vld [vmem:[%s11313_s1 + $0x388] sm:$0xff]  ;;  %5442 = vmatprep.subr.bf16.mxu0 %v7349_v22  ;;  %v329_v14 = vand.u32 4294901760, %v134_v2 }
  0x28   :  { %12262 = vst [vmem:[#allocation70_spill] sm:$0xff] %v7330_v9  ;;  %12263 = vst [vmem:[#allocation71_spill] sm:$0xff] %v7332_v54  ;;  %v7357_v9 = vsub.f32 %v112_v35, %v1601_v28  ;;  %v325_v5 = vand.u32 4294901760, %v126_v3  ;;  %v125_v35 = vld [vmem:[%s11313_s1 + $0x380] sm:$0xff]  ;;  %5826 = vmatprep.subr.bf16.mxu1 %v7365_v20 }
  0x29   :  { %12264 = vst [vmem:[#allocation72_spill] sm:$0xff] %v7334_v26  ;;  %12265 = vst [vmem:[#allocation73_spill] sm:$0xff] %v7336_v36  ;;  %v323_v36 = vand.u32 4294901760, %v117_v15  ;;  %v1603_v26 = vand.u32 4294901760, %v111_v57 }
  0x2a   :  { %12266 = vst [vmem:[#allocation74_spill] sm:$0xff] %v7349_v22  ;;  %12267 = vst [vmem:[#allocation75_spill] sm:$0xff] %v7351_v24  ;;  %v7371_v22 = vsub.f32 %v109_v53, %v319_v21  ;;  %v7388_v53 = vsub.f32 %v119_v42, %v1607_v49  ;;  %v327_v42 = vand.u32 4294901760, %v125_v35 }
  0x2b   :  { %12268 = vst [vmem:[#allocation76_spill] sm:$0xff] %v7353_v47  ;;  %12269 = vst [vmem:[#allocation77_spill] sm:$0xff] %v7357_v9  ;;  %v7369_v54 = vpack.c.bf16 %v323_v36, %v319_v21  ;;  %v133_v9 = vld [vmem:[%s11313_s1 + $0x3c0] sm:$0xff]  ;;  %v127_v47 = vld [vmem:[%s11313_s1 + $0x390] sm:$0xff]  ;;  %v7382_v28 = vsub.f32 %v117_v15, %v323_v36  ;;  %v7384_v60 = vpack.c.bf16 %v1607_v49, %v1603_v26  ;;  %v1613_v36 = vand.u32 4294901760, %v136_v45 }
  0x2c   :  { %12270 = vst [vmem:[#allocation78_spill] sm:$0xff] %v7365_v20  ;;  %12271 = vst [vmem:[#allocation79_spill] sm:$0xff] %v7367_v11  ;;  %v7386_v19 = vsub.f32 %v111_v57, %v1603_v26  ;;  %v135_v21 = vld [vmem:[%s11313_s1 + $0x3d0] sm:$0xff]  ;;  %v150_v11 = vld [vmem:[%s11313_s1 + $0x448] sm:$0xff]  ;;  %v7401_v15 = vpack.c.bf16 %v329_v14, %v325_v5  ;;  %v7403_v57 = vsub.f32 %v126_v3, %v325_v5  ;;  %v1609_v26 = vand.u32 4294901760, %v128_v38 }
  0x2d   :  { %12272 = vst [vmem:[#allocation80_spill] sm:$0xff] %v7369_v54  ;;  %12273 = vst [vmem:[#allocation81_spill] sm:$0xff] %v7371_v22  ;;  %v142_v22 = vld [vmem:[%s11313_s1 + $0x408] sm:$0xff]  ;;  %5444 = vmatpush1.bf16.msra.mxu0 %v7369_v54  ;;  %v7405_v49 = vsub.f32 %v134_v2, %v329_v14  ;;  %5828 = vmatpush1.bf16.msra.mxu1 %v7384_v60  ;;  %v1615_v20 = vand.u32 4294901760, %v135_v21  ;;  %v337_v54 = vand.u32 4294901760, %v150_v11  ;;  %v144_v3 = vld [vmem:[%s11313_s1 + $0x418] sm:$0xff] }
  0x2e   :  { %12274 = vst [vmem:[#allocation82_spill] sm:$0xff] %v7382_v28  ;;  %12275 = vst [vmem:[#allocation83_spill] sm:$0xff] %v7384_v60  ;;  %5446 = vmatprep.subr.bf16.mxu0 %v7401_v15  ;;  %v7409_v28 = vsub.f32 %v128_v38, %v1609_v26  ;;  %v333_v24 = vand.u32 4294901760, %v142_v22  ;;  %v152_v14 = vld [vmem:[%s11313_s1 + $0x458] sm:$0xff]  ;;  %v7417_v5 = vpack.c.bf16 %v1613_v36, %v1609_v26  ;;  %v141_v38 = vld [vmem:[%s11313_s1 + $0x400] sm:$0xff] }
  0x2f   :  { %12276 = vst [vmem:[#allocation84_spill] sm:$0xff] %v7386_v19  ;;  %12277 = vst [vmem:[#allocation85_spill] sm:$0xff] %v7388_v53  ;;  %v331_v53 = vand.u32 4294901760, %v133_v9  ;;  %v1611_v19 = vand.u32 4294901760, %v127_v47  ;;  %v7419_v2 = vsub.f32 %v136_v45, %v1613_v36 }
  0x30   :  { %12278 = vst [vmem:[#allocation86_spill] sm:$0xff] %v7401_v15  ;;  %12279 = vst [vmem:[#allocation87_spill] sm:$0xff] %v7403_v57  ;;  %v7423_v15 = vsub.f32 %v125_v35, %v327_v42  ;;  %v7440_v35 = vsub.f32 %v135_v21, %v1615_v20  ;;  %5830 = vmatprep.subr.bf16.mxu1 %v7417_v5  ;;  %v335_v21 = vand.u32 4294901760, %v141_v38 }
  0x31   :  { %12280 = vst [vmem:[#allocation88_spill] sm:$0xff] %v7405_v49  ;;  %12281 = vst [vmem:[#allocation89_spill] sm:$0xff] %v7409_v28  ;;  %v7421_v60 = vpack.c.bf16 %v331_v53, %v327_v42  ;;  %v149_v28 = vld [vmem:[%s11313_s1 + $0x440] sm:$0xff]  ;;  %v143_v49 = vld [vmem:[%s11313_s1 + $0x410] sm:$0xff]  ;;  %v7434_v26 = vsub.f32 %v133_v9, %v331_v53  ;;  %v7436_v45 = vpack.c.bf16 %v1615_v20, %v1611_v19  ;;  %v1621_v53 = vand.u32 4294901760, %v152_v14 }
  0x32   :  { %12282 = vst [vmem:[#allocation90_spill] sm:$0xff] %v7417_v5  ;;  %12283 = vst [vmem:[#allocation91_spill] sm:$0xff] %v7419_v2  ;;  %v7438_v36 = vsub.f32 %v127_v47, %v1611_v19  ;;  %v151_v42 = vld [vmem:[%s11313_s1 + $0x450] sm:$0xff]  ;;  %v166_v2 = vld [vmem:[%s11313_s1 + $0x4c8] sm:$0xff]  ;;  %v7453_v9 = vpack.c.bf16 %v337_v54, %v333_v24  ;;  %v7455_v47 = vsub.f32 %v142_v22, %v333_v24  ;;  %v1617_v19 = vand.u32 4294901760, %v144_v3 }
  0x33   :  { %12284 = vst [vmem:[#allocation92_spill] sm:$0xff] %v7421_v60  ;;  %12285 = vst [vmem:[#allocation93_spill] sm:$0xff] %v7423_v15  ;;  %v158_v15 = vld [vmem:[%s11313_s1 + $0x488] sm:$0xff]  ;;  %5448 = vmatpush1.bf16.msra.mxu0 %v7421_v60  ;;  %v7457_v20 = vsub.f32 %v150_v11, %v337_v54  ;;  %5832 = vmatpush1.bf16.msra.mxu1 %v7436_v45  ;;  %v1623_v5 = vand.u32 4294901760, %v151_v42  ;;  %v345_v60 = vand.u32 4294901760, %v166_v2  ;;  %v160_v22 = vld [vmem:[%s11313_s1 + $0x498] sm:$0xff] }
  0x34   :  { %12286 = vst [vmem:[#allocation94_spill] sm:$0xff] %v7434_v26  ;;  %12287 = vst [vmem:[#allocation95_spill] sm:$0xff] %v7436_v45  ;;  %5450 = vmatprep.subr.bf16.mxu0 %v7453_v9  ;;  %v7461_v26 = vsub.f32 %v144_v3, %v1617_v19  ;;  %v341_v57 = vand.u32 4294901760, %v158_v15  ;;  %v168_v54 = vld [vmem:[%s11313_s1 + $0x4d8] sm:$0xff]  ;;  %v7469_v24 = vpack.c.bf16 %v1621_v53, %v1617_v19  ;;  %v157_v3 = vld [vmem:[%s11313_s1 + $0x480] sm:$0xff] }
  0x35   :  { %12288 = vst [vmem:[#allocation96_spill] sm:$0xff] %v7438_v36  ;;  %12289 = vst [vmem:[#allocation97_spill] sm:$0xff] %v7440_v35  ;;  %v339_v35 = vand.u32 4294901760, %v149_v28  ;;  %v1619_v36 = vand.u32 4294901760, %v143_v49  ;;  %v7471_v11 = vsub.f32 %v152_v14, %v1621_v53 }
  0x36   :  { %12290 = vst [vmem:[#allocation98_spill] sm:$0xff] %v7453_v9  ;;  %12291 = vst [vmem:[#allocation99_spill] sm:$0xff] %v7455_v47  ;;  %v7475_v9 = vsub.f32 %v141_v38, %v335_v21  ;;  %v7492_v38 = vsub.f32 %v151_v42, %v1623_v5  ;;  %5834 = vmatprep.subr.bf16.mxu1 %v7469_v24  ;;  %v343_v42 = vand.u32 4294901760, %v157_v3 }
  0x37   :  { %12292 = vst [vmem:[#allocation100_spill] sm:$0xff] %v7457_v20  ;;  %12293 = vst [vmem:[#allocation101_spill] sm:$0xff] %v7461_v26  ;;  %v7473_v45 = vpack.c.bf16 %v339_v35, %v335_v21  ;;  %v165_v26 = vld [vmem:[%s11313_s1 + $0x4c0] sm:$0xff]  ;;  %v159_v20 = vld [vmem:[%s11313_s1 + $0x490] sm:$0xff]  ;;  %v7486_v19 = vsub.f32 %v149_v28, %v339_v35  ;;  %v7488_v14 = vpack.c.bf16 %v1623_v5, %v1619_v36  ;;  %v1629_v35 = vand.u32 4294901760, %v168_v54 }
  0x38   :  { %12294 = vst [vmem:[#allocation102_spill] sm:$0xff] %v7469_v24  ;;  %12295 = vst [vmem:[#allocation103_spill] sm:$0xff] %v7471_v11  ;;  %v7490_v53 = vsub.f32 %v143_v49, %v1619_v36  ;;  %v167_v21 = vld [vmem:[%s11313_s1 + $0x4d0] sm:$0xff]  ;;  %v182_v11 = vld [vmem:[%s11313_s1 + $0x548] sm:$0xff]  ;;  %v7505_v28 = vpack.c.bf16 %v345_v60, %v341_v57  ;;  %v7507_v49 = vsub.f32 %v158_v15, %v341_v57  ;;  %v1625_v36 = vand.u32 4294901760, %v160_v22 }
  0x39   :  { %12296 = vst [vmem:[#allocation104_spill] sm:$0xff] %v7473_v45  ;;  %12297 = vst [vmem:[#allocation105_spill] sm:$0xff] %v7475_v9  ;;  %v174_v9 = vld [vmem:[%s11313_s1 + $0x508] sm:$0xff]  ;;  %5452 = vmatpush1.bf16.msra.mxu0 %v7473_v45  ;;  %v7509_v5 = vsub.f32 %v166_v2, %v345_v60  ;;  %5836 = vmatpush1.bf16.msra.mxu1 %v7488_v14  ;;  %v1631_v24 = vand.u32 4294901760, %v167_v21  ;;  %v353_v45 = vand.u32 4294901760, %v182_v11  ;;  %v176_v15 = vld [vmem:[%s11313_s1 + $0x518] sm:$0xff] }
  0x3a   :  { %12298 = vst [vmem:[#allocation106_spill] sm:$0xff] %v7486_v19  ;;  %12299 = vst [vmem:[#allocation107_spill] sm:$0xff] %v7488_v14  ;;  %5454 = vmatprep.subr.bf16.mxu0 %v7505_v28  ;;  %v7513_v19 = vsub.f32 %v160_v22, %v1625_v36  ;;  %v349_v47 = vand.u32 4294901760, %v174_v9  ;;  %v184_v60 = vld [vmem:[%s11313_s1 + $0x558] sm:$0xff]  ;;  %v7521_v57 = vpack.c.bf16 %v1629_v35, %v1625_v36  ;;  %v173_v22 = vld [vmem:[%s11313_s1 + $0x500] sm:$0xff] }
  0x3b   :  { %12300 = vst [vmem:[#allocation108_spill] sm:$0xff] %v7490_v53  ;;  %12301 = vst [vmem:[#allocation109_spill] sm:$0xff] %v7492_v38  ;;  %v347_v38 = vand.u32 4294901760, %v165_v26  ;;  %v1627_v53 = vand.u32 4294901760, %v159_v20  ;;  %v7523_v2 = vsub.f32 %v168_v54, %v1629_v35 }
  0x3c   :  { %12302 = vst [vmem:[#allocation110_spill] sm:$0xff] %v7505_v28  ;;  %12303 = vst [vmem:[#allocation111_spill] sm:$0xff] %v7507_v49  ;;  %v7527_v28 = vsub.f32 %v157_v3, %v343_v42  ;;  %v7544_v3 = vsub.f32 %v167_v21, %v1631_v24  ;;  %5838 = vmatprep.subr.bf16.mxu1 %v7521_v57  ;;  %v351_v21 = vand.u32 4294901760, %v173_v22 }
  0x3d   :  { %12304 = vst [vmem:[#allocation112_spill] sm:$0xff] %v7509_v5  ;;  %12305 = vst [vmem:[#allocation113_spill] sm:$0xff] %v7513_v19  ;;  %v7525_v14 = vpack.c.bf16 %v347_v38, %v343_v42  ;;  %v181_v19 = vld [vmem:[%s11313_s1 + $0x540] sm:$0xff]  ;;  %v175_v5 = vld [vmem:[%s11313_s1 + $0x510] sm:$0xff]  ;;  %v7538_v36 = vsub.f32 %v165_v26, %v347_v38  ;;  %v7540_v54 = vpack.c.bf16 %v1631_v24, %v1627_v53  ;;  %v1637_v38 = vand.u32 4294901760, %v184_v60 }
  0x3e   :  { %12306 = vst [vmem:[#allocation114_spill] sm:$0xff] %v7521_v57  ;;  %12307 = vst [vmem:[#allocation115_spill] sm:$0xff] %v7523_v2  ;;  %v7542_v35 = vsub.f32 %v159_v20, %v1627_v53  ;;  %v183_v42 = vld [vmem:[%s11313_s1 + $0x550] sm:$0xff]  ;;  %v198_v2 = vld [vmem:[%s11313_s1 + $0x5c8] sm:$0xff]  ;;  %v7557_v26 = vpack.c.bf16 %v353_v45, %v349_v47  ;;  %v7559_v20 = vsub.f32 %v174_v9, %v349_v47  ;;  %v1633_v53 = vand.u32 4294901760, %v176_v15 }
  0x3f   :  { %12308 = vst [vmem:[#allocation116_spill] sm:$0xff] %v7525_v14  ;;  %12309 = vst [vmem:[#allocation117_spill] sm:$0xff] %v7527_v28  ;;  %v190_v28 = vld [vmem:[%s11313_s1 + $0x588] sm:$0xff]  ;;  %5456 = vmatpush1.bf16.msra.mxu0 %v7525_v14  ;;  %v7561_v24 = vsub.f32 %v182_v11, %v353_v45  ;;  %5840 = vmatpush1.bf16.msra.mxu1 %v7540_v54  ;;  %v1639_v57 = vand.u32 4294901760, %v183_v42  ;;  %v361_v14 = vand.u32 4294901760, %v198_v2  ;;  %v192_v9 = vld [vmem:[%s11313_s1 + $0x598] sm:$0xff] }
  0x40   :  { %12310 = vst [vmem:[#allocation118_spill] sm:$0xff] %v7538_v36  ;;  %12311 = vst [vmem:[#allocation119_spill] sm:$0xff] %v7540_v54  ;;  %5458 = vmatprep.subr.bf16.mxu0 %v7557_v26  ;;  %v7565_v36 = vsub.f32 %v176_v15, %v1633_v53  ;;  %v357_v49 = vand.u32 4294901760, %v190_v28  ;;  %v200_v45 = vld [vmem:[%s11313_s1 + $0x5d8] sm:$0xff]  ;;  %v7573_v47 = vpack.c.bf16 %v1637_v38, %v1633_v53  ;;  %v189_v15 = vld [vmem:[%s11313_s1 + $0x580] sm:$0xff] }
  0x41   :  { %12312 = vst [vmem:[#allocation120_spill] sm:$0xff] %v7542_v35  ;;  %12313 = vst [vmem:[#allocation121_spill] sm:$0xff] %v7544_v3  ;;  %v355_v3 = vand.u32 4294901760, %v181_v19  ;;  %v1635_v35 = vand.u32 4294901760, %v175_v5  ;;  %v7575_v11 = vsub.f32 %v184_v60, %v1637_v38 }
  0x42   :  { %12314 = vst [vmem:[#allocation122_spill] sm:$0xff] %v7557_v26  ;;  %12315 = vst [vmem:[#allocation123_spill] sm:$0xff] %v7559_v20  ;;  %v7579_v26 = vsub.f32 %v173_v22, %v351_v21  ;;  %v7596_v22 = vsub.f32 %v183_v42, %v1639_v57  ;;  %5842 = vmatprep.subr.bf16.mxu1 %v7573_v47  ;;  %v359_v42 = vand.u32 4294901760, %v189_v15 }
  0x43   :  { %12316 = vst [vmem:[#allocation124_spill] sm:$0xff] %v7561_v24  ;;  %12317 = vst [vmem:[#allocation125_spill] sm:$0xff] %v7565_v36  ;;  %v7577_v54 = vpack.c.bf16 %v355_v3, %v351_v21  ;;  %v197_v36 = vld [vmem:[%s11313_s1 + $0x5c0] sm:$0xff]  ;;  %v191_v24 = vld [vmem:[%s11313_s1 + $0x590] sm:$0xff]  ;;  %v7590_v53 = vsub.f32 %v181_v19, %v355_v3  ;;  %v7592_v60 = vpack.c.bf16 %v1639_v57, %v1635_v35  ;;  %v1645_v3 = vand.u32 4294901760, %v200_v45 }
  0x44   :  { %12318 = vst [vmem:[#allocation126_spill] sm:$0xff] %v7573_v47  ;;  %12319 = vst [vmem:[#allocation127_spill] sm:$0xff] %v7575_v11  ;;  %v7594_v38 = vsub.f32 %v175_v5, %v1635_v35  ;;  %v199_v21 = vld [vmem:[%s11313_s1 + $0x5d0] sm:$0xff]  ;;  %v214_v11 = vld [vmem:[%s11313_s1 + $0x648] sm:$0xff]  ;;  %v7609_v19 = vpack.c.bf16 %v361_v14, %v357_v49  ;;  %v7611_v5 = vsub.f32 %v190_v28, %v357_v49  ;;  %v1641_v35 = vand.u32 4294901760, %v192_v9 }
  0x45   :  { %12320 = vst [vmem:[#allocation128_spill] sm:$0xff] %v7577_v54  ;;  %12321 = vst [vmem:[#allocation129_spill] sm:$0xff] %v7579_v26  ;;  %v206_v26 = vld [vmem:[%s11313_s1 + $0x608] sm:$0xff]  ;;  %5460 = vmatpush1.bf16.msra.mxu0 %v7577_v54  ;;  %v7613_v57 = vsub.f32 %v198_v2, %v361_v14  ;;  %5844 = vmatpush1.bf16.msra.mxu1 %v7592_v60  ;;  %v1647_v47 = vand.u32 4294901760, %v199_v21  ;;  %v369_v54 = vand.u32 4294901760, %v214_v11  ;;  %v208_v28 = vld [vmem:[%s11313_s1 + $0x618] sm:$0xff] }
  0x46   :  { %12322 = vst [vmem:[#allocation130_spill] sm:$0xff] %v7590_v53  ;;  %12323 = vst [vmem:[#allocation131_spill] sm:$0xff] %v7592_v60  ;;  %5462 = vmatprep.subr.bf16.mxu0 %v7609_v19  ;;  %v7617_v53 = vsub.f32 %v192_v9, %v1641_v35  ;;  %v365_v20 = vand.u32 4294901760, %v206_v26  ;;  %v216_v14 = vld [vmem:[%s11313_s1 + $0x658] sm:$0xff]  ;;  %v7625_v49 = vpack.c.bf16 %v1645_v3, %v1641_v35  ;;  %v205_v9 = vld [vmem:[%s11313_s1 + $0x600] sm:$0xff] }
  0x47   :  { %12324 = vst [vmem:[#allocation132_spill] sm:$0xff] %v7594_v38  ;;  %12325 = vst [vmem:[#allocation133_spill] sm:$0xff] %v7596_v22  ;;  %v363_v22 = vand.u32 4294901760, %v197_v36  ;;  %v1643_v38 = vand.u32 4294901760, %v191_v24  ;;  %v7627_v2 = vsub.f32 %v200_v45, %v1645_v3 }
  0x48   :  { %12326 = vst [vmem:[#allocation134_spill] sm:$0xff] %v7609_v19  ;;  %12327 = vst [vmem:[#allocation135_spill] sm:$0xff] %v7611_v5  ;;  %v7631_v19 = vsub.f32 %v189_v15, %v359_v42  ;;  %v7648_v15 = vsub.f32 %v199_v21, %v1647_v47  ;;  %5846 = vmatprep.subr.bf16.mxu1 %v7625_v49  ;;  %v367_v21 = vand.u32 4294901760, %v205_v9 }
  0x49   :  { %12328 = vst [vmem:[#allocation136_spill] sm:$0xff] %v7613_v57  ;;  %12329 = vst [vmem:[#allocation137_spill] sm:$0xff] %v7617_v53  ;;  %v7629_v60 = vpack.c.bf16 %v363_v22, %v359_v42  ;;  %v213_v53 = vld [vmem:[%s11313_s1 + $0x640] sm:$0xff]  ;;  %v207_v57 = vld [vmem:[%s11313_s1 + $0x610] sm:$0xff]  ;;  %v7642_v35 = vsub.f32 %v197_v36, %v363_v22  ;;  %v7644_v45 = vpack.c.bf16 %v1647_v47, %v1643_v38  ;;  %v1653_v22 = vand.u32 4294901760, %v216_v14 }
  0x4a   :  { %12330 = vst [vmem:[#allocation138_spill] sm:$0xff] %v7625_v49  ;;  %12331 = vst [vmem:[#allocation139_spill] sm:$0xff] %v7627_v2  ;;  %v7646_v3 = vsub.f32 %v191_v24, %v1643_v38  ;;  %v215_v42 = vld [vmem:[%s11313_s1 + $0x650] sm:$0xff]  ;;  %v230_v2 = vld [vmem:[%s11313_s1 + $0x6c8] sm:$0xff]  ;;  %v7661_v36 = vpack.c.bf16 %v369_v54, %v365_v20  ;;  %v7663_v24 = vsub.f32 %v206_v26, %v365_v20  ;;  %v1649_v38 = vand.u32 4294901760, %v208_v28 }
  0x4b   :  { %12332 = vst [vmem:[#allocation140_spill] sm:$0xff] %v7629_v60  ;;  %12333 = vst [vmem:[#allocation141_spill] sm:$0xff] %v7631_v19  ;;  %v222_v19 = vld [vmem:[%s11313_s1 + $0x688] sm:$0xff]  ;;  %5464 = vmatpush1.bf16.msra.mxu0 %v7629_v60  ;;  %v7665_v47 = vsub.f32 %v214_v11, %v369_v54  ;;  %5848 = vmatpush1.bf16.msra.mxu1 %v7644_v45  ;;  %v1655_v49 = vand.u32 4294901760, %v215_v42  ;;  %v377_v60 = vand.u32 4294901760, %v230_v2  ;;  %v224_v26 = vld [vmem:[%s11313_s1 + $0x698] sm:$0xff] }
  0x4c   :  { %12334 = vst [vmem:[#allocation142_spill] sm:$0xff] %v7642_v35  ;;  %12335 = vst [vmem:[#allocation143_spill] sm:$0xff] %v7644_v45  ;;  %5466 = vmatprep.subr.bf16.mxu0 %v7661_v36  ;;  %v7669_v35 = vsub.f32 %v208_v28, %v1649_v38  ;;  %v373_v5 = vand.u32 4294901760, %v222_v19  ;;  %v232_v54 = vld [vmem:[%s11313_s1 + $0x6d8] sm:$0xff]  ;;  %v7677_v20 = vpack.c.bf16 %v1653_v22, %v1649_v38  ;;  %v221_v28 = vld [vmem:[%s11313_s1 + $0x680] sm:$0xff] }
  0x4d   :  { %12336 = vst [vmem:[#allocation144_spill] sm:$0xff] %v7646_v3  ;;  %12337 = vst [vmem:[#allocation145_spill] sm:$0xff] %v7648_v15  ;;  %v371_v15 = vand.u32 4294901760, %v213_v53  ;;  %v1651_v3 = vand.u32 4294901760, %v207_v57  ;;  %v7679_v11 = vsub.f32 %v216_v14, %v1653_v22 }
  0x4e   :  { %12338 = vst [vmem:[#allocation146_spill] sm:$0xff] %v7661_v36  ;;  %12339 = vst [vmem:[#allocation147_spill] sm:$0xff] %v7663_v24  ;;  %v7683_v36 = vsub.f32 %v205_v9, %v367_v21  ;;  %v7700_v9 = vsub.f32 %v215_v42, %v1655_v49  ;;  %5850 = vmatprep.subr.bf16.mxu1 %v7677_v20  ;;  %v375_v42 = vand.u32 4294901760, %v221_v28 }
  0x4f   :  { %12340 = vst [vmem:[#allocation148_spill] sm:$0xff] %v7665_v47  ;;  %12341 = vst [vmem:[#allocation149_spill] sm:$0xff] %v7669_v35  ;;  %v7681_v45 = vpack.c.bf16 %v371_v15, %v367_v21  ;;  %v229_v35 = vld [vmem:[%s11313_s1 + $0x6c0] sm:$0xff]  ;;  %v223_v47 = vld [vmem:[%s11313_s1 + $0x690] sm:$0xff]  ;;  %v7694_v38 = vsub.f32 %v213_v53, %v371_v15  ;;  %v7696_v14 = vpack.c.bf16 %v1655_v49, %v1651_v3  ;;  %v1661_v15 = vand.u32 4294901760, %v232_v54 }
  0x50   :  { %12342 = vst [vmem:[#allocation150_spill] sm:$0xff] %v7677_v20  ;;  %12343 = vst [vmem:[#allocation151_spill] sm:$0xff] %v7679_v11  ;;  %v7698_v22 = vsub.f32 %v207_v57, %v1651_v3  ;;  %v231_v21 = vld [vmem:[%s11313_s1 + $0x6d0] sm:$0xff]  ;;  %v246_v11 = vld [vmem:[%s11313_s1 + $0x748] sm:$0xff]  ;;  %v7713_v53 = vpack.c.bf16 %v377_v60, %v373_v5  ;;  %v7715_v57 = vsub.f32 %v222_v19, %v373_v5  ;;  %v1657_v3 = vand.u32 4294901760, %v224_v26 }
  0x51   :  { %12344 = vst [vmem:[#allocation152_spill] sm:$0xff] %v7681_v45  ;;  %12345 = vst [vmem:[#allocation153_spill] sm:$0xff] %v7683_v36  ;;  %v238_v36 = vld [vmem:[%s11313_s1 + $0x708] sm:$0xff]  ;;  %5468 = vmatpush1.bf16.msra.mxu0 %v7681_v45  ;;  %v7717_v49 = vsub.f32 %v230_v2, %v377_v60  ;;  %5852 = vmatpush1.bf16.msra.mxu1 %v7696_v14  ;;  %v1663_v20 = vand.u32 4294901760, %v231_v21  ;;  %v385_v45 = vand.u32 4294901760, %v246_v11  ;;  %v240_v19 = vld [vmem:[%s11313_s1 + $0x718] sm:$0xff] }
  0x52   :  { %12346 = vst [vmem:[#allocation154_spill] sm:$0xff] %v7694_v38  ;;  %12347 = vst [vmem:[#allocation155_spill] sm:$0xff] %v7696_v14  ;;  %5470 = vmatprep.subr.bf16.mxu0 %v7713_v53  ;;  %v7721_v38 = vsub.f32 %v224_v26, %v1657_v3  ;;  %v381_v24 = vand.u32 4294901760, %v238_v36  ;;  %v248_v60 = vld [vmem:[%s11313_s1 + $0x758] sm:$0xff]  ;;  %v7729_v5 = vpack.c.bf16 %v1661_v15, %v1657_v3  ;;  %v237_v26 = vld [vmem:[%s11313_s1 + $0x700] sm:$0xff] }
  0x53   :  { %12348 = vst [vmem:[#allocation156_spill] sm:$0xff] %v7698_v22  ;;  %12349 = vst [vmem:[#allocation157_spill] sm:$0xff] %v7700_v9  ;;  %v379_v9 = vand.u32 4294901760, %v229_v35  ;;  %v1659_v22 = vand.u32 4294901760, %v223_v47  ;;  %v7731_v2 = vsub.f32 %v232_v54, %v1661_v15 }
  0x54   :  { %12350 = vst [vmem:[#allocation158_spill] sm:$0xff] %v7713_v53  ;;  %12351 = vst [vmem:[#allocation159_spill] sm:$0xff] %v7715_v57  ;;  %v7735_v53 = vsub.f32 %v221_v28, %v375_v42  ;;  %v7752_v28 = vsub.f32 %v231_v21, %v1663_v20  ;;  %5854 = vmatprep.subr.bf16.mxu1 %v7729_v5  ;;  %v383_v21 = vand.u32 4294901760, %v237_v26 }
  0x55   :  { %12352 = vst [vmem:[#allocation160_spill] sm:$0xff] %v7717_v49  ;;  %12353 = vst [vmem:[#allocation161_spill] sm:$0xff] %v7721_v38  ;;  %v7733_v14 = vpack.c.bf16 %v379_v9, %v375_v42  ;;  %v245_v38 = vld [vmem:[%s11313_s1 + $0x740] sm:$0xff]  ;;  %v239_v49 = vld [vmem:[%s11313_s1 + $0x710] sm:$0xff]  ;;  %v7746_v3 = vsub.f32 %v229_v35, %v379_v9  ;;  %v7748_v54 = vpack.c.bf16 %v1663_v20, %v1659_v22  ;;  %v1669_v9 = vand.u32 4294901760, %v248_v60 }
  0x56   :  { %12354 = vst [vmem:[#allocation162_spill] sm:$0xff] %v7729_v5  ;;  %12355 = vst [vmem:[#allocation163_spill] sm:$0xff] %v7731_v2  ;;  %v7750_v15 = vsub.f32 %v223_v47, %v1659_v22  ;;  %v247_v42 = vld [vmem:[%s11313_s1 + $0x750] sm:$0xff]  ;;  %v262_v2 = vld [vmem:[%s11313_s1 + $0x7c8] sm:$0xff]  ;;  %v7765_v35 = vpack.c.bf16 %v385_v45, %v381_v24  ;;  %v7767_v47 = vsub.f32 %v238_v36, %v381_v24  ;;  %v1665_v22 = vand.u32 4294901760, %v240_v19 }
  0x57   :  { %12356 = vst [vmem:[#allocation164_spill] sm:$0xff] %v7733_v14  ;;  %12357 = vst [vmem:[#allocation165_spill] sm:$0xff] %v7735_v53  ;;  %v254_v53 = vld [vmem:[%s11313_s1 + $0x788] sm:$0xff]  ;;  %5472 = vmatpush1.bf16.msra.mxu0 %v7733_v14  ;;  %v7769_v20 = vsub.f32 %v246_v11, %v385_v45  ;;  %5856 = vmatpush1.bf16.msra.mxu1 %v7748_v54  ;;  %v1671_v5 = vand.u32 4294901760, %v247_v42  ;;  %v393_v14 = vand.u32 4294901760, %v262_v2  ;;  %v256_v36 = vld [vmem:[%s11313_s1 + $0x798] sm:$0xff] }
  0x58   :  { %12358 = vst [vmem:[#allocation166_spill] sm:$0xff] %v7746_v3  ;;  %12359 = vst [vmem:[#allocation167_spill] sm:$0xff] %v7748_v54  ;;  %5474 = vmatprep.subr.bf16.mxu0 %v7765_v35  ;;  %v7773_v3 = vsub.f32 %v240_v19, %v1665_v22  ;;  %v389_v57 = vand.u32 4294901760, %v254_v53  ;;  %v264_v45 = vld [vmem:[%s11313_s1 + $0x7d8] sm:$0xff]  ;;  %v7781_v24 = vpack.c.bf16 %v1669_v9, %v1665_v22  ;;  %v253_v19 = vld [vmem:[%s11313_s1 + $0x780] sm:$0xff] }
  0x59   :  { %12360 = vst [vmem:[#allocation168_spill] sm:$0xff] %v7750_v15  ;;  %12361 = vst [vmem:[#allocation169_spill] sm:$0xff] %v7752_v28  ;;  %v387_v28 = vand.u32 4294901760, %v245_v38  ;;  %v1667_v15 = vand.u32 4294901760, %v239_v49  ;;  %v7783_v11 = vsub.f32 %v248_v60, %v1669_v9 }
  0x5a   :  { %12362 = vst [vmem:[#allocation170_spill] sm:$0xff] %v7765_v35  ;;  %12363 = vst [vmem:[#allocation171_spill] sm:$0xff] %v7767_v47  ;;  %v7787_v35 = vsub.f32 %v237_v26, %v383_v21  ;;  %v7804_v26 = vsub.f32 %v247_v42, %v1671_v5  ;;  %5858 = vmatprep.subr.bf16.mxu1 %v7781_v24  ;;  %v391_v42 = vand.u32 4294901760, %v253_v19 }
  0x5b   :  { %12364 = vst [vmem:[#allocation172_spill] sm:$0xff] %v7769_v20  ;;  %12365 = vst [vmem:[#allocation173_spill] sm:$0xff] %v7773_v3  ;;  %v7785_v54 = vpack.c.bf16 %v387_v28, %v383_v21  ;;  %v261_v3 = vld [vmem:[%s11313_s1 + $0x7c0] sm:$0xff]  ;;  %v255_v20 = vld [vmem:[%s11313_s1 + $0x790] sm:$0xff]  ;;  %v7798_v22 = vsub.f32 %v245_v38, %v387_v28  ;;  %v7800_v60 = vpack.c.bf16 %v1671_v5, %v1667_v15  ;;  %v1673_v5 = vand.u32 4294901760, %v256_v36 }
  0x5c   :  { %12366 = vst [vmem:[#allocation174_spill] sm:$0xff] %v7781_v24  ;;  %12367 = vst [vmem:[#allocation175_spill] sm:$0xff] %v7783_v11  ;;  %v7802_v9 = vsub.f32 %v239_v49, %v1667_v15  ;;  %v263_v21 = vld [vmem:[%s11313_s1 + $0x7d0] sm:$0xff]  ;;  %v7814_v38 = vpack.c.bf16 %v393_v14, %v389_v57  ;;  %v7816_v28 = vsub.f32 %v254_v53, %v389_v57  ;;  %v1677_v15 = vand.u32 4294901760, %v264_v45 }
  0x5d   :  { %12368 = vst [vmem:[#allocation176_spill] sm:$0xff] %v7785_v54  ;;  %12369 = vst [vmem:[#allocation177_spill] sm:$0xff] %v7787_v35  ;;  %v12_v35 = vld [vmem:[%s11314_s0 + $0x8] sm:$0xff]  ;;  %5476 = vmatpush1.bf16.msra.mxu0 %v7785_v54  ;;  %v7818_v49 = vsub.f32 %v262_v2, %v393_v14  ;;  %5860 = vmatpush1.bf16.msra.mxu1 %v7800_v60  ;;  %v1679_v24 = vand.u32 4294901760, %v263_v21  ;;  %v11520_v54 = vand.u32 4294901760, %v7037_v16 }
  0x5e   :  { %12370 = vst [vmem:[#allocation178_spill] sm:$0xff] %v7798_v22  ;;  %12371 = vst [vmem:[#allocation179_spill] sm:$0xff] %v7800_v60  ;;  %5478 = vmatprep.subr.bf16.mxu0 %v7814_v38  ;;  %v7822_v22 = vsub.f32 %v256_v36, %v1673_v5  ;;  %v7824_v11 = vand.u32 4294901760, %v12_v35  ;;  %v7827_v53 = vpack.c.bf16 %v1677_v15, %v1673_v5  ;;  %v11_v60 = vld [vmem:[%s11314_s0] sm:$0xff] }
  0x5f   :  { %12372 = vst [vmem:[#allocation180_spill] sm:$0xff] %v7802_v9  ;;  %12373 = vst [vmem:[#allocation181_spill] sm:$0xff] %v7804_v26  ;;  %v395_v26 = vand.u32 4294901760, %v261_v3  ;;  %v1675_v9 = vand.u32 4294901760, %v255_v20  ;;  %v7829_v14 = vsub.f32 %v264_v45, %v1677_v15  ;;  %v7833_v2 = vsub.f32 %v253_v19, %v391_v42 }
  0x60   :  { %12374 = vst [vmem:[#allocation182_spill] sm:$0xff] %v7814_v38  ;;  %12375 = vst [vmem:[#allocation183_spill] sm:$0xff] %v7816_v28  ;;  %5862 = vmatprep.subr.bf16.mxu1 %v7827_v53  ;;  %v7849_v45 = vsub.f32 %v12_v35, %v7824_v11  ;;  %v417_v19 = vsub.f32 %v7037_v16, %v11520_v54 }
  0x61   :  { %12376 = vst [vmem:[#allocation184_spill] sm:$0xff] %v7818_v49  ;;  %12377 = vst [vmem:[#allocation185_spill] sm:$0xff] %v7822_v22  ;;  %v7831_v57 = vpack.c.bf16 %v395_v26, %v391_v42  ;;  %v7838_v38 = vsub.f32 %v261_v3, %v395_v26  ;;  %v7840_v36 = vpack.c.bf16 %v1679_v24, %v1675_v9  ;;  %v11525_v3 = vand.u32 4294901760, %v7039_v17 }
  0x62   :  { %12378 = vst [vmem:[#allocation186_spill] sm:$0xff] %v7824_v11  ;;  %12379 = vst [vmem:[#allocation187_spill] sm:$0xff] %v7827_v53  ;;  %v7842_v22 = vsub.f32 %v255_v20, %v1675_v9  ;;  %v7844_v49 = vsub.f32 %v263_v21, %v1679_v24  ;;  %v11528_v26 = vand.u32 4294901760, %v7041_v18  ;;  %v11533_v20 = vand.u32 4294901760, %v7054_v23 }
  0x63   :  { %12380 = vst [vmem:[#allocation188_spill] sm:$0xff] %v7829_v14  ;;  %12381 = vst [vmem:[#allocation189_spill] sm:$0xff] %v7831_v57  ;;  %5480 = vmatpush1.bf16.msra.mxu0 %v7831_v57  ;;  %5864 = vmatpush1.bf16.msra.mxu1 %v7840_v36  ;;  %v7858_v24 = vand.u32 4294901760, %v11_v60  ;;  %v7863_v35 = vand.u32 4294901760, %v7849_v45  ;;  %v418_v5 = vand.u32 4294901760, %v417_v19  ;;  %v429_v15 = vsub.f32 %v7039_v17, %v11525_v3 }
  0x64   :  { %12382 = vst [vmem:[#allocation190_spill] sm:$0xff] %v7833_v2  ;;  %12383 = vst [vmem:[#allocation191_spill] sm:$0xff] %v7838_v38  ;;  %v1701_v42 = vsub.f32 %v7041_v18, %v11528_v26  ;;  %v1713_v54 = vsub.f32 %v7054_v23, %v11533_v20  ;;  %v12391_v21 = vand.u32 4294901760, %v7058_v25  ;;  %v12392_v19 = vand.u32 4294901760, %v7064_v27 }
  0x65   :  { %12384 = vst [vmem:[#allocation192_spill] sm:$0xff] %v7840_v36  ;;  %12385 = vst [vmem:[#allocation193_spill] sm:$0xff] %v7842_v22  ;;  %v7875_v9 = vsub.f32 %v11_v60, %v7858_v24  ;;  %v400_v3 = vsub.f32 %v7849_v45, %v7863_v35  ;;  %v430_v53 = vand.u32 4294901760, %v429_v15  ;;  %v11543_v18 = vand.u32 4294901760, %v7079_v39 }
  0x66   :  { %12386 = vst [vmem:[#allocation194_spill] sm:$0xff] %v7844_v49  ;;  %12387 = vst [vmem:[#allocation195_spill] sm:$0xff] %v7849_v45  ;;  %v423_v36 = vsub.f32 %v7058_v25, %v12391_v21  ;;  %v435_v57 = vsub.f32 %v7064_v27, %v12392_v19  ;;  %v1702_v26 = vand.u32 4294901760, %v1701_v42  ;;  %v1714_v17 = vand.u32 4294901760, %v1713_v54 }
  0x67   :  { %12388 = vst [vmem:[#allocation196_spill] sm:$0xff] %v7858_v24  ;;  %12389 = vst [vmem:[#allocation197_spill] sm:$0xff] %v7863_v35  ;;  %v7887_v20 = vand.u32 4294901760, %v7875_v9  ;;  %v7889_v23 = vand.u32 4294901760, %v400_v3  ;;  %v5481_v21 = vpack.c.bf16 %v430_v53, %v418_v5  ;;  %v1707_v19 = vsub.f32 %v7079_v39, %v11543_v18 }
  0x68   :  { %12390 = vst [vmem:[#allocation198_spill] sm:$0xff] %v7875_v9  ;;  %v424_v60 = vand.u32 4294901760, %v423_v36  ;;  %v436_v24 = vand.u32 4294901760, %v435_v57  ;;  %v11542_v27 = vand.u32 4294901760, %v7081_v40  ;;  %v5865_v35 = vpack.c.bf16 %v1714_v17, %v1702_v26 }
  0x69   :  { %12393 = vst [vmem:[#allocation199_spill] sm:$0xff] %v7887_v20  ;;  %12394 = vst [vmem:[#allocation200_spill] sm:$0xff] %v7889_v23  ;;  %v406_v15 = vsub.f32 %v7875_v9, %v7887_v20  ;;  %v11546_v54 = vand.u32 4294901760, %v7083_v41  ;;  %402 = vmatprep.mubr.f32.mxu0 %v7889_v23  ;;  %5482 = vmatprep.subr.bf16.mxu0 %v5481_v21  ;;  %v1708_v57 = vand.u32 4294901760, %v1707_v19  ;;  %v11544_v36 = vand.u32 4294901760, %v7096_v46  ;;  %v12398_v20 = vld [vmem:[#allocation64_spill] sm:$0xff] }
  0x6a   :  { %v5483_v42 = vpack.c.bf16 %v436_v24, %v424_v60  ;;  %v1719_v53 = vsub.f32 %v7081_v40, %v11542_v27  ;;  %v11545_v3 = vand.u32 4294901760, %v7100_v48  ;;  %1686 = vmatprep.mubr.f32.mxu1 %v7889_v23  ;;  %5866 = vmatprep.subr.bf16.mxu1 %v5865_v35  ;;  %v11551_v24 = vand.u32 4294901760, %v7106_v50 }
  0x6b   :  { %v7905_v17 = vand.u32 4294901760, %v406_v15  ;;  %v441_v26 = vsub.f32 %v7083_v41, %v11546_v54  ;;  %v11552_v5 = vand.u32 4294901760, %v7108_v52  ;;  %v453_v21 = vsub.f32 %v7096_v46, %v11544_v36 }
  0x6c   :  { %v1720_v60 = vand.u32 4294901760, %v1719_v53  ;;  %v1725_v19 = vsub.f32 %v7100_v48, %v11545_v3  ;;  %v11553_v35 = vand.u32 4294901760, %v7120_v61  ;;  %v1737_v27 = vsub.f32 %v7106_v50, %v11551_v24 }
  0x6d   :  { %12395 = vst [vmem:[#allocation201_spill] sm:$0xff] %v7905_v17  ;;  %408 = vmatmul.mubr.f32.vlgmr.msra.gmra.mrb[0].mxu0 %v7905_v17  ;;  %1692 = vmatmul.mubr.f32.vlgmr.msra.gmra.mrb[0].mxu1 %v7905_v17  ;;  %v442_v15 = vand.u32 4294901760, %v441_v26  ;;  %v447_v53 = vsub.f32 %v7108_v52, %v11552_v5  ;;  %v11554_v18 = vand.u32 4294901760, %v7122_v62  ;;  %v454_v3 = vand.u32 4294901760, %v453_v21 }
  0x6e   :  { %5484 = vmatpush1.bf16.msra.mxu0 %v5483_v42  ;;  %v5867_v36 = vpack.c.bf16 %v1720_v60, %v1708_v57  ;;  %v1726_v54 = vand.u32 4294901760, %v1725_v19  ;;  %v459_v23 = vsub.f32 %v7120_v61, %v11553_v35  ;;  %799 = vmatprep.mubr.f32.mxu0 %v7824_v11  ;;  %v1738_v26 = vand.u32 4294901760, %v1737_v27 }
  0x6f   :  { %v448_v17 = vand.u32 4294901760, %v447_v53  ;;  %v1731_v24 = vsub.f32 %v7122_v62, %v11554_v18  ;;  %v11555_v5 = vand.u32 4294901760, %v7135_v4  ;;  %2083 = vmatprep.mubr.f32.mxu1 %v7824_v11  ;;  %v5485_v42 = vpack.c.bf16 %v454_v3, %v442_v15 }
  0x70   :  { %5868 = vmatpush1.bf16.msra.mxu1 %v5867_v36  ;;  %v460_v57 = vand.u32 4294901760, %v459_v23  ;;  %v11558_v60 = vand.u32 4294901760, %v7139_v6  ;;  %v11556_v21 = vand.u32 4294901760, %v7151_v10  ;;  %v5869_v19 = vpack.c.bf16 %v1738_v26, %v1726_v54 }
  0x71   :  { %v1732_v35 = vand.u32 4294901760, %v1731_v24  ;;  %v1743_v27 = vsub.f32 %v7135_v4, %v11555_v5  ;;  %v11557_v53 = vand.u32 4294901760, %v7155_v12  ;;  %5486 = vmatprep.subr.bf16.mxu0 %v5485_v42  ;;  %v11559_v3 = vand.u32 4294901760, %v7157_v13 }
  0x72   :  { %v5487_v18 = vpack.c.bf16 %v460_v57, %v448_v17  ;;  %v465_v36 = vsub.f32 %v7139_v6, %v11558_v60  ;;  %v477_v23 = vsub.f32 %v7151_v10, %v11556_v21  ;;  %5870 = vmatprep.subr.bf16.mxu1 %v5869_v19  ;;  %v11560_v15 = vand.u32 4294901760, %v7167_v33 }
  0x73   :  { %v1744_v54 = vand.u32 4294901760, %v1743_v27  ;;  %v1749_v24 = vsub.f32 %v7155_v12, %v11557_v53  ;;  %v11570_v17 = vand.u32 4294901760, %v7169_v34  ;;  %v1761_v57 = vsub.f32 %v7157_v13, %v11559_v3 }
  0x74   :  { %5488 = vmatpush1.bf16.msra.mxu0 %v5487_v18  ;;  %v466_v26 = vand.u32 4294901760, %v465_v36  ;;  %v478_v42 = vand.u32 4294901760, %v477_v23  ;;  %v11564_v5 = vand.u32 4294901760, %v7182_v43  ;;  %v471_v27 = vsub.f32 %v7167_v33, %v11560_v15 }
  0x75   :  { %v5871_v21 = vpack.c.bf16 %v1744_v54, %v1732_v35  ;;  %v1750_v19 = vand.u32 4294901760, %v1749_v24  ;;  %v483_v53 = vsub.f32 %v7169_v34, %v11570_v17  ;;  %v1762_v18 = vand.u32 4294901760, %v1761_v57 }
  0x76   :  { %v5489_v60 = vpack.c.bf16 %v478_v42, %v466_v26  ;;  %v1755_v36 = vsub.f32 %v7182_v43, %v11564_v5  ;;  %v11563_v23 = vand.u32 4294901760, %v7184_v44  ;;  %v472_v3 = vand.u32 4294901760, %v471_v27 }
  0x77   :  { %5872 = vmatpush1.bf16.msra.mxu1 %v5871_v21  ;;  %v484_v35 = vand.u32 4294901760, %v483_v53  ;;  %v11567_v54 = vand.u32 4294901760, %v7188_v51  ;;  %v11565_v24 = vand.u32 4294901760, %v7201_v56  ;;  %v5873_v15 = vpack.c.bf16 %v1762_v18, %v1750_v19 }
  0x78   :  { %5490 = vmatprep.subr.bf16.mxu0 %v5489_v60  ;;  %v1756_v11 = vand.u32 4294901760, %v1755_v36  ;;  %v1767_v26 = vsub.f32 %v7184_v44, %v11563_v23  ;;  %v11566_v42 = vand.u32 4294901760, %v7205_v58  ;;  %v11568_v27 = vand.u32 4294901760, %v7208_v63 }
  0x79   :  { %v5491_v57 = vpack.c.bf16 %v484_v35, %v472_v3  ;;  %v489_v21 = vsub.f32 %v7188_v51, %v11567_v54  ;;  %v501_v53 = vsub.f32 %v7201_v56, %v11565_v24  ;;  %5874 = vmatprep.subr.bf16.mxu1 %v5873_v15  ;;  %v11569_v18 = vand.u32 4294901760, %v7214_v7 }
  0x7a   :  { %v1768_v60 = vand.u32 4294901760, %v1767_v26  ;;  %v1773_v19 = vsub.f32 %v7205_v58, %v11566_v42  ;;  %v11577_v3 = vand.u32 4294901760, %v7227_v29  ;;  %v1785_v23 = vsub.f32 %v7208_v63, %v11568_v27 }
  0x7b   :  { %5492 = vmatpush1.bf16.msra.mxu0 %v5491_v57  ;;  %v490_v36 = vand.u32 4294901760, %v489_v21  ;;  %v502_v35 = vand.u32 4294901760, %v501_v53  ;;  %v11572_v5 = vand.u32 4294901760, %v7231_v31  ;;  %v495_v26 = vsub.f32 %v7214_v7, %v11569_v18 }
  0x7c   :  { %v5875_v24 = vpack.c.bf16 %v1768_v60, %v1756_v11  ;;  %v1774_v15 = vand.u32 4294901760, %v1773_v19  ;;  %v507_v42 = vsub.f32 %v7227_v29, %v11577_v3  ;;  %v1786_v57 = vand.u32 4294901760, %v1785_v23 }
  0x7d   :  { %v5493_v54 = vpack.c.bf16 %v502_v35, %v490_v36  ;;  %v1779_v21 = vsub.f32 %v7231_v31, %v11572_v5  ;;  %v11571_v53 = vand.u32 4294901760, %v7242_v59  ;;  %v496_v27 = vand.u32 4294901760, %v495_v26 }
  0x7e   :  { %5876 = vmatpush1.bf16.msra.mxu1 %v5875_v24  ;;  %v508_v11 = vand.u32 4294901760, %v507_v42  ;;  %v11575_v60 = vand.u32 4294901760, %v7246_v0  ;;  %v11573_v19 = vand.u32 4294901760, %v7248_v37  ;;  %v5877_v18 = vpack.c.bf16 %v1786_v57, %v1774_v15 }
  0x7f   :  { %5494 = vmatprep.subr.bf16.mxu0 %v5493_v54  ;;  %v1780_v17 = vand.u32 4294901760, %v1779_v21  ;;  %v1791_v23 = vsub.f32 %v7242_v59, %v11571_v53  ;;  %v11574_v36 = vand.u32 4294901760, %v7252_v32  ;;  %v11576_v26 = vand.u32 4294901760, %v7263_v55 }
  0x80   :  { %v5495_v35 = vpack.c.bf16 %v508_v11, %v496_v27  ;;  %v513_v24 = vsub.f32 %v7246_v0, %v11575_v60  ;;  %v525_v42 = vsub.f32 %v7248_v37, %v11573_v19  ;;  %5878 = vmatprep.subr.bf16.mxu1 %v5877_v18  ;;  %v11582_v57 = vand.u32 4294901760, %v7267_v30 }
  0x81   :  { %v1792_v54 = vand.u32 4294901760, %v1791_v23  ;;  %v1797_v15 = vsub.f32 %v7252_v32, %v11574_v36  ;;  %v11585_v27 = vand.u32 4294901760, %v7278_v8  ;;  %v1809_v53 = vsub.f32 %v7263_v55, %v11576_v26 }
  0x82   :  { %5496 = vmatpush1.bf16.msra.mxu0 %v5495_v35  ;;  %v514_v21 = vand.u32 4294901760, %v513_v24  ;;  %v526_v11 = vand.u32 4294901760, %v525_v42  ;;  %v11586_v5 = vand.u32 4294901760, %v7282_v1  ;;  %v519_v23 = vsub.f32 %v7267_v30, %v11582_v57  ;;  %v12396_v42 = vld [vmem:[#allocation61_spill] sm:$0xff] }
  0x83   :  { %v5879_v19 = vpack.c.bf16 %v1792_v54, %v1780_v17  ;;  %v1798_v18 = vand.u32 4294901760, %v1797_v15  ;;  %v531_v36 = vsub.f32 %v7278_v8, %v11585_v27  ;;  %v1810_v35 = vand.u32 4294901760, %v1809_v53  ;;  %v12397_v54 = vld [vmem:[#allocation63_spill] sm:$0xff] }
  0x84   :  { %v5497_v60 = vpack.c.bf16 %v526_v11, %v514_v21  ;;  %v1803_v24 = vsub.f32 %v7282_v1, %v11586_v5  ;;  %v11587_v26 = vand.u32 4294901760, %v12396_v42  ;;  %v520_v3 = vand.u32 4294901760, %v519_v23  ;;  %v12399_v21 = vld [vmem:[#allocation65_spill] sm:$0xff]  ;;  %v12400_v23 = vld [vmem:[#allocation67_spill] sm:$0xff] }
  0x85   :  { %5880 = vmatpush1.bf16.msra.mxu1 %v5879_v19  ;;  %v532_v17 = vand.u32 4294901760, %v531_v36  ;;  %v11589_v15 = vand.u32 4294901760, %v12397_v54  ;;  %v11590_v9 = vand.u32 4294901760, %v12398_v20  ;;  %v5881_v57 = vpack.c.bf16 %v1810_v35, %v1798_v18  ;;  %v12401_v35 = vld [vmem:[#allocation69_spill] sm:$0xff] }
  0x86   :  { %5498 = vmatprep.subr.bf16.mxu0 %v5497_v60  ;;  %v1804_v30 = vand.u32 4294901760, %v1803_v24  ;;  %v1815_v53 = vsub.f32 %v12396_v42, %v11587_v26  ;;  %v11594_v11 = vand.u32 4294901760, %v12399_v21  ;;  %v11596_v5 = vand.u32 4294901760, %v12400_v23  ;;  %v12402_v26 = vld [vmem:[#allocation70_spill] sm:$0xff] }
  0x87   :  { %v5499_v27 = vpack.c.bf16 %v532_v17, %v520_v3  ;;  %v537_v19 = vsub.f32 %v12397_v54, %v11589_v15  ;;  %v549_v36 = vsub.f32 %v12398_v20, %v11590_v9  ;;  %5882 = vmatprep.subr.bf16.mxu1 %v5881_v57  ;;  %v11601_v24 = vand.u32 4294901760, %v12401_v35  ;;  %v12403_v9 = vld [vmem:[#allocation72_spill] sm:$0xff] }
  0x88   :  { %v1816_v60 = vand.u32 4294901760, %v1815_v53  ;;  %v1821_v18 = vsub.f32 %v12399_v21, %v11594_v11  ;;  %v11603_v3 = vand.u32 4294901760, %v12402_v26  ;;  %v1833_v15 = vsub.f32 %v12400_v23, %v11596_v5  ;;  %v12406_v54 = vld [vmem:[#allocation76_spill] sm:$0xff] }
  0x89   :  { %5500 = vmatpush1.bf16.msra.mxu0 %v5499_v27  ;;  %v538_v17 = vand.u32 4294901760, %v537_v19  ;;  %v550_v42 = vand.u32 4294901760, %v549_v36  ;;  %v11604_v1 = vand.u32 4294901760, %v12403_v9  ;;  %v543_v53 = vsub.f32 %v12401_v35, %v11601_v24  ;;  %v12404_v36 = vld [vmem:[#allocation73_spill] sm:$0xff] }
  0x8a   :  { %v5883_v20 = vpack.c.bf16 %v1816_v60, %v1804_v30  ;;  %v1822_v57 = vand.u32 4294901760, %v1821_v18  ;;  %v555_v11 = vsub.f32 %v12402_v26, %v11603_v3  ;;  %v1834_v27 = vand.u32 4294901760, %v1833_v15  ;;  %v12405_v60 = vld [vmem:[#allocation75_spill] sm:$0xff]  ;;  %v12407_v15 = vld [vmem:[#allocation77_spill] sm:$0xff] }
  0x8b   :  { %v5501_v21 = vpack.c.bf16 %v550_v42, %v538_v17  ;;  %v1827_v19 = vsub.f32 %v12403_v9, %v11604_v1  ;;  %v11605_v5 = vand.u32 4294901760, %v12404_v36  ;;  %v544_v23 = vand.u32 4294901760, %v543_v53  ;;  %v12408_v53 = vld [vmem:[#allocation79_spill] sm:$0xff] }
  0x8c   :  { %5884 = vmatpush1.bf16.msra.mxu1 %v5883_v20  ;;  %v556_v30 = vand.u32 4294901760, %v555_v11  ;;  %v11607_v18 = vand.u32 4294901760, %v12405_v60  ;;  %v11608_v8 = vand.u32 4294901760, %v12406_v54  ;;  %v5885_v24 = vpack.c.bf16 %v1834_v27, %v1822_v57  ;;  %v12409_v27 = vld [vmem:[#allocation81_spill] sm:$0xff] }
  0x8d   :  { %5502 = vmatprep.subr.bf16.mxu0 %v5501_v21  ;;  %v1828_v35 = vand.u32 4294901760, %v1827_v19  ;;  %v1839_v42 = vsub.f32 %v12404_v36, %v11605_v5  ;;  %v11611_v17 = vand.u32 4294901760, %v12407_v15  ;;  %v11613_v1 = vand.u32 4294901760, %v12408_v53  ;;  %v12410_v5 = vld [vmem:[#allocation82_spill] sm:$0xff] }
  0x8e   :  { %v5503_v3 = vpack.c.bf16 %v556_v30, %v544_v23  ;;  %v561_v20 = vsub.f32 %v12405_v60, %v11607_v18  ;;  %v573_v11 = vsub.f32 %v12406_v54, %v11608_v8  ;;  %5886 = vmatprep.subr.bf16.mxu1 %v5885_v24  ;;  %v11617_v19 = vand.u32 4294901760, %v12409_v27  ;;  %v12411_v8 = vld [vmem:[#allocation84_spill] sm:$0xff] }
  0x8f   :  { %v1840_v21 = vand.u32 4294901760, %v1839_v42  ;;  %v1845_v57 = vsub.f32 %v12407_v15, %v11611_v17  ;;  %v11619_v23 = vand.u32 4294901760, %v12410_v5  ;;  %v1857_v18 = vsub.f32 %v12408_v53, %v11613_v1  ;;  %v12414_v60 = vld [vmem:[#allocation88_spill] sm:$0xff] }
  0x90   :  { %5504 = vmatpush1.bf16.msra.mxu0 %v5503_v3  ;;  %v562_v30 = vand.u32 4294901760, %v561_v20  ;;  %v574_v36 = vand.u32 4294901760, %v573_v11  ;;  %v11620_v9 = vand.u32 4294901760, %v12411_v8  ;;  %v567_v42 = vsub.f32 %v12409_v27, %v11617_v19  ;;  %v12412_v11 = vld [vmem:[#allocation85_spill] sm:$0xff] }
  0x91   :  { %v5887_v54 = vpack.c.bf16 %v1840_v21, %v1828_v35  ;;  %v1846_v24 = vand.u32 4294901760, %v1845_v57  ;;  %v579_v17 = vsub.f32 %v12410_v5, %v11619_v23  ;;  %v1858_v3 = vand.u32 4294901760, %v1857_v18  ;;  %v12413_v21 = vld [vmem:[#allocation87_spill] sm:$0xff]  ;;  %v12415_v18 = vld [vmem:[#allocation89_spill] sm:$0xff] }
  0x92   :  { %v5505_v15 = vpack.c.bf16 %v574_v36, %v562_v30  ;;  %v1851_v20 = vsub.f32 %v12411_v8, %v11620_v9  ;;  %v11621_v1 = vand.u32 4294901760, %v12412_v11  ;;  %v568_v53 = vand.u32 4294901760, %v567_v42  ;;  %v12416_v42 = vld [vmem:[#allocation91_spill] sm:$0xff] }
  0x93   :  { %5888 = vmatpush1.bf16.msra.mxu1 %v5887_v54  ;;  %v580_v35 = vand.u32 4294901760, %v579_v17  ;;  %v11623_v57 = vand.u32 4294901760, %v12413_v21  ;;  %v11624_v26 = vand.u32 4294901760, %v12414_v60  ;;  %v5889_v19 = vpack.c.bf16 %v1858_v3, %v1846_v24  ;;  %v12417_v3 = vld [vmem:[#allocation93_spill] sm:$0xff] }
  0x94   :  { %5506 = vmatprep.subr.bf16.mxu0 %v5505_v15  ;;  %v1852_v27 = vand.u32 4294901760, %v1851_v20  ;;  %v1863_v36 = vsub.f32 %v12412_v11, %v11621_v1  ;;  %v11627_v30 = vand.u32 4294901760, %v12415_v18  ;;  %v11629_v9 = vand.u32 4294901760, %v12416_v42  ;;  %v12418_v1 = vld [vmem:[#allocation94_spill] sm:$0xff] }
  0x95   :  { %v5507_v23 = vpack.c.bf16 %v580_v35, %v568_v53  ;;  %v585_v54 = vsub.f32 %v12413_v21, %v11623_v57  ;;  %v597_v17 = vsub.f32 %v12414_v60, %v11624_v26  ;;  %5890 = vmatprep.subr.bf16.mxu1 %v5889_v19  ;;  %v11633_v20 = vand.u32 4294901760, %v12417_v3  ;;  %v12419_v26 = vld [vmem:[#allocation96_spill] sm:$0xff] }
  0x96   :  { %v1864_v15 = vand.u32 4294901760, %v1863_v36  ;;  %v1869_v24 = vsub.f32 %v12415_v18, %v11627_v30  ;;  %v11635_v53 = vand.u32 4294901760, %v12418_v1  ;;  %v1881_v57 = vsub.f32 %v12416_v42, %v11629_v9  ;;  %v12422_v21 = vld [vmem:[#allocation100_spill] sm:$0xff] }
  0x97   :  { %5508 = vmatpush1.bf16.msra.mxu0 %v5507_v23  ;;  %v586_v35 = vand.u32 4294901760, %v585_v54  ;;  %v598_v11 = vand.u32 4294901760, %v597_v17  ;;  %v11636_v8 = vand.u32 4294901760, %v12419_v26  ;;  %v591_v36 = vsub.f32 %v12417_v3, %v11633_v20  ;;  %v12420_v17 = vld [vmem:[#allocation97_spill] sm:$0xff] }
  0x98   :  { %v5891_v60 = vpack.c.bf16 %v1864_v15, %v1852_v27  ;;  %v1870_v19 = vand.u32 4294901760, %v1869_v24  ;;  %v603_v30 = vsub.f32 %v12418_v1, %v11635_v53  ;;  %v1882_v23 = vand.u32 4294901760, %v1881_v57  ;;  %v12421_v15 = vld [vmem:[#allocation99_spill] sm:$0xff]  ;;  %v12423_v57 = vld [vmem:[#allocation101_spill] sm:$0xff] }
  0x99   :  { %v5509_v18 = vpack.c.bf16 %v598_v11, %v586_v35  ;;  %v1875_v54 = vsub.f32 %v12419_v26, %v11636_v8  ;;  %v11637_v9 = vand.u32 4294901760, %v12420_v17  ;;  %v592_v42 = vand.u32 4294901760, %v591_v36  ;;  %v12424_v36 = vld [vmem:[#allocation103_spill] sm:$0xff] }
  0x9a   :  { %5892 = vmatpush1.bf16.msra.mxu1 %v5891_v60  ;;  %v604_v27 = vand.u32 4294901760, %v603_v30  ;;  %v11639_v24 = vand.u32 4294901760, %v12421_v15  ;;  %v11640_v5 = vand.u32 4294901760, %v12422_v21  ;;  %v5893_v20 = vpack.c.bf16 %v1882_v23, %v1870_v19  ;;  %v12425_v23 = vld [vmem:[#allocation105_spill] sm:$0xff] }
  0x9b   :  { %5510 = vmatprep.subr.bf16.mxu0 %v5509_v18  ;;  %v1876_v3 = vand.u32 4294901760, %v1875_v54  ;;  %v1887_v11 = vsub.f32 %v12420_v17, %v11637_v9  ;;  %v11643_v35 = vand.u32 4294901760, %v12423_v57  ;;  %v11645_v8 = vand.u32 4294901760, %v12424_v36  ;;  %v12426_v9 = vld [vmem:[#allocation106_spill] sm:$0xff] }
  0x9c   :  { %v5511_v53 = vpack.c.bf16 %v604_v27, %v592_v42  ;;  %v609_v60 = vsub.f32 %v12421_v15, %v11639_v24  ;;  %v621_v30 = vsub.f32 %v12422_v21, %v11640_v5  ;;  %5894 = vmatprep.subr.bf16.mxu1 %v5893_v20  ;;  %v11649_v54 = vand.u32 4294901760, %v12425_v23  ;;  %v12427_v5 = vld [vmem:[#allocation108_spill] sm:$0xff] }
  0x9d   :  { %v1888_v18 = vand.u32 4294901760, %v1887_v11  ;;  %v1893_v19 = vsub.f32 %v12423_v57, %v11643_v35  ;;  %v11652_v42 = vand.u32 4294901760, %v12426_v9  ;;  %v1905_v24 = vsub.f32 %v12424_v36, %v11645_v8  ;;  %v12430_v15 = vld [vmem:[#allocation112_spill] sm:$0xff] }
  0x9e   :  { %5512 = vmatpush1.bf16.msra.mxu0 %v5511_v53  ;;  %v610_v27 = vand.u32 4294901760, %v609_v60  ;;  %v622_v17 = vand.u32 4294901760, %v621_v30  ;;  %v11653_v26 = vand.u32 4294901760, %v12427_v5  ;;  %v615_v11 = vsub.f32 %v12425_v23, %v11649_v54  ;;  %v12428_v30 = vld [vmem:[#allocation109_spill] sm:$0xff] }
  0x9f   :  { %v5895_v21 = vpack.c.bf16 %v1888_v18, %v1876_v3  ;;  %v1894_v20 = vand.u32 4294901760, %v1893_v19  ;;  %v627_v35 = vsub.f32 %v12426_v9, %v11652_v42  ;;  %v1906_v53 = vand.u32 4294901760, %v1905_v24  ;;  %v12429_v18 = vld [vmem:[#allocation111_spill] sm:$0xff]  ;;  %v12431_v24 = vld [vmem:[#allocation113_spill] sm:$0xff] }
  0xa0   :  { %v5513_v57 = vpack.c.bf16 %v622_v17, %v610_v27  ;;  %v1899_v60 = vsub.f32 %v12427_v5, %v11653_v26  ;;  %v11654_v8 = vand.u32 4294901760, %v12428_v30  ;;  %v616_v36 = vand.u32 4294901760, %v615_v11  ;;  %v12432_v11 = vld [vmem:[#allocation115_spill] sm:$0xff] }
  0xa1   :  { %5896 = vmatpush1.bf16.msra.mxu1 %v5895_v21  ;;  %v628_v3 = vand.u32 4294901760, %v627_v35  ;;  %v11657_v19 = vand.u32 4294901760, %v12429_v18  ;;  %v11658_v1 = vand.u32 4294901760, %v12430_v15  ;;  %v5897_v54 = vpack.c.bf16 %v1906_v53, %v1894_v20  ;;  %v12433_v53 = vld [vmem:[#allocation117_spill] sm:$0xff] }
  0xa2   :  { %5514 = vmatprep.subr.bf16.mxu0 %v5513_v57  ;;  %v1900_v55 = vand.u32 4294901760, %v1899_v60  ;;  %v1911_v17 = vsub.f32 %v12428_v30, %v11654_v8  ;;  %v11663_v27 = vand.u32 4294901760, %v12431_v24  ;;  %v11666_v26 = vand.u32 4294901760, %v12432_v11  ;;  %v12434_v8 = vld [vmem:[#allocation118_spill] sm:$0xff] }
  0xa3   :  { %v5515_v42 = vpack.c.bf16 %v628_v3, %v616_v36  ;;  %v633_v21 = vsub.f32 %v12429_v18, %v11657_v19  ;;  %v645_v35 = vsub.f32 %v12430_v15, %v11658_v1  ;;  %5898 = vmatprep.subr.bf16.mxu1 %v5897_v54  ;;  %v11670_v60 = vand.u32 4294901760, %v12433_v53  ;;  %v12435_v1 = vld [vmem:[#allocation120_spill] sm:$0xff] }
  0xa4   :  { %v1912_v57 = vand.u32 4294901760, %v1911_v17  ;;  %v1917_v20 = vsub.f32 %v12431_v24, %v11663_v27  ;;  %v11672_v36 = vand.u32 4294901760, %v12434_v8  ;;  %v1929_v19 = vsub.f32 %v12432_v11, %v11666_v26  ;;  %v12438_v24 = vld [vmem:[#allocation124_spill] sm:$0xff] }
  0xa5   :  { %5516 = vmatpush1.bf16.msra.mxu0 %v5515_v42  ;;  %v634_v3 = vand.u32 4294901760, %v633_v21  ;;  %v646_v32 = vand.u32 4294901760, %v645_v35  ;;  %v11673_v59 = vand.u32 4294901760, %v12435_v1  ;;  %v639_v17 = vsub.f32 %v12433_v53, %v11670_v60  ;;  %v12436_v35 = vld [vmem:[#allocation121_spill] sm:$0xff] }
  0xa6   :  { %v5899_v31 = vpack.c.bf16 %v1912_v57, %v1900_v55  ;;  %v1918_v54 = vand.u32 4294901760, %v1917_v20  ;;  %v651_v27 = vsub.f32 %v12434_v8, %v11672_v36  ;;  %v1930_v42 = vand.u32 4294901760, %v1929_v19  ;;  %v12437_v57 = vld [vmem:[#allocation123_spill] sm:$0xff]  ;;  %v12439_v19 = vld [vmem:[#allocation125_spill] sm:$0xff] }
  0xa7   :  { %v5517_v45 = vpack.c.bf16 %v646_v32, %v634_v3  ;;  %v1923_v21 = vsub.f32 %v12435_v1, %v11673_v59  ;;  %v11674_v26 = vand.u32 4294901760, %v12436_v35  ;;  %v640_v11 = vand.u32 4294901760, %v639_v17  ;;  %v12440_v17 = vld [vmem:[#allocation127_spill] sm:$0xff]  ;;  %v12446_v1 = vld [vmem:[#allocation136_spill] sm:$0xff] }
  0xa8   :  { %5900 = vmatpush1.bf16.msra.mxu1 %v5899_v31  ;;  %v652_v55 = vand.u32 4294901760, %v651_v27  ;;  %v11676_v20 = vand.u32 4294901760, %v12437_v57  ;;  %v11677_v15 = vand.u32 4294901760, %v12438_v24  ;;  %v5901_v60 = vpack.c.bf16 %v1930_v42, %v1918_v54  ;;  %v12441_v42 = vld [vmem:[#allocation129_spill] sm:$0xff] }
  0xa9   :  { %5518 = vmatprep.subr.bf16.mxu0 %v5517_v45  ;;  %v1924_v53 = vand.u32 4294901760, %v1923_v21  ;;  %v1935_v32 = vsub.f32 %v12436_v35, %v11674_v26  ;;  %v11680_v3 = vand.u32 4294901760, %v12439_v19  ;;  %v11682_v59 = vand.u32 4294901760, %v12440_v17  ;;  %v12442_v26 = vld [vmem:[#allocation130_spill] sm:$0xff] }
  0xaa   :  { %v5519_v36 = vpack.c.bf16 %v652_v55, %v640_v11  ;;  %v657_v31 = vsub.f32 %v12437_v57, %v11676_v20  ;;  %v669_v27 = vsub.f32 %v12438_v24, %v11677_v15  ;;  %5902 = vmatprep.subr.bf16.mxu1 %v5901_v60  ;;  %v11686_v21 = vand.u32 4294901760, %v12441_v42  ;;  %v12443_v15 = vld [vmem:[#allocation132_spill] sm:$0xff] }
  0xab   :  { %v1936_v45 = vand.u32 4294901760, %v1935_v32  ;;  %v1941_v54 = vsub.f32 %v12439_v19, %v11680_v3  ;;  %v11688_v11 = vand.u32 4294901760, %v12442_v26  ;;  %v1953_v20 = vsub.f32 %v12440_v17, %v11682_v59 }
  0xac   :  { %5520 = vmatpush1.bf16.msra.mxu0 %v5519_v36  ;;  %v658_v55 = vand.u32 4294901760, %v657_v31  ;;  %v670_v35 = vand.u32 4294901760, %v669_v27  ;;  %v11689_v24 = vand.u32 4294901760, %v12443_v15  ;;  %v663_v32 = vsub.f32 %v12441_v42, %v11686_v21  ;;  %v12444_v27 = vld [vmem:[#allocation133_spill] sm:$0xff] }
  0xad   :  { %v5903_v57 = vpack.c.bf16 %v1936_v45, %v1924_v53  ;;  %v1942_v60 = vand.u32 4294901760, %v1941_v54  ;;  %v675_v3 = vsub.f32 %v12442_v26, %v11688_v11  ;;  %v1954_v36 = vand.u32 4294901760, %v1953_v20  ;;  %v12445_v45 = vld [vmem:[#allocation135_spill] sm:$0xff]  ;;  %v12447_v20 = vld [vmem:[#allocation137_spill] sm:$0xff] }
  0xae   :  { %v5521_v19 = vpack.c.bf16 %v670_v35, %v658_v55  ;;  %v1947_v31 = vsub.f32 %v12443_v15, %v11689_v24  ;;  %v11690_v59 = vand.u32 4294901760, %v12444_v27  ;;  %v664_v17 = vand.u32 4294901760, %v663_v32  ;;  %v12448_v32 = vld [vmem:[#allocation139_spill] sm:$0xff]  ;;  %v12454_v15 = vld [vmem:[#allocation148_spill] sm:$0xff] }
  0xaf   :  { %5904 = vmatpush1.bf16.msra.mxu1 %v5903_v57  ;;  %v676_v53 = vand.u32 4294901760, %v675_v3  ;;  %v11692_v54 = vand.u32 4294901760, %v12445_v45  ;;  %v11693_v8 = vand.u32 4294901760, %v12446_v1  ;;  %v5905_v21 = vpack.c.bf16 %v1954_v36, %v1942_v60  ;;  %v12449_v36 = vld [vmem:[#allocation141_spill] sm:$0xff] }
  0xb0   :  { %5522 = vmatprep.subr.bf16.mxu0 %v5521_v19  ;;  %v1948_v42 = vand.u32 4294901760, %v1947_v31  ;;  %v1959_v35 = vsub.f32 %v12444_v27, %v11690_v59  ;;  %v11696_v55 = vand.u32 4294901760, %v12447_v20  ;;  %v11698_v24 = vand.u32 4294901760, %v12448_v32  ;;  %v12450_v59 = vld [vmem:[#allocation142_spill] sm:$0xff] }
  0xb1   :  { %v5523_v11 = vpack.c.bf16 %v676_v53, %v664_v17  ;;  %v681_v57 = vsub.f32 %v12445_v45, %v11692_v54  ;;  %v693_v3 = vsub.f32 %v12446_v1, %v11693_v8  ;;  %5906 = vmatprep.subr.bf16.mxu1 %v5905_v21  ;;  %v11702_v31 = vand.u32 4294901760, %v12449_v36  ;;  %v12451_v8 = vld [vmem:[#allocation144_spill] sm:$0xff] }
  0xb2   :  { %v1960_v19 = vand.u32 4294901760, %v1959_v35  ;;  %v1965_v60 = vsub.f32 %v12447_v20, %v11696_v55  ;;  %v11704_v17 = vand.u32 4294901760, %v12450_v59  ;;  %v1977_v54 = vsub.f32 %v12448_v32, %v11698_v24 }
  0xb3   :  { %5524 = vmatpush1.bf16.msra.mxu0 %v5523_v11  ;;  %v682_v53 = vand.u32 4294901760, %v681_v57  ;;  %v694_v27 = vand.u32 4294901760, %v693_v3  ;;  %v11705_v1 = vand.u32 4294901760, %v12451_v8  ;;  %v687_v35 = vsub.f32 %v12449_v36, %v11702_v31  ;;  %v12452_v3 = vld [vmem:[#allocation145_spill] sm:$0xff] }
  0xb4   :  { %v5907_v45 = vpack.c.bf16 %v1960_v19, %v1948_v42  ;;  %v1966_v21 = vand.u32 4294901760, %v1965_v60  ;;  %v699_v55 = vsub.f32 %v12450_v59, %v11704_v17  ;;  %v1978_v11 = vand.u32 4294901760, %v1977_v54  ;;  %v12453_v19 = vld [vmem:[#allocation147_spill] sm:$0xff]  ;;  %v12455_v54 = vld [vmem:[#allocation149_spill] sm:$0xff] }
  0xb5   :  { %v5525_v20 = vpack.c.bf16 %v694_v27, %v682_v53  ;;  %v1971_v57 = vsub.f32 %v12451_v8, %v11705_v1  ;;  %v11706_v24 = vand.u32 4294901760, %v12452_v3  ;;  %v688_v32 = vand.u32 4294901760, %v687_v35  ;;  %v12456_v35 = vld [vmem:[#allocation151_spill] sm:$0xff]  ;;  %v12462_v8 = vld [vmem:[#allocation160_spill] sm:$0xff] }
  0xb6   :  { %5908 = vmatpush1.bf16.msra.mxu1 %v5907_v45  ;;  %v700_v42 = vand.u32 4294901760, %v699_v55  ;;  %v11708_v60 = vand.u32 4294901760, %v12453_v19  ;;  %v11709_v26 = vand.u32 4294901760, %v12454_v15  ;;  %v5909_v31 = vpack.c.bf16 %v1978_v11, %v1966_v21  ;;  %v12457_v11 = vld [vmem:[#allocation153_spill] sm:$0xff] }
  0xb7   :  { %5526 = vmatprep.subr.bf16.mxu0 %v5525_v20  ;;  %v1972_v36 = vand.u32 4294901760, %v1971_v57  ;;  %v1983_v27 = vsub.f32 %v12452_v3, %v11706_v24  ;;  %v11712_v53 = vand.u32 4294901760, %v12455_v54  ;;  %v11714_v1 = vand.u32 4294901760, %v12456_v35  ;;  %v12458_v24 = vld [vmem:[#allocation154_spill] sm:$0xff] }
  0xb8   :  { %v5527_v17 = vpack.c.bf16 %v700_v42, %v688_v32  ;;  %v705_v45 = vsub.f32 %v12453_v19, %v11708_v60  ;;  %v717_v55 = vsub.f32 %v12454_v15, %v11709_v26  ;;  %5910 = vmatprep.subr.bf16.mxu1 %v5909_v31  ;;  %v11718_v57 = vand.u32 4294901760, %v12457_v11  ;;  %v12459_v26 = vld [vmem:[#allocation156_spill] sm:$0xff] }
  0xb9   :  { %v1984_v20 = vand.u32 4294901760, %v1983_v27  ;;  %v1989_v21 = vsub.f32 %v12455_v54, %v11712_v53  ;;  %v11720_v32 = vand.u32 4294901760, %v12458_v24  ;;  %v2001_v60 = vsub.f32 %v12456_v35, %v11714_v1 }
  0xba   :  { %5528 = vmatpush1.bf16.msra.mxu0 %v5527_v17  ;;  %v706_v42 = vand.u32 4294901760, %v705_v45  ;;  %v718_v3 = vand.u32 4294901760, %v717_v55  ;;  %v11721_v15 = vand.u32 4294901760, %v12459_v26  ;;  %v711_v27 = vsub.f32 %v12457_v11, %v11718_v57  ;;  %v12460_v55 = vld [vmem:[#allocation157_spill] sm:$0xff] }
  0xbb   :  { %v5911_v19 = vpack.c.bf16 %v1984_v20, %v1972_v36  ;;  %v1990_v31 = vand.u32 4294901760, %v1989_v21  ;;  %v723_v53 = vsub.f32 %v12458_v24, %v11720_v32  ;;  %v2002_v17 = vand.u32 4294901760, %v2001_v60  ;;  %v12461_v20 = vld [vmem:[#allocation159_spill] sm:$0xff]  ;;  %v12463_v60 = vld [vmem:[#allocation161_spill] sm:$0xff] }
  0xbc   :  { %v5529_v54 = vpack.c.bf16 %v718_v3, %v706_v42  ;;  %v1995_v45 = vsub.f32 %v12459_v26, %v11721_v15  ;;  %v11722_v1 = vand.u32 4294901760, %v12460_v55  ;;  %v712_v35 = vand.u32 4294901760, %v711_v27  ;;  %v12464_v27 = vld [vmem:[#allocation163_spill] sm:$0xff]  ;;  %v12523_v24 = vld [vmem:[#allocation173_spill] sm:$0xff] }
  0xbd   :  { %5912 = vmatpush1.bf16.msra.mxu1 %v5911_v19  ;;  %v724_v36 = vand.u32 4294901760, %v723_v53  ;;  %v11724_v21 = vand.u32 4294901760, %v12461_v20  ;;  %v11725_v59 = vand.u32 4294901760, %v12462_v8  ;;  %v5913_v57 = vpack.c.bf16 %v2002_v17, %v1990_v31  ;;  %v12465_v17 = vld [vmem:[#allocation165_spill] sm:$0xff] }
  0xbe   :  { %5530 = vmatprep.subr.bf16.mxu0 %v5529_v54  ;;  %v1996_v11 = vand.u32 4294901760, %v1995_v45  ;;  %v2007_v3 = vsub.f32 %v12460_v55, %v11722_v1  ;;  %v11728_v42 = vand.u32 4294901760, %v12463_v60  ;;  %v11730_v15 = vand.u32 4294901760, %v12464_v27  ;;  %v12466_v1 = vld [vmem:[#allocation166_spill] sm:$0xff] }
  0xbf   :  { %v5531_v32 = vpack.c.bf16 %v724_v36, %v712_v35  ;;  %v729_v19 = vsub.f32 %v12461_v20, %v11724_v21  ;;  %v741_v53 = vsub.f32 %v12462_v8, %v11725_v59  ;;  %5914 = vmatprep.subr.bf16.mxu1 %v5913_v57  ;;  %v11733_v45 = vand.u32 4294901760, %v12465_v17  ;;  %v12467_v59 = vld [vmem:[#allocation168_spill] sm:$0xff] }
  0xc0   :  { %v2008_v54 = vand.u32 4294901760, %v2007_v3  ;;  %v2013_v31 = vsub.f32 %v12463_v60, %v11728_v42  ;;  %v11735_v35 = vand.u32 4294901760, %v12466_v1  ;;  %v2025_v21 = vsub.f32 %v12464_v27, %v11730_v15 }
  0xc1   :  { %5532 = vmatpush1.bf16.msra.mxu0 %v5531_v32  ;;  %v730_v36 = vand.u32 4294901760, %v729_v19  ;;  %v742_v55 = vand.u32 4294901760, %v741_v53  ;;  %v11736_v8 = vand.u32 4294901760, %v12467_v59  ;;  %v735_v3 = vsub.f32 %v12465_v17, %v11733_v45  ;;  %v12468_v53 = vld [vmem:[#allocation169_spill] sm:$0xff] }
  0xc2   :  { %v5915_v20 = vpack.c.bf16 %v2008_v54, %v1996_v11  ;;  %v2014_v57 = vand.u32 4294901760, %v2013_v31  ;;  %v747_v42 = vsub.f32 %v12466_v1, %v11735_v35  ;;  %v2026_v32 = vand.u32 4294901760, %v2025_v21  ;;  %v12469_v31 = vld [vmem:[#allocation172_spill] sm:$0xff]  ;;  %v12470_v21 = vld [vmem:[#allocation173_spill] sm:$0xff] }
  0xc3   :  { %v5533_v60 = vpack.c.bf16 %v742_v55, %v730_v36  ;;  %v2019_v19 = vsub.f32 %v12467_v59, %v11736_v8  ;;  %v11737_v15 = vand.u32 4294901760, %v12468_v53  ;;  %v736_v27 = vand.u32 4294901760, %v735_v3  ;;  %v12471_v3 = vld [vmem:[#allocation175_spill] sm:$0xff] }
  0xc4   :  { %5916 = vmatpush1.bf16.msra.mxu1 %v5915_v20  ;;  %v748_v11 = vand.u32 4294901760, %v747_v42  ;;  %v11739_v54 = vand.u32 4294901760, %v7767_v47  ;;  %v11740_v26 = vand.u32 4294901760, %v12469_v31  ;;  %v5917_v45 = vpack.c.bf16 %v2026_v32, %v2014_v57  ;;  %v12472_v32 = vld [vmem:[#allocation177_spill] sm:$0xff] }
  0xc5   :  { %5534 = vmatprep.subr.bf16.mxu0 %v5533_v60  ;;  %v2020_v17 = vand.u32 4294901760, %v2019_v19  ;;  %v2031_v55 = vsub.f32 %v12468_v53, %v11737_v15  ;;  %v11744_v36 = vand.u32 4294901760, %v12470_v21  ;;  %v11746_v8 = vand.u32 4294901760, %v12471_v3  ;;  %v12473_v15 = vld [vmem:[#allocation178_spill] sm:$0xff] }
  0xc6   :  { %v5535_v35 = vpack.c.bf16 %v748_v11, %v736_v27  ;;  %v753_v20 = vsub.f32 %v7767_v47, %v11739_v54  ;;  %v765_v42 = vsub.f32 %v12469_v31, %v11740_v26  ;;  %5918 = vmatprep.subr.bf16.mxu1 %v5917_v45  ;;  %v11749_v19 = vand.u32 4294901760, %v12472_v32  ;;  %v12474_v26 = vld [vmem:[#allocation180_spill] sm:$0xff] }
  0xc7   :  { %v2032_v60 = vand.u32 4294901760, %v2031_v55  ;;  %v2037_v57 = vsub.f32 %v12470_v21, %v11744_v36  ;;  %v11751_v27 = vand.u32 4294901760, %v12473_v15  ;;  %v2049_v54 = vsub.f32 %v12471_v3, %v11746_v8 }
  0xc8   :  { %5536 = vmatpush1.bf16.msra.mxu0 %v5535_v35  ;;  %v754_v11 = vand.u32 4294901760, %v753_v20  ;;  %v766_v53 = vand.u32 4294901760, %v765_v42  ;;  %v11756_v31 = vand.u32 4294901760, %v12474_v26  ;;  %v759_v55 = vsub.f32 %v12472_v32, %v11749_v19  ;;  %v12475_v42 = vld [vmem:[#allocation181_spill] sm:$0xff] }
  0xc9   :  { %v5919_v47 = vpack.c.bf16 %v2032_v60, %v2020_v17  ;;  %v2038_v45 = vand.u32 4294901760, %v2037_v57  ;;  %v771_v36 = vsub.f32 %v12473_v15, %v11751_v27  ;;  %v2050_v35 = vand.u32 4294901760, %v2049_v54  ;;  %v12476_v57 = vld [vmem:[#allocation184_spill] sm:$0xff]  ;;  %v12477_v54 = vld [vmem:[#allocation185_spill] sm:$0xff] }
  0xca   :  { %v5537_v21 = vpack.c.bf16 %v766_v53, %v754_v11  ;;  %v2043_v20 = vsub.f32 %v12474_v26, %v11756_v31  ;;  %v11754_v8 = vand.u32 4294901760, %v12475_v42  ;;  %v760_v3 = vand.u32 4294901760, %v759_v55  ;;  %v12531_v26 = vld [vmem:[#allocation55_spill] sm:$0xff] }
  0xcb   :  { %5920 = vmatpush1.bf16.msra.mxu1 %v5919_v47  ;;  %v772_v17 = vand.u32 4294901760, %v771_v36  ;;  %v11752_v60 = vand.u32 4294901760, %v7816_v28  ;;  %v11753_v59 = vand.u32 4294901760, %v12476_v57  ;;  %v5921_v19 = vpack.c.bf16 %v2050_v35, %v2038_v45 }
  0xcc   :  { %5538 = vmatprep.subr.bf16.mxu0 %v5537_v21  ;;  %v2044_v32 = vand.u32 4294901760, %v2043_v20  ;;  %v2055_v53 = vsub.f32 %v12475_v42, %v11754_v8  ;;  %v11755_v11 = vand.u32 4294901760, %v12477_v54  ;;  %v11757_v55 = vand.u32 4294901760, %v7829_v14  ;;  %v12532_v42 = vld [vmem:[#allocation57_spill] sm:$0xff] }
  0xcd   :  { %v5539_v27 = vpack.c.bf16 %v772_v17, %v760_v3  ;;  %v777_v47 = vsub.f32 %v7816_v28, %v11752_v60  ;;  %v789_v36 = vsub.f32 %v12476_v57, %v11753_v59  ;;  %5922 = vmatprep.subr.bf16.mxu1 %v5921_v19  ;;  %v11758_v35 = vand.u32 4294901760, %v7833_v2  ;;  %v12533_v28 = vld [vmem:[#allocation58_spill] sm:$0xff] }
  0xce   :  { %v2056_v21 = vand.u32 4294901760, %v2055_v53  ;;  %v2061_v45 = vsub.f32 %v12477_v54, %v11755_v11  ;;  %v11759_v3 = vand.u32 4294901760, %v7838_v38  ;;  %v2073_v60 = vsub.f32 %v7829_v14, %v11757_v55  ;;  %v12534_v54 = vld [vmem:[#allocation63_spill] sm:$0xff] }
  0xcf   :  { %5540 = vmatpush1.bf16.msra.mxu0 %v5539_v27  ;;  %v778_v20 = vand.u32 4294901760, %v777_v47  ;;  %v790_v17 = vand.u32 4294901760, %v789_v36  ;;  %v11760_v59 = vand.u32 4294901760, %v7842_v22  ;;  %v783_v53 = vsub.f32 %v7833_v2, %v11758_v35 }
  0xd0   :  { %v5923_v8 = vpack.c.bf16 %v2056_v21, %v2044_v32  ;;  %v2062_v19 = vand.u32 4294901760, %v2061_v45  ;;  %v795_v11 = vsub.f32 %v7838_v38, %v11759_v3  ;;  %v2074_v27 = vand.u32 4294901760, %v2073_v60  ;;  %v12478_v3 = vld [vmem:[#allocation4_spill] sm:$0xff] }
  0xd1   :  { %v5541_v31 = vpack.c.bf16 %v790_v17, %v778_v20  ;;  %v2067_v47 = vsub.f32 %v7842_v22, %v11760_v59  ;;  %v11765_v36 = vand.u32 4294901760, %v7844_v49  ;;  %v784_v55 = vand.u32 4294901760, %v783_v53  ;;  %v12479_v59 = vld [vmem:[#allocation5_spill] sm:$0xff]  ;;  %v12480_v22 = vld [vmem:[#allocation7_spill] sm:$0xff]  ;;  %v12482_v53 = vld [vmem:[#allocation196_spill] sm:$0xff] }
  0xd2   :  { %5924 = vmatpush1.bf16.msra.mxu1 %v5923_v8  ;;  %v796_v32 = vand.u32 4294901760, %v795_v11  ;;  %v5925_v21 = vpack.c.bf16 %v2074_v27, %v2062_v19  ;;  %v5545_v20 = vpack.c.bf16 %v12478_v3, %v7037_v16  ;;  %v5929_v38 = vpack.c.bf16 %v12480_v22, %v12479_v59  ;;  %v12481_v8 = vld [vmem:[#allocation10_spill] sm:$0xff]  ;;  %v12514_v59 = vld [vmem:[#allocation159_spill] sm:$0xff]  ;;  %v12537_v3 = vld [vmem:[#allocation61_spill] sm:$0xff] }
  0xd3   :  { %5542 = vmatprep.subr.bf16.mxu0 %v5541_v31  ;;  %v2068_v45 = vand.u32 4294901760, %v2067_v47  ;;  %v2079_v35 = vsub.f32 %v7844_v49, %v11765_v36  ;;  %v5547_v11 = vpack.c.bf16 %v12481_v8, %v7058_v25  ;;  %v5549_v19 = vpack.c.bf16 %v7096_v46, %v7083_v41  ;;  %v12483_v36 = vld [vmem:[#allocation112_spill] sm:$0xff]  ;;  %v12508_v46 = vld [vmem:[#allocation195_spill] sm:$0xff] }
  0xd4   :  { %v5543_v60 = vpack.c.bf16 %v796_v32, %v784_v55  ;;  %5926 = vmatprep.subr.bf16.mxu1 %v5925_v21  ;;  %v5931_v55 = vpack.c.bf16 %v7081_v40, %v7079_v39  ;;  %v5551_v27 = vpack.c.bf16 %v7120_v61, %v7108_v52  ;;  %v5935_v47 = vpack.c.bf16 %v7135_v4, %v7122_v62  ;;  %v12496_v4 = vld [vmem:[#allocation132_spill] sm:$0xff]  ;;  %v12503_v52 = vld [vmem:[#allocation142_spill] sm:$0xff]  ;;  %v12517_v16 = vld [vmem:[#allocation163_spill] sm:$0xff] }
  0xd5   :  { %v2080_v17 = vand.u32 4294901760, %v2079_v35  ;;  %v5933_v35 = vpack.c.bf16 %v7106_v50, %v7100_v48  ;;  %v5553_v32 = vpack.c.bf16 %v7151_v10, %v7139_v6  ;;  %v5937_v21 = vpack.c.bf16 %v7157_v13, %v7155_v12  ;;  %v12494_v13 = vld [vmem:[#allocation129_spill] sm:$0xff]  ;;  %v12499_v62 = vld [vmem:[#allocation136_spill] sm:$0xff]  ;;  %v12501_v6 = vld [vmem:[#allocation139_spill] sm:$0xff] }
  0xd6   :  { %5544 = vmatpush1.bf16.msra.mxu0 %v5543_v60  ;;  %v5941_v60 = vpack.c.bf16 %v7208_v63, %v7205_v58  ;;  %v12486_v63 = vld [vmem:[#allocation117_spill] sm:$0xff]  ;;  %v12488_v58 = vld [vmem:[#allocation120_spill] sm:$0xff]  ;;  %v12521_v12 = vld [vmem:[#allocation171_spill] sm:$0xff] }
  0xd7   :  { %v5927_v31 = vpack.c.bf16 %v2080_v17, %v2068_v45  ;;  %5546 = vmatprep.subr.bf16.mxu0 %v5545_v20  ;;  %v5939_v45 = vpack.c.bf16 %v7184_v44, %v7182_v43  ;;  %v5557_v20 = vpack.c.bf16 %v7201_v56, %v7188_v51  ;;  %v5559_v17 = vpack.c.bf16 %v7227_v29, %v7214_v7  ;;  %v12484_v44 = vld [vmem:[#allocation113_spill] sm:$0xff]  ;;  %v12485_v43 = vld [vmem:[#allocation115_spill] sm:$0xff]  ;;  %v12487_v29 = vld [vmem:[#allocation118_spill] sm:$0xff] }
  0xd8   :  { %v12491_v51 = vld [vmem:[#allocation124_spill] sm:$0xff]  ;;  %v12497_v56 = vld [vmem:[#allocation133_spill] sm:$0xff]  ;;  %v12524_v22 = vld [vmem:[#allocation175_spill] sm:$0xff] }
  0xd9   :  { %5928 = vmatpush1.bf16.msra.mxu1 %v5927_v31  ;;  %801 = vmatmul.mubr.f32.vlgmr.msra.gmra.mrb[0].mxu0 %v12482_v53  ;;  %v12500_v7 = vld [vmem:[#allocation137_spill] sm:$0xff]  ;;  %v12515_v50 = vld [vmem:[#allocation160_spill] sm:$0xff] }
  0xda   :  { %5930 = vmatprep.subr.bf16.mxu1 %v5929_v38  ;;  %5548 = vmatpush1.bf16.msra.mxu0 %v5547_v11  ;;  %v5555_v38 = vpack.c.bf16 %v7169_v34, %v7167_v33  ;;  %v5561_v11 = vpack.c.bf16 %v7248_v37, %v7246_v0  ;;  %v12489_v37 = vld [vmem:[#allocation121_spill] sm:$0xff]  ;;  %v12490_v0 = vld [vmem:[#allocation123_spill] sm:$0xff]  ;;  %v12507_v33 = vld [vmem:[#allocation148_spill] sm:$0xff] }
  0xdb   :  { %5550 = vmatprep.subr.bf16.mxu0 %v5549_v19  ;;  %v12492_v34 = vld [vmem:[#allocation125_spill] sm:$0xff]  ;;  %v12493_v19 = vld [vmem:[#allocation127_spill] sm:$0xff]  ;;  %1001 = vmatprep.mubr.f32.mxu0 %v12508_v46  ;;  %v12522_v10 = vld [vmem:[#allocation172_spill] sm:$0xff] }
  0xdc   :  { %2085 = vmatmul.mubr.f32.vlgmr.msra.gmra.mrb[0].mxu1 %v12482_v53  ;;  %v12495_v53 = vld [vmem:[#allocation130_spill] sm:$0xff]  ;;  %v12516_v48 = vld [vmem:[#allocation161_spill] sm:$0xff]  ;;  %v12528_v25 = vld [vmem:[#allocation48_spill] sm:$0xff] }
  0xdd   :  { %5932 = vmatpush1.bf16.msra.mxu1 %v5931_v55  ;;  %v12502_v55 = vld [vmem:[#allocation141_spill] sm:$0xff]  ;;  %2285 = vmatprep.mubr.f32.mxu1 %v12508_v46  ;;  %v12535_v41 = vld [vmem:[#allocation64_spill] sm:$0xff] }
  0xde   :  { %5934 = vmatprep.subr.bf16.mxu1 %v5933_v35  ;;  %5552 = vmatpush1.bf16.msra.mxu0 %v5551_v27  ;;  %v12498_v27 = vld [vmem:[#allocation135_spill] sm:$0xff]  ;;  %v12518_v31 = vld [vmem:[#allocation165_spill] sm:$0xff]  ;;  %v5565_v2 = vpack.c.bf16 %v12535_v41, %v12534_v54  ;;  %v12536_v8 = vld [vmem:[#allocation60_spill] sm:$0xff] }
  0xdf   :  { %5554 = vmatprep.subr.bf16.mxu0 %v5553_v32  ;;  %v12510_v35 = vld [vmem:[#allocation151_spill] sm:$0xff]  ;;  %v12519_v32 = vld [vmem:[#allocation168_spill] sm:$0xff]  ;;  %v12520_v40 = vld [vmem:[#allocation169_spill] sm:$0xff]  ;;  %v5947_v46 = vpack.c.bf16 %v12537_v3, %v12536_v8 }
  0xe0   :  { %v12547_v3 = vld [vmem:[#allocation79_spill] sm:$0xff]  ;;  %v12549_v8 = vld [vmem:[#allocation82_spill] sm:$0xff] }
  0xe1   :  { %5936 = vmatpush1.bf16.msra.mxu1 %v5935_v47  ;;  %v5563_v47 = vpack.c.bf16 %v12533_v28, %v12532_v42  ;;  %v12545_v42 = vld [vmem:[#allocation73_spill] sm:$0xff] }
  0xe2   :  { %5938 = vmatprep.subr.bf16.mxu1 %v5937_v21  ;;  %5556 = vmatpush1.bf16.msra.mxu0 %v5555_v38  ;;  %v12529_v21 = vld [vmem:[#allocation49_spill] sm:$0xff] }
  0xe3   :  { %5558 = vmatprep.subr.bf16.mxu0 %v5557_v20  ;;  %v12526_v20 = vld [vmem:[#allocation191_spill] sm:$0xff]  ;;  %v5943_v61 = vpack.c.bf16 %v12529_v21, %v12528_v25  ;;  %v12530_v38 = vld [vmem:[#allocation53_spill] sm:$0xff]  ;;  %v12541_v25 = vld [vmem:[#allocation70_spill] sm:$0xff] }
  0xe4   :  { %v5945_v39 = vpack.c.bf16 %v12531_v26, %v12530_v38  ;;  %v12539_v21 = vld [vmem:[#allocation67_spill] sm:$0xff]  ;;  %v12543_v38 = vld [vmem:[#allocation76_spill] sm:$0xff] }
  0xe5   :  { %5940 = vmatpush1.bf16.msra.mxu1 %v5939_v45  ;;  %v12538_v45 = vld [vmem:[#allocation65_spill] sm:$0xff]  ;;  %v12542_v26 = vld [vmem:[#allocation75_spill] sm:$0xff] }
  0xe6   :  { %5942 = vmatprep.subr.bf16.mxu1 %v5941_v60  ;;  %5560 = vmatpush1.bf16.msra.mxu0 %v5559_v17  ;;  %v5949_v60 = vpack.c.bf16 %v12539_v21, %v12538_v45  ;;  %v12540_v17 = vld [vmem:[#allocation69_spill] sm:$0xff]  ;;  %v5569_v28 = vpack.c.bf16 %v12543_v38, %v12542_v26  ;;  %v12550_v21 = vld [vmem:[#allocation87_spill] sm:$0xff]  ;;  %v12551_v45 = vld [vmem:[#allocation88_spill] sm:$0xff] }
  0xe7   :  { %5562 = vmatprep.subr.bf16.mxu0 %v5561_v11  ;;  %v5567_v49 = vpack.c.bf16 %v12541_v25, %v12540_v17  ;;  %v12544_v11 = vld [vmem:[#allocation72_spill] sm:$0xff]  ;;  %v5573_v25 = vpack.c.bf16 %v12551_v45, %v12550_v21  ;;  %v12553_v17 = vld [vmem:[#allocation85_spill] sm:$0xff] }
  0xe8   :  { %v5951_v41 = vpack.c.bf16 %v12545_v42, %v12544_v11  ;;  %v12555_v42 = vld [vmem:[#allocation91_spill] sm:$0xff]  ;;  %v12557_v11 = vld [vmem:[#allocation94_spill] sm:$0xff] }
  0xe9   :  { %5944 = vmatpush1.bf16.msra.mxu1 %v5943_v61  ;;  %v12546_v61 = vld [vmem:[#allocation77_spill] sm:$0xff] }
  0xea   :  { %5946 = vmatprep.subr.bf16.mxu1 %v5945_v39  ;;  %5564 = vmatpush1.bf16.msra.mxu0 %v5563_v47  ;;  %v5953_v39 = vpack.c.bf16 %v12547_v3, %v12546_v61  ;;  %v12548_v47 = vld [vmem:[#allocation81_spill] sm:$0xff]  ;;  %v12558_v3 = vld [vmem:[#allocation99_spill] sm:$0xff]  ;;  %v12559_v61 = vld [vmem:[#allocation100_spill] sm:$0xff] }
  0xeb   :  { %5566 = vmatprep.subr.bf16.mxu0 %v5565_v2  ;;  %v5571_v54 = vpack.c.bf16 %v12549_v8, %v12548_v47  ;;  %v12552_v2 = vld [vmem:[#allocation84_spill] sm:$0xff]  ;;  %v5577_v8 = vpack.c.bf16 %v12559_v61, %v12558_v3  ;;  %v12561_v47 = vld [vmem:[#allocation97_spill] sm:$0xff] }
  0xec   :  { %v5955_v38 = vpack.c.bf16 %v12553_v17, %v12552_v2  ;;  %v12563_v17 = vld [vmem:[#allocation103_spill] sm:$0xff] }
  0xed   :  { %5948 = vmatpush1.bf16.msra.mxu1 %v5947_v46  ;;  %v12554_v46 = vld [vmem:[#allocation89_spill] sm:$0xff] }
  0xee   :  { %5950 = vmatprep.subr.bf16.mxu1 %v5949_v60  ;;  %5568 = vmatpush1.bf16.msra.mxu0 %v5567_v49  ;;  %v5957_v60 = vpack.c.bf16 %v12555_v42, %v12554_v46  ;;  %v12556_v49 = vld [vmem:[#allocation93_spill] sm:$0xff] }
  0xef   :  { %5570 = vmatprep.subr.bf16.mxu0 %v5569_v28  ;;  %v5575_v26 = vpack.c.bf16 %v12557_v11, %v12556_v49  ;;  %v12560_v28 = vld [vmem:[#allocation96_spill] sm:$0xff] }
  0xf0   :  { %v5959_v45 = vpack.c.bf16 %v12561_v47, %v12560_v28 }
  0xf1   :  { %5952 = vmatpush1.bf16.msra.mxu1 %v5951_v41  ;;  %v12562_v41 = vld [vmem:[#allocation101_spill] sm:$0xff] }
  0xf2   :  { %5954 = vmatprep.subr.bf16.mxu1 %v5953_v39  ;;  %5572 = vmatpush1.bf16.msra.mxu0 %v5571_v54  ;;  %v5961_v39 = vpack.c.bf16 %v12563_v17, %v12562_v41  ;;  %v12564_v54 = vpack.c.bf16 %v12426_v9, %v12425_v23 }
  0xf3   :  { %5574 = vmatprep.subr.bf16.mxu0 %v5573_v25  ;;  %v12565_v25 = vpack.c.bf16 %v12483_v36, %v12429_v18 }
  0xf5   :  { %5956 = vmatpush1.bf16.msra.mxu1 %v5955_v38  ;;  %v12566_v38 = vpack.c.bf16 %v12428_v30, %v12427_v5 }
  0xf6   :  { %5958 = vmatprep.subr.bf16.mxu1 %v5957_v60  ;;  %5576 = vmatpush1.bf16.msra.mxu0 %v5575_v26  ;;  %v12567_v26 = vpack.c.bf16 %v12485_v43, %v12484_v44  ;;  %v12570_v60 = vpack.c.bf16 %v12489_v37, %v12488_v58 }
  0xf7   :  { %5578 = vmatprep.subr.bf16.mxu0 %v5577_v8  ;;  %v12568_v8 = vpack.c.bf16 %v12487_v29, %v12486_v63 }
  0xf9   :  { %5960 = vmatpush1.bf16.msra.mxu1 %v5959_v45  ;;  %v12569_v45 = vpack.c.bf16 %v12491_v51, %v12490_v0 }
  0xfa   :  { %5962 = vmatprep.subr.bf16.mxu1 %v5961_v39  ;;  %5580 = vmatpush1.bf16.msra.mxu0 %v12564_v54  ;;  %v12571_v39 = vpack.c.bf16 %v12493_v19, %v12492_v34  ;;  %v12572_v54 = vpack.c.bf16 %v12495_v53, %v12494_v13 }
  0xfb   :  { %5582 = vmatprep.subr.bf16.mxu0 %v12565_v25  ;;  %v12573_v25 = vpack.c.bf16 %v12499_v62, %v12498_v27 }
  0xfd   :  { %5964 = vmatpush1.bf16.msra.mxu1 %v12566_v38  ;;  %v12574_v38 = vpack.c.bf16 %v12497_v56, %v12496_v4  ;;  %v12585_v4 = vld [vmem:[#allocation153_spill] sm:$0xff] }
  0xfe   :  { %5966 = vmatprep.subr.bf16.mxu1 %v12567_v26  ;;  %5584 = vmatpush1.bf16.msra.mxu0 %v12568_v8  ;;  %v12575_v26 = vpack.c.bf16 %v12501_v6, %v12500_v7  ;;  %v12576_v8 = vpack.c.bf16 %v12503_v52, %v12502_v55  ;;  %v12589_v52 = vld [vmem:[#allocation156_spill] sm:$0xff] }
  0xff   :  { %5586 = vmatprep.subr.bf16.mxu0 %v12569_v45  ;;  %v12577_v45 = vld [vmem:[#allocation147_spill] sm:$0xff] }
 0x101   :  { %5968 = vmatpush1.bf16.msra.mxu1 %v12570_v60  ;;  %v12578_v60 = vpack.c.bf16 %v12507_v33, %v12577_v45 }
 0x102   :  { %5970 = vmatprep.subr.bf16.mxu1 %v12571_v39  ;;  %5588 = vmatpush1.bf16.msra.mxu0 %v12572_v54  ;;  %v12579_v39 = vld [vmem:[#allocation145_spill] sm:$0xff]  ;;  %v12580_v54 = vld [vmem:[#allocation144_spill] sm:$0xff] }
 0x103   :  { %5590 = vmatprep.subr.bf16.mxu0 %v12573_v25  ;;  %v12581_v62 = vpack.c.bf16 %v12579_v39, %v12580_v54  ;;  %v12582_v25 = vld [vmem:[#allocation149_spill] sm:$0xff] }
 0x104   :  { %v12583_v56 = vpack.c.bf16 %v12510_v35, %v12582_v25 }
 0x105   :  { %5972 = vmatpush1.bf16.msra.mxu1 %v12574_v38  ;;  %v12584_v38 = vld [vmem:[#allocation154_spill] sm:$0xff] }
 0x106   :  { %5974 = vmatprep.subr.bf16.mxu1 %v12575_v26  ;;  %5592 = vmatpush1.bf16.msra.mxu0 %v12576_v8  ;;  %v12586_v6 = vpack.c.bf16 %v12584_v38, %v12585_v4  ;;  %v12587_v26 = vpack.c.bf16 %v12515_v50, %v12514_v59  ;;  %v12588_v8 = vld [vmem:[#allocation157_spill] sm:$0xff]  ;;  %v12707_v59 = vld [vmem:[#allocation28_spill] sm:$0xff] }
 0x107   :  { %5594 = vmatprep.subr.bf16.mxu0 %v12578_v60  ;;  %v12590_v33 = vpack.c.bf16 %v12588_v8, %v12589_v52  ;;  %v12591_v60 = vpack.c.bf16 %v12517_v16, %v12516_v48  ;;  %v12695_v48 = vld [vmem:[#allocation13_spill] sm:$0xff] }
 0x109   :  { %5976 = vmatpush1.bf16.msra.mxu1 %v12581_v62  ;;  %v12592_v62 = vpack.c.bf16 %v12466_v1, %v12518_v31  ;;  %v12601_v31 = vld [vmem:[#allocation180_spill] sm:$0xff] }
 0x10a   :  { %5978 = vmatprep.subr.bf16.mxu1 %v12583_v56  ;;  %5596 = vmatpush1.bf16.msra.mxu0 %v12586_v6  ;;  %v12593_v56 = vpack.c.bf16 %v12522_v10, %v12521_v12  ;;  %v12594_v6 = vpack.c.bf16 %v12520_v40, %v12519_v32  ;;  %v12691_v32 = vld [vmem:[#allocation192_spill] sm:$0xff] }
 0x10b   :  { %5598 = vmatprep.subr.bf16.mxu0 %v12587_v26  ;;  %v12595_v26 = vpack.c.bf16 %v12524_v22, %v12523_v24  ;;  %v12685_v24 = vld [vmem:[#allocation10_spill] sm:$0xff] }
 0x10d   :  { %5980 = vmatpush1.bf16.msra.mxu1 %v12590_v33  ;;  %v12596_v33 = vld [vmem:[#allocation177_spill] sm:$0xff] }
 0x10e   :  { %5982 = vmatprep.subr.bf16.mxu1 %v12591_v60  ;;  %5600 = vmatpush1.bf16.msra.mxu0 %v12592_v62  ;;  %v12597_v16 = vpack.c.bf16 %v12473_v15, %v12596_v33  ;;  %v12598_v60 = vld [vmem:[#allocation183_spill] sm:$0xff]  ;;  %v12600_v62 = vld [vmem:[#allocation181_spill] sm:$0xff]  ;;  %v12608_v15 = vld [vmem:[#allocation194_spill] sm:$0xff] }
 0x10f   :  { %5602 = vmatprep.subr.bf16.mxu0 %v12593_v56  ;;  %v12599_v1 = vpack.c.bf16 %v12476_v57, %v12598_v60  ;;  %v12602_v10 = vpack.c.bf16 %v12600_v62, %v12601_v31  ;;  %v12603_v56 = vld [vmem:[#allocation185_spill] sm:$0xff]  ;;  %v12611_v57 = vld [vmem:[#allocation198_spill] sm:$0xff]  ;;  %v12613_v60 = vld [vmem:[#allocation8_spill] sm:$0xff] }
 0x110   :  { %v12604_v12 = vpack.c.bf16 %v7829_v14, %v12603_v56  ;;  %v12615_v14 = vld [vmem:[#allocation197_spill] sm:$0xff] }
 0x111   :  { %5984 = vmatpush1.bf16.msra.mxu1 %v12594_v6  ;;  %v12605_v6 = vld [vmem:[#allocation190_spill] sm:$0xff]  ;;  %v12683_v31 = vld [vmem:[#allocation9_spill] sm:$0xff] }
 0x112   :  { %5986 = vmatprep.subr.bf16.mxu1 %v12595_v26  ;;  %5604 = vmatpush1.bf16.msra.mxu0 %v12597_v16  ;;  %v12606_v22 = vpack.c.bf16 %v12526_v20, %v12605_v6  ;;  %v12607_v26 = vld [vmem:[#allocation2_spill] sm:$0xff]  ;;  %v12609_v16 = vld [vmem:[#allocation193_spill] sm:$0xff]  ;;  %v12674_v20 = vld [vmem:[#allocation4_spill] sm:$0xff] }
 0x113   :  { %5606 = vmatprep.subr.bf16.mxu0 %v12599_v1  ;;  %v12610_v33 = vpack.c.bf16 %v12608_v15, %v12609_v16  ;;  %v12612_v1 = vld [vmem:[#allocation6_spill] sm:$0xff]  ;;  %v12620_v15 = vld [vmem:[#allocation24_spill] sm:$0xff]  ;;  %v12624_v16 = vld [vmem:[#allocation35_spill] sm:$0xff] }
 0x115   :  { %5988 = vmatpush1.bf16.msra.mxu1 %v12602_v10  ;;  %v12614_v10 = vld [vmem:[#allocation15_spill] sm:$0xff] }
 0x116   :  { %5990 = vmatprep.subr.bf16.mxu1 %v12604_v12  ;;  %5608 = vmatpush1.bf16.msra.mxu0 %v12606_v22  ;;  %v12616_v12 = vld [vmem:[#allocation11_spill] sm:$0xff]  ;;  %v12617_v22 = vld [vmem:[#allocation17_spill] sm:$0xff] }
 0x117   :  { %5610 = vmatprep.subr.bf16.mxu0 %v12607_v26  ;;  %v12618_v26 = vld [vmem:[#allocation21_spill] sm:$0xff] }
 0x119   :  { %5992 = vmatpush1.bf16.msra.mxu1 %v12610_v33  ;;  %1004 = vmatmul.mubr.f32.vlgmr.msra.gmra.mrb[0].mxu0 %v12611_v57  ;;  %v12619_v33 = vld [vmem:[#allocation26_spill] sm:$0xff] }
 0x11a   :  { %5994 = vmatprep.subr.bf16.mxu1 %v12612_v1  ;;  %5612 = vmatpush1.bf16.msra.mxu0 %v12613_v60  ;;  %v12621_v1 = vld [vmem:[#allocation29_spill] sm:$0xff]  ;;  %v12622_v60 = vld [vmem:[#allocation32_spill] sm:$0xff] }
 0x11b   :  { %5614 = vmatprep.subr.bf16.mxu0 %v12614_v10  ;;  %1141 = vmatprep.mubr.f32.mxu0 %v12615_v14  ;;  %v12623_v10 = vld [vmem:[#allocation38_spill] sm:$0xff] }
 0x11c   :  { %2288 = vmatmul.mubr.f32.vlgmr.msra.gmra.mrb[0].mxu1 %v12611_v57  ;;  %v12625_v57 = vld [vmem:[#allocation41_spill] sm:$0xff] }
 0x11d   :  { %5996 = vmatpush1.bf16.msra.mxu1 %v12616_v12  ;;  %2425 = vmatprep.mubr.f32.mxu1 %v12615_v14  ;;  %v12626_v12 = vld [vmem:[#allocation45_spill] sm:$0xff]  ;;  %v12627_v14 = vld [vmem:[#allocation50_spill] sm:$0xff] }
 0x11e   :  { %5998 = vmatprep.subr.bf16.mxu1 %v12617_v22  ;;  %5616 = vmatpush1.bf16.msra.mxu0 %v12618_v26  ;;  %v12628_v22 = vld [vmem:[#allocation47_spill] sm:$0xff]  ;;  %v12629_v26 = vld [vmem:[#allocation54_spill] sm:$0xff] }
 0x11f   :  { %5618 = vmatprep.subr.bf16.mxu0 %v12619_v33  ;;  %v12630_v33 = vld [vmem:[#allocation56_spill] sm:$0xff] }
 0x121   :  { %6000 = vmatpush1.bf16.msra.mxu1 %v12620_v15  ;;  %v12631_v15 = vld [vmem:[#allocation62_spill] sm:$0xff] }
 0x122   :  { %6002 = vmatprep.subr.bf16.mxu1 %v12621_v1  ;;  %5620 = vmatpush1.bf16.msra.mxu0 %v12622_v60  ;;  %v12632_v1 = vld [vmem:[#allocation59_spill] sm:$0xff]  ;;  %v12633_v60 = vld [vmem:[#allocation66_spill] sm:$0xff] }
 0x123   :  { %5622 = vmatprep.subr.bf16.mxu0 %v12623_v10  ;;  %v12634_v10 = vld [vmem:[#allocation68_spill] sm:$0xff] }
 0x125   :  { %6004 = vmatpush1.bf16.msra.mxu1 %v12624_v16  ;;  %v12635_v16 = vld [vmem:[#allocation74_spill] sm:$0xff] }
 0x126   :  { %6006 = vmatprep.subr.bf16.mxu1 %v12625_v57  ;;  %5624 = vmatpush1.bf16.msra.mxu0 %v12626_v12  ;;  %v12636_v57 = vld [vmem:[#allocation71_spill] sm:$0xff]  ;;  %v12637_v12 = vld [vmem:[#allocation78_spill] sm:$0xff] }
 0x127   :  { %5626 = vmatprep.subr.bf16.mxu0 %v12627_v14  ;;  %v12638_v14 = vld [vmem:[#allocation80_spill] sm:$0xff] }
 0x129   :  { %6008 = vmatpush1.bf16.msra.mxu1 %v12628_v22  ;;  %v12639_v22 = vld [vmem:[#allocation86_spill] sm:$0xff] }
 0x12a   :  { %6010 = vmatprep.subr.bf16.mxu1 %v12629_v26  ;;  %5628 = vmatpush1.bf16.msra.mxu0 %v12630_v33  ;;  %v12640_v26 = vld [vmem:[#allocation83_spill] sm:$0xff]  ;;  %v12641_v33 = vld [vmem:[#allocation90_spill] sm:$0xff] }
 0x12b   :  { %5630 = vmatprep.subr.bf16.mxu0 %v12631_v15  ;;  %v12642_v15 = vld [vmem:[#allocation92_spill] sm:$0xff] }
 0x12d   :  { %6012 = vmatpush1.bf16.msra.mxu1 %v12632_v1  ;;  %v12643_v1 = vld [vmem:[#allocation98_spill] sm:$0xff] }
 0x12e   :  { %6014 = vmatprep.subr.bf16.mxu1 %v12633_v60  ;;  %5632 = vmatpush1.bf16.msra.mxu0 %v12634_v10  ;;  %v12644_v60 = vld [vmem:[#allocation95_spill] sm:$0xff]  ;;  %v12645_v10 = vld [vmem:[#allocation102_spill] sm:$0xff] }
 0x12f   :  { %5634 = vmatprep.subr.bf16.mxu0 %v12635_v16  ;;  %v12646_v16 = vld [vmem:[#allocation104_spill] sm:$0xff] }
 0x131   :  { %6016 = vmatpush1.bf16.msra.mxu1 %v12636_v57  ;;  %v12647_v57 = vld [vmem:[#allocation110_spill] sm:$0xff] }
 0x132   :  { %6018 = vmatprep.subr.bf16.mxu1 %v12637_v12  ;;  %5636 = vmatpush1.bf16.msra.mxu0 %v12638_v14  ;;  %v12648_v12 = vld [vmem:[#allocation107_spill] sm:$0xff]  ;;  %v12649_v14 = vld [vmem:[#allocation114_spill] sm:$0xff] }
 0x133   :  { %5638 = vmatprep.subr.bf16.mxu0 %v12639_v22  ;;  %v12650_v22 = vld [vmem:[#allocation116_spill] sm:$0xff] }
 0x135   :  { %6020 = vmatpush1.bf16.msra.mxu1 %v12640_v26  ;;  %v12651_v26 = vld [vmem:[#allocation122_spill] sm:$0xff] }
 0x136   :  { %6022 = vmatprep.subr.bf16.mxu1 %v12641_v33  ;;  %5640 = vmatpush1.bf16.msra.mxu0 %v12642_v15  ;;  %v12652_v33 = vld [vmem:[#allocation119_spill] sm:$0xff]  ;;  %v12653_v15 = vld [vmem:[#allocation126_spill] sm:$0xff] }
 0x137   :  { %5642 = vmatprep.subr.bf16.mxu0 %v12643_v1  ;;  %v12654_v1 = vld [vmem:[#allocation128_spill] sm:$0xff] }
 0x139   :  { %6024 = vmatpush1.bf16.msra.mxu1 %v12644_v60  ;;  %v12655_v60 = vld [vmem:[#allocation134_spill] sm:$0xff] }
 0x13a   :  { %6026 = vmatprep.subr.bf16.mxu1 %v12645_v10  ;;  %5644 = vmatpush1.bf16.msra.mxu0 %v12646_v16  ;;  %v12656_v10 = vld [vmem:[#allocation131_spill] sm:$0xff]  ;;  %v12657_v16 = vld [vmem:[#allocation138_spill] sm:$0xff] }
 0x13b   :  { %5646 = vmatprep.subr.bf16.mxu0 %v12647_v57  ;;  %v12658_v57 = vld [vmem:[#allocation140_spill] sm:$0xff] }
 0x13d   :  { %6028 = vmatpush1.bf16.msra.mxu1 %v12648_v12  ;;  %v12659_v12 = vld [vmem:[#allocation146_spill] sm:$0xff] }
 0x13e   :  { %6030 = vmatprep.subr.bf16.mxu1 %v12649_v14  ;;  %5648 = vmatpush1.bf16.msra.mxu0 %v12650_v22  ;;  %v12660_v14 = vld [vmem:[#allocation143_spill] sm:$0xff]  ;;  %v12661_v22 = vld [vmem:[#allocation150_spill] sm:$0xff] }
 0x13f   :  { %5650 = vmatprep.subr.bf16.mxu0 %v12651_v26  ;;  %v12662_v26 = vld [vmem:[#allocation152_spill] sm:$0xff] }
 0x141   :  { %6032 = vmatpush1.bf16.msra.mxu1 %v12652_v33  ;;  %v12663_v33 = vld [vmem:[#allocation158_spill] sm:$0xff] }
 0x142   :  { %6034 = vmatprep.subr.bf16.mxu1 %v12653_v15  ;;  %5652 = vmatpush1.bf16.msra.mxu0 %v12654_v1  ;;  %v12664_v15 = vld [vmem:[#allocation155_spill] sm:$0xff]  ;;  %v12665_v1 = vld [vmem:[#allocation162_spill] sm:$0xff] }
 0x143   :  { %5654 = vmatprep.subr.bf16.mxu0 %v12655_v60  ;;  %v12666_v60 = vld [vmem:[#allocation164_spill] sm:$0xff] }
 0x145   :  { %6036 = vmatpush1.bf16.msra.mxu1 %v12656_v10  ;;  %v12667_v10 = vld [vmem:[#allocation170_spill] sm:$0xff] }
 0x146   :  { %6038 = vmatprep.subr.bf16.mxu1 %v12657_v16  ;;  %5656 = vmatpush1.bf16.msra.mxu0 %v12658_v57  ;;  %v12668_v16 = vld [vmem:[#allocation167_spill] sm:$0xff]  ;;  %v12669_v57 = vld [vmem:[#allocation174_spill] sm:$0xff] }
 0x147   :  { %5658 = vmatprep.subr.bf16.mxu0 %v12659_v12  ;;  %v12670_v12 = vld [vmem:[#allocation176_spill] sm:$0xff] }
 0x149   :  { %6040 = vmatpush1.bf16.msra.mxu1 %v12660_v14  ;;  %v12671_v14 = vld [vmem:[#allocation182_spill] sm:$0xff] }
 0x14a   :  { %6042 = vmatprep.subr.bf16.mxu1 %v12661_v22  ;;  %5660 = vmatpush1.bf16.msra.mxu0 %v12662_v26  ;;  %v12672_v22 = vld [vmem:[#allocation3_spill] sm:$0xff] }
 0x14b   :  { %5662 = vmatprep.subr.bf16.mxu0 %v12663_v33  ;;  %v12673_v26 = vand.u32 4294901760, %v12672_v22  ;;  %v12675_v33 = vand.u32 4294901760, %v12674_v20  ;;  %v12687_v22 = vld [vmem:[#allocation14_spill] sm:$0xff] }
 0x14c   :  { %v12688_v20 = vand.u32 4294901760, %v12687_v22 }
 0x14d   :  { %6044 = vmatpush1.bf16.msra.mxu1 %v12664_v15  ;;  %v5673_v6 = vpack.c.bf16 %v12675_v33, %v12673_v26  ;;  %v12676_v15 = vld [vmem:[#allocation179_spill] sm:$0xff]  ;;  %v12689_v26 = vld [vmem:[#allocation16_spill] sm:$0xff] }
 0x14e   :  { %6046 = vmatprep.subr.bf16.mxu1 %v12665_v1  ;;  %5664 = vmatpush1.bf16.msra.mxu0 %v12666_v60  ;;  %v12677_v1 = vld [vmem:[#allocation187_spill] sm:$0xff]  ;;  %v12678_v60 = vld [vmem:[#allocation189_spill] sm:$0xff]  ;;  %v12690_v33 = vand.u32 4294901760, %v12689_v26  ;;  %v12703_v26 = vld [vmem:[#allocation22_spill] sm:$0xff] }
 0x14f   :  { %5666 = vmatprep.subr.bf16.mxu0 %v12667_v10  ;;  %v12679_v10 = vld [vmem:[#allocation5_spill] sm:$0xff] }
 0x150   :  { %v12680_v56 = vand.u32 4294901760, %v12679_v10 }
 0x151   :  { %6048 = vmatpush1.bf16.msra.mxu1 %v12668_v16  ;;  %v12681_v16 = vld [vmem:[#allocation7_spill] sm:$0xff] }
 0x152   :  { %6050 = vmatprep.subr.bf16.mxu1 %v12669_v57  ;;  %5668 = vmatpush1.bf16.msra.mxu0 %v12670_v12  ;;  %v12682_v62 = vand.u32 4294901760, %v12681_v16  ;;  %v12684_v12 = vand.u32 4294901760, %v12683_v31  ;;  %v12696_v16 = vand.u32 4294901760, %v12695_v48  ;;  %v12697_v31 = vld [vmem:[#allocation18_spill] sm:$0xff] }
 0x153   :  { %5670 = vmatprep.subr.bf16.mxu0 %v12671_v14  ;;  %v12686_v14 = vand.u32 4294901760, %v12685_v24  ;;  %v12698_v24 = vand.u32 4294901760, %v12697_v31  ;;  %v12709_v48 = vld [vmem:[#allocation186_spill] sm:$0xff] }
 0x154   :  { %v6057_v57 = vpack.c.bf16 %v12682_v62, %v12680_v56 }
 0x155   :  { %6052 = vmatpush1.bf16.msra.mxu1 %v12676_v15  ;;  %v5675_v40 = vpack.c.bf16 %v12686_v14, %v12684_v12  ;;  %v5677_v15 = vpack.c.bf16 %v12690_v33, %v12688_v20  ;;  %v12699_v14 = vld [vmem:[#allocation19_spill] sm:$0xff]  ;;  %v12701_v12 = vld [vmem:[#allocation20_spill] sm:$0xff]  ;;  %v12704_v20 = vand.u32 4294901760, %v12703_v26 }
 0x156   :  { %6054 = vmatprep.subr.bf16.mxu1 %v12677_v1  ;;  %5672 = vmatpush1.bf16.msra.mxu0 %v12678_v60  ;;  %v12692_v1 = vld [vmem:[#allocation199_spill] sm:$0xff]  ;;  %v12693_v60 = vld [vmem:[#allocation12_spill] sm:$0xff]  ;;  %v12700_v56 = vand.u32 4294901760, %v12699_v14  ;;  %v12702_v22 = vand.u32 4294901760, %v12701_v12  ;;  %v12720_v12 = vld [vmem:[#allocation34_spill] sm:$0xff] }
 0x157   :  { %5674 = vmatprep.subr.bf16.mxu0 %v5673_v6  ;;  %v12694_v10 = vand.u32 4294901760, %v12693_v60  ;;  %v12708_v60 = vand.u32 4294901760, %v12707_v59 }
 0x158   :  { %v6061_v6 = vpack.c.bf16 %v12700_v56, %v12698_v24  ;;  %v5679_v33 = vpack.c.bf16 %v12704_v20, %v12702_v22  ;;  %v12721_v22 = vand.u32 4294901760, %v12720_v12 }
 0x159   :  { %6056 = vmatpush1.bf16.msra.mxu1 %v12691_v32  ;;  %1145 = vmatmul.mubr.f32.vlgmr.msra.gmra.mrb[0].mxu0 %v12692_v1  ;;  %v6059_v62 = vpack.c.bf16 %v12696_v16, %v12694_v10  ;;  %v12705_v32 = vld [vmem:[#allocation27_spill] sm:$0xff]  ;;  %v12712_v10 = vld [vmem:[#allocation25_spill] sm:$0xff] }
 0x15a   :  { %6058 = vmatprep.subr.bf16.mxu1 %v6057_v57  ;;  %5676 = vmatpush1.bf16.msra.mxu0 %v5675_v40  ;;  %v12706_v50 = vand.u32 4294901760, %v12705_v32  ;;  %v12710_v40 = vld [vmem:[#allocation23_spill] sm:$0xff]  ;;  %v12713_v16 = vand.u32 4294901760, %v12712_v10  ;;  %v12726_v10 = vld [vmem:[#allocation36_spill] sm:$0xff] }
 0x15b   :  { %5678 = vmatprep.subr.bf16.mxu0 %v5677_v15  ;;  %1408 = vmatprep.mubr.f32.mxu0 %v12709_v48  ;;  %v12711_v57 = vand.u32 4294901760, %v12710_v40  ;;  %v12714_v15 = vld [vmem:[#allocation30_spill] sm:$0xff]  ;;  %v12716_v32 = vld [vmem:[#allocation31_spill] sm:$0xff] }
 0x15c   :  { %v5681_v8 = vpack.c.bf16 %v12708_v60, %v12706_v50  ;;  %2429 = vmatmul.mubr.f32.vlgmr.msra.gmra.mrb[0].mxu1 %v12692_v1  ;;  %v12715_v24 = vand.u32 4294901760, %v12714_v15  ;;  %v12717_v14 = vand.u32 4294901760, %v12716_v32  ;;  %v12718_v50 = vld [vmem:[#allocation33_spill] sm:$0xff]  ;;  %v12724_v60 = vld [vmem:[#allocation40_spill] sm:$0xff] }
 0x15d   :  { %6060 = vmatpush1.bf16.msra.mxu1 %v6059_v62  ;;  %v6063_v31 = vpack.c.bf16 %v12713_v16, %v12711_v57  ;;  %2692 = vmatprep.mubr.f32.mxu1 %v12709_v48  ;;  %v12719_v56 = vand.u32 4294901760, %v12718_v50  ;;  %v12722_v62 = vld [vmem:[#allocation39_spill] sm:$0xff]  ;;  %v12725_v40 = vand.u32 4294901760, %v12724_v60  ;;  %v12740_v60 = vld [vmem:[#allocation52_spill] sm:$0xff] }
 0x15e   :  { %6062 = vmatprep.subr.bf16.mxu1 %v6061_v6  ;;  %5680 = vmatpush1.bf16.msra.mxu0 %v5679_v33  ;;  %v6065_v59 = vpack.c.bf16 %v12717_v14, %v12715_v24  ;;  %v12723_v20 = vand.u32 4294901760, %v12722_v62  ;;  %v12727_v6 = vand.u32 4294901760, %v12726_v10  ;;  %v12728_v33 = vld [vmem:[#allocation37_spill] sm:$0xff]  ;;  %v12730_v24 = vld [vmem:[#allocation42_spill] sm:$0xff]  ;;  %v12732_v14 = vld [vmem:[#allocation43_spill] sm:$0xff] }
 0x15f   :  { %v5683_v26 = vpack.c.bf16 %v12721_v22, %v12719_v56  ;;  %5682 = vmatprep.subr.bf16.mxu0 %v5681_v8  ;;  %v12729_v16 = vand.u32 4294901760, %v12728_v33  ;;  %v12731_v32 = vand.u32 4294901760, %v12730_v24  ;;  %v12733_v50 = vand.u32 4294901760, %v12732_v14  ;;  %v12734_v56 = vld [vmem:[#allocation44_spill] sm:$0xff]  ;;  %v12736_v22 = vld [vmem:[#allocation46_spill] sm:$0xff]  ;;  %v12746_v24 = vld [vmem:[#allocation53_spill] sm:$0xff] }
 0x160   :  { %v5685_v57 = vpack.c.bf16 %v12725_v40, %v12723_v20  ;;  %v12735_v8 = vand.u32 4294901760, %v12734_v56  ;;  %v12737_v62 = vand.u32 4294901760, %v12736_v22  ;;  %v12738_v20 = vld [vmem:[#allocation51_spill] sm:$0xff]  ;;  %v12741_v40 = vand.u32 4294901760, %v12740_v60  ;;  %v12752_v22 = vld [vmem:[#allocation58_spill] sm:$0xff]  ;;  %v12756_v60 = vld [vmem:[#allocation64_spill] sm:$0xff] }
 0x161   :  { %6064 = vmatpush1.bf16.msra.mxu1 %v6063_v31  ;;  %v6067_v15 = vpack.c.bf16 %v12729_v16, %v12727_v6  ;;  %v6069_v12 = vpack.c.bf16 %v12733_v50, %v12731_v32  ;;  %v12739_v31 = vand.u32 4294901760, %v12738_v20  ;;  %v12742_v6 = vld [vmem:[#allocation48_spill] sm:$0xff]  ;;  %v12747_v32 = vand.u32 4294901760, %v12746_v24  ;;  %v12748_v14 = vld [vmem:[#allocation55_spill] sm:$0xff]  ;;  %v12762_v24 = vld [vmem:[#allocation65_spill] sm:$0xff] }
 0x162   :  { %6066 = vmatprep.subr.bf16.mxu1 %v6065_v59  ;;  %5684 = vmatpush1.bf16.msra.mxu0 %v5683_v26  ;;  %v5687_v1 = vpack.c.bf16 %v12737_v62, %v12735_v8  ;;  %v12743_v59 = vand.u32 4294901760, %v12742_v6  ;;  %v12744_v26 = vld [vmem:[#allocation49_spill] sm:$0xff]  ;;  %v12749_v50 = vand.u32 4294901760, %v12748_v14  ;;  %v12753_v62 = vand.u32 4294901760, %v12752_v22  ;;  %v12764_v14 = vld [vmem:[#allocation67_spill] sm:$0xff]  ;;  %v12768_v22 = vld [vmem:[#allocation70_spill] sm:$0xff] }
 0x163   :  { %5686 = vmatprep.subr.bf16.mxu0 %v5685_v57  ;;  %v5689_v10 = vpack.c.bf16 %v12741_v40, %v12739_v31  ;;  %v12745_v33 = vand.u32 4294901760, %v12744_v26  ;;  %v12750_v8 = vld [vmem:[#allocation57_spill] sm:$0xff]  ;;  %v12754_v31 = vld [vmem:[#allocation63_spill] sm:$0xff]  ;;  %v12757_v40 = vand.u32 4294901760, %v12756_v60  ;;  %v12772_v60 = vld [vmem:[#allocation76_spill] sm:$0xff] }
 0x164   :  { %v6073_v56 = vpack.c.bf16 %v12749_v50, %v12747_v32  ;;  %v12751_v57 = vand.u32 4294901760, %v12750_v8  ;;  %v12763_v32 = vand.u32 4294901760, %v12762_v24  ;;  %v12765_v50 = vand.u32 4294901760, %v12764_v14  ;;  %v12778_v24 = vld [vmem:[#allocation77_spill] sm:$0xff]  ;;  %v12780_v14 = vld [vmem:[#allocation79_spill] sm:$0xff] }
 0x165   :  { %6068 = vmatpush1.bf16.msra.mxu1 %v6067_v15  ;;  %v6071_v16 = vpack.c.bf16 %v12745_v33, %v12743_v59  ;;  %v12755_v15 = vand.u32 4294901760, %v12754_v31  ;;  %v12758_v59 = vld [vmem:[#allocation60_spill] sm:$0xff] }
 0x166   :  { %6070 = vmatprep.subr.bf16.mxu1 %v6069_v12  ;;  %5688 = vmatpush1.bf16.msra.mxu0 %v5687_v1  ;;  %v5691_v20 = vpack.c.bf16 %v12753_v62, %v12751_v57  ;;  %v12759_v12 = vand.u32 4294901760, %v12758_v59  ;;  %v12760_v1 = vld [vmem:[#allocation61_spill] sm:$0xff]  ;;  %v6077_v8 = vpack.c.bf16 %v12765_v50, %v12763_v32  ;;  %v12769_v62 = vand.u32 4294901760, %v12768_v22  ;;  %v12784_v22 = vld [vmem:[#allocation82_spill] sm:$0xff] }
 0x167   :  { %5690 = vmatprep.subr.bf16.mxu0 %v5689_v10  ;;  %v5693_v6 = vpack.c.bf16 %v12757_v40, %v12755_v15  ;;  %v12761_v26 = vand.u32 4294901760, %v12760_v1  ;;  %v12766_v57 = vld [vmem:[#allocation69_spill] sm:$0xff]  ;;  %v12770_v15 = vld [vmem:[#allocation75_spill] sm:$0xff]  ;;  %v12773_v40 = vand.u32 4294901760, %v12772_v60  ;;  %v12779_v32 = vand.u32 4294901760, %v12778_v24 }
 0x168   :  { %v12767_v10 = vand.u32 4294901760, %v12766_v57  ;;  %v12781_v50 = vand.u32 4294901760, %v12780_v14 }
 0x169   :  { %6072 = vmatpush1.bf16.msra.mxu1 %v6071_v16  ;;  %v6075_v33 = vpack.c.bf16 %v12761_v26, %v12759_v12  ;;  %v12771_v16 = vand.u32 4294901760, %v12770_v15  ;;  %v12774_v12 = vld [vmem:[#allocation72_spill] sm:$0xff] }
 0x16a   :  { %6074 = vmatprep.subr.bf16.mxu1 %v6073_v56  ;;  %5692 = vmatpush1.bf16.msra.mxu0 %v5691_v20  ;;  %v5695_v31 = vpack.c.bf16 %v12769_v62, %v12767_v10  ;;  %v12775_v56 = vand.u32 4294901760, %v12774_v12  ;;  %v12776_v20 = vld [vmem:[#allocation73_spill] sm:$0xff]  ;;  %v6081_v57 = vpack.c.bf16 %v12781_v50, %v12779_v32  ;;  %v12785_v62 = vand.u32 4294901760, %v12784_v22 }
 0x16b   :  { %5694 = vmatprep.subr.bf16.mxu0 %v5693_v6  ;;  %v5697_v59 = vpack.c.bf16 %v12773_v40, %v12771_v16  ;;  %v12777_v1 = vand.u32 4294901760, %v12776_v20  ;;  %v12782_v10 = vld [vmem:[#allocation81_spill] sm:$0xff]  ;;  %v12787_v16 = vld [vmem:[#allocation88_spill] sm:$0xff]  ;;  %v12792_v20 = vand.u32 4294901760, %v12554_v46  ;;  %v12798_v50 = vand.u32 4294901760, %v12560_v28 }
 0x16c   :  { %v12783_v6 = vand.u32 4294901760, %v12782_v10  ;;  %v12788_v60 = vand.u32 4294901760, %v12787_v16  ;;  %v12802_v10 = vand.u32 4294901760, %v12425_v23  ;;  %v12805_v28 = vand.u32 4294901760, %v12483_v36 }
 0x16d   :  { %6076 = vmatpush1.bf16.msra.mxu1 %v6075_v33  ;;  %v6079_v26 = vpack.c.bf16 %v12777_v1, %v12775_v56  ;;  %v12786_v33 = vand.u32 4294901760, %v12550_v21  ;;  %v12793_v1 = vand.u32 4294901760, %v12555_v42  ;;  %v12795_v21 = vand.u32 4294901760, %v12557_v11 }
 0x16e   :  { %6078 = vmatprep.subr.bf16.mxu1 %v6077_v8  ;;  %5696 = vmatpush1.bf16.msra.mxu0 %v5695_v31  ;;  %v5699_v15 = vpack.c.bf16 %v12785_v62, %v12783_v6  ;;  %v12789_v8 = vand.u32 4294901760, %v12552_v2  ;;  %v12790_v31 = vld [vmem:[#allocation85_spill] sm:$0xff]  ;;  %v12797_v2 = vand.u32 4294901760, %v12559_v61  ;;  %v12800_v42 = vand.u32 4294901760, %v12562_v41 }
 0x16f   :  { %5698 = vmatprep.subr.bf16.mxu0 %v5697_v59  ;;  %v5701_v40 = vpack.c.bf16 %v12788_v60, %v12786_v33  ;;  %v12791_v12 = vand.u32 4294901760, %v12790_v31  ;;  %v6085_v24 = vpack.c.bf16 %v12793_v1, %v12792_v20  ;;  %v12794_v59 = vand.u32 4294901760, %v12556_v49  ;;  %v12821_v31 = vld [vmem:[#allocation136_spill] sm:$0xff]  ;;  %v12825_v20 = vld [vmem:[#allocation133_spill] sm:$0xff] }
 0x170   :  { %v12801_v49 = vand.u32 4294901760, %v12563_v17  ;;  %v12804_v61 = vand.u32 4294901760, %v12429_v18  ;;  %v12807_v62 = vand.u32 4294901760, %v12428_v30  ;;  %v12808_v17 = vand.u32 4294901760, %v12484_v44 }
 0x171   :  { %6080 = vmatpush1.bf16.msra.mxu1 %v6079_v26  ;;  %v6083_v56 = vpack.c.bf16 %v12791_v12, %v12789_v8  ;;  %v5703_v32 = vpack.c.bf16 %v12795_v21, %v12794_v59  ;;  %v12796_v26 = vand.u32 4294901760, %v12558_v3  ;;  %v12803_v3 = vand.u32 4294901760, %v12426_v9  ;;  %v12831_v21 = vld [vmem:[#allocation142_spill] sm:$0xff] }
 0x172   :  { %6082 = vmatprep.subr.bf16.mxu1 %v6081_v57  ;;  %5700 = vmatpush1.bf16.msra.mxu0 %v5699_v15  ;;  %v12799_v57 = vand.u32 4294901760, %v12561_v47  ;;  %v6089_v11 = vpack.c.bf16 %v12801_v49, %v12800_v42  ;;  %v5709_v22 = vpack.c.bf16 %v12805_v28, %v12804_v61  ;;  %v12806_v47 = vand.u32 4294901760, %v12427_v5  ;;  %v12843_v28 = vld [vmem:[#allocation157_spill] sm:$0xff] }
 0x173   :  { %5702 = vmatprep.subr.bf16.mxu0 %v5701_v40  ;;  %v5705_v14 = vpack.c.bf16 %v12797_v2, %v12796_v26  ;;  %v5707_v6 = vpack.c.bf16 %v12803_v3, %v12802_v10  ;;  %v12809_v23 = vand.u32 4294901760, %v12485_v43  ;;  %v12810_v15 = vand.u32 4294901760, %v12486_v63  ;;  %v26_v2 = vld [vmem:[%s11313_s1 + $0x68] sm:$0xff] }
 0x174   :  { %v6087_v46 = vpack.c.bf16 %v12799_v57, %v12798_v50  ;;  %v6091_v41 = vpack.c.bf16 %v12807_v62, %v12806_v47  ;;  %v12811_v18 = vand.u32 4294901760, %v12487_v29  ;;  %v12812_v36 = vand.u32 4294901760, %v12490_v0  ;;  %v12845_v62 = vld [vmem:[#allocation159_spill] sm:$0xff] }
 0x175   :  { %6084 = vmatpush1.bf16.msra.mxu1 %v6083_v56  ;;  %v6093_v9 = vpack.c.bf16 %v12809_v23, %v12808_v17  ;;  %v12813_v5 = vand.u32 4294901760, %v12491_v51  ;;  %v12814_v30 = vand.u32 4294901760, %v12488_v58  ;;  %v12815_v60 = vand.u32 4294901760, %v12489_v37  ;;  %v12823_v37 = vld [vmem:[#allocation132_spill] sm:$0xff] }
 0x176   :  { %6086 = vmatprep.subr.bf16.mxu1 %v6085_v24  ;;  %5704 = vmatpush1.bf16.msra.mxu0 %v5703_v32  ;;  %v5711_v33 = vpack.c.bf16 %v12811_v18, %v12810_v15  ;;  %v12816_v43 = vand.u32 4294901760, %v12492_v34  ;;  %v12817_v63 = vand.u32 4294901760, %v12493_v19  ;;  %v12818_v40 = vand.u32 4294901760, %v12494_v13  ;;  %v12828_v24 = vld [vmem:[#allocation139_spill] sm:$0xff]  ;;  %v12847_v17 = vld [vmem:[#allocation160_spill] sm:$0xff]  ;;  %v12849_v15 = vld [vmem:[#allocation161_spill] sm:$0xff] }
 0x177   :  { %5706 = vmatprep.subr.bf16.mxu0 %v5705_v14  ;;  %v5713_v16 = vpack.c.bf16 %v12813_v5, %v12812_v36  ;;  %v6095_v44 = vpack.c.bf16 %v12815_v60, %v12814_v30  ;;  %v12819_v0 = vand.u32 4294901760, %v12495_v53  ;;  %v12820_v51 = vand.u32 4294901760, %v12498_v27  ;;  %v18_v27 = vld [vmem:[%s11313_s1 + $0x28] sm:$0xff]  ;;  %v12855_v30 = vld [vmem:[#allocation166_spill] sm:$0xff] }
 0x178   :  { %v6097_v29 = vpack.c.bf16 %v12817_v63, %v12816_v43  ;;  %v12822_v58 = vand.u32 4294901760, %v12821_v31  ;;  %v12824_v56 = vand.u32 4294901760, %v12823_v37  ;;  %v12826_v1 = vand.u32 4294901760, %v12825_v20  ;;  %v12859_v43 = vld [vmem:[#allocation169_spill] sm:$0xff]  ;;  %v27_v37 = vld [vmem:[%s11313_s1 + $0x70] sm:$0xff] }
 0x179   :  { %6088 = vmatpush1.bf16.msra.mxu1 %v6087_v46  ;;  %v5715_v8 = vpack.c.bf16 %v12819_v0, %v12818_v40  ;;  %v12827_v19 = vand.u32 4294901760, %v12500_v7  ;;  %v12829_v59 = vand.u32 4294901760, %v12828_v24  ;;  %v12830_v53 = vand.u32 4294901760, %v12502_v55  ;;  %v20_v7 = vld [vmem:[%s11313_s1 + $0x38] sm:$0xff]  ;;  %v12836_v46 = vld [vmem:[#allocation148_spill] sm:$0xff] }
 0x17a   :  { %6090 = vmatprep.subr.bf16.mxu1 %v6089_v11  ;;  %5708 = vmatpush1.bf16.msra.mxu0 %v5707_v6  ;;  %v5717_v12 = vpack.c.bf16 %v12822_v58, %v12820_v51  ;;  %v6099_v34 = vpack.c.bf16 %v12826_v1, %v12824_v56  ;;  %v12832_v32 = vand.u32 4294901760, %v12831_v21  ;;  %v12833_v14 = vand.u32 4294901760, %v12580_v54  ;;  %v28_v6 = vld [vmem:[%s11313_s1 + $0x78] sm:$0xff]  ;;  %v17_v54 = vld [vmem:[%s11313_s1 + $0x20] sm:$0xff]  ;;  %v12861_v56 = vld [vmem:[#allocation171_spill] sm:$0xff] }
 0x17b   :  { %5710 = vmatprep.subr.bf16.mxu0 %v5709_v22  ;;  %v6101_v13 = vpack.c.bf16 %v12829_v59, %v12827_v19  ;;  %v12834_v55 = vand.u32 4294901760, %v12579_v39  ;;  %v12835_v57 = vand.u32 4294901760, %v12577_v45  ;;  %v12837_v42 = vand.u32 4294901760, %v12836_v46  ;;  %v25_v45 = vld [vmem:[%s11313_s1 + $0x60] sm:$0xff]  ;;  %v12863_v1 = vld [vmem:[#allocation172_spill] sm:$0xff] }
 0x17c   :  { %v5719_v26 = vpack.c.bf16 %v12832_v32, %v12830_v53  ;;  %v12838_v11 = vand.u32 4294901760, %v12582_v25  ;;  %v12839_v10 = vand.u32 4294901760, %v12510_v35  ;;  %v12840_v39 = vand.u32 4294901760, %v12585_v4  ;;  %v12867_v53 = vld [vmem:[#allocation175_spill] sm:$0xff] }
 0x17d   :  { %6092 = vmatpush1.bf16.msra.mxu1 %v6091_v41  ;;  %v6103_v50 = vpack.c.bf16 %v12834_v55, %v12833_v14  ;;  %v5721_v49 = vpack.c.bf16 %v12837_v42, %v12835_v57  ;;  %v12841_v25 = vand.u32 4294901760, %v12584_v38  ;;  %v12842_v35 = vand.u32 4294901760, %v12589_v52  ;;  %v12869_v14 = vld [vmem:[#allocation177_spill] sm:$0xff]  ;;  %v12871_v57 = vld [vmem:[#allocation178_spill] sm:$0xff] }
 0x17e   :  { %6094 = vmatprep.subr.bf16.mxu1 %v6093_v9  ;;  %5712 = vmatpush1.bf16.msra.mxu0 %v5711_v33  ;;  %v6105_v3 = vpack.c.bf16 %v12839_v10, %v12838_v11  ;;  %v12844_v22 = vand.u32 4294901760, %v12843_v28  ;;  %v12846_v41 = vand.u32 4294901760, %v12845_v62  ;;  %v12848_v23 = vand.u32 4294901760, %v12847_v17  ;;  %v12851_v33 = vld [vmem:[#allocation163_spill] sm:$0xff]  ;;  %v12875_v11 = vld [vmem:[#allocation181_spill] sm:$0xff]  ;;  %v12879_v28 = vld [vmem:[#allocation184_spill] sm:$0xff] }
 0x17f   :  { %5714 = vmatprep.subr.bf16.mxu0 %v5713_v16  ;;  %v5723_v61 = vpack.c.bf16 %v12841_v25, %v12840_v39  ;;  %v12850_v18 = vand.u32 4294901760, %v12849_v15  ;;  %v12852_v36 = vand.u32 4294901760, %v12851_v33  ;;  %v12853_v16 = vld [vmem:[#allocation165_spill] sm:$0xff]  ;;  %v12856_v38 = vand.u32 4294901760, %v12855_v30  ;;  %v12877_v25 = vld [vmem:[#allocation183_spill] sm:$0xff]  ;;  %v12885_v33 = vld [vmem:[#allocation190_spill] sm:$0xff] }
 0x180   :  { %v6107_v47 = vpack.c.bf16 %v12844_v22, %v12842_v35  ;;  %v5725_v9 = vpack.c.bf16 %v12848_v23, %v12846_v41  ;;  %v12854_v4 = vand.u32 4294901760, %v12853_v16  ;;  %v12860_v63 = vand.u32 4294901760, %v12859_v43  ;;  %v12881_v41 = vld [vmem:[#allocation185_spill] sm:$0xff]  ;;  %v12883_v23 = vld [vmem:[#allocation188_spill] sm:$0xff]  ;;  %v34_v30 = vld [vmem:[%s11313_s1 + $0xa8] sm:$0xff] }
 0x181   :  { %6096 = vmatpush1.bf16.msra.mxu1 %v6095_v44  ;;  %v6109_v5 = vpack.c.bf16 %v12852_v36, %v12850_v18  ;;  %v12857_v44 = vld [vmem:[#allocation168_spill] sm:$0xff]  ;;  %v2837_v40 = vand.u32 4294901760, %v18_v27  ;;  %v2841_v0 = vand.u32 4294901760, %v26_v2  ;;  %v4125_v51 = vand.u32 4294901760, %v28_v6  ;;  %v12887_v36 = vld [vmem:[#allocation191_spill] sm:$0xff]  ;;  %v12891_v43 = vld [vmem:[#allocation194_spill] sm:$0xff] }
 0x182   :  { %6098 = vmatprep.subr.bf16.mxu1 %v6097_v29  ;;  %5716 = vmatpush1.bf16.msra.mxu0 %v5715_v8  ;;  %v5727_v60 = vpack.c.bf16 %v12856_v38, %v12854_v4  ;;  %v12858_v52 = vand.u32 4294901760, %v12857_v44  ;;  %v4121_v8 = vand.u32 4294901760, %v20_v7  ;;  %v2839_v31 = vand.u32 4294901760, %v17_v54  ;;  %v42_v38 = vld [vmem:[%s11313_s1 + $0xe8] sm:$0xff]  ;;  %v12889_v44 = vld [vmem:[#allocation193_spill] sm:$0xff] }
 0x183   :  { %5718 = vmatprep.subr.bf16.mxu0 %v5717_v12  ;;  %v2843_v58 = vand.u32 4294901760, %v25_v45  ;;  %v19_v12 = vld [vmem:[%s11313_s1 + $0x30] sm:$0xff]  ;;  %v12862_v20 = vand.u32 4294901760, %v12861_v56  ;;  %v12864_v19 = vand.u32 4294901760, %v12863_v1  ;;  %v12868_v21 = vand.u32 4294901760, %v12867_v53 }
 0x184   :  { %v8924_v29 = vpack.c.bf16 %v12860_v63, %v12858_v52  ;;  %v12870_v55 = vand.u32 4294901760, %v12869_v14  ;;  %v12872_v46 = vand.u32 4294901760, %v12871_v57  ;;  %v12876_v10 = vand.u32 4294901760, %v12875_v11  ;;  %v33_v57 = vld [vmem:[%s11313_s1 + $0xa0] sm:$0xff] }
 0x185   :  { %6100 = vmatpush1.bf16.msra.mxu1 %v6099_v34  ;;  %v5729_v24 = vpack.c.bf16 %v12864_v19, %v12862_v20  ;;  %v12865_v34 = vld [vmem:[#allocation173_spill] sm:$0xff]  ;;  %v12878_v35 = vand.u32 4294901760, %v12877_v25  ;;  %v12880_v22 = vand.u32 4294901760, %v12879_v28  ;;  %v12882_v17 = vand.u32 4294901760, %v12881_v41 }
 0x186   :  { %6102 = vmatprep.subr.bf16.mxu1 %v6101_v13  ;;  %5720 = vmatpush1.bf16.msra.mxu0 %v5719_v26  ;;  %v12866_v59 = vand.u32 4294901760, %v12865_v34  ;;  %v8946_v42 = vpack.c.bf16 %v12872_v46, %v12870_v55  ;;  %v12873_v13 = vld [vmem:[#allocation180_spill] sm:$0xff]  ;;  %v12884_v15 = vand.u32 4294901760, %v12883_v23  ;;  %v12888_v16 = vand.u32 4294901760, %v12887_v36  ;;  %v36_v34 = vld [vmem:[%s11313_s1 + $0xb8] sm:$0xff]  ;;  %v41_v46 = vld [vmem:[%s11313_s1 + $0xe0] sm:$0xff] }
 0x187   :  { %5722 = vmatprep.subr.bf16.mxu0 %v5721_v49  ;;  %v12874_v26 = vand.u32 4294901760, %v12873_v13  ;;  %v8958_v62 = vpack.c.bf16 %v12880_v22, %v12878_v35  ;;  %v12886_v49 = vand.u32 4294901760, %v12885_v33  ;;  %v12890_v52 = vand.u32 4294901760, %v12889_v44 }
 0x188   :  { %v8940_v32 = vpack.c.bf16 %v12868_v21, %v12866_v59  ;;  %v8964_v18 = vpack.c.bf16 %v12884_v15, %v12882_v17  ;;  %v12892_v63 = vand.u32 4294901760, %v12891_v43  ;;  %v8984_v20 = vpack.c.bf16 %v2841_v0, %v2837_v40  ;;  %v44_v59 = vld [vmem:[%s11313_s1 + $0xf8] sm:$0xff]  ;;  %v49_v17 = vld [vmem:[%s11313_s1 + $0x120] sm:$0xff] }
 0x189   :  { %v8952_v39 = vpack.c.bf16 %v12876_v10, %v12874_v26  ;;  %v8970_v4 = vpack.c.bf16 %v12888_v16, %v12886_v49  ;;  %v4123_v1 = vand.u32 4294901760, %v19_v12  ;;  %v4127_v19 = vand.u32 4294901760, %v27_v37  ;;  %6104 = vmatpush1.bf16.msra.mxu1 %v6103_v50  ;;  %v51_v16 = vld [vmem:[%s11313_s1 + $0x130] sm:$0xff] }
 0x18a   :  { %v8982_v56 = vpack.c.bf16 %v12892_v63, %v12890_v52  ;;  %12893 = vst [vmem:[#allocation105_spill] sm:$0xff] %v8984_v20  ;;  %v8992_v53 = vsub.f32 %v18_v27, %v2837_v40  ;;  %v8994_v21 = vsub.f32 %v26_v2, %v2841_v0  ;;  %v8996_v14 = vpack.c.bf16 %v4125_v51, %v4121_v8  ;;  %v35_v40 = vld [vmem:[%s11313_s1 + $0xb0] sm:$0xff]  ;;  %v74_v63 = vld [vmem:[%s11313_s1 + $0x1e8] sm:$0xff] }
 0x18b   :  { %v8998_v55 = vpack.c.bf16 %v2843_v58, %v2839_v31  ;;  %6106 = vmatprep.subr.bf16.mxu1 %v6105_v3  ;;  %5724 = vmatpush1.bf16.msra.mxu0 %v5723_v61  ;;  %v9006_v13 = vsub.f32 %v20_v7, %v4121_v8  ;;  %v9008_v27 = vsub.f32 %v28_v6, %v4125_v51  ;;  %v2845_v2 = vand.u32 4294901760, %v34_v30  ;;  %v43_v0 = vld [vmem:[%s11313_s1 + $0xf0] sm:$0xff]  ;;  %v50_v6 = vld [vmem:[%s11313_s1 + $0x128] sm:$0xff] }
 0x18c   :  { %12894 = vst [vmem:[#allocation106_spill] sm:$0xff] %v8992_v53  ;;  %12895 = vst [vmem:[#allocation108_spill] sm:$0xff] %v8994_v21  ;;  %v2849_v50 = vand.u32 4294901760, %v42_v38  ;;  %5726 = vmatprep.subr.bf16.mxu0 %v5725_v9  ;;  %v9016_v26 = vsub.f32 %v17_v54, %v2839_v31  ;;  %v9018_v11 = vsub.f32 %v25_v45, %v2843_v58  ;;  %v4129_v3 = vand.u32 4294901760, %v36_v34  ;;  %v58_v61 = vld [vmem:[%s11313_s1 + $0x168] sm:$0xff]  ;;  %v52_v54 = vld [vmem:[%s11313_s1 + $0x138] sm:$0xff] }
 0x18d   :  { %12896 = vst [vmem:[#allocation109_spill] sm:$0xff] %v8996_v14  ;;  %12897 = vst [vmem:[#allocation111_spill] sm:$0xff] %v8998_v55  ;;  %v4133_v7 = vand.u32 4294901760, %v44_v59  ;;  %v9026_v8 = vpack.c.bf16 %v4127_v19, %v4123_v1  ;;  %v9028_v51 = vsub.f32 %v19_v12, %v4123_v1  ;;  %v2847_v10 = vand.u32 4294901760, %v33_v57  ;;  %v60_v45 = vld [vmem:[%s11313_s1 + $0x178] sm:$0xff]  ;;  %6108 = vmatpush1.bf16.msra.mxu1 %v6107_v47  ;;  %v57_v47 = vld [vmem:[%s11313_s1 + $0x160] sm:$0xff] }
 0x18e   :  { %12898 = vst [vmem:[#allocation112_spill] sm:$0xff] %v9006_v13  ;;  %12899 = vst [vmem:[#allocation113_spill] sm:$0xff] %v9008_v27  ;;  %v2851_v9 = vand.u32 4294901760, %v41_v46  ;;  %v9036_v31 = vsub.f32 %v27_v37, %v4127_v19  ;;  %v9038_v58 = vsub.f32 %v34_v30, %v2845_v2  ;;  %v4131_v25 = vand.u32 4294901760, %v35_v40  ;;  %6110 = vmatprep.subr.bf16.mxu1 %v6109_v5  ;;  %v66_v30 = vld [vmem:[%s11313_s1 + $0x1a8] sm:$0xff]  ;;  %v68_v1 = vld [vmem:[%s11313_s1 + $0x1b8] sm:$0xff] }
 0x18f   :  { %12900 = vst [vmem:[#allocation115_spill] sm:$0xff] %v9016_v26  ;;  %12901 = vst [vmem:[#allocation117_spill] sm:$0xff] %v9018_v11  ;;  %v4135_v35 = vand.u32 4294901760, %v43_v0  ;;  %5728 = vmatpush1.bf16.msra.mxu0 %v5727_v60  ;;  %v9040_v12 = vpack.c.bf16 %v2849_v50, %v2845_v2  ;;  %v9042_v28 = vsub.f32 %v42_v38, %v2849_v50  ;;  %v2853_v22 = vand.u32 4294901760, %v50_v6  ;;  %v76_v19 = vld [vmem:[%s11313_s1 + $0x1f8] sm:$0xff] }
 0x190   :  { %12902 = vst [vmem:[#allocation118_spill] sm:$0xff] %v9026_v8  ;;  %12903 = vst [vmem:[#allocation120_spill] sm:$0xff] %v9028_v51  ;;  %v2857_v41 = vand.u32 4294901760, %v58_v61  ;;  %5730 = vmatprep.subr.bf16.mxu0 %v5729_v24  ;;  %v9050_v37 = vpack.c.bf16 %v4133_v7, %v4129_v3  ;;  %v9052_v23 = vsub.f32 %v36_v34, %v4129_v3  ;;  %v4137_v5 = vand.u32 4294901760, %v52_v54  ;;  %v59_v24 = vld [vmem:[%s11313_s1 + $0x170] sm:$0xff] }
 0x191   :  { %12904 = vst [vmem:[#allocation121_spill] sm:$0xff] %v9036_v31  ;;  %12905 = vst [vmem:[#allocation123_spill] sm:$0xff] %v9038_v58  ;;  %v4141_v60 = vand.u32 4294901760, %v60_v45  ;;  %v9054_v15 = vsub.f32 %v44_v59, %v4133_v7  ;;  %v9056_v33 = vpack.c.bf16 %v2851_v9, %v2847_v10  ;;  %v9058_v49 = vsub.f32 %v33_v57, %v2847_v10 }
 0x192   :  { %12906 = vst [vmem:[#allocation124_spill] sm:$0xff] %v9040_v12  ;;  %12907 = vst [vmem:[#allocation125_spill] sm:$0xff] %v9042_v28  ;;  %v9060_v36 = vsub.f32 %v41_v46, %v2851_v9  ;;  %6112 = vmatpush1.bf16.msra.mxu1 %v8924_v29  ;;  %v9072_v38 = vpack.c.bf16 %v4135_v35, %v4131_v25  ;;  %v9074_v44 = vsub.f32 %v35_v40, %v4131_v25 }
 0x193   :  { %12908 = vst [vmem:[#allocation127_spill] sm:$0xff] %v9050_v37  ;;  %12909 = vst [vmem:[#allocation129_spill] sm:$0xff] %v9052_v23  ;;  %v2855_v52 = vand.u32 4294901760, %v49_v17  ;;  %v2859_v43 = vand.u32 4294901760, %v57_v47  ;;  %6114 = vmatprep.subr.bf16.mxu1 %v8940_v32  ;;  %5732 = vmatpush1.bf16.msra.mxu0 %v8946_v42  ;;  %v9087_v29 = vsub.f32 %v43_v0, %v4135_v35  ;;  %v4139_v2 = vand.u32 4294901760, %v51_v16  ;;  %v65_v32 = vld [vmem:[%s11313_s1 + $0x1a0] sm:$0xff] }
 0x194   :  { %12910 = vst [vmem:[#allocation130_spill] sm:$0xff] %v9054_v15  ;;  %12911 = vst [vmem:[#allocation135_spill] sm:$0xff] %v9056_v33  ;;  %v9089_v34 = vpack.c.bf16 %v2857_v41, %v2853_v22  ;;  %v9091_v59 = vsub.f32 %v50_v6, %v2853_v22  ;;  %5734 = vmatprep.subr.bf16.mxu0 %v8958_v62  ;;  %v9094_v57 = vsub.f32 %v58_v61, %v2857_v41  ;;  %v73_v42 = vld [vmem:[%s11313_s1 + $0x1e0] sm:$0xff]  ;;  %v67_v62 = vld [vmem:[%s11313_s1 + $0x1b0] sm:$0xff] }
 0x195   :  { %12912 = vst [vmem:[#allocation137_spill] sm:$0xff] %v9058_v49  ;;  %12913 = vst [vmem:[#allocation141_spill] sm:$0xff] %v9060_v36  ;;  %v9096_v46 = vpack.c.bf16 %v4141_v60, %v4137_v5  ;;  %v4143_v50 = vand.u32 4294901760, %v59_v24  ;;  %v2861_v40 = vand.u32 4294901760, %v66_v30  ;;  %v2865_v0 = vand.u32 4294901760, %v74_v63  ;;  %v75_v6 = vld [vmem:[%s11313_s1 + $0x1f0] sm:$0xff] }
 0x196   :  { %12914 = vst [vmem:[#allocation151_spill] sm:$0xff] %v9072_v38  ;;  %12915 = vst [vmem:[#allocation87_spill] sm:$0xff] %v9074_v44  ;;  %v4145_v3 = vand.u32 4294901760, %v68_v1  ;;  %v4149_v7 = vand.u32 4294901760, %v76_v19  ;;  %6116 = vmatpush1.bf16.msra.mxu1 %v8952_v39  ;;  %v9111_v61 = vsub.f32 %v52_v54, %v4137_v5  ;;  %v9113_v10 = vsub.f32 %v60_v45, %v4141_v60  ;;  %v82_v39 = vld [vmem:[%s11313_s1 + $0x228] sm:$0xff]  ;;  %v12927_v45 = vld [vmem:[#allocation2_spill] sm:$0xff] }
 0x197   :  { %12916 = vst [vmem:[#allocation84_spill] sm:$0xff] %v9087_v29  ;;  %12917 = vst [vmem:[#allocation89_spill] sm:$0xff] %v9089_v34  ;;  %v9115_v9 = vpack.c.bf16 %v2859_v43, %v2855_v52  ;;  %v9117_v25 = vsub.f32 %v49_v17, %v2855_v52  ;;  %6118 = vmatprep.subr.bf16.mxu1 %v8964_v18  ;;  %5736 = vmatpush1.bf16.msra.mxu0 %v8970_v4  ;;  %v2863_v41 = vand.u32 4294901760, %v65_v32  ;;  %v90_v54 = vld [vmem:[%s11313_s1 + $0x268] sm:$0xff]  ;;  %v84_v5 = vld [vmem:[%s11313_s1 + $0x238] sm:$0xff] }
 0x198   :  { %12918 = vst [vmem:[#allocation91_spill] sm:$0xff] %v9091_v59  ;;  %12919 = vst [vmem:[#allocation93_spill] sm:$0xff] %v9094_v57  ;;  %v9121_v35 = vsub.f32 %v57_v47, %v2859_v43  ;;  %v9123_v22 = vsub.f32 %v51_v16, %v4139_v2  ;;  %5738 = vmatprep.subr.bf16.mxu0 %v12927_v45  ;;  %v9132_v17 = vpack.c.bf16 %v4143_v50, %v4139_v2  ;;  %v92_v60 = vld [vmem:[%s11313_s1 + $0x278] sm:$0xff]  ;;  %v12934_v45 = vld [vmem:[#allocation196_spill] sm:$0xff] }
 0x199   :  { %12920 = vst [vmem:[#allocation94_spill] sm:$0xff] %v9096_v46  ;;  %12921 = vst [vmem:[#allocation99_spill] sm:$0xff] %v9111_v61  ;;  %v2867_v46 = vand.u32 4294901760, %v73_v42  ;;  %v9134_v18 = vsub.f32 %v59_v24, %v4143_v50  ;;  %v4147_v4 = vand.u32 4294901760, %v67_v62  ;;  %v4151_v47 = vand.u32 4294901760, %v75_v6  ;;  %v81_v24 = vld [vmem:[%s11313_s1 + $0x220] sm:$0xff] }
 0x19a   :  { %12922 = vst [vmem:[#allocation100_spill] sm:$0xff] %v9113_v10  ;;  %12923 = vst [vmem:[#allocation96_spill] sm:$0xff] %v9115_v9  ;;  %v9142_v16 = vpack.c.bf16 %v2865_v0, %v2861_v40  ;;  %v9144_v52 = vsub.f32 %v66_v30, %v2861_v40  ;;  %v9146_v43 = vsub.f32 %v74_v63, %v2865_v0  ;;  %v89_v50 = vld [vmem:[%s11313_s1 + $0x260] sm:$0xff]  ;;  %6120 = vmatpush1.bf16.msra.mxu1 %v8982_v56  ;;  %v83_v0 = vld [vmem:[%s11313_s1 + $0x230] sm:$0xff] }
 0x19b   :  { %12924 = vst [vmem:[#allocation97_spill] sm:$0xff] %v9117_v25  ;;  %12925 = vst [vmem:[#allocation101_spill] sm:$0xff] %v9121_v35  ;;  %v9148_v2 = vpack.c.bf16 %v4149_v7, %v4145_v3  ;;  %1410 = vmatmul.mubr.f32.vlgmr.msra.gmra.mrb[0].mxu0 %v12934_v45  ;;  %v9160_v30 = vsub.f32 %v76_v19, %v4149_v7  ;;  %v2869_v63 = vand.u32 4294901760, %v82_v39  ;;  %v2873_v40 = vand.u32 4294901760, %v90_v54  ;;  %v12941_v7 = vld [vmem:[#allocation15_spill] sm:$0xff] }
 0x19c   :  { %12926 = vst [vmem:[#allocation103_spill] sm:$0xff] %v9123_v22  ;;  %12928 = vst [vmem:[#allocation147_spill] sm:$0xff] %v9132_v17  ;;  %v12938_v22 = vld [vmem:[#allocation8_spill] sm:$0xff]  ;;  %v9170_v56 = vpack.c.bf16 %v2867_v46, %v2863_v41  ;;  %v4153_v19 = vand.u32 4294901760, %v84_v5  ;;  %1545 = vmatprep.mubr.f32.mxu0 %v12709_v48  ;;  %v2871_v35 = vand.u32 4294901760, %v81_v24  ;;  %v178_v61 = vld [vmem:[%s11313_s1 + $0x528] sm:$0xff] }
 0x19d   :  { %12929 = vst [vmem:[#allocation145_spill] sm:$0xff] %v9134_v18  ;;  %12930 = vst [vmem:[#allocation144_spill] sm:$0xff] %v9142_v16  ;;  %v9158_v18 = vsub.f32 %v68_v1, %v4145_v3  ;;  %5740 = vmatpush1.bf16.msra.mxu0 %v12938_v22  ;;  %v9172_v1 = vsub.f32 %v65_v32, %v2863_v41  ;;  %v4157_v3 = vand.u32 4294901760, %v92_v60  ;;  %v98_v22 = vld [vmem:[%s11313_s1 + $0x2a8] sm:$0xff]  ;;  %2694 = vmatmul.mubr.f32.vlgmr.msra.gmra.mrb[0].mxu1 %v12934_v45 }
 0x19e   :  { %12931 = vst [vmem:[#allocation149_spill] sm:$0xff] %v9144_v52  ;;  %12932 = vst [vmem:[#allocation154_spill] sm:$0xff] %v9146_v43  ;;  %v91_v43 = vld [vmem:[%s11313_s1 + $0x270] sm:$0xff]  ;;  %v12937_v52 = vld [vmem:[#allocation6_spill] sm:$0xff]  ;;  %5742 = vmatprep.subr.bf16.mxu0 %v12941_v7  ;;  %v9187_v41 = vsub.f32 %v67_v62, %v4147_v4  ;;  %2829 = vmatprep.mubr.f32.mxu1 %v12709_v48  ;;  %v9201_v62 = vsub.f32 %v82_v39, %v2869_v63 }
 0x19f   :  { %12933 = vst [vmem:[#allocation153_spill] sm:$0xff] %v9148_v2  ;;  %12935 = vst [vmem:[#allocation156_spill] sm:$0xff] %v9158_v18  ;;  %6122 = vmatprep.subr.bf16.mxu1 %v12937_v52  ;;  %v9178_v18 = vpack.c.bf16 %v4151_v47, %v4147_v4  ;;  %v2875_v2 = vand.u32 4294901760, %v89_v50  ;;  %v106_v32 = vld [vmem:[%s11313_s1 + $0x2e8] sm:$0xff]  ;;  %v9189_v52 = vsub.f32 %v75_v6, %v4151_v47  ;;  %v100_v7 = vld [vmem:[%s11313_s1 + $0x2b8] sm:$0xff] }
 0x1a0   :  { %12936 = vst [vmem:[#allocation3_spill] sm:$0xff] %v9160_v30  ;;  %12939 = vst [vmem:[#allocation4_spill] sm:$0xff] %v9170_v56  ;;  %v9176_v30 = vsub.f32 %v73_v42, %v2867_v46  ;;  %v4155_v46 = vand.u32 4294901760, %v83_v0  ;;  %v4159_v42 = vand.u32 4294901760, %v91_v43  ;;  %v9203_v6 = vsub.f32 %v90_v54, %v2873_v40  ;;  %v97_v4 = vld [vmem:[%s11313_s1 + $0x2a0] sm:$0xff]  ;;  %v12950_v47 = vld [vmem:[#allocation17_spill] sm:$0xff] }
 0x1a1   :  { %12940 = vst [vmem:[#allocation5_spill] sm:$0xff] %v9172_v1  ;;  %12943 = vst [vmem:[#allocation9_spill] sm:$0xff] %v9178_v18  ;;  %v12946_v1 = vld [vmem:[#allocation11_spill] sm:$0xff]  ;;  %v9199_v18 = vpack.c.bf16 %v2873_v40, %v2869_v63  ;;  %v9212_v56 = vsub.f32 %v84_v5, %v4153_v19  ;;  %v2881_v48 = vand.u32 4294901760, %v106_v32  ;;  %v105_v39 = vld [vmem:[%s11313_s1 + $0x2e0] sm:$0xff]  ;;  %v9226_v5 = vpack.c.bf16 %v2875_v2, %v2871_v35 }
 0x1a2   :  { %12942 = vst [vmem:[#allocation7_spill] sm:$0xff] %v9176_v30  ;;  %12944 = vst [vmem:[#allocation10_spill] sm:$0xff] %v9187_v41  ;;  %v108_v30 = vld [vmem:[%s11313_s1 + $0x2f8] sm:$0xff]  ;;  %6124 = vmatpush1.bf16.msra.mxu1 %v12946_v1  ;;  %v9210_v41 = vpack.c.bf16 %v4157_v3, %v4153_v19  ;;  %v2877_v1 = vand.u32 4294901760, %v98_v22  ;;  %v99_v54 = vld [vmem:[%s11313_s1 + $0x2b0] sm:$0xff]  ;;  %v4161_v19 = vand.u32 4294901760, %v100_v7 }
 0x1a3   :  { %12945 = vst [vmem:[#allocation14_spill] sm:$0xff] %v9189_v52  ;;  %12947 = vst [vmem:[#allocation16_spill] sm:$0xff] %v9199_v18  ;;  %6126 = vmatprep.subr.bf16.mxu1 %v12950_v47  ;;  %v12951_v52 = vld [vmem:[#allocation21_spill] sm:$0xff]  ;;  %v107_v63 = vld [vmem:[%s11313_s1 + $0x2f0] sm:$0xff]  ;;  %v4165_v47 = vand.u32 4294901760, %v108_v30 }
 0x1a4   :  { %12948 = vst [vmem:[#allocation12_spill] sm:$0xff] %v9201_v62  ;;  %12949 = vst [vmem:[#allocation13_spill] sm:$0xff] %v9203_v6  ;;  %5744 = vmatpush1.bf16.msra.mxu0 %v12951_v52  ;;  %v12954_v40 = vld [vmem:[#allocation26_spill] sm:$0xff]  ;;  %v9224_v52 = vsub.f32 %v92_v60, %v4157_v3  ;;  %v9230_v6 = vsub.f32 %v89_v50, %v2875_v2  ;;  %v9232_v62 = vpack.c.bf16 %v4159_v42, %v4155_v46  ;;  %v114_v18 = vld [vmem:[%s11313_s1 + $0x328] sm:$0xff] }
 0x1a5   :  { %12952 = vst [vmem:[#allocation18_spill] sm:$0xff] %v9210_v41  ;;  %12953 = vst [vmem:[#allocation19_spill] sm:$0xff] %v9212_v56  ;;  %5746 = vmatprep.subr.bf16.mxu0 %v12954_v40  ;;  %v9228_v56 = vsub.f32 %v81_v24, %v2871_v35  ;;  %v9234_v41 = vsub.f32 %v83_v0, %v4155_v46  ;;  %v122_v60 = vld [vmem:[%s11313_s1 + $0x368] sm:$0xff]  ;;  %v12961_v3 = vld [vmem:[#allocation24_spill] sm:$0xff]  ;;  %v2879_v40 = vand.u32 4294901760, %v97_v4  ;;  %v4163_v35 = vand.u32 4294901760, %v99_v54 }
 0x1a6   :  { %12955 = vst [vmem:[#allocation20_spill] sm:$0xff] %v9224_v52  ;;  %12956 = vst [vmem:[#allocation22_spill] sm:$0xff] %v9226_v5  ;;  %6128 = vmatpush1.bf16.msra.mxu1 %v12961_v3  ;;  %v2883_v52 = vand.u32 4294901760, %v105_v39  ;;  %v4167_v24 = vand.u32 4294901760, %v107_v63  ;;  %v116_v2 = vld [vmem:[%s11313_s1 + $0x338] sm:$0xff]  ;;  %v12963_v46 = vld [vmem:[#allocation32_spill] sm:$0xff]  ;;  %v9255_v3 = vsub.f32 %v98_v22, %v2877_v1  ;;  %v9260_v5 = vpack.c.bf16 %v4165_v47, %v4161_v19 }
 0x1a7   :  { %12957 = vst [vmem:[#allocation27_spill] sm:$0xff] %v9228_v56  ;;  %12958 = vst [vmem:[#allocation28_spill] sm:$0xff] %v9230_v6  ;;  %v124_v50 = vld [vmem:[%s11313_s1 + $0x378] sm:$0xff]  ;;  %v9253_v6 = vpack.c.bf16 %v2881_v48, %v2877_v1  ;;  %v12967_v56 = vld [vmem:[#allocation38_spill] sm:$0xff]  ;;  %v2885_v25 = vand.u32 4294901760, %v114_v18  ;;  %v2889_v10 = vand.u32 4294901760, %v122_v60  ;;  %v9270_v22 = vsub.f32 %v108_v30, %v4165_v47 }
 0x1a8   :  { %12959 = vst [vmem:[#allocation23_spill] sm:$0xff] %v9232_v62  ;;  %12960 = vst [vmem:[#allocation25_spill] sm:$0xff] %v9234_v41  ;;  %v12962_v0 = vld [vmem:[#allocation29_spill] sm:$0xff]  ;;  %5748 = vmatpush1.bf16.msra.mxu0 %v12963_v46  ;;  %v9251_v41 = vsub.f32 %v91_v43, %v4159_v42  ;;  %v9258_v62 = vsub.f32 %v106_v32, %v2881_v48  ;;  %v121_v43 = vld [vmem:[%s11313_s1 + $0x360] sm:$0xff]  ;;  %v9268_v42 = vsub.f32 %v100_v7, %v4161_v19 }
 0x1a9   :  { %6130 = vmatprep.subr.bf16.mxu1 %v12962_v0  ;;  %12965 = vst [vmem:[#allocation31_spill] sm:$0xff] %v9253_v6  ;;  %12966 = vst [vmem:[#allocation33_spill] sm:$0xff] %v9255_v3  ;;  %5750 = vmatprep.subr.bf16.mxu0 %v12967_v56  ;;  %v113_v0 = vld [vmem:[%s11313_s1 + $0x320] sm:$0xff]  ;;  %v4169_v1 = vand.u32 4294901760, %v116_v2  ;;  %v4173_v56 = vand.u32 4294901760, %v124_v50  ;;  %v115_v48 = vld [vmem:[%s11313_s1 + $0x330] sm:$0xff]  ;;  %v9281_v3 = vsub.f32 %v97_v4, %v2879_v40 }
 0x1aa   :  { %12964 = vst [vmem:[#allocation30_spill] sm:$0xff] %v9251_v41  ;;  %12968 = vst [vmem:[#allocation34_spill] sm:$0xff] %v9258_v62  ;;  %v123_v32 = vld [vmem:[%s11313_s1 + $0x370] sm:$0xff]  ;;  %v12972_v46 = vld [vmem:[#allocation35_spill] sm:$0xff]  ;;  %v9279_v62 = vpack.c.bf16 %v2883_v52, %v2879_v40  ;;  %v9283_v7 = vsub.f32 %v105_v39, %v2883_v52  ;;  %v9285_v30 = vpack.c.bf16 %v4167_v24, %v4163_v35 }
 0x1ab   :  { %12969 = vst [vmem:[#allocation39_spill] sm:$0xff] %v9260_v5  ;;  %12970 = vst [vmem:[#allocation40_spill] sm:$0xff] %v9268_v42  ;;  %6132 = vmatpush1.bf16.msra.mxu1 %v12972_v46  ;;  %v130_v19 = vld [vmem:[%s11313_s1 + $0x3a8] sm:$0xff]  ;;  %v12977_v47 = vld [vmem:[#allocation41_spill] sm:$0xff]  ;;  %v9292_v42 = vsub.f32 %v99_v54, %v4163_v35  ;;  %v9294_v41 = vsub.f32 %v107_v63, %v4167_v24  ;;  %v2887_v46 = vand.u32 4294901760, %v113_v0  ;;  %v4171_v35 = vand.u32 4294901760, %v115_v48 }
 0x1ac   :  { %12971 = vst [vmem:[#allocation36_spill] sm:$0xff] %v9270_v22  ;;  %12973 = vst [vmem:[#allocation37_spill] sm:$0xff] %v9279_v62  ;;  %6134 = vmatprep.subr.bf16.mxu1 %v12977_v47  ;;  %v12978_v22 = vld [vmem:[#allocation45_spill] sm:$0xff]  ;;  %v2891_v62 = vand.u32 4294901760, %v121_v43  ;;  %v138_v4 = vld [vmem:[%s11313_s1 + $0x3e8] sm:$0xff]  ;;  %v9306_v54 = vpack.c.bf16 %v2889_v10, %v2885_v25  ;;  %v9308_v63 = vsub.f32 %v114_v18, %v2885_v25  ;;  %v4175_v24 = vand.u32 4294901760, %v123_v32 }
 0x1ad   :  { %12974 = vst [vmem:[#allocation42_spill] sm:$0xff] %v9281_v3  ;;  %12975 = vst [vmem:[#allocation43_spill] sm:$0xff] %v9283_v7  ;;  %5752 = vmatpush1.bf16.msra.mxu0 %v12978_v22  ;;  %v132_v39 = vld [vmem:[%s11313_s1 + $0x3b8] sm:$0xff]  ;;  %v12981_v40 = vld [vmem:[#allocation50_spill] sm:$0xff]  ;;  %v9310_v22 = vsub.f32 %v122_v60, %v2889_v10  ;;  %v9312_v47 = vpack.c.bf16 %v4173_v56, %v4169_v1  ;;  %v2893_v18 = vand.u32 4294901760, %v130_v19 }
 0x1ae   :  { %12976 = vst [vmem:[#allocation44_spill] sm:$0xff] %v9285_v30  ;;  %12979 = vst [vmem:[#allocation46_spill] sm:$0xff] %v9292_v42  ;;  %v140_v52 = vld [vmem:[%s11313_s1 + $0x3f8] sm:$0xff]  ;;  %5754 = vmatprep.subr.bf16.mxu0 %v12981_v40  ;;  %v9316_v42 = vsub.f32 %v124_v50, %v4173_v56  ;;  %v129_v7 = vld [vmem:[%s11313_s1 + $0x3a0] sm:$0xff]  ;;  %v4177_v10 = vand.u32 4294901760, %v132_v39  ;;  %v9345_v30 = vsub.f32 %v115_v48, %v4171_v35 }
 0x1af   :  { %12980 = vst [vmem:[#allocation51_spill] sm:$0xff] %v9294_v41  ;;  %12982 = vst [vmem:[#allocation52_spill] sm:$0xff] %v9306_v54  ;;  %v9314_v41 = vsub.f32 %v116_v2, %v4169_v1  ;;  %v137_v40 = vld [vmem:[%s11313_s1 + $0x3e0] sm:$0xff]  ;;  %v12988_v25 = vld [vmem:[#allocation47_spill] sm:$0xff]  ;;  %v4181_v60 = vand.u32 4294901760, %v140_v52  ;;  %v2895_v54 = vand.u32 4294901760, %v129_v7 }
 0x1b0   :  { %12983 = vst [vmem:[#allocation48_spill] sm:$0xff] %v9308_v63  ;;  %12984 = vst [vmem:[#allocation49_spill] sm:$0xff] %v9310_v22  ;;  %6136 = vmatpush1.bf16.msra.mxu1 %v12988_v25  ;;  %v2897_v63 = vand.u32 4294901760, %v138_v4  ;;  %v131_v2 = vld [vmem:[%s11313_s1 + $0x3b0] sm:$0xff]  ;;  %v12989_v1 = vld [vmem:[#allocation54_spill] sm:$0xff]  ;;  %v9337_v25 = vsub.f32 %v121_v43, %v2891_v62  ;;  %v9356_v43 = vsub.f32 %v123_v32, %v4175_v24 }
 0x1b1   :  { %12985 = vst [vmem:[#allocation53_spill] sm:$0xff] %v9312_v47  ;;  %12986 = vst [vmem:[#allocation55_spill] sm:$0xff] %v9314_v41  ;;  %v139_v50 = vld [vmem:[%s11313_s1 + $0x3f0] sm:$0xff]  ;;  %6138 = vmatprep.subr.bf16.mxu1 %v12989_v1  ;;  %v9335_v41 = vsub.f32 %v113_v0, %v2887_v46  ;;  %v146_v22 = vld [vmem:[%s11313_s1 + $0x428] sm:$0xff]  ;;  %v9343_v47 = vpack.c.bf16 %v4175_v24, %v4171_v35  ;;  %v2899_v1 = vand.u32 4294901760, %v137_v40  ;;  %v4179_v48 = vand.u32 4294901760, %v131_v2 }
 0x1b2   :  { %12987 = vst [vmem:[#allocation57_spill] sm:$0xff] %v9316_v42  ;;  %v12990_v56 = vld [vmem:[#allocation56_spill] sm:$0xff]  ;;  %v9333_v42 = vpack.c.bf16 %v2891_v62, %v2887_v46  ;;  %12993 = vst [vmem:[#allocation64_spill] sm:$0xff] %v9337_v25  ;;  %v12994_v3 = vld [vmem:[#allocation62_spill] sm:$0xff]  ;;  %v4183_v46 = vand.u32 4294901760, %v139_v50  ;;  %v9363_v25 = vsub.f32 %v138_v4, %v2897_v63 }
 0x1b3   :  { %5756 = vmatpush1.bf16.msra.mxu0 %v12990_v56  ;;  %12992 = vst [vmem:[#allocation63_spill] sm:$0xff] %v9335_v41  ;;  %12995 = vst [vmem:[#allocation60_spill] sm:$0xff] %v9343_v47  ;;  %v154_v56 = vld [vmem:[%s11313_s1 + $0x468] sm:$0xff]  ;;  %v148_v62 = vld [vmem:[%s11313_s1 + $0x438] sm:$0xff]  ;;  %v9365_v41 = vpack.c.bf16 %v4181_v60, %v4177_v10  ;;  %v9367_v47 = vsub.f32 %v132_v39, %v4177_v10 }
 0x1b4   :  { %12991 = vst [vmem:[#allocation58_spill] sm:$0xff] %v9333_v42  ;;  %5758 = vmatprep.subr.bf16.mxu0 %v12994_v3  ;;  %12996 = vst [vmem:[#allocation61_spill] sm:$0xff] %v9345_v30  ;;  %v156_v0 = vld [vmem:[%s11313_s1 + $0x478] sm:$0xff]  ;;  %v9358_v3 = vsub.f32 %v130_v19, %v2893_v18  ;;  %v12999_v35 = vld [vmem:[#allocation59_spill] sm:$0xff]  ;;  %v9361_v30 = vpack.c.bf16 %v2897_v63, %v2893_v18  ;;  %v2901_v18 = vand.u32 4294901760, %v146_v22  ;;  %v4185_v4 = vand.u32 4294901760, %v148_v62 }
 0x1b5   :  { %12997 = vst [vmem:[#allocation65_spill] sm:$0xff] %v9356_v43  ;;  %6140 = vmatpush1.bf16.msra.mxu1 %v12999_v35  ;;  %13001 = vst [vmem:[#allocation70_spill] sm:$0xff] %v9363_v25  ;;  %v145_v42 = vld [vmem:[%s11313_s1 + $0x420] sm:$0xff]  ;;  %v13005_v24 = vld [vmem:[#allocation68_spill] sm:$0xff]  ;;  %v2905_v35 = vand.u32 4294901760, %v154_v56  ;;  %v4189_v63 = vand.u32 4294901760, %v156_v0  ;;  %v9384_v25 = vsub.f32 %v140_v52, %v4181_v60 }
 0x1b6   :  { %12998 = vst [vmem:[#allocation67_spill] sm:$0xff] %v9358_v3  ;;  %13000 = vst [vmem:[#allocation69_spill] sm:$0xff] %v9361_v30  ;;  %v153_v32 = vld [vmem:[%s11313_s1 + $0x460] sm:$0xff]  ;;  %v147_v39 = vld [vmem:[%s11313_s1 + $0x430] sm:$0xff]  ;;  %v9386_v3 = vpack.c.bf16 %v2899_v1, %v2895_v54  ;;  %v9397_v30 = vsub.f32 %v131_v2, %v4179_v48  ;;  %v2903_v5 = vand.u32 4294901760, %v145_v42  ;;  %v9411_v60 = vsub.f32 %v146_v22, %v2901_v18 }
 0x1b7   :  { %13002 = vst [vmem:[#allocation75_spill] sm:$0xff] %v9365_v41  ;;  %13003 = vst [vmem:[#allocation76_spill] sm:$0xff] %v9367_v47  ;;  %v13004_v19 = vld [vmem:[#allocation66_spill] sm:$0xff]  ;;  %5760 = vmatpush1.bf16.msra.mxu0 %v13005_v24  ;;  %v155_v10 = vld [vmem:[%s11313_s1 + $0x470] sm:$0xff]  ;;  %v9390_v24 = vsub.f32 %v137_v40, %v2899_v1  ;;  %v9395_v41 = vpack.c.bf16 %v4183_v46, %v4179_v48  ;;  %v2907_v6 = vand.u32 4294901760, %v153_v32  ;;  %v4187_v2 = vand.u32 4294901760, %v147_v39 }
 0x1b8   :  { %6142 = vmatprep.subr.bf16.mxu1 %v13004_v19  ;;  %v13006_v47 = vld [vmem:[#allocation74_spill] sm:$0xff]  ;;  %13007 = vst [vmem:[#allocation72_spill] sm:$0xff] %v9384_v25  ;;  %13008 = vst [vmem:[#allocation73_spill] sm:$0xff] %v9386_v3  ;;  %v9388_v19 = vsub.f32 %v129_v7, %v2895_v54  ;;  %v162_v43 = vld [vmem:[%s11313_s1 + $0x4a8] sm:$0xff]  ;;  %v9409_v40 = vsub.f32 %v139_v50, %v4183_v46  ;;  %v4191_v1 = vand.u32 4294901760, %v155_v10 }
 0x1b9   :  { %5762 = vmatprep.subr.bf16.mxu0 %v13006_v47  ;;  %13010 = vst [vmem:[#allocation79_spill] sm:$0xff] %v9390_v24  ;;  %13011 = vst [vmem:[#allocation81_spill] sm:$0xff] %v9395_v41  ;;  %v170_v52 = vld [vmem:[%s11313_s1 + $0x4e8] sm:$0xff]  ;;  %v164_v7 = vld [vmem:[%s11313_s1 + $0x4b8] sm:$0xff]  ;;  %v9415_v24 = vpack.c.bf16 %v2905_v35, %v2901_v18  ;;  %v9419_v25 = vpack.c.bf16 %v4189_v63, %v4185_v4  ;;  %v2909_v46 = vand.u32 4294901760, %v162_v43 }
 0x1ba   :  { %13009 = vst [vmem:[#allocation77_spill] sm:$0xff] %v9388_v19  ;;  %13012 = vst [vmem:[#allocation82_spill] sm:$0xff] %v9397_v30  ;;  %v172_v54 = vld [vmem:[%s11313_s1 + $0x4f8] sm:$0xff]  ;;  %v13013_v47 = vld [vmem:[#allocation71_spill] sm:$0xff]  ;;  %v9417_v19 = vsub.f32 %v154_v56, %v2905_v35  ;;  %v9434_v35 = vsub.f32 %v148_v62, %v4185_v4  ;;  %v9443_v41 = vsub.f32 %v153_v32, %v2907_v6 }
 0x1bb   :  { %6144 = vmatpush1.bf16.msra.mxu1 %v13013_v47  ;;  %13014 = vst [vmem:[#allocation88_spill] sm:$0xff] %v9409_v40  ;;  %13015 = vst [vmem:[#allocation85_spill] sm:$0xff] %v9411_v60  ;;  %v13016_v48 = vld [vmem:[#allocation78_spill] sm:$0xff]  ;;  %v13017_v30 = vld [vmem:[#allocation80_spill] sm:$0xff]  ;;  %v4193_v60 = vand.u32 4294901760, %v164_v7  ;;  %v9438_v40 = vpack.c.bf16 %v2907_v6, %v2903_v5  ;;  %v9457_v6 = vsub.f32 %v155_v10, %v4191_v1 }
 0x1bc   :  { %6146 = vmatprep.subr.bf16.mxu1 %v13016_v48  ;;  %5764 = vmatpush1.bf16.msra.mxu0 %v13017_v30  ;;  %13018 = vst [vmem:[#allocation136_spill] sm:$0xff] %v9415_v24  ;;  %13019 = vst [vmem:[#allocation132_spill] sm:$0xff] %v9417_v19  ;;  %v161_v47 = vld [vmem:[%s11313_s1 + $0x4a0] sm:$0xff]  ;;  %v2913_v48 = vand.u32 4294901760, %v170_v52  ;;  %v4197_v30 = vand.u32 4294901760, %v172_v54  ;;  %v163_v56 = vld [vmem:[%s11313_s1 + $0x4b0] sm:$0xff]  ;;  %v9436_v19 = vsub.f32 %v156_v0, %v4189_v63 }
 0x1bd   :  { %13020 = vst [vmem:[#allocation133_spill] sm:$0xff] %v9419_v25  ;;  %v169_v22 = vld [vmem:[%s11313_s1 + $0x4e0] sm:$0xff]  ;;  %v171_v18 = vld [vmem:[%s11313_s1 + $0x4f0] sm:$0xff]  ;;  %13022 = vst [vmem:[#allocation139_spill] sm:$0xff] %v9434_v35  ;;  %v9440_v25 = vsub.f32 %v145_v42, %v2903_v5  ;;  %v9445_v24 = vpack.c.bf16 %v4191_v1, %v4187_v2  ;;  %v2911_v3 = vand.u32 4294901760, %v161_v47  ;;  %v9455_v42 = vsub.f32 %v147_v39, %v4187_v2 }
 0x1be   :  { %v13021_v50 = vld [vmem:[#allocation86_spill] sm:$0xff]  ;;  %13023 = vst [vmem:[#allocation142_spill] sm:$0xff] %v9436_v19  ;;  %13024 = vst [vmem:[#allocation148_spill] sm:$0xff] %v9438_v40  ;;  %v2915_v17 = vand.u32 4294901760, %v169_v22  ;;  %v186_v62 = vld [vmem:[%s11313_s1 + $0x568] sm:$0xff]  ;;  %v4195_v32 = vand.u32 4294901760, %v163_v56  ;;  %v9470_v39 = vsub.f32 %v170_v52, %v2913_v48  ;;  %v9472_v10 = vpack.c.bf16 %v4197_v30, %v4193_v60 }
 0x1bf   :  { %5766 = vmatprep.subr.bf16.mxu0 %v13021_v50  ;;  %13025 = vst [vmem:[#allocation157_spill] sm:$0xff] %v9440_v25  ;;  %v13026_v50 = vld [vmem:[#allocation83_spill] sm:$0xff]  ;;  %13027 = vst [vmem:[#allocation159_spill] sm:$0xff] %v9443_v41  ;;  %v13029_v0 = vld [vmem:[#allocation90_spill] sm:$0xff]  ;;  %v4199_v4 = vand.u32 4294901760, %v171_v18  ;;  %v9466_v25 = vpack.c.bf16 %v2913_v48, %v2909_v46 }
 0x1c0   :  { %6148 = vmatpush1.bf16.msra.mxu1 %v13026_v50  ;;  %13028 = vst [vmem:[#allocation160_spill] sm:$0xff] %v9445_v24  ;;  %v13030_v5 = vld [vmem:[#allocation92_spill] sm:$0xff]  ;;  %13031 = vst [vmem:[#allocation161_spill] sm:$0xff] %v9455_v42  ;;  %v180_v63 = vld [vmem:[%s11313_s1 + $0x538] sm:$0xff]  ;;  %v2921_v42 = vand.u32 4294901760, %v186_v62  ;;  %v9491_v48 = vpack.c.bf16 %v2915_v17, %v2911_v3  ;;  %v9508_v19 = vsub.f32 %v163_v56, %v4195_v32 }
 0x1c1   :  { %6150 = vmatprep.subr.bf16.mxu1 %v13029_v0  ;;  %5768 = vmatpush1.bf16.msra.mxu0 %v13030_v5  ;;  %13032 = vst [vmem:[#allocation163_spill] sm:$0xff] %v9457_v6  ;;  %v188_v50 = vld [vmem:[%s11313_s1 + $0x578] sm:$0xff]  ;;  %v13033_v41 = vld [vmem:[#allocation98_spill] sm:$0xff]  ;;  %13034 = vst [vmem:[#allocation165_spill] sm:$0xff] %v9466_v25  ;;  %v9468_v0 = vsub.f32 %v162_v43, %v2909_v46  ;;  %v9480_v5 = vsub.f32 %v164_v7, %v4193_v60  ;;  %v4201_v7 = vand.u32 4294901760, %v180_v63 }
 0x1c2   :  { %5770 = vmatprep.subr.bf16.mxu0 %v13033_v41  ;;  %13036 = vst [vmem:[#allocation168_spill] sm:$0xff] %v9470_v39  ;;  %13037 = vst [vmem:[#allocation169_spill] sm:$0xff] %v9472_v10  ;;  %v177_v2 = vld [vmem:[%s11313_s1 + $0x520] sm:$0xff]  ;;  %v9482_v6 = vsub.f32 %v172_v54, %v4197_v30  ;;  %v2917_v41 = vand.u32 4294901760, %v178_v61  ;;  %v179_v43 = vld [vmem:[%s11313_s1 + $0x530] sm:$0xff]  ;;  %v9493_v39 = vsub.f32 %v161_v47, %v2911_v3  ;;  %v4205_v60 = vand.u32 4294901760, %v188_v50 }
 0x1c3   :  { %13035 = vst [vmem:[#allocation166_spill] sm:$0xff] %v9468_v0  ;;  %v185_v1 = vld [vmem:[%s11313_s1 + $0x560] sm:$0xff]  ;;  %13038 = vst [vmem:[#allocation171_spill] sm:$0xff] %v9480_v5  ;;  %v187_v52 = vld [vmem:[%s11313_s1 + $0x570] sm:$0xff]  ;;  %v9503_v0 = vsub.f32 %v169_v22, %v2915_v17  ;;  %v2919_v3 = vand.u32 4294901760, %v177_v2  ;;  %v9510_v35 = vsub.f32 %v171_v18, %v4199_v4 }
 0x1c4   :  { %13039 = vst [vmem:[#allocation172_spill] sm:$0xff] %v9482_v6  ;;  %v13040_v46 = vld [vmem:[#allocation95_spill] sm:$0xff]  ;;  %13041 = vst [vmem:[#allocation173_spill] sm:$0xff] %v9491_v48  ;;  %v13043_v6 = vld [vmem:[#allocation102_spill] sm:$0xff]  ;;  %v2923_v47 = vand.u32 4294901760, %v185_v1  ;;  %v4203_v48 = vand.u32 4294901760, %v179_v43  ;;  %v9518_v22 = vpack.c.bf16 %v2921_v42, %v2917_v41 }
 0x1c5   :  { %6152 = vmatpush1.bf16.msra.mxu1 %v13040_v46  ;;  %13042 = vst [vmem:[#allocation175_spill] sm:$0xff] %v9493_v39  ;;  %v194_v54 = vld [vmem:[%s11313_s1 + $0x5a8] sm:$0xff]  ;;  %v13044_v5 = vld [vmem:[#allocation104_spill] sm:$0xff]  ;;  %13045 = vst [vmem:[#allocation177_spill] sm:$0xff] %v9503_v0  ;;  %v9505_v46 = vpack.c.bf16 %v4199_v4, %v4195_v32  ;;  %v4207_v10 = vand.u32 4294901760, %v187_v52  ;;  %v9526_v32 = vsub.f32 %v186_v62, %v2921_v42 }
 0x1c6   :  { %v202_v30 = vld [vmem:[%s11313_s1 + $0x5e8] sm:$0xff]  ;;  %6154 = vmatprep.subr.bf16.mxu1 %v13043_v6  ;;  %5772 = vmatpush1.bf16.msra.mxu0 %v13044_v5  ;;  %v13047_v39 = vld [vmem:[#allocation110_spill] sm:$0xff]  ;;  %13048 = vst [vmem:[#allocation180_spill] sm:$0xff] %v9508_v19  ;;  %13049 = vst [vmem:[#allocation181_spill] sm:$0xff] %v9510_v35  ;;  %v9520_v5 = vsub.f32 %v178_v61, %v2917_v41  ;;  %v2925_v0 = vand.u32 4294901760, %v194_v54  ;;  %v9528_v4 = vpack.c.bf16 %v4205_v60, %v4201_v7 }
 0x1c7   :  { %13046 = vst [vmem:[#allocation178_spill] sm:$0xff] %v9505_v46  ;;  %5774 = vmatprep.subr.bf16.mxu0 %v13047_v39  ;;  %v196_v6 = vld [vmem:[%s11313_s1 + $0x5b8] sm:$0xff]  ;;  %13050 = vst [vmem:[#allocation183_spill] sm:$0xff] %v9518_v22  ;;  %v2929_v39 = vand.u32 4294901760, %v202_v30  ;;  %v193_v56 = vld [vmem:[%s11313_s1 + $0x5a0] sm:$0xff]  ;;  %v9530_v35 = vsub.f32 %v180_v63, %v4201_v7  ;;  %v9532_v19 = vsub.f32 %v188_v50, %v4205_v60 }
 0x1c8   :  { %v204_v17 = vld [vmem:[%s11313_s1 + $0x5f8] sm:$0xff]  ;;  %13051 = vst [vmem:[#allocation184_spill] sm:$0xff] %v9520_v5  ;;  %v13052_v18 = vld [vmem:[#allocation107_spill] sm:$0xff]  ;;  %13053 = vst [vmem:[#allocation185_spill] sm:$0xff] %v9526_v32  ;;  %v9542_v62 = vpack.c.bf16 %v2923_v47, %v2919_v3  ;;  %v9544_v42 = vsub.f32 %v177_v2, %v2919_v3  ;;  %v4209_v63 = vand.u32 4294901760, %v196_v6  ;;  %v9558_v2 = vpack.c.bf16 %v4207_v10, %v4203_v48 }
 0x1c9   :  { %6156 = vmatpush1.bf16.msra.mxu1 %v13052_v18  ;;  %13054 = vst [vmem:[#allocation188_spill] sm:$0xff] %v9528_v4  ;;  %13055 = vst [vmem:[#allocation190_spill] sm:$0xff] %v9530_v35  ;;  %v201_v61 = vld [vmem:[%s11313_s1 + $0x5e0] sm:$0xff]  ;;  %v195_v41 = vld [vmem:[%s11313_s1 + $0x5b0] sm:$0xff]  ;;  %v4213_v7 = vand.u32 4294901760, %v204_v17  ;;  %v9560_v3 = vsub.f32 %v179_v43, %v4203_v48  ;;  %v9564_v35 = vpack.c.bf16 %v2929_v39, %v2925_v0 }
 0x1ca   :  { %13056 = vst [vmem:[#allocation191_spill] sm:$0xff] %v9532_v19  ;;  %v13057_v5 = vld [vmem:[#allocation114_spill] sm:$0xff]  ;;  %v13058_v46 = vld [vmem:[#allocation116_spill] sm:$0xff]  ;;  %13059 = vst [vmem:[#allocation193_spill] sm:$0xff] %v9542_v62  ;;  %v9562_v19 = vsub.f32 %v187_v52, %v4207_v10  ;;  %v9566_v32 = vsub.f32 %v194_v54, %v2925_v0  ;;  %v2931_v62 = vand.u32 4294901760, %v201_v61  ;;  %v4211_v43 = vand.u32 4294901760, %v195_v41 }
 0x1cb   :  { %6158 = vmatprep.subr.bf16.mxu1 %v13057_v5  ;;  %5776 = vmatpush1.bf16.msra.mxu0 %v13058_v46  ;;  %13060 = vst [vmem:[#allocation194_spill] sm:$0xff] %v9544_v42  ;;  %v203_v50 = vld [vmem:[%s11313_s1 + $0x5f0] sm:$0xff]  ;;  %v210_v60 = vld [vmem:[%s11313_s1 + $0x628] sm:$0xff]  ;;  %v13061_v18 = vld [vmem:[#allocation122_spill] sm:$0xff]  ;;  %v9556_v46 = vsub.f32 %v185_v1, %v2923_v47  ;;  %v2927_v42 = vand.u32 4294901760, %v193_v56 }
 0x1cc   :  { %v218_v5 = vld [vmem:[%s11313_s1 + $0x668] sm:$0xff]  ;;  %5778 = vmatprep.subr.bf16.mxu0 %v13061_v18  ;;  %13063 = vst [vmem:[#allocation6_spill] sm:$0xff] %v9558_v2  ;;  %13064 = vst [vmem:[#allocation8_spill] sm:$0xff] %v9560_v3  ;;  %v212_v4 = vld [vmem:[%s11313_s1 + $0x638] sm:$0xff]  ;;  %v4215_v48 = vand.u32 4294901760, %v203_v50  ;;  %v2933_v18 = vand.u32 4294901760, %v210_v60  ;;  %v9585_v3 = vpack.c.bf16 %v4213_v7, %v4209_v63  ;;  %v9590_v2 = vsub.f32 %v204_v17, %v4213_v7 }
 0x1cd   :  { %13062 = vst [vmem:[#allocation2_spill] sm:$0xff] %v9556_v46  ;;  %13065 = vst [vmem:[#allocation15_spill] sm:$0xff] %v9562_v19  ;;  %v220_v1 = vld [vmem:[%s11313_s1 + $0x678] sm:$0xff]  ;;  %v13068_v47 = vld [vmem:[#allocation119_spill] sm:$0xff]  ;;  %v2937_v10 = vand.u32 4294901760, %v218_v5  ;;  %v9583_v19 = vsub.f32 %v202_v30, %v2929_v39  ;;  %v4217_v22 = vand.u32 4294901760, %v212_v4  ;;  %v9600_v39 = vpack.c.bf16 %v2931_v62, %v2927_v42 }
 0x1ce   :  { %13066 = vst [vmem:[#allocation11_spill] sm:$0xff] %v9564_v35  ;;  %13067 = vst [vmem:[#allocation17_spill] sm:$0xff] %v9566_v32  ;;  %6160 = vmatpush1.bf16.msra.mxu1 %v13068_v47  ;;  %v209_v0 = vld [vmem:[%s11313_s1 + $0x620] sm:$0xff]  ;;  %v13070_v32 = vld [vmem:[#allocation128_spill] sm:$0xff]  ;;  %v9587_v47 = vsub.f32 %v196_v6, %v4209_v63  ;;  %v9592_v35 = vsub.f32 %v193_v56, %v2927_v42  ;;  %v4221_v24 = vand.u32 4294901760, %v220_v1 }
 0x1cf   :  { %v217_v52 = vld [vmem:[%s11313_s1 + $0x660] sm:$0xff]  ;;  %5780 = vmatpush1.bf16.msra.mxu0 %v13070_v32  ;;  %13071 = vst [vmem:[#allocation21_spill] sm:$0xff] %v9583_v19  ;;  %13072 = vst [vmem:[#allocation26_spill] sm:$0xff] %v9585_v3  ;;  %v219_v30 = vld [vmem:[%s11313_s1 + $0x670] sm:$0xff]  ;;  %v9602_v6 = vsub.f32 %v201_v61, %v2931_v62  ;;  %v2935_v32 = vand.u32 4294901760, %v209_v0  ;;  %v9615_v42 = vsub.f32 %v203_v50, %v4215_v48 }
 0x1d0   :  { %v13069_v54 = vld [vmem:[#allocation126_spill] sm:$0xff]  ;;  %13073 = vst [vmem:[#allocation24_spill] sm:$0xff] %v9587_v47  ;;  %13075 = vst [vmem:[#allocation29_spill] sm:$0xff] %v9590_v2  ;;  %v2939_v63 = vand.u32 4294901760, %v217_v52  ;;  %v226_v17 = vld [vmem:[%s11313_s1 + $0x6a8] sm:$0xff]  ;;  %v9617_v61 = vpack.c.bf16 %v2937_v10, %v2933_v18  ;;  %v9638_v19 = vpack.c.bf16 %v4221_v24, %v4217_v22 }
 0x1d1   :  { %6162 = vmatprep.subr.bf16.mxu1 %v13069_v54  ;;  %v13074_v46 = vld [vmem:[#allocation134_spill] sm:$0xff]  ;;  %13076 = vst [vmem:[#allocation32_spill] sm:$0xff] %v9592_v35  ;;  %v211_v54 = vld [vmem:[%s11313_s1 + $0x630] sm:$0xff]  ;;  %13077 = vst [vmem:[#allocation38_spill] sm:$0xff] %v9600_v39  ;;  %v9613_v35 = vsub.f32 %v195_v41, %v4211_v43  ;;  %v9629_v41 = vsub.f32 %v218_v5, %v2937_v10 }
 0x1d2   :  { %5782 = vmatprep.subr.bf16.mxu0 %v13074_v46  ;;  %13078 = vst [vmem:[#allocation35_spill] sm:$0xff] %v9602_v6  ;;  %v234_v56 = vld [vmem:[%s11313_s1 + $0x6e8] sm:$0xff]  ;;  %v9611_v46 = vpack.c.bf16 %v4215_v48, %v4211_v43  ;;  %13082 = vst [vmem:[#allocation50_spill] sm:$0xff] %v9615_v42  ;;  %v228_v62 = vld [vmem:[%s11313_s1 + $0x6b8] sm:$0xff]  ;;  %v4219_v50 = vand.u32 4294901760, %v211_v54  ;;  %v4223_v43 = vand.u32 4294901760, %v219_v30 }
 0x1d3   :  { %v13079_v7 = vld [vmem:[#allocation131_spill] sm:$0xff]  ;;  %13081 = vst [vmem:[#allocation45_spill] sm:$0xff] %v9613_v35  ;;  %13083 = vst [vmem:[#allocation47_spill] sm:$0xff] %v9617_v61  ;;  %v236_v6 = vld [vmem:[%s11313_s1 + $0x6f8] sm:$0xff] }
 0x1d4   :  { %6164 = vmatpush1.bf16.msra.mxu1 %v13079_v7  ;;  %13080 = vst [vmem:[#allocation41_spill] sm:$0xff] %v9611_v46  ;;  %v13084_v2 = vld [vmem:[#allocation138_spill] sm:$0xff]  ;;  %v13085_v47 = vld [vmem:[#allocation140_spill] sm:$0xff]  ;;  %v9627_v7 = vsub.f32 %v210_v60, %v2933_v18  ;;  %13087 = vst [vmem:[#allocation56_spill] sm:$0xff] %v9629_v41  ;;  %v2941_v60 = vand.u32 4294901760, %v226_v17  ;;  %v2945_v18 = vand.u32 4294901760, %v234_v56  ;;  %v9650_v41 = vpack.c.bf16 %v2939_v63, %v2935_v32 }
 0x1d5   :  { %6166 = vmatprep.subr.bf16.mxu1 %v13084_v2  ;;  %5784 = vmatpush1.bf16.msra.mxu0 %v13085_v47  ;;  %v225_v48 = vld [vmem:[%s11313_s1 + $0x6a0] sm:$0xff]  ;;  %13089 = vst [vmem:[#allocation62_spill] sm:$0xff] %v9638_v19  ;;  %v9640_v2 = vsub.f32 %v212_v4, %v4217_v22  ;;  %v227_v5 = vld [vmem:[%s11313_s1 + $0x6b0] sm:$0xff]  ;;  %v9648_v47 = vsub.f32 %v220_v1, %v4221_v24  ;;  %v13093_v46 = vld [vmem:[#allocation143_spill] sm:$0xff] }
 0x1d6   :  { %13086 = vst [vmem:[#allocation54_spill] sm:$0xff] %v9627_v7  ;;  %v233_v42 = vld [vmem:[%s11313_s1 + $0x6e0] sm:$0xff]  ;;  %v235_v10 = vld [vmem:[%s11313_s1 + $0x6f0] sm:$0xff]  ;;  %13092 = vst [vmem:[#allocation68_spill] sm:$0xff] %v9650_v41  ;;  %v4225_v7 = vand.u32 4294901760, %v228_v62  ;;  %v9653_v22 = vsub.f32 %v209_v0, %v2935_v32  ;;  %v9655_v4 = vsub.f32 %v217_v52, %v2939_v63  ;;  %v9665_v41 = vpack.c.bf16 %v4223_v43, %v4219_v50 }
 0x1d7   :  { %v13088_v35 = vld [vmem:[#allocation146_spill] sm:$0xff]  ;;  %13090 = vst [vmem:[#allocation59_spill] sm:$0xff] %v9640_v2  ;;  %13091 = vst [vmem:[#allocation66_spill] sm:$0xff] %v9648_v47  ;;  %v2943_v2 = vand.u32 4294901760, %v225_v48  ;;  %v2947_v19 = vand.u32 4294901760, %v233_v42  ;;  %v242_v61 = vld [vmem:[%s11313_s1 + $0x728] sm:$0xff]  ;;  %v9667_v0 = vsub.f32 %v211_v54, %v4219_v50  ;;  %v9682_v54 = vsub.f32 %v234_v56, %v2945_v18 }
 0x1d8   :  { %5786 = vmatprep.subr.bf16.mxu0 %v13088_v35  ;;  %v4229_v35 = vand.u32 4294901760, %v236_v6  ;;  %6168 = vmatpush1.bf16.msra.mxu1 %v13093_v46  ;;  %13094 = vst [vmem:[#allocation74_spill] sm:$0xff] %v9653_v22  ;;  %13095 = vst [vmem:[#allocation71_spill] sm:$0xff] %v9655_v4  ;;  %v250_v24 = vld [vmem:[%s11313_s1 + $0x768] sm:$0xff]  ;;  %v13096_v1 = vld [vmem:[#allocation150_spill] sm:$0xff]  ;;  %v4227_v52 = vand.u32 4294901760, %v227_v5  ;;  %v9676_v22 = vsub.f32 %v219_v30, %v4223_v43 }
 0x1d9   :  { %6170 = vmatprep.subr.bf16.mxu1 %v13096_v1  ;;  %v13097_v47 = vld [vmem:[#allocation152_spill] sm:$0xff]  ;;  %13098 = vst [vmem:[#allocation78_spill] sm:$0xff] %v9665_v41  ;;  %13099 = vst [vmem:[#allocation80_spill] sm:$0xff] %v9667_v0  ;;  %v4231_v32 = vand.u32 4294901760, %v235_v10  ;;  %v244_v63 = vld [vmem:[%s11313_s1 + $0x738] sm:$0xff]  ;;  %v9678_v1 = vpack.c.bf16 %v2945_v18, %v2941_v60  ;;  %v9686_v0 = vsub.f32 %v228_v62, %v4225_v7  ;;  %v2949_v41 = vand.u32 4294901760, %v242_v61 }
 0x1da   :  { %5788 = vmatpush1.bf16.msra.mxu0 %v13097_v47  ;;  %v252_v46 = vld [vmem:[%s11313_s1 + $0x778] sm:$0xff]  ;;  %v13100_v4 = vld [vmem:[#allocation158_spill] sm:$0xff]  ;;  %13101 = vst [vmem:[#allocation86_spill] sm:$0xff] %v9676_v22  ;;  %v9680_v47 = vsub.f32 %v226_v17, %v2941_v60  ;;  %13104 = vst [vmem:[#allocation92_spill] sm:$0xff] %v9682_v54  ;;  %v9684_v50 = vpack.c.bf16 %v4229_v35, %v4225_v7  ;;  %v2953_v39 = vand.u32 4294901760, %v250_v24  ;;  %v4233_v60 = vand.u32 4294901760, %v244_v63 }
 0x1db   :  { %5790 = vmatprep.subr.bf16.mxu0 %v13100_v4  ;;  %13102 = vst [vmem:[#allocation83_spill] sm:$0xff] %v9678_v1  ;;  %13106 = vst [vmem:[#allocation95_spill] sm:$0xff] %v9686_v0  ;;  %v241_v3 = vld [vmem:[%s11313_s1 + $0x720] sm:$0xff]  ;;  %v13107_v43 = vld [vmem:[#allocation155_spill] sm:$0xff]  ;;  %v9695_v17 = vsub.f32 %v236_v6, %v4229_v35  ;;  %v9697_v56 = vpack.c.bf16 %v2947_v19, %v2943_v2  ;;  %v4237_v18 = vand.u32 4294901760, %v252_v46 }
 0x1dc   :  { %13103 = vst [vmem:[#allocation90_spill] sm:$0xff] %v9680_v47  ;;  %13105 = vst [vmem:[#allocation98_spill] sm:$0xff] %v9684_v50  ;;  %v249_v30 = vld [vmem:[%s11313_s1 + $0x760] sm:$0xff]  ;;  %6172 = vmatpush1.bf16.msra.mxu1 %v13107_v43  ;;  %v243_v62 = vld [vmem:[%s11313_s1 + $0x730] sm:$0xff]  ;;  %v9707_v54 = vsub.f32 %v225_v48, %v2943_v2  ;;  %v9709_v6 = vsub.f32 %v233_v42, %v2947_v19  ;;  %v9711_v35 = vpack.c.bf16 %v4231_v32, %v4227_v52 }
 0x1dd   :  { %13108 = vst [vmem:[#allocation102_spill] sm:$0xff] %v9695_v17  ;;  %13109 = vst [vmem:[#allocation104_spill] sm:$0xff] %v9697_v56  ;;  %v251_v7 = vld [vmem:[%s11313_s1 + $0x770] sm:$0xff]  ;;  %v13110_v4 = vld [vmem:[#allocation162_spill] sm:$0xff]  ;;  %v9717_v47 = vsub.f32 %v227_v5, %v4227_v52  ;;  %v9719_v22 = vsub.f32 %v235_v10, %v4231_v32  ;;  %v2951_v56 = vand.u32 4294901760, %v241_v3  ;;  %v9730_v2 = vpack.c.bf16 %v2953_v39, %v2949_v41 }
 0x1de   :  { %6174 = vmatprep.subr.bf16.mxu1 %v13110_v4  ;;  %v13111_v0 = vld [vmem:[#allocation164_spill] sm:$0xff]  ;;  %13112 = vst [vmem:[#allocation110_spill] sm:$0xff] %v9707_v54  ;;  %13113 = vst [vmem:[#allocation107_spill] sm:$0xff] %v9709_v6  ;;  %v258_v43 = vld [vmem:[%s11313_s1 + $0x7a8] sm:$0xff]  ;;  %v2955_v4 = vand.u32 4294901760, %v249_v30  ;;  %v9732_v5 = vsub.f32 %v242_v61, %v2949_v41  ;;  %v4235_v10 = vand.u32 4294901760, %v243_v62  ;;  %v9745_v6 = vsub.f32 %v244_v63, %v4233_v60 }
 0x1df   :  { %5792 = vmatpush1.bf16.msra.mxu0 %v13111_v0  ;;  %13114 = vst [vmem:[#allocation114_spill] sm:$0xff] %v9711_v35  ;;  %v13115_v17 = vld [vmem:[#allocation170_spill] sm:$0xff]  ;;  %13116 = vst [vmem:[#allocation116_spill] sm:$0xff] %v9717_v47  ;;  %v266_v48 = vld [vmem:[%s11313_s1 + $0x7e8] sm:$0xff]  ;;  %v4239_v0 = vand.u32 4294901760, %v251_v7  ;;  %v9743_v47 = vpack.c.bf16 %v4237_v18, %v4233_v60  ;;  %v9747_v61 = vsub.f32 %v252_v46, %v4237_v18 }
 0x1e0   :  { %5794 = vmatprep.subr.bf16.mxu0 %v13115_v17  ;;  %13117 = vst [vmem:[#allocation122_spill] sm:$0xff] %v9719_v22  ;;  %v260_v19 = vld [vmem:[%s11313_s1 + $0x7b8] sm:$0xff]  ;;  %13118 = vst [vmem:[#allocation119_spill] sm:$0xff] %v9730_v2  ;;  %v257_v52 = vld [vmem:[%s11313_s1 + $0x7a0] sm:$0xff]  ;;  %v9741_v22 = vsub.f32 %v250_v24, %v2953_v39  ;;  %v2957_v24 = vand.u32 4294901760, %v258_v43  ;;  %v9762_v18 = vpack.c.bf16 %v2955_v4, %v2951_v56 }
 0x1e1   :  { %v268_v42 = vld [vmem:[%s11313_s1 + $0x7f8] sm:$0xff]  ;;  %13119 = vst [vmem:[#allocation126_spill] sm:$0xff] %v9732_v5  ;;  %v265_v32 = vld [vmem:[%s11313_s1 + $0x7e0] sm:$0xff]  ;;  %v13120_v17 = vld [vmem:[#allocation167_spill] sm:$0xff]  ;;  %v4241_v63 = vand.u32 4294901760, %v260_v19  ;;  %v9768_v35 = vpack.c.bf16 %v4239_v0, %v4235_v10  ;;  %v9773_v50 = vsub.f32 %v243_v62, %v4235_v10  ;;  %v9775_v1 = vsub.f32 %v251_v7, %v4239_v0 }
 0x1e2   :  { %6176 = vmatpush1.bf16.msra.mxu1 %v13120_v17  ;;  %13121 = vst [vmem:[#allocation128_spill] sm:$0xff] %v9741_v22  ;;  %13122 = vst [vmem:[#allocation134_spill] sm:$0xff] %v9743_v47  ;;  %v9752_v41 = vld [vmem:[%s11313_s1 + $0x7b0] sm:$0xff]  ;;  %v13125_v54 = vld [vmem:[#allocation174_spill] sm:$0xff]  ;;  %v2961_v17 = vand.u32 4294901760, %v266_v48  ;;  %v4245_v60 = vand.u32 4294901760, %v268_v42  ;;  %v9766_v47 = vsub.f32 %v249_v30, %v2955_v4 }
 0x1e3   :  { %13123 = vst [vmem:[#allocation131_spill] sm:$0xff] %v9745_v6  ;;  %13124 = vst [vmem:[#allocation138_spill] sm:$0xff] %v9747_v61  ;;  %v9757_v5 = vld [vmem:[%s11313_s1 + $0x7f0] sm:$0xff]  ;;  %6178 = vmatprep.subr.bf16.mxu1 %v13125_v54  ;;  %v13127_v46 = vld [vmem:[#allocation182_spill] sm:$0xff]  ;;  %v9764_v61 = vsub.f32 %v241_v3, %v2951_v56  ;;  %v2959_v6 = vand.u32 4294901760, %v257_v52  ;;  %v2963_v22 = vand.u32 4294901760, %v265_v32  ;;  %v9790_v62 = vsub.f32 %v260_v19, %v4241_v63 }
 0x1e4   :  { %v13126_v39 = vld [vmem:[#allocation176_spill] sm:$0xff]  ;;  %13128 = vst [vmem:[#allocation140_spill] sm:$0xff] %v9762_v18  ;;  %13129 = vst [vmem:[#allocation146_spill] sm:$0xff] %v9766_v47  ;;  %v13131_v2 = vld [vmem:[#allocation179_spill] sm:$0xff]  ;;  %v11976_v3 = vand.u32 4294901760, %v8992_v53  ;;  %v9782_v4 = vpack.c.bf16 %v2961_v17, %v2957_v24  ;;  %v9784_v47 = vsub.f32 %v266_v48, %v2961_v17  ;;  %v9786_v54 = vpack.c.bf16 %v4245_v60, %v4241_v63 }
 0x1e5   :  { %5796 = vmatpush1.bf16.msra.mxu0 %v13126_v39  ;;  %13130 = vst [vmem:[#allocation143_spill] sm:$0xff] %v9768_v35  ;;  %v11977_v39 = vand.u32 4294901760, %v9757_v5  ;;  %13132 = vst [vmem:[#allocation150_spill] sm:$0xff] %v9773_v50  ;;  %v13135_v56 = vld [vmem:[#allocation187_spill] sm:$0xff]  ;;  %v13136_v30 = vld [vmem:[#allocation189_spill] sm:$0xff]  ;;  %v9792_v7 = vsub.f32 %v268_v42, %v4245_v60  ;;  %v9796_v10 = vsub.f32 %v257_v52, %v2959_v6  ;;  %v11979_v17 = vand.u32 4294901760, %v9006_v13 }
 0x1e6   :  { %5798 = vmatprep.subr.bf16.mxu0 %v13127_v46  ;;  %6180 = vmatpush1.bf16.msra.mxu1 %v13131_v2  ;;  %13133 = vst [vmem:[#allocation152_spill] sm:$0xff] %v9775_v1  ;;  %v9777_v46 = vsub.f32 %v258_v43, %v2957_v24  ;;  %13137 = vst [vmem:[#allocation155_spill] sm:$0xff] %v9782_v4  ;;  %v11978_v2 = vand.u32 4294901760, %v8994_v21  ;;  %v9794_v43 = vpack.c.bf16 %v2963_v22, %v2959_v6  ;;  %v13147_v19 = vld [vmem:[#allocation192_spill] sm:$0xff]  ;;  %v13271_v50 = vld [vmem:[#allocation26_spill] sm:$0xff] }
 0x1e7   :  { %6182 = vmatprep.subr.bf16.mxu1 %v13135_v56  ;;  %13138 = vst [vmem:[#allocation162_spill] sm:$0xff] %v9784_v47  ;;  %13139 = vst [vmem:[#allocation164_spill] sm:$0xff] %v9786_v54  ;;  %v9798_v0 = vsub.f32 %v265_v32, %v2963_v22  ;;  %v13145_v24 = vand.u32 4294901760, %v9752_v41  ;;  %v11980_v56 = vand.u32 4294901760, %v9008_v27  ;;  %v9813_v6 = vsub.f32 %v8992_v53, %v11976_v3 }
 0x1e8   :  { %13134 = vst [vmem:[#allocation158_spill] sm:$0xff] %v9777_v46  ;;  %13140 = vst [vmem:[#allocation170_spill] sm:$0xff] %v9790_v62  ;;  %v11981_v22 = vand.u32 4294901760, %v9016_v26  ;;  %v11982_v42 = vand.u32 4294901760, %v9018_v11  ;;  %v9823_v32 = vsub.f32 %v8994_v21, %v11978_v2  ;;  %v11987_v63 = vand.u32 4294901760, %v9036_v31 }
 0x1e9   :  { %5800 = vmatpush1.bf16.msra.mxu0 %v13136_v30  ;;  %13141 = vst [vmem:[#allocation167_spill] sm:$0xff] %v9792_v7  ;;  %13142 = vst [vmem:[#allocation174_spill] sm:$0xff] %v9794_v43  ;;  %v9804_v48 = vpack.c.bf16 %v11977_v39, %v13145_v24  ;;  %v13148_v24 = vld [vmem:[#allocation200_spill] sm:$0xff]  ;;  %v4269_v2 = vsub.f32 %v9006_v13, %v11979_v17  ;;  %v4281_v30 = vsub.f32 %v9008_v27, %v11980_v56  ;;  %v13213_v27 = vld [vmem:[#allocation53_spill] sm:$0xff] }
 0x1ea   :  { %6186 = vmatprep.subr.bf16.mxu0 %v8984_v20  ;;  %13143 = vst [vmem:[#allocation176_spill] sm:$0xff] %v9796_v10  ;;  %13144 = vst [vmem:[#allocation182_spill] sm:$0xff] %v9798_v0  ;;  %6184 = vmatpush1.bf16.msra.mxu1 %v13147_v19  ;;  %v2986_v39 = vand.u32 4294901760, %v9813_v6  ;;  %v2991_v52 = vsub.f32 %v9016_v26, %v11981_v22  ;;  %v3003_v17 = vsub.f32 %v9018_v11, %v11982_v42  ;;  %v13211_v11 = vld [vmem:[#allocation27_spill] sm:$0xff]  ;;  %v13215_v13 = vld [vmem:[#allocation69_spill] sm:$0xff] }
 0x1eb   :  { %13146 = vst [vmem:[#allocation179_spill] sm:$0xff] %v9804_v48  ;;  %6570 = vmatprep.subr.bf16.mxu1 %v8996_v14  ;;  %v13149_v56 = vand.u32 4294901760, %v9028_v51  ;;  %v2998_v6 = vand.u32 4294901760, %v9823_v32  ;;  %v13150_v22 = vand.u32 4294901760, %v9038_v58  ;;  %v13151_v42 = vand.u32 4294901760, %v9042_v28  ;;  %v13268_v10 = vld [vmem:[#allocation67_spill] sm:$0xff] }
 0x1ec   :  { %1547 = vmatmul.mubr.f32.vlgmr.msra.gmra.mrb[0].mxu0 %v12934_v45  ;;  %v13153_v32 = vand.u32 4294901760, %v9054_v15  ;;  %v13157_v14 = vand.u32 4294901760, %v9087_v29 }
 0x1ed   :  { %6188 = vmatpush1.bf16.msra.mxu0 %v8998_v55  ;;  %2970 = vmatprep.mubr.f32.mxu0 %v13148_v24  ;;  %v4275_v60 = vsub.f32 %v9028_v51, %v13149_v56  ;;  %v3009_v19 = vsub.f32 %v9038_v58, %v13150_v22  ;;  %v3021_v3 = vsub.f32 %v9042_v28, %v13151_v42  ;;  %v13152_v56 = vand.u32 4294901760, %v9052_v23  ;;  %v13191_v51 = vld [vmem:[#allocation23_spill] sm:$0xff]  ;;  %v13208_v58 = vld [vmem:[#allocation44_spill] sm:$0xff] }
 0x1ee   :  { %6190 = vmatprep.subr.bf16.mxu0 %v9040_v12  ;;  %2831 = vmatmul.mubr.f32.vlgmr.msra.gmra.mrb[0].mxu1 %v12934_v45  ;;  %v13155_v22 = vand.u32 4294901760, %v9060_v36  ;;  %v4270_v55 = vand.u32 4294901760, %v4269_v2  ;;  %v13156_v42 = vand.u32 4294901760, %v9074_v44  ;;  %v13194_v45 = vld [vmem:[#allocation39_spill] sm:$0xff] }
 0x1ef   :  { %6572 = vmatpush1.bf16.msra.mxu1 %v9026_v8  ;;  %4254 = vmatprep.mubr.f32.mxu1 %v13148_v24  ;;  %v4287_v24 = vsub.f32 %v9036_v31, %v11987_v63  ;;  %v13154_v63 = vand.u32 4294901760, %v9058_v49  ;;  %v4276_v2 = vand.u32 4294901760, %v4275_v60  ;;  %v13162_v60 = vand.u32 4294901760, %v9752_v41  ;;  %v13190_v31 = vld [vmem:[#allocation12_spill] sm:$0xff] }
 0x1f0   :  { %6574 = vmatprep.subr.bf16.mxu1 %v9050_v37  ;;  %v4305_v37 = vsub.f32 %v9054_v15, %v13153_v32  ;;  %v3027_v12 = vsub.f32 %v9060_v36, %v13155_v22  ;;  %v4282_v32 = vand.u32 4294901760, %v4281_v30  ;;  %v2992_v15 = vand.u32 4294901760, %v2991_v52 }
 0x1f1   :  { %6192 = vmatpush1.bf16.msra.mxu0 %v9056_v33  ;;  %v4293_v33 = vsub.f32 %v9052_v23, %v13152_v56  ;;  %v3015_v8 = vsub.f32 %v9058_v49, %v13154_v63  ;;  %v4311_v56 = vsub.f32 %v9087_v29, %v13157_v14  ;;  %v3004_v63 = vand.u32 4294901760, %v3003_v17  ;;  %v13158_v23 = vld [vmem:[#allocation94_spill] sm:$0xff]  ;;  %v13160_v49 = vld [vmem:[#allocation99_spill] sm:$0xff] }
 0x1f2   :  { %6194 = vmatprep.subr.bf16.mxu0 %v9089_v34  ;;  %v4299_v34 = vsub.f32 %v9074_v44, %v13156_v42  ;;  %v4288_v22 = vand.u32 4294901760, %v4287_v24  ;;  %v3010_v42 = vand.u32 4294901760, %v3009_v19  ;;  %v3022_v44 = vand.u32 4294901760, %v3021_v3  ;;  %v13167_v24 = vld [vmem:[#allocation153_spill] sm:$0xff] }
 0x1f3   :  { %6576 = vmatpush1.bf16.msra.mxu1 %v9072_v38  ;;  %v4294_v14 = vand.u32 4294901760, %v4293_v33  ;;  %v4306_v29 = vand.u32 4294901760, %v4305_v37  ;;  %v3016_v20 = vand.u32 4294901760, %v3015_v8  ;;  %v3028_v36 = vand.u32 4294901760, %v3027_v12  ;;  %v13165_v12 = vld [vmem:[#allocation100_spill] sm:$0xff] }
 0x1f4   :  { %6578 = vmatprep.subr.bf16.mxu1 %v13158_v23  ;;  %v4300_v38 = vand.u32 4294901760, %v4299_v34  ;;  %v4312_v30 = vand.u32 4294901760, %v4311_v56  ;;  %v13159_v17 = vand.u32 4294901760, %v9091_v59  ;;  %v9902_v3 = vsub.f32 %v9752_v41, %v13162_v60  ;;  %v13166_v34 = vld [vmem:[#allocation97_spill] sm:$0xff]  ;;  %v13168_v56 = vld [vmem:[#allocation4_spill] sm:$0xff] }
 0x1f5   :  { %6196 = vmatpush1.bf16.msra.mxu0 %v9115_v9  ;;  %v13161_v9 = vld [vmem:[#allocation147_spill] sm:$0xff]  ;;  %v13164_v37 = vand.u32 4294901760, %v9094_v57  ;;  %v9918_v41 = vpack.c.bf16 %v2998_v6, %v2986_v39  ;;  %v9920_v60 = vpack.c.bf16 %v4282_v32, %v4270_v55  ;;  %v9924_v33 = vpack.c.bf16 %v3004_v63, %v2992_v15  ;;  %v13174_v32 = vld [vmem:[#allocation9_spill] sm:$0xff] }
 0x1f6   :  { %6198 = vmatprep.subr.bf16.mxu0 %v9142_v16  ;;  %v9895_v52 = vsub.f32 %v9091_v59, %v13159_v17  ;;  %13163 = vst [vmem:[#allocation187_spill] sm:$0xff] %v9902_v3  ;;  %v13169_v17 = vand.u32 4294901760, %v9757_v5  ;;  %v13172_v16 = vld [vmem:[#allocation16_spill] sm:$0xff]  ;;  %v9926_v19 = vpack.c.bf16 %v4288_v22, %v4276_v2  ;;  %v13173_v55 = vand.u32 4294901760, %v13160_v49  ;;  %v13178_v2 = vld [vmem:[#allocation18_spill] sm:$0xff]  ;;  %v13183_v39 = vld [vmem:[#allocation31_spill] sm:$0xff] }
 0x1f7   :  { %6580 = vmatpush1.bf16.msra.mxu1 %v13161_v9  ;;  %v9907_v8 = vsub.f32 %v9094_v57, %v13164_v37  ;;  %v13171_v9 = vld [vmem:[#allocation101_spill] sm:$0xff]  ;;  %v9932_v57 = vpack.c.bf16 %v3028_v36, %v3016_v20  ;;  %v13176_v20 = vand.u32 4294901760, %v13166_v34  ;;  %v13179_v22 = vld [vmem:[#allocation22_spill] sm:$0xff]  ;;  %v13185_v63 = vld [vmem:[#allocation3_spill] sm:$0xff] }
 0x1f8   :  { %6582 = vmatprep.subr.bf16.mxu1 %v13167_v24  ;;  %v9916_v23 = vsub.f32 %v9757_v5, %v13169_v17  ;;  %v12023_v37 = vand.u32 4294901760, %v13171_v9  ;;  %v9928_v24 = vpack.c.bf16 %v3022_v44, %v3010_v42  ;;  %v9934_v5 = vpack.c.bf16 %v4312_v30, %v4300_v38  ;;  %v13177_v38 = vld [vmem:[#allocation103_spill] sm:$0xff]  ;;  %v13181_v17 = vld [vmem:[#allocation149_spill] sm:$0xff]  ;;  %v13189_v59 = vld [vmem:[#allocation14_spill] sm:$0xff] }
 0x1f9   :  { %6200 = vmatpush1.bf16.msra.mxu0 %v13168_v56  ;;  %v9930_v56 = vpack.c.bf16 %v4306_v29, %v4294_v14  ;;  %v9940_v6 = vsub.f32 %v13160_v49, %v13173_v55  ;;  %v13175_v44 = vand.u32 4294901760, %v13165_v12  ;;  %v9952_v36 = vsub.f32 %v13166_v34, %v13176_v20  ;;  %v13180_v14 = vld [vmem:[#allocation145_spill] sm:$0xff]  ;;  %v13184_v20 = vld [vmem:[#allocation156_spill] sm:$0xff] }
 0x1fa   :  { %13170 = vst [vmem:[#allocation189_spill] sm:$0xff] %v9916_v23  ;;  %6202 = vmatprep.subr.bf16.mxu0 %v13172_v16  ;;  %v9960_v42 = vsub.f32 %v13171_v9, %v12023_v37  ;;  %v13188_v37 = vld [vmem:[#allocation10_spill] sm:$0xff]  ;;  %v13192_v16 = vand.u32 4294901760, %v13177_v38  ;;  %v13196_v55 = vand.u32 4294901760, %v13180_v14  ;;  %v13264_v3 = vld [vmem:[#allocation188_spill] sm:$0xff] }
 0x1fb   :  { %6584 = vmatpush1.bf16.msra.mxu1 %v13174_v32  ;;  %v9947_v29 = vsub.f32 %v13165_v12, %v13175_v44  ;;  %v13182_v44 = vld [vmem:[#allocation154_spill] sm:$0xff]  ;;  %v4318_v49 = vand.u32 4294901760, %v9940_v6  ;;  %v3040_v32 = vand.u32 4294901760, %v9952_v36  ;;  %v13195_v6 = vld [vmem:[#allocation37_spill] sm:$0xff]  ;;  %v13200_v12 = vand.u32 4294901760, %v13184_v20 }
 0x1fc   :  { %6586 = vmatprep.subr.bf16.mxu1 %v13178_v2  ;;  %v13186_v2 = vld [vmem:[#allocation5_spill] sm:$0xff]  ;;  %v4323_v34 = vsub.f32 %v13177_v38, %v13192_v16  ;;  %v3052_v30 = vand.u32 4294901760, %v9960_v42  ;;  %v4335_v9 = vsub.f32 %v13180_v14, %v13196_v55  ;;  %v13199_v38 = vld [vmem:[#allocation52_spill] sm:$0xff]  ;;  %v13201_v42 = vand.u32 4294901760, %v13185_v63 }
 0x1fd   :  { %6204 = vmatpush1.bf16.msra.mxu0 %v13179_v22  ;;  %v13187_v22 = vld [vmem:[#allocation7_spill] sm:$0xff]  ;;  %v4330_v15 = vand.u32 4294901760, %v9947_v29  ;;  %v13197_v29 = vand.u32 4294901760, %v13181_v17  ;;  %v13202_v55 = vand.u32 4294901760, %v13186_v2 }
 0x1fe   :  { %6206 = vmatprep.subr.bf16.mxu0 %v13183_v39  ;;  %v13193_v39 = vld [vmem:[#allocation13_spill] sm:$0xff] }
 0x1ff   :  { %6588 = vmatpush1.bf16.msra.mxu1 %v13191_v51  ;;  %v3057_v36 = vsub.f32 %v13181_v17, %v13197_v29  ;;  %v13198_v51 = vand.u32 4294901760, %v13182_v44  ;;  %v3063_v14 = vsub.f32 %v13186_v2, %v13202_v55  ;;  %v13203_v29 = vand.u32 4294901760, %v13187_v22 }
 0x200   :  { %6590 = vmatprep.subr.bf16.mxu1 %v13194_v45  ;;  %v4353_v45 = vsub.f32 %v13185_v63, %v13201_v42  ;;  %v13207_v63 = vld [vmem:[#allocation19_spill] sm:$0xff]  ;;  %v13209_v55 = vand.u32 4294901760, %v13193_v39 }
 0x201   :  { %6208 = vmatpush1.bf16.msra.mxu0 %v13195_v6  ;;  %v3069_v16 = vsub.f32 %v13182_v44, %v13198_v51  ;;  %v4341_v6 = vsub.f32 %v13184_v20, %v13200_v12  ;;  %v3075_v17 = vsub.f32 %v13187_v22, %v13203_v29  ;;  %v13204_v51 = vand.u32 4294901760, %v13188_v37  ;;  %v13210_v22 = vld [vmem:[#allocation20_spill] sm:$0xff] }
 0x202   :  { %6210 = vmatprep.subr.bf16.mxu0 %v13199_v38  ;;  %v13205_v44 = vand.u32 4294901760, %v13189_v59  ;;  %v13206_v20 = vand.u32 4294901760, %v13190_v31  ;;  %v3093_v29 = vsub.f32 %v13193_v39, %v13209_v55  ;;  %v4354_v21 = vand.u32 4294901760, %v4353_v45 }
 0x203   :  { %v4347_v38 = vsub.f32 %v13188_v37, %v13204_v51  ;;  %6592 = vmatpush1.bf16.msra.mxu1 %v13208_v58  ;;  %v13212_v37 = vld [vmem:[#allocation28_spill] sm:$0xff]  ;;  %v3070_v28 = vand.u32 4294901760, %v3069_v16  ;;  %v4342_v58 = vand.u32 4294901760, %v4341_v6  ;;  %v3064_v53 = vand.u32 4294901760, %v3063_v14  ;;  %v13221_v6 = vld [vmem:[#allocation75_spill] sm:$0xff]  ;;  %v13222_v16 = vld [vmem:[#allocation73_spill] sm:$0xff] }
 0x204   :  { %v4359_v12 = vsub.f32 %v13189_v59, %v13205_v44  ;;  %v3081_v42 = vsub.f32 %v13190_v31, %v13206_v20  ;;  %6594 = vmatprep.subr.bf16.mxu1 %v13213_v27  ;;  %v13214_v44 = vld [vmem:[#allocation58_spill] sm:$0xff]  ;;  %v4324_v59 = vand.u32 4294901760, %v4323_v34  ;;  %v4336_v20 = vand.u32 4294901760, %v4335_v9  ;;  %v13217_v27 = vld [vmem:[#allocation60_spill] sm:$0xff] }
 0x205   :  { %6212 = vmatpush1.bf16.msra.mxu0 %v13214_v44  ;;  %v3058_v31 = vand.u32 4294901760, %v3057_v36  ;;  %v3076_v55 = vand.u32 4294901760, %v3075_v17  ;;  %v4348_v39 = vand.u32 4294901760, %v4347_v38  ;;  %v13216_v51 = vand.u32 4294901760, %v13207_v63 }
 0x206   :  { %6214 = vmatprep.subr.bf16.mxu0 %v13215_v13  ;;  %v4360_v2 = vand.u32 4294901760, %v4359_v12  ;;  %v3082_v23 = vand.u32 4294901760, %v3081_v42  ;;  %v3094_v34 = vand.u32 4294901760, %v3093_v29  ;;  %v13218_v9 = vand.u32 4294901760, %v13210_v22  ;;  %v13227_v13 = vld [vmem:[#allocation33_spill] sm:$0xff] }
 0x207   :  { %v10029_v26 = vsub.f32 %v13207_v63, %v13216_v51  ;;  %6596 = vmatpush1.bf16.msra.mxu1 %v13217_v27  ;;  %v13219_v45 = vand.u32 4294901760, %v13211_v11  ;;  %v13220_v38 = vand.u32 4294901760, %v13212_v37  ;;  %v13223_v12 = vand.u32 4294901760, %v9895_v52  ;;  %v13225_v51 = vld [vmem:[#allocation25_spill] sm:$0xff]  ;;  %v13226_v27 = vld [vmem:[#allocation30_spill] sm:$0xff] }
 0x208   :  { %v10035_v36 = vsub.f32 %v13210_v22, %v13218_v9  ;;  %6598 = vmatprep.subr.bf16.mxu1 %v13221_v6  ;;  %v13224_v42 = vand.u32 4294901760, %v9907_v8  ;;  %v12063_v9 = vand.u32 4294901760, %v13225_v51  ;;  %v10063_v6 = vpack.c.bf16 %v4336_v20, %v4324_v59  ;;  %v13235_v20 = vld [vmem:[#allocation36_spill] sm:$0xff]  ;;  %v13237_v59 = vld [vmem:[#allocation43_spill] sm:$0xff]  ;;  %v13247_v63 = vld [vmem:[#allocation169_spill] sm:$0xff] }
 0x209   :  { %v10040_v14 = vsub.f32 %v13211_v11, %v13219_v45  ;;  %v10045_v17 = vsub.f32 %v13212_v37, %v13220_v38  ;;  %6216 = vmatpush1.bf16.msra.mxu0 %v13222_v16  ;;  %v13228_v11 = vld [vmem:[#allocation136_spill] sm:$0xff]  ;;  %v10059_v38 = vpack.c.bf16 %v4330_v15, %v4318_v49  ;;  %v10061_v37 = vpack.c.bf16 %v3052_v30, %v3040_v32  ;;  %v13229_v45 = vld [vmem:[#allocation81_spill] sm:$0xff]  ;;  %v13238_v49 = vld [vmem:[#allocation46_spill] sm:$0xff] }
 0x20a   :  { %v10053_v29 = vpack.c.bf16 %v13224_v42, %v13223_v12  ;;  %6218 = vmatprep.subr.bf16.mxu0 %v13228_v11  ;;  %v10065_v16 = vpack.c.bf16 %v3070_v28, %v3058_v31  ;;  %v10067_v52 = vpack.c.bf16 %v4354_v21, %v4342_v58  ;;  %v10069_v8 = vpack.c.bf16 %v3076_v55, %v3064_v53  ;;  %v13230_v31 = vld [vmem:[#allocation133_spill] sm:$0xff]  ;;  %v13239_v42 = vld [vmem:[#allocation51_spill] sm:$0xff]  ;;  %v13246_v22 = vld [vmem:[#allocation64_spill] sm:$0xff] }
 0x20b   :  { %v10071_v12 = vpack.c.bf16 %v4360_v2, %v4348_v39  ;;  %6600 = vmatpush1.bf16.msra.mxu1 %v13229_v45  ;;  %v10075_v44 = vpack.c.bf16 %v3094_v34, %v3082_v23  ;;  %v10085_v53 = vsub.f32 %v13225_v51, %v12063_v9  ;;  %v13231_v21 = vand.u32 4294901760, %v13226_v27  ;;  %v13233_v39 = vld [vmem:[#allocation34_spill] sm:$0xff]  ;;  %v13234_v2 = vld [vmem:[#allocation40_spill] sm:$0xff]  ;;  %v13243_v15 = vld [vmem:[#allocation55_spill] sm:$0xff] }
 0x20c   :  { %6602 = vmatprep.subr.bf16.mxu1 %v13230_v31  ;;  %v13232_v28 = vand.u32 4294901760, %v13227_v13  ;;  %v13236_v34 = vld [vmem:[#allocation42_spill] sm:$0xff]  ;;  %v13240_v31 = vld [vmem:[#allocation48_spill] sm:$0xff]  ;;  %v13244_v51 = vld [vmem:[#allocation57_spill] sm:$0xff]  ;;  %v13251_v55 = vand.u32 4294901760, %v13234_v2  ;;  %v13252_v30 = vand.u32 4294901760, %v13235_v20 }
 0x20d   :  { %6220 = vmatpush1.bf16.msra.mxu0 %v9438_v40  ;;  %v10090_v58 = vsub.f32 %v13226_v27, %v13231_v21  ;;  %v13242_v27 = vld [vmem:[#allocation160_spill] sm:$0xff]  ;;  %v13248_v32 = vld [vmem:[#allocation173_spill] sm:$0xff]  ;;  %v4372_v40 = vand.u32 4294901760, %v10085_v53  ;;  %v13249_v21 = vand.u32 4294901760, %v13233_v39  ;;  %v13253_v53 = vand.u32 4294901760, %v13236_v34 }
 0x20e   :  { %v10095_v23 = vsub.f32 %v13227_v13, %v13232_v28  ;;  %6222 = vmatprep.subr.bf16.mxu0 %v9466_v25  ;;  %v13241_v28 = vld [vmem:[#allocation49_spill] sm:$0xff]  ;;  %v13245_v13 = vld [vmem:[#allocation63_spill] sm:$0xff]  ;;  %v4389_v9 = vsub.f32 %v13234_v2, %v13251_v55  ;;  %v13257_v2 = vand.u32 4294901760, %v13240_v31 }
 0x20f   :  { %6604 = vmatpush1.bf16.msra.mxu1 %v13242_v27  ;;  %v4384_v45 = vand.u32 4294901760, %v10090_v58  ;;  %v3117_v25 = vsub.f32 %v13233_v39, %v13249_v21  ;;  %v13250_v27 = vld [vmem:[#allocation183_spill] sm:$0xff]  ;;  %v3111_v58 = vsub.f32 %v13236_v34, %v13253_v53  ;;  %v13255_v21 = vand.u32 4294901760, %v13238_v49  ;;  %v13259_v34 = vld [vmem:[#allocation178_spill] sm:$0xff] }
 0x210   :  { %6606 = vmatprep.subr.bf16.mxu1 %v13247_v63  ;;  %v3106_v11 = vand.u32 4294901760, %v10095_v23  ;;  %v13254_v23 = vand.u32 4294901760, %v13237_v59  ;;  %v13256_v39 = vand.u32 4294901760, %v13239_v42 }
 0x211   :  { %6224 = vmatpush1.bf16.msra.mxu0 %v13248_v32  ;;  %v4401_v32 = vsub.f32 %v13235_v20, %v13252_v30  ;;  %v3129_v30 = vsub.f32 %v13240_v31, %v13257_v2  ;;  %v13258_v20 = vand.u32 4294901760, %v13241_v28  ;;  %v13263_v2 = vand.u32 4294901760, %v13246_v22 }
 0x212   :  { %6226 = vmatprep.subr.bf16.mxu0 %v13250_v27  ;;  %v3123_v63 = vsub.f32 %v13237_v59, %v13254_v23  ;;  %v4395_v27 = vsub.f32 %v13238_v49, %v13255_v21  ;;  %v4407_v55 = vsub.f32 %v13239_v42, %v13256_v39  ;;  %v13260_v23 = vand.u32 4294901760, %v13243_v15 }
 0x213   :  { %v3141_v53 = vsub.f32 %v13241_v28, %v13258_v20  ;;  %6608 = vmatpush1.bf16.msra.mxu1 %v13259_v34  ;;  %v13261_v21 = vand.u32 4294901760, %v13244_v51  ;;  %v13262_v39 = vand.u32 4294901760, %v13245_v13  ;;  %v3147_v31 = vsub.f32 %v13246_v22, %v13263_v2  ;;  %v13265_v20 = vld [vmem:[#allocation193_spill] sm:$0xff] }
 0x214   :  { %v4413_v59 = vsub.f32 %v13243_v15, %v13260_v23  ;;  %6610 = vmatprep.subr.bf16.mxu1 %v13264_v3  ;;  %v3118_v34 = vand.u32 4294901760, %v3117_v25  ;;  %v13266_v28 = vld [vmem:[#allocation61_spill] sm:$0xff]  ;;  %v4402_v62 = vand.u32 4294901760, %v4401_v32  ;;  %v4396_v47 = vand.u32 4294901760, %v4395_v27  ;;  %v13270_v3 = vld [vmem:[#allocation6_spill] sm:$0xff] }
 0x215   :  { %v4425_v49 = vsub.f32 %v13244_v51, %v13261_v21  ;;  %v3135_v42 = vsub.f32 %v13245_v13, %v13262_v39  ;;  %6228 = vmatpush1.bf16.msra.mxu0 %v13265_v20  ;;  %v13267_v23 = vld [vmem:[#allocation65_spill] sm:$0xff]  ;;  %v13269_v21 = vld [vmem:[#allocation11_spill] sm:$0xff]  ;;  %v4390_v51 = vand.u32 4294901760, %v4389_v9  ;;  %v3112_v39 = vand.u32 4294901760, %v3111_v58  ;;  %v13272_v15 = vld [vmem:[#allocation38_spill] sm:$0xff] }
 0x216   :  { %6230 = vmatprep.subr.bf16.mxu0 %v13269_v21  ;;  %v3124_v13 = vand.u32 4294901760, %v3123_v63  ;;  %v4408_v46 = vand.u32 4294901760, %v4407_v55  ;;  %v3130_v2 = vand.u32 4294901760, %v3129_v30  ;;  %v3142_v22 = vand.u32 4294901760, %v3141_v53  ;;  %v13299_v21 = vld [vmem:[#allocation157_spill] sm:$0xff] }
 0x217   :  { %6612 = vmatpush1.bf16.msra.mxu1 %v13270_v3  ;;  %v4414_v20 = vand.u32 4294901760, %v4413_v59  ;;  %v4426_v25 = vand.u32 4294901760, %v4425_v49  ;;  %v3136_v1 = vand.u32 4294901760, %v3135_v42  ;;  %v3148_v0 = vand.u32 4294901760, %v3147_v31  ;;  %v13276_v59 = vld [vmem:[#allocation70_spill] sm:$0xff]  ;;  %v13277_v42 = vld [vmem:[#allocation47_spill] sm:$0xff] }
 0x218   :  { %6614 = vmatprep.subr.bf16.mxu1 %v13271_v50  ;;  %v13273_v7 = vand.u32 4294901760, %v13266_v28  ;;  %v13274_v63 = vand.u32 4294901760, %v13267_v23  ;;  %v13275_v32 = vand.u32 4294901760, %v13268_v10  ;;  %v13278_v31 = vand.u32 4294901760, %v10029_v26  ;;  %v13282_v50 = vld [vmem:[#allocation76_spill] sm:$0xff] }
 0x219   :  { %6232 = vmatpush1.bf16.msra.mxu0 %v13272_v15  ;;  %v13279_v55 = vand.u32 4294901760, %v10035_v36  ;;  %v13281_v53 = vand.u32 4294901760, %v10045_v17  ;;  %v10193_v3 = vpack.c.bf16 %v3118_v34, %v3106_v11  ;;  %v10195_v49 = vpack.c.bf16 %v4402_v62, %v4390_v51  ;;  %v13283_v36 = vld [vmem:[#allocation41_spill] sm:$0xff]  ;;  %v13286_v11 = vld [vmem:[#allocation68_spill] sm:$0xff]  ;;  %v13288_v34 = vld [vmem:[#allocation83_spill] sm:$0xff] }
 0x21a   :  { %v4419_v9 = vsub.f32 %v13266_v28, %v13273_v7  ;;  %v4431_v27 = vsub.f32 %v13267_v23, %v13274_v63  ;;  %v3153_v58 = vsub.f32 %v13268_v10, %v13275_v32  ;;  %6234 = vmatprep.subr.bf16.mxu0 %v13277_v42  ;;  %v13280_v7 = vand.u32 4294901760, %v10040_v14  ;;  %v13301_v23 = vld [vmem:[#allocation98_spill] sm:$0xff]  ;;  %v13306_v10 = vld [vmem:[#allocation119_spill] sm:$0xff] }
 0x21b   :  { %v10182_v30 = vpack.c.bf16 %v13279_v55, %v13278_v31  ;;  %v10190_v63 = vpack.c.bf16 %v4384_v45, %v4372_v40  ;;  %v12095_v32 = vand.u32 4294901760, %v13282_v50  ;;  %v10197_v42 = vpack.c.bf16 %v3124_v13, %v3112_v39  ;;  %6616 = vmatpush1.bf16.msra.mxu1 %v13283_v36  ;;  %v13284_v40 = vld [vmem:[#allocation72_spill] sm:$0xff]  ;;  %v13285_v55 = vld [vmem:[#allocation62_spill] sm:$0xff] }
 0x21c   :  { %v10188_v15 = vpack.c.bf16 %v13281_v53, %v13280_v7  ;;  %v10199_v26 = vpack.c.bf16 %v4408_v46, %v4396_v47  ;;  %v10202_v31 = vpack.c.bf16 %v3142_v22, %v3130_v2  ;;  %v10204_v14 = vpack.c.bf16 %v4426_v25, %v4414_v20  ;;  %6618 = vmatprep.subr.bf16.mxu1 %v13285_v55  ;;  %v13290_v20 = vld [vmem:[#allocation79_spill] sm:$0xff]  ;;  %v13291_v2 = vld [vmem:[#allocation82_spill] sm:$0xff]  ;;  %v13294_v53 = vld [vmem:[#allocation132_spill] sm:$0xff] }
 0x21d   :  { %v10206_v17 = vpack.c.bf16 %v3148_v0, %v3136_v1  ;;  %6236 = vmatpush1.bf16.msra.mxu0 %v13286_v11  ;;  %v4420_v62 = vand.u32 4294901760, %v4419_v9  ;;  %v4432_v51 = vand.u32 4294901760, %v4431_v27  ;;  %v3154_v13 = vand.u32 4294901760, %v3153_v58  ;;  %v13289_v0 = vld [vmem:[#allocation77_spill] sm:$0xff]  ;;  %v13292_v9 = vld [vmem:[#allocation88_spill] sm:$0xff]  ;;  %v13298_v36 = vld [vmem:[#allocation142_spill] sm:$0xff] }
 0x21e   :  { %v13287_v47 = vand.u32 4294901760, %v13276_v59  ;;  %6238 = vmatprep.subr.bf16.mxu0 %v13288_v34  ;;  %v10218_v1 = vsub.f32 %v13282_v50, %v12095_v32  ;;  %v13293_v58 = vld [vmem:[#allocation85_spill] sm:$0xff]  ;;  %v13296_v34 = vld [vmem:[#allocation78_spill] sm:$0xff]  ;;  %v13297_v55 = vand.u32 4294901760, %v13284_v40  ;;  %v13300_v50 = vld [vmem:[#allocation159_spill] sm:$0xff]  ;;  %v13307_v22 = vand.u32 4294901760, %v13289_v0 }
 0x21f   :  { %6620 = vmatpush1.bf16.msra.mxu1 %v13296_v34  ;;  %v13302_v27 = vld [vmem:[#allocation104_spill] sm:$0xff]  ;;  %v10236_v7 = vpack.c.bf16 %v4432_v51, %v4420_v62  ;;  %v13304_v11 = vld [vmem:[#allocation161_spill] sm:$0xff]  ;;  %v13305_v34 = vld [vmem:[#allocation163_spill] sm:$0xff]  ;;  %v13308_v25 = vand.u32 4294901760, %v13290_v20  ;;  %v13309_v62 = vand.u32 4294901760, %v13291_v2  ;;  %v13311_v28 = vand.u32 4294901760, %v13293_v58 }
 0x220   :  { %v3165_v46 = vsub.f32 %v13276_v59, %v13287_v47  ;;  %v13295_v47 = vld [vmem:[#allocation139_spill] sm:$0xff]  ;;  %v4449_v32 = vsub.f32 %v13284_v40, %v13297_v55  ;;  %6622 = vmatprep.subr.bf16.mxu1 %v13301_v23  ;;  %v4438_v55 = vand.u32 4294901760, %v10218_v1  ;;  %v3159_v39 = vsub.f32 %v13289_v0, %v13307_v22  ;;  %v13318_v0 = vld [vmem:[#allocation166_spill] sm:$0xff] }
 0x221   :  { %6240 = vmatpush1.bf16.msra.mxu0 %v13302_v27  ;;  %13303 = vst [vmem:[#allocation192_spill] sm:$0xff] %v10236_v7  ;;  %v3171_v23 = vsub.f32 %v13290_v20, %v13308_v25  ;;  %v4443_v51 = vsub.f32 %v13291_v2, %v13309_v62  ;;  %v3177_v1 = vsub.f32 %v13293_v58, %v13311_v28  ;;  %v13313_v27 = vand.u32 4294901760, %v13295_v47  ;;  %v13314_v20 = vld [vmem:[#allocation114_spill] sm:$0xff] }
 0x222   :  { %v3166_v45 = vand.u32 4294901760, %v3165_v46  ;;  %6242 = vmatprep.subr.bf16.mxu0 %v13306_v10  ;;  %v13310_v46 = vand.u32 4294901760, %v13292_v9  ;;  %v13312_v10 = vand.u32 4294901760, %v13294_v53  ;;  %v13315_v62 = vand.u32 4294901760, %v13298_v36 }
 0x223   :  { %v4461_v25 = vsub.f32 %v13295_v47, %v13313_v27  ;;  %6624 = vmatpush1.bf16.msra.mxu1 %v13314_v20  ;;  %v13317_v28 = vand.u32 4294901760, %v13300_v50  ;;  %v4450_v20 = vand.u32 4294901760, %v4449_v32  ;;  %v13321_v47 = vand.u32 4294901760, %v13304_v11 }
 0x224   :  { %v4455_v59 = vsub.f32 %v13292_v9, %v13310_v46  ;;  %v3189_v22 = vsub.f32 %v13294_v53, %v13312_v10  ;;  %v4473_v2 = vsub.f32 %v13298_v36, %v13315_v62  ;;  %v13316_v46 = vand.u32 4294901760, %v13299_v21  ;;  %v13319_v53 = vld [vmem:[#allocation134_spill] sm:$0xff] }
 0x225   :  { %v3195_v58 = vsub.f32 %v13300_v50, %v13317_v28  ;;  %6626 = vmatprep.subr.bf16.mxu1 %v13319_v53  ;;  %6244 = vmatpush1.bf16.msra.mxu0 %v9762_v18  ;;  %v10276_v27 = vpack.c.bf16 %v3166_v45, %v3154_v13  ;;  %v4467_v62 = vsub.f32 %v13304_v11, %v13321_v47  ;;  %v13322_v36 = vand.u32 4294901760, %v13305_v34  ;;  %v13396_v11 = vld [vmem:[#allocation176_spill] sm:$0xff] }
 0x226   :  { %v3183_v9 = vsub.f32 %v13299_v21, %v13316_v46  ;;  %6246 = vmatprep.subr.bf16.mxu0 %v9782_v4  ;;  %v3160_v28 = vand.u32 4294901760, %v3159_v39  ;;  %v3172_v50 = vand.u32 4294901760, %v3171_v23  ;;  %v4444_v10 = vand.u32 4294901760, %v4443_v51  ;;  %v13323_v21 = vld [vmem:[#allocation168_spill] sm:$0xff] }
 0x227   :  { %13320 = vst [vmem:[#allocation200_spill] sm:$0xff] %v10276_v27  ;;  %v4479_v46 = vsub.f32 %v13305_v34, %v13322_v36  ;;  %v12120_v53 = vand.u32 4294901760, %v13323_v21  ;;  %v4456_v40 = vand.u32 4294901760, %v4455_v59  ;;  %v3178_v18 = vand.u32 4294901760, %v3177_v1  ;;  %6628 = vmatpush1.bf16.msra.mxu1 %v9768_v35  ;;  %v13325_v59 = vld [vmem:[#allocation171_spill] sm:$0xff]  ;;  %v13326_v1 = vld [vmem:[#allocation172_spill] sm:$0xff] }
 0x228   :  { %v3190_v45 = vand.u32 4294901760, %v3189_v22  ;;  %v4462_v13 = vand.u32 4294901760, %v4461_v25  ;;  %v4474_v32 = vand.u32 4294901760, %v4473_v2  ;;  %v3184_v7 = vand.u32 4294901760, %v3183_v9  ;;  %6630 = vmatprep.subr.bf16.mxu1 %v9786_v54  ;;  %v13327_v9 = vld [vmem:[#allocation175_spill] sm:$0xff]  ;;  %v13328_v25 = vld [vmem:[#allocation177_spill] sm:$0xff] }
 0x229   :  { %v3196_v47 = vand.u32 4294901760, %v3195_v58  ;;  %v13324_v27 = vand.u32 4294901760, %v13318_v0  ;;  %6248 = vmatpush1.bf16.msra.mxu0 %v9794_v43  ;;  %v4468_v23 = vand.u32 4294901760, %v4467_v62  ;;  %v4480_v39 = vand.u32 4294901760, %v4479_v46  ;;  %v13329_v54 = vld [vmem:[#allocation180_spill] sm:$0xff]  ;;  %v13333_v22 = vld [vmem:[#allocation181_spill] sm:$0xff] }
 0x22a   :  { %6250 = vmatprep.subr.bf16.mxu0 %v9918_v41  ;;  %v10300_v2 = vsub.f32 %v13323_v21, %v12120_v53  ;;  %v12123_v35 = vand.u32 4294901760, %v13329_v54  ;;  %v10305_v43 = vpack.c.bf16 %v4450_v20, %v4438_v55  ;;  %v10307_v62 = vpack.c.bf16 %v3172_v50, %v3160_v28  ;;  %v13334_v41 = vld [vmem:[#allocation201_spill] sm:$0xff]  ;;  %v13394_v34 = vld [vmem:[#allocation170_spill] sm:$0xff] }
 0x22b   :  { %v10290_v36 = vsub.f32 %v13318_v0, %v13324_v27  ;;  %v12124_v27 = vand.u32 4294901760, %v13328_v25  ;;  %v10309_v46 = vpack.c.bf16 %v4456_v40, %v4444_v10  ;;  %v12127_v51 = vand.u32 4294901760, %v13333_v22  ;;  %6632 = vmatpush1.bf16.msra.mxu1 %v9804_v48  ;;  %v13348_v40 = vld [vmem:[#allocation2_spill] sm:$0xff] }
 0x22c   :  { %13330 = vst [vmem:[#allocation202_spill] sm:$0xff] %v10305_v43  ;;  %13331 = vst [vmem:[#allocation203_spill] sm:$0xff] %v10307_v62  ;;  %2976 = vmatmul.mubr.f32.vlgmr.msra.gmra.mrb[2].mxu0 %v13334_v41  ;;  %v10314_v53 = vpack.c.bf16 %v3190_v45, %v3178_v18  ;;  %v10316_v4 = vpack.c.bf16 %v4474_v32, %v4462_v13  ;;  %v10318_v58 = vpack.c.bf16 %v3196_v47, %v3184_v7  ;;  %v13342_v13 = vld [vmem:[#allocation186_spill] sm:$0xff]  ;;  %v13343_v32 = vld [vmem:[#allocation184_spill] sm:$0xff] }
 0x22d   :  { %13332 = vst [vmem:[#allocation204_spill] sm:$0xff] %v10309_v46  ;;  %6634 = vmatprep.subr.bf16.mxu1 %v9920_v60  ;;  %6252 = vmatpush1.bf16.msra.mxu0 %v9924_v33  ;;  %v10322_v50 = vpack.c.bf16 %v4480_v39, %v4468_v23  ;;  %v13339_v20 = vand.u32 4294901760, %v13325_v59  ;;  %v13340_v18 = vand.u32 4294901760, %v13326_v1  ;;  %v13341_v33 = vand.u32 4294901760, %v13327_v9  ;;  %v13344_v23 = vld [vmem:[#allocation185_spill] sm:$0xff]  ;;  %v13350_v39 = vld [vmem:[#allocation15_spill] sm:$0xff] }
 0x22e   :  { %13335 = vst [vmem:[#allocation201_spill] sm:$0xff] %v10314_v53  ;;  %13336 = vst [vmem:[#allocation205_spill] sm:$0xff] %v10316_v4  ;;  %6254 = vmatprep.subr.bf16.mxu0 %v9928_v24  ;;  %v10345_v28 = vsub.f32 %v13328_v25, %v12124_v27  ;;  %v10350_v45 = vsub.f32 %v13329_v54, %v12123_v35  ;;  %3367 = vmatprep.mubr.f32.mxu0 %v13342_v13  ;;  %v13347_v27 = vld [vmem:[#allocation194_spill] sm:$0xff]  ;;  %v13351_v47 = vld [vmem:[#allocation17_spill] sm:$0xff]  ;;  %v13404_v21 = vand.u32 4294901760, %v10290_v36 }
 0x22f   :  { %13337 = vst [vmem:[#allocation206_spill] sm:$0xff] %v10318_v58  ;;  %13338 = vst [vmem:[#allocation207_spill] sm:$0xff] %v10322_v50  ;;  %v10328_v55 = vsub.f32 %v13325_v59, %v13339_v20  ;;  %v10333_v10 = vsub.f32 %v13326_v1, %v13340_v18  ;;  %v10340_v7 = vsub.f32 %v13327_v9, %v13341_v33  ;;  %4260 = vmatmul.mubr.f32.vlgmr.msra.gmra.mrb[2].mxu1 %v13334_v41  ;;  %v13345_v20 = vld [vmem:[#allocation190_spill] sm:$0xff]  ;;  %v13346_v33 = vld [vmem:[#allocation191_spill] sm:$0xff] }
 0x230   :  { %v10357_v24 = vsub.f32 %v13333_v22, %v12127_v51  ;;  %6636 = vmatpush1.bf16.msra.mxu1 %v9926_v19  ;;  %v13349_v41 = vld [vmem:[#allocation8_spill] sm:$0xff]  ;;  %4651 = vmatprep.mubr.f32.mxu1 %v13342_v13  ;;  %v13352_v13 = vld [vmem:[#allocation21_spill] sm:$0xff]  ;;  %v13353_v51 = vand.u32 4294901760, %v13343_v32  ;;  %v13354_v19 = vand.u32 4294901760, %v13344_v23  ;;  %v13356_v60 = vand.u32 4294901760, %v13346_v33  ;;  %v13371_v46 = vld [vmem:[#allocation59_spill] sm:$0xff] }
 0x231   :  { %6638 = vmatprep.subr.bf16.mxu1 %v9930_v56  ;;  %6256 = vmatpush1.bf16.msra.mxu0 %v9932_v57  ;;  %v13363_v53 = vld [vmem:[#allocation29_spill] sm:$0xff]  ;;  %v13365_v62 = vld [vmem:[#allocation32_spill] sm:$0xff]  ;;  %v13377_v54 = vld [vmem:[#allocation90_spill] sm:$0xff] }
 0x232   :  { %6258 = vmatprep.subr.bf16.mxu0 %v10053_v29  ;;  %v10383_v18 = vsub.f32 %v13343_v32, %v13353_v51  ;;  %v10388_v35 = vsub.f32 %v13344_v23, %v13354_v19  ;;  %v13355_v29 = vand.u32 4294901760, %v13345_v20  ;;  %v10399_v57 = vsub.f32 %v13346_v33, %v13356_v60  ;;  %v13376_v33 = vld [vmem:[#allocation86_spill] sm:$0xff]  ;;  %v13382_v25 = vld [vmem:[#allocation107_spill] sm:$0xff]  ;;  %v13383_v59 = vld [vmem:[#allocation116_spill] sm:$0xff] }
 0x233   :  { %v13357_v51 = vand.u32 4294901760, %v13347_v27  ;;  %v13358_v19 = vand.u32 4294901760, %v13348_v40  ;;  %v13381_v9 = vld [vmem:[#allocation110_spill] sm:$0xff]  ;;  %v13391_v22 = vld [vmem:[#allocation152_spill] sm:$0xff] }
 0x234   :  { %v10393_v50 = vsub.f32 %v13345_v20, %v13355_v29  ;;  %6640 = vmatpush1.bf16.msra.mxu1 %v9934_v5  ;;  %v13359_v29 = vand.u32 4294901760, %v13349_v41  ;;  %v13360_v5 = vand.u32 4294901760, %v13350_v39  ;;  %v13367_v20 = vld [vmem:[#allocation45_spill] sm:$0xff]  ;;  %v13390_v43 = vld [vmem:[#allocation150_spill] sm:$0xff] }
 0x235   :  { %v10404_v48 = vsub.f32 %v13347_v27, %v13357_v51  ;;  %v10409_v56 = vsub.f32 %v13348_v40, %v13358_v19  ;;  %6642 = vmatprep.subr.bf16.mxu1 %v10059_v38  ;;  %6260 = vmatpush1.bf16.msra.mxu0 %v10061_v37  ;;  %v13361_v51 = vand.u32 4294901760, %v13351_v47  ;;  %v13362_v19 = vld [vmem:[#allocation24_spill] sm:$0xff]  ;;  %v13364_v38 = vand.u32 4294901760, %v13352_v13  ;;  %v13369_v40 = vld [vmem:[#allocation54_spill] sm:$0xff] }
 0x236   :  { %v10414_v58 = vsub.f32 %v13349_v41, %v13359_v29  ;;  %v10421_v60 = vsub.f32 %v13350_v39, %v13360_v5  ;;  %6262 = vmatprep.subr.bf16.mxu0 %v10065_v16  ;;  %v13368_v29 = vld [vmem:[#allocation50_spill] sm:$0xff]  ;;  %v13399_v5 = vld [vmem:[#allocation189_spill] sm:$0xff]  ;;  %v3226_v27 = vand.u32 4294901760, %v10383_v18  ;;  %v3238_v41 = vand.u32 4294901760, %v10388_v35 }
 0x237   :  { %v10426_v4 = vsub.f32 %v13351_v47, %v13361_v51  ;;  %v10434_v37 = vsub.f32 %v13352_v13, %v13364_v38  ;;  %v13370_v51 = vld [vmem:[#allocation56_spill] sm:$0xff]  ;;  %v13372_v39 = vld [vmem:[#allocation66_spill] sm:$0xff]  ;;  %v13398_v13 = vld [vmem:[#allocation187_spill] sm:$0xff]  ;;  %v3232_v1 = vand.u32 4294901760, %v10404_v48  ;;  %v3244_v16 = vand.u32 4294901760, %v10409_v56 }
 0x238   :  { %6644 = vmatpush1.bf16.msra.mxu1 %v10063_v6  ;;  %v13366_v6 = vld [vmem:[#allocation35_spill] sm:$0xff]  ;;  %v13373_v47 = vld [vmem:[#allocation74_spill] sm:$0xff]  ;;  %v4528_v0 = vand.u32 4294901760, %v10421_v60  ;;  %v13401_v35 = vand.u32 4294901760, %v13363_v53  ;;  %v13402_v56 = vand.u32 4294901760, %v13365_v62 }
 0x239   :  { %6646 = vmatprep.subr.bf16.mxu1 %v10067_v52  ;;  %6264 = vmatpush1.bf16.msra.mxu0 %v10069_v8  ;;  %v13374_v52 = vld [vmem:[#allocation71_spill] sm:$0xff]  ;;  %v13375_v8 = vld [vmem:[#allocation80_spill] sm:$0xff]  ;;  %v13392_v23 = vld [vmem:[#allocation158_spill] sm:$0xff] }
 0x23a   :  { %6266 = vmatprep.subr.bf16.mxu0 %v10075_v44  ;;  %v13384_v44 = vld [vmem:[#allocation122_spill] sm:$0xff]  ;;  %v3255_v60 = vsub.f32 %v13365_v62, %v13402_v56  ;;  %v13409_v56 = vand.u32 4294901760, %v10345_v28 }
 0x23b   :  { %v13393_v32 = vld [vmem:[#allocation162_spill] sm:$0xff] }
 0x23c   :  { %6648 = vmatpush1.bf16.msra.mxu1 %v10071_v12  ;;  %v13397_v38 = vld [vmem:[#allocation182_spill] sm:$0xff]  ;;  %v4516_v12 = vand.u32 4294901760, %v10414_v58  ;;  %v3250_v58 = vand.u32 4294901760, %v10426_v4  ;;  %v13407_v4 = vand.u32 4294901760, %v10333_v10 }
 0x23d   :  { %6650 = vmatprep.subr.bf16.mxu1 %v10182_v30  ;;  %6268 = vmatpush1.bf16.msra.mxu0 %v10188_v15  ;;  %v4510_v30 = vand.u32 4294901760, %v10393_v50  ;;  %v4522_v15 = vand.u32 4294901760, %v10399_v57  ;;  %v4545_v50 = vsub.f32 %v13363_v53, %v13401_v35  ;;  %v13408_v57 = vand.u32 4294901760, %v10340_v7 }
 0x23e   :  { %6270 = vmatprep.subr.bf16.mxu0 %v10193_v3  ;;  %v13400_v3 = vand.u32 4294901760, %v13362_v19  ;;  %v10560_v10 = vpack.c.bf16 %v4528_v0, %v4516_v12  ;;  %v3256_v0 = vand.u32 4294901760, %v3255_v60  ;;  %v12151_v12 = vand.u32 4294901760, %v13371_v46 }
 0x23f   :  { %v10546_v62 = vpack.c.bf16 %v13409_v56, %v13408_v57  ;;  %v4546_v28 = vand.u32 4294901760, %v4545_v50  ;;  %v13412_v57 = vand.u32 4294901760, %v13367_v20  ;;  %v13417_v56 = vld [vmem:[#allocation202_spill] sm:$0xff] }
 0x240   :  { %6652 = vmatpush1.bf16.msra.mxu1 %v10190_v63  ;;  %v4533_v18 = vsub.f32 %v13362_v19, %v13400_v3  ;;  %v3262_v63 = vand.u32 4294901760, %v10434_v37  ;;  %v13403_v3 = vand.u32 4294901760, %v13366_v6  ;;  %v13420_v50 = vld [vmem:[#allocation102_spill] sm:$0xff] }
 0x241   :  { %6654 = vmatprep.subr.bf16.mxu1 %v10195_v49  ;;  %6272 = vmatpush1.bf16.msra.mxu0 %v10197_v42  ;;  %v13405_v49 = vand.u32 4294901760, %v10300_v2  ;;  %v13406_v42 = vand.u32 4294901760, %v10328_v55  ;;  %v10554_v2 = vpack.c.bf16 %v3238_v41, %v3226_v27  ;;  %v10558_v55 = vpack.c.bf16 %v3244_v16, %v3232_v1  ;;  %v13414_v41 = vld [vmem:[#allocation200_spill] sm:$0xff] }
 0x242   :  { %v3267_v35 = vsub.f32 %v13366_v6, %v13403_v3  ;;  %6274 = vmatprep.subr.bf16.mxu0 %v10202_v31  ;;  %v13410_v3 = vand.u32 4294901760, %v10350_v45  ;;  %v13411_v31 = vand.u32 4294901760, %v10357_v24  ;;  %v4534_v7 = vand.u32 4294901760, %v4533_v18 }
 0x243   :  { %v6285_v48 = vpack.c.bf16 %v13405_v49, %v13404_v21  ;;  %v10540_v37 = vpack.c.bf16 %v13407_v4, %v13406_v42  ;;  %v10556_v21 = vpack.c.bf16 %v4522_v15, %v4510_v30  ;;  %v4539_v45 = vsub.f32 %v13367_v20, %v13412_v57  ;;  %v13416_v42 = vld [vmem:[#allocation92_spill] sm:$0xff] }
 0x244   :  { %v10552_v36 = vpack.c.bf16 %v13411_v31, %v13410_v3  ;;  %6656 = vmatpush1.bf16.msra.mxu1 %v10199_v26  ;;  %v13413_v24 = vand.u32 4294901760, %v13368_v29  ;;  %v10571_v1 = vpack.c.bf16 %v3262_v63, %v3250_v58  ;;  %v3268_v27 = vand.u32 4294901760, %v3267_v35  ;;  %v13415_v58 = vld [vmem:[#allocation192_spill] sm:$0xff]  ;;  %v13418_v3 = vld [vmem:[#allocation203_spill] sm:$0xff] }
 0x245   :  { %6658 = vmatprep.subr.bf16.mxu1 %v10204_v14  ;;  %6276 = vmatpush1.bf16.msra.mxu0 %v10206_v17  ;;  %v12156_v26 = vand.u32 4294901760, %v13369_v40  ;;  %v12152_v16 = vand.u32 4294901760, %v13370_v51  ;;  %v12150_v30 = vand.u32 4294901760, %v13372_v39  ;;  %v12154_v15 = vand.u32 4294901760, %v13373_v47 }
 0x246   :  { %v4551_v49 = vsub.f32 %v13368_v29, %v13413_v24  ;;  %6278 = vmatprep.subr.bf16.mxu0 %v13414_v41  ;;  %v12153_v14 = vand.u32 4294901760, %v13374_v52  ;;  %v12155_v17 = vand.u32 4294901760, %v13375_v8  ;;  %v12157_v18 = vand.u32 4294901760, %v13376_v33  ;;  %v13419_v24 = vld [vmem:[#allocation95_spill] sm:$0xff] }
 0x247   :  { %v10584_v63 = vpack.c.bf16 %v4546_v28, %v4534_v7  ;;  %v4540_v60 = vand.u32 4294901760, %v4539_v45  ;;  %v12158_v4 = vand.u32 4294901760, %v13416_v42  ;;  %v10589_v31 = vpack.c.bf16 %v3268_v27, %v3256_v0  ;;  %v13421_v7 = vld [vmem:[#allocation201_spill] sm:$0xff] }
 0x248   :  { %6660 = vmatpush1.bf16.msra.mxu1 %v13415_v58  ;;  %v4552_v35 = vand.u32 4294901760, %v4551_v49  ;;  %v3273_v57 = vsub.f32 %v13369_v40, %v12156_v26  ;;  %v12163_v41 = vand.u32 4294901760, %v13419_v24  ;;  %v3285_v28 = vsub.f32 %v13370_v51, %v12152_v16  ;;  %v13424_v26 = vld [vmem:[#allocation205_spill] sm:$0xff]  ;;  %v13425_v58 = vld [vmem:[#allocation206_spill] sm:$0xff] }
 0x249   :  { %6662 = vmatprep.subr.bf16.mxu1 %v13417_v56  ;;  %6280 = vmatpush1.bf16.msra.mxu0 %v13418_v3  ;;  %v4557_v45 = vsub.f32 %v13371_v46, %v12151_v12  ;;  %v4569_v49 = vsub.f32 %v13372_v39, %v12150_v30  ;;  %v3279_v0 = vsub.f32 %v13373_v47, %v12154_v15  ;;  %v13423_v12 = vld [vmem:[#allocation204_spill] sm:$0xff] }
 0x24a   :  { %6282 = vmatprep.subr.bf16.mxu0 %v13421_v7  ;;  %v3291_v27 = vsub.f32 %v13374_v52, %v12153_v14  ;;  %v4563_v56 = vsub.f32 %v13375_v8, %v12155_v17  ;;  %v4575_v3 = vsub.f32 %v13376_v33, %v12157_v18  ;;  %v13422_v7 = vand.u32 4294901760, %v13377_v54 }
 0x24b   :  { %v10622_v16 = vpack.c.bf16 %v4552_v35, %v4540_v60  ;;  %v3309_v14 = vsub.f32 %v13416_v42, %v12158_v4  ;;  %v3274_v18 = vand.u32 4294901760, %v3273_v57  ;;  %v3286_v4 = vand.u32 4294901760, %v3285_v28  ;;  %v13427_v57 = vld [vmem:[#allocation207_spill] sm:$0xff] }
 0x24c   :  { %v3297_v30 = vsub.f32 %v13377_v54, %v13422_v7  ;;  %6664 = vmatpush1.bf16.msra.mxu1 %v13423_v12  ;;  %v4581_v7 = vsub.f32 %v13419_v24, %v12163_v41  ;;  %v13426_v12 = vand.u32 4294901760, %v13420_v50  ;;  %v4558_v15 = vand.u32 4294901760, %v4557_v45 }
 0x24d   :  { %6666 = vmatprep.subr.bf16.mxu1 %v13424_v26  ;;  %6284 = vmatpush1.bf16.msra.mxu0 %v13425_v58  ;;  %v4570_v8 = vand.u32 4294901760, %v4569_v49  ;;  %v3280_v17 = vand.u32 4294901760, %v3279_v0  ;;  %v3292_v33 = vand.u32 4294901760, %v3291_v27  ;;  %v4564_v26 = vand.u32 4294901760, %v4563_v56  ;;  %v13431_v49 = vld [vmem:[#allocation126_spill] sm:$0xff]  ;;  %v13432_v56 = vld [vmem:[#allocation128_spill] sm:$0xff] }
 0x24e   :  { %v4593_v60 = vsub.f32 %v13420_v50, %v13426_v12  ;;  %6286 = vmatprep.subr.bf16.mxu0 %v6285_v48  ;;  %v4576_v54 = vand.u32 4294901760, %v4575_v3  ;;  %v3298_v58 = vand.u32 4294901760, %v3297_v30  ;;  %v3310_v42 = vand.u32 4294901760, %v3309_v14  ;;  %v13434_v48 = vld [vmem:[#allocation138_spill] sm:$0xff] }
 0x24f   :  { %v13428_v41 = vand.u32 4294901760, %v13381_v9  ;;  %v13429_v12 = vand.u32 4294901760, %v13382_v25  ;;  %v4582_v28 = vand.u32 4294901760, %v4581_v7  ;;  %v13430_v30 = vand.u32 4294901760, %v13383_v59 }
 0x250   :  { %6668 = vmatpush1.bf16.msra.mxu1 %v13427_v57  ;;  %v4594_v45 = vand.u32 4294901760, %v4593_v60  ;;  %v6681_v27 = vpack.c.bf16 %v4570_v8, %v4558_v15  ;;  %v12181_v3 = vand.u32 4294901760, %v13432_v56  ;;  %v13433_v57 = vld [vmem:[#allocation131_spill] sm:$0xff]  ;;  %v12167_v7 = vand.u32 4294901760, %v9764_v61  ;;  %v13435_v60 = vld [vmem:[#allocation146_spill] sm:$0xff] }
 0x251   :  { %v3303_v24 = vsub.f32 %v13381_v9, %v13428_v41  ;;  %v3315_v35 = vsub.f32 %v13382_v25, %v13429_v12  ;;  %6670 = vmatprep.subr.bf16.mxu1 %v10540_v37  ;;  %6288 = vmatpush1.bf16.msra.mxu0 %v10546_v62  ;;  %v10651_v14 = vsub.f32 %v13383_v59, %v13430_v30  ;;  %v12175_v12 = vand.u32 4294901760, %v13433_v57 }
 0x252   :  { %6290 = vmatprep.subr.bf16.mxu0 %v10554_v2  ;;  %v6297_v41 = vpack.c.bf16 %v3286_v4, %v3274_v18  ;;  %v6299_v37 = vpack.c.bf16 %v3292_v33, %v3280_v17  ;;  %v12169_v62 = vand.u32 4294901760, %v13434_v48  ;;  %v12168_v9 = vand.u32 4294901760, %v13435_v60 }
 0x253   :  { %v6683_v30 = vpack.c.bf16 %v4576_v54, %v4564_v26  ;;  %v3304_v59 = vand.u32 4294901760, %v3303_v24  ;;  %v3316_v0 = vand.u32 4294901760, %v3315_v35  ;;  %v13436_v2 = vand.u32 4294901760, %v13384_v44 }
 0x254   :  { %6672 = vmatpush1.bf16.msra.mxu1 %v10552_v36  ;;  %v6301_v33 = vpack.c.bf16 %v3310_v42, %v3298_v58  ;;  %v6685_v15 = vpack.c.bf16 %v4594_v45, %v4582_v28  ;;  %v4588_v17 = vand.u32 4294901760, %v10651_v14  ;;  %v13437_v18 = vand.u32 4294901760, %v13431_v49 }
 0x255   :  { %v4599_v8 = vsub.f32 %v13384_v44, %v13436_v2  ;;  %6674 = vmatprep.subr.bf16.mxu1 %v10556_v21  ;;  %6292 = vmatpush1.bf16.msra.mxu0 %v10558_v55  ;;  %v3333_v54 = vsub.f32 %v13432_v56, %v12181_v3  ;;  %v4605_v36 = vsub.f32 %v13433_v57, %v12175_v12  ;;  %v12174_v21 = vand.u32 4294901760, %v13392_v23  ;;  %v13438_v2 = vld [vmem:[#allocation167_spill] sm:$0xff] }
 0x256   :  { %v3321_v4 = vsub.f32 %v13431_v49, %v13437_v18  ;;  %6294 = vmatprep.subr.bf16.mxu0 %v10571_v1  ;;  %v12173_v55 = vand.u32 4294901760, %v13393_v32  ;;  %v4617_v42 = vsub.f32 %v13434_v48, %v12169_v62  ;;  %v3327_v1 = vsub.f32 %v9764_v61, %v12167_v7 }
 0x257   :  { %v3339_v24 = vsub.f32 %v13435_v60, %v12168_v9  ;;  %v12172_v35 = vand.u32 4294901760, %v13390_v43  ;;  %v6303_v26 = vpack.c.bf16 %v3316_v0, %v3304_v59  ;;  %v4600_v58 = vand.u32 4294901760, %v4599_v8 }
 0x258   :  { %6676 = vmatpush1.bf16.msra.mxu1 %v10560_v10  ;;  %v12171_v28 = vand.u32 4294901760, %v13391_v22  ;;  %v12170_v45 = vand.u32 4294901760, %v13394_v34  ;;  %v3322_v14 = vand.u32 4294901760, %v3321_v4  ;;  %v12176_v18 = vand.u32 4294901760, %v13438_v2 }
 0x259   :  { %6678 = vmatprep.subr.bf16.mxu1 %v10584_v63  ;;  %6296 = vmatpush1.bf16.msra.mxu0 %v10589_v31  ;;  %v12177_v7 = vand.u32 4294901760, %v13396_v11  ;;  %v12180_v9 = vand.u32 4294901760, %v13397_v38  ;;  %v3334_v62 = vand.u32 4294901760, %v3333_v54  ;;  %v4606_v10 = vand.u32 4294901760, %v4605_v36 }
 0x25a   :  { %6298 = vmatprep.subr.bf16.mxu0 %v6297_v41  ;;  %v3345_v59 = vsub.f32 %v13392_v23, %v12174_v21  ;;  %v3357_v63 = vsub.f32 %v13393_v32, %v12173_v55  ;;  %v4618_v0 = vand.u32 4294901760, %v4617_v42  ;;  %v3328_v31 = vand.u32 4294901760, %v3327_v1 }
 0x25b   :  { %v3340_v8 = vand.u32 4294901760, %v3339_v24  ;;  %v4611_v4 = vsub.f32 %v13390_v43, %v12172_v35  ;;  %v4623_v41 = vsub.f32 %v13391_v22, %v12171_v28  ;;  %v4629_v54 = vsub.f32 %v13394_v34, %v12170_v45 }
 0x25c   :  { %6680 = vmatpush1.bf16.msra.mxu1 %v10622_v16  ;;  %v12179_v36 = vand.u32 4294901760, %v13398_v13  ;;  %v12178_v42 = vand.u32 4294901760, %v13399_v5  ;;  %v4641_v1 = vsub.f32 %v13438_v2, %v12176_v18  ;;  %v3351_v16 = vsub.f32 %v13396_v11, %v12177_v7 }
 0x25d   :  { %6682 = vmatprep.subr.bf16.mxu1 %v6681_v27  ;;  %6300 = vmatpush1.bf16.msra.mxu0 %v6299_v37  ;;  %v3363_v24 = vsub.f32 %v13397_v38, %v12180_v9  ;;  %v6305_v45 = vpack.c.bf16 %v3334_v62, %v3322_v14  ;;  %v3346_v28 = vand.u32 4294901760, %v3345_v59  ;;  %v3358_v35 = vand.u32 4294901760, %v3357_v63  ;;  %v13464_v9 = vld [vmem:[#allocation154_spill] sm:$0xff] }
 0x25e   :  { %6302 = vmatprep.subr.bf16.mxu0 %v6301_v33  ;;  %v6687_v55 = vpack.c.bf16 %v4600_v58, %v4588_v17  ;;  %v6689_v21 = vpack.c.bf16 %v4618_v0, %v4606_v10  ;;  %v6307_v27 = vpack.c.bf16 %v3340_v8, %v3328_v31  ;;  %v4612_v37 = vand.u32 4294901760, %v4611_v4  ;;  %v13439_v31 = vld [vmem:[#allocation106_spill] sm:$0xff]  ;;  %v13440_v8 = vld [vmem:[#allocation108_spill] sm:$0xff] }
 0x25f   :  { %v4624_v12 = vand.u32 4294901760, %v4623_v41  ;;  %v4635_v18 = vsub.f32 %v13398_v13, %v12179_v36  ;;  %v4647_v7 = vsub.f32 %v13399_v5, %v12178_v42  ;;  %v4630_v33 = vand.u32 4294901760, %v4629_v54  ;;  %v13442_v41 = vld [vmem:[#allocation113_spill] sm:$0xff]  ;;  %v13448_v54 = vld [vmem:[#allocation120_spill] sm:$0xff] }
 0x260   :  { %6684 = vmatpush1.bf16.msra.mxu1 %v6683_v30  ;;  %v4642_v62 = vand.u32 4294901760, %v4641_v1  ;;  %v3352_v14 = vand.u32 4294901760, %v3351_v16  ;;  %v3364_v59 = vand.u32 4294901760, %v3363_v24  ;;  %v6309_v17 = vpack.c.bf16 %v3358_v35, %v3346_v28  ;;  %v13443_v35 = vld [vmem:[#allocation115_spill] sm:$0xff]  ;;  %v13449_v1 = vld [vmem:[#allocation121_spill] sm:$0xff] }
 0x261   :  { %6686 = vmatprep.subr.bf16.mxu1 %v6685_v15  ;;  %6304 = vmatpush1.bf16.msra.mxu0 %v6303_v26  ;;  %v6691_v30 = vpack.c.bf16 %v4624_v12, %v4612_v37  ;;  %v4636_v58 = vand.u32 4294901760, %v4635_v18  ;;  %v4648_v10 = vand.u32 4294901760, %v4647_v7  ;;  %v6313_v4 = vpack.c.bf16 %v13440_v8, %v13439_v31  ;;  %v13441_v26 = vld [vmem:[#allocation112_spill] sm:$0xff]  ;;  %v13445_v7 = vld [vmem:[#allocation123_spill] sm:$0xff]  ;;  %v13450_v24 = vld [vmem:[#allocation129_spill] sm:$0xff] }
 0x262   :  { %6306 = vmatprep.subr.bf16.mxu0 %v6305_v45  ;;  %v6693_v63 = vpack.c.bf16 %v4642_v62, %v4630_v33  ;;  %v6311_v0 = vpack.c.bf16 %v3364_v59, %v3352_v14  ;;  %v6697_v45 = vpack.c.bf16 %v13442_v41, %v13441_v26  ;;  %v13447_v18 = vld [vmem:[#allocation196_spill] sm:$0xff]  ;;  %v6699_v16 = vpack.c.bf16 %v13449_v1, %v13448_v54  ;;  %v13452_v33 = vld [vmem:[#allocation137_spill] sm:$0xff]  ;;  %v13454_v59 = vld [vmem:[#allocation91_spill] sm:$0xff] }
 0x263   :  { %v6695_v15 = vpack.c.bf16 %v4648_v10, %v4636_v58  ;;  %v13453_v62 = vld [vmem:[#allocation141_spill] sm:$0xff]  ;;  %v13456_v58 = vld [vmem:[#allocation195_spill] sm:$0xff] }
 0x264   :  { %6688 = vmatpush1.bf16.msra.mxu1 %v6687_v55  ;;  %v13444_v55 = vld [vmem:[#allocation117_spill] sm:$0xff]  ;;  %v6319_v14 = vpack.c.bf16 %v13453_v62, %v13452_v33  ;;  %v13457_v10 = vld [vmem:[#allocation87_spill] sm:$0xff] }
 0x265   :  { %6690 = vmatprep.subr.bf16.mxu1 %v6689_v21  ;;  %6308 = vmatpush1.bf16.msra.mxu0 %v6307_v27  ;;  %v6315_v12 = vpack.c.bf16 %v13444_v55, %v13443_v35  ;;  %v13446_v21 = vld [vmem:[#allocation125_spill] sm:$0xff]  ;;  %v13451_v27 = vld [vmem:[#allocation130_spill] sm:$0xff] }
 0x266   :  { %6310 = vmatprep.subr.bf16.mxu0 %v6309_v17  ;;  %v6317_v28 = vpack.c.bf16 %v13446_v21, %v13445_v7  ;;  %v6701_v37 = vpack.c.bf16 %v13451_v27, %v13450_v24  ;;  %v13455_v17 = vld [vmem:[#allocation93_spill] sm:$0xff] }
 0x267   :  { %v13463_v36 = vld [vmem:[#allocation149_spill] sm:$0xff] }
 0x268   :  { %6692 = vmatpush1.bf16.msra.mxu1 %v6691_v30  ;;  %v6321_v30 = vpack.c.bf16 %v13455_v17, %v13454_v59  ;;  %v6325_v3 = vpack.c.bf16 %v13464_v9, %v13463_v36 }
 0x269   :  { %6694 = vmatprep.subr.bf16.mxu1 %v6693_v63  ;;  %6312 = vmatpush1.bf16.msra.mxu0 %v6311_v0  ;;  %v13458_v63 = vld [vmem:[#allocation84_spill] sm:$0xff] }
 0x26a   :  { %6314 = vmatprep.subr.bf16.mxu0 %v6313_v4  ;;  %v6703_v0 = vpack.c.bf16 %v13458_v63, %v13457_v10  ;;  %v13459_v4 = vld [vmem:[#allocation99_spill] sm:$0xff]  ;;  %v13467_v63 = vld [vmem:[#allocation156_spill] sm:$0xff] }
 0x26b   :  { %v13470_v10 = vld [vmem:[#allocation7_spill] sm:$0xff] }
 0x26c   :  { %6696 = vmatpush1.bf16.msra.mxu1 %v6695_v15  ;;  %3369 = vmatmul.mubr.f32.vlgmr.msra.gmra.mrb[2].mxu0 %v13447_v18  ;;  %v13460_v15 = vld [vmem:[#allocation100_spill] sm:$0xff] }
 0x26d   :  { %6698 = vmatprep.subr.bf16.mxu1 %v6697_v45  ;;  %6316 = vmatpush1.bf16.msra.mxu0 %v6315_v12  ;;  %v6705_v45 = vpack.c.bf16 %v13460_v15, %v13459_v4  ;;  %v13461_v12 = vld [vmem:[#allocation97_spill] sm:$0xff]  ;;  %v13471_v15 = vld [vmem:[#allocation12_spill] sm:$0xff] }
 0x26e   :  { %6318 = vmatprep.subr.bf16.mxu0 %v6317_v28  ;;  %3569 = vmatprep.mubr.f32.mxu0 %v13456_v58  ;;  %v13462_v28 = vld [vmem:[#allocation101_spill] sm:$0xff] }
 0x26f   :  { %4653 = vmatmul.mubr.f32.vlgmr.msra.gmra.mrb[2].mxu1 %v13447_v18  ;;  %v6323_v42 = vpack.c.bf16 %v13462_v28, %v13461_v12  ;;  %v13465_v18 = vld [vmem:[#allocation103_spill] sm:$0xff]  ;;  %v13472_v4 = vld [vmem:[#allocation13_spill] sm:$0xff]  ;;  %v13474_v12 = vld [vmem:[#allocation14_spill] sm:$0xff] }
 0x270   :  { %6700 = vmatpush1.bf16.msra.mxu1 %v6699_v16  ;;  %4853 = vmatprep.mubr.f32.mxu1 %v13456_v58  ;;  %v13466_v16 = vld [vmem:[#allocation145_spill] sm:$0xff]  ;;  %v13468_v58 = vld [vmem:[#allocation3_spill] sm:$0xff]  ;;  %v6329_v28 = vpack.c.bf16 %v13472_v4, %v13471_v15 }
 0x271   :  { %6702 = vmatprep.subr.bf16.mxu1 %v6701_v37  ;;  %6320 = vmatpush1.bf16.msra.mxu0 %v6319_v14  ;;  %v6707_v17 = vpack.c.bf16 %v13466_v16, %v13465_v18  ;;  %v6709_v37 = vpack.c.bf16 %v13468_v58, %v13467_v63  ;;  %v13469_v14 = vld [vmem:[#allocation5_spill] sm:$0xff]  ;;  %v13476_v16 = vld [vmem:[#allocation20_spill] sm:$0xff]  ;;  %v13480_v63 = vld [vmem:[#allocation34_spill] sm:$0xff] }
 0x272   :  { %6322 = vmatprep.subr.bf16.mxu0 %v6321_v30  ;;  %v6327_v59 = vpack.c.bf16 %v13470_v10, %v13469_v14  ;;  %v13473_v30 = vld [vmem:[#allocation10_spill] sm:$0xff]  ;;  %v13478_v18 = vld [vmem:[#allocation28_spill] sm:$0xff]  ;;  %v13479_v58 = vld [vmem:[#allocation33_spill] sm:$0xff] }
 0x273   :  { %v6711_v9 = vpack.c.bf16 %v13474_v12, %v13473_v30  ;;  %v6333_v10 = vpack.c.bf16 %v13480_v63, %v13479_v58  ;;  %v13482_v14 = vld [vmem:[#allocation30_spill] sm:$0xff]  ;;  %v13484_v12 = vld [vmem:[#allocation36_spill] sm:$0xff]  ;;  %v13486_v30 = vld [vmem:[#allocation43_spill] sm:$0xff] }
 0x274   :  { %6704 = vmatpush1.bf16.msra.mxu1 %v6703_v0  ;;  %v13475_v0 = vld [vmem:[#allocation19_spill] sm:$0xff] }
 0x275   :  { %6706 = vmatprep.subr.bf16.mxu1 %v6705_v45  ;;  %6324 = vmatpush1.bf16.msra.mxu0 %v6323_v42  ;;  %v6713_v45 = vpack.c.bf16 %v13476_v16, %v13475_v0  ;;  %v13477_v42 = vld [vmem:[#allocation27_spill] sm:$0xff]  ;;  %v13487_v16 = vld [vmem:[#allocation48_spill] sm:$0xff]  ;;  %v13488_v0 = vld [vmem:[#allocation49_spill] sm:$0xff] }
 0x276   :  { %6326 = vmatprep.subr.bf16.mxu0 %v6325_v3  ;;  %v6331_v36 = vpack.c.bf16 %v13478_v18, %v13477_v42  ;;  %v13481_v3 = vld [vmem:[#allocation25_spill] sm:$0xff]  ;;  %v6337_v18 = vpack.c.bf16 %v13488_v0, %v13487_v16  ;;  %v13490_v42 = vld [vmem:[#allocation51_spill] sm:$0xff] }
 0x277   :  { %v6715_v4 = vpack.c.bf16 %v13482_v14, %v13481_v3  ;;  %v13492_v14 = vld [vmem:[#allocation57_spill] sm:$0xff]  ;;  %v13494_v3 = vld [vmem:[#allocation64_spill] sm:$0xff] }
 0x278   :  { %6708 = vmatpush1.bf16.msra.mxu1 %v6707_v17  ;;  %v13483_v17 = vld [vmem:[#allocation40_spill] sm:$0xff] }
 0x279   :  { %6710 = vmatprep.subr.bf16.mxu1 %v6709_v37  ;;  %6328 = vmatpush1.bf16.msra.mxu0 %v6327_v59  ;;  %v6717_v37 = vpack.c.bf16 %v13484_v12, %v13483_v17  ;;  %v13485_v59 = vld [vmem:[#allocation42_spill] sm:$0xff]  ;;  %v13495_v12 = vld [vmem:[#allocation67_spill] sm:$0xff] }
 0x27a   :  { %6330 = vmatprep.subr.bf16.mxu0 %v6329_v28  ;;  %v6335_v15 = vpack.c.bf16 %v13486_v30, %v13485_v59  ;;  %v13489_v28 = vld [vmem:[#allocation46_spill] sm:$0xff]  ;;  %v13498_v59 = vld [vmem:[#allocation65_spill] sm:$0xff] }
 0x27b   :  { %v6719_v63 = vpack.c.bf16 %v13490_v42, %v13489_v28  ;;  %v13496_v17 = vld [vmem:[#allocation70_spill] sm:$0xff]  ;;  %v13500_v42 = vld [vmem:[#allocation72_spill] sm:$0xff]  ;;  %v13502_v28 = vld [vmem:[#allocation79_spill] sm:$0xff] }
 0x27c   :  { %6712 = vmatpush1.bf16.msra.mxu1 %v6711_v9  ;;  %v13491_v9 = vld [vmem:[#allocation55_spill] sm:$0xff]  ;;  %v6341_v30 = vpack.c.bf16 %v13496_v17, %v13495_v12 }
 0x27d   :  { %6714 = vmatprep.subr.bf16.mxu1 %v6713_v45  ;;  %6332 = vmatpush1.bf16.msra.mxu0 %v6331_v36  ;;  %v6721_v45 = vpack.c.bf16 %v13492_v14, %v13491_v9  ;;  %v13493_v36 = vld [vmem:[#allocation63_spill] sm:$0xff]  ;;  %v13503_v14 = vld [vmem:[#allocation85_spill] sm:$0xff]  ;;  %v13504_v9 = vld [vmem:[#allocation132_spill] sm:$0xff] }
 0x27e   :  { %6334 = vmatprep.subr.bf16.mxu0 %v6333_v10  ;;  %v6339_v58 = vpack.c.bf16 %v13494_v3, %v13493_v36  ;;  %v13497_v10 = vld [vmem:[#allocation61_spill] sm:$0xff]  ;;  %v6345_v3 = vpack.c.bf16 %v13504_v9, %v13503_v14  ;;  %v13506_v36 = vld [vmem:[#allocation88_spill] sm:$0xff] }
 0x27f   :  { %v6723_v0 = vpack.c.bf16 %v13498_v59, %v13497_v10  ;;  %v13508_v59 = vld [vmem:[#allocation142_spill] sm:$0xff]  ;;  %v13510_v10 = vld [vmem:[#allocation159_spill] sm:$0xff]  ;;  %v13515_v9 = vld [vmem:[#allocation161_spill] sm:$0xff] }
 0x280   :  { %6716 = vmatpush1.bf16.msra.mxu1 %v6715_v4  ;;  %v13499_v4 = vld [vmem:[#allocation76_spill] sm:$0xff] }
 0x281   :  { %6718 = vmatprep.subr.bf16.mxu1 %v6717_v37  ;;  %6336 = vmatpush1.bf16.msra.mxu0 %v6335_v15  ;;  %v6725_v37 = vpack.c.bf16 %v13500_v42, %v13499_v4  ;;  %v13501_v15 = vld [vmem:[#allocation77_spill] sm:$0xff] }
 0x282   :  { %6338 = vmatprep.subr.bf16.mxu0 %v6337_v18  ;;  %v6343_v16 = vpack.c.bf16 %v13502_v28, %v13501_v15  ;;  %v13505_v18 = vld [vmem:[#allocation82_spill] sm:$0xff] }
 0x283   :  { %v6727_v17 = vpack.c.bf16 %v13506_v36, %v13505_v18  ;;  %v13512_v28 = vld [vmem:[#allocation166_spill] sm:$0xff] }
 0x284   :  { %6720 = vmatpush1.bf16.msra.mxu1 %v6719_v63  ;;  %v13507_v63 = vld [vmem:[#allocation139_spill] sm:$0xff] }
 0x285   :  { %6722 = vmatprep.subr.bf16.mxu1 %v6721_v45  ;;  %6340 = vmatpush1.bf16.msra.mxu0 %v6339_v58  ;;  %v6729_v45 = vpack.c.bf16 %v13508_v59, %v13507_v63  ;;  %v13509_v58 = vld [vmem:[#allocation157_spill] sm:$0xff]  ;;  %v13521_v63 = vld [vmem:[#allocation175_spill] sm:$0xff] }
 0x286   :  { %6342 = vmatprep.subr.bf16.mxu0 %v6341_v30  ;;  %v6347_v12 = vpack.c.bf16 %v13510_v10, %v13509_v58  ;;  %v13511_v30 = vld [vmem:[#allocation168_spill] sm:$0xff]  ;;  %v13520_v59 = vld [vmem:[#allocation177_spill] sm:$0xff] }
 0x287   :  { %v13513_v15 = vpack.c.bf16 %v13511_v30, %v13512_v28  ;;  %v13522_v18 = vpack.c.bf16 %v13520_v59, %v13521_v63  ;;  %v13527_v10 = vld [vmem:[#allocation180_spill] sm:$0xff]  ;;  %v13530_v28 = vld [vmem:[#allocation190_spill] sm:$0xff] }
 0x288   :  { %6724 = vmatpush1.bf16.msra.mxu1 %v6723_v0  ;;  %v13514_v0 = vld [vmem:[#allocation163_spill] sm:$0xff]  ;;  %v13539_v63 = vld [vmem:[#allocation8_spill] sm:$0xff] }
 0x289   :  { %6726 = vmatprep.subr.bf16.mxu1 %v6725_v37  ;;  %6344 = vmatpush1.bf16.msra.mxu0 %v6343_v16  ;;  %v13516_v14 = vpack.c.bf16 %v13514_v0, %v13515_v9  ;;  %v13517_v37 = vld [vmem:[#allocation172_spill] sm:$0xff]  ;;  %v13518_v16 = vld [vmem:[#allocation171_spill] sm:$0xff]  ;;  %v13533_v9 = vld [vmem:[#allocation194_spill] sm:$0xff] }
 0x28a   :  { %6346 = vmatprep.subr.bf16.mxu0 %v6345_v3  ;;  %v13519_v36 = vpack.c.bf16 %v13517_v37, %v13518_v16  ;;  %v13523_v3 = vld [vmem:[#allocation185_spill] sm:$0xff] }
 0x28b   :  { %v13536_v16 = vld [vmem:[#allocation17_spill] sm:$0xff] }
 0x28c   :  { %6728 = vmatpush1.bf16.msra.mxu1 %v6727_v17  ;;  %v13524_v17 = vld [vmem:[#allocation184_spill] sm:$0xff] }
 0x28d   :  { %6730 = vmatprep.subr.bf16.mxu1 %v6729_v45  ;;  %6348 = vmatpush1.bf16.msra.mxu0 %v6347_v12  ;;  %v13525_v45 = vpack.c.bf16 %v13523_v3, %v13524_v17  ;;  %v13526_v12 = vld [vmem:[#allocation181_spill] sm:$0xff] }
 0x28e   :  { %6350 = vmatprep.subr.bf16.mxu0 %v13513_v15  ;;  %v13528_v30 = vpack.c.bf16 %v13526_v12, %v13527_v10  ;;  %v13529_v15 = vld [vmem:[#allocation191_spill] sm:$0xff] }
 0x28f   :  { %v13531_v0 = vpack.c.bf16 %v13529_v15, %v13530_v28 }
 0x290   :  { %6732 = vmatpush1.bf16.msra.mxu1 %v13516_v14  ;;  %v13532_v14 = vld [vmem:[#allocation2_spill] sm:$0xff] }
 0x291   :  { %6734 = vmatprep.subr.bf16.mxu1 %v13519_v36  ;;  %6352 = vmatpush1.bf16.msra.mxu0 %v13522_v18  ;;  %v13534_v37 = vpack.c.bf16 %v13532_v14, %v13533_v9  ;;  %v13535_v36 = vld [vmem:[#allocation21_spill] sm:$0xff]  ;;  %v13538_v18 = vld [vmem:[#allocation15_spill] sm:$0xff] }
 0x292   :  { %6354 = vmatprep.subr.bf16.mxu0 %v13525_v45  ;;  %v13537_v59 = vpack.c.bf16 %v13535_v36, %v13536_v16  ;;  %v13540_v3 = vpack.c.bf16 %v13538_v18, %v13539_v63  ;;  %v13541_v45 = vpack.c.bf16 %v13363_v53, %v13362_v19  ;;  %v13549_v53 = vld [vmem:[#allocation90_spill] sm:$0xff] }
 0x294   :  { %6736 = vmatpush1.bf16.msra.mxu1 %v13528_v30  ;;  %v13542_v30 = vld [vmem:[#allocation32_spill] sm:$0xff] }
 0x295   :  { %6738 = vmatprep.subr.bf16.mxu1 %v13531_v0  ;;  %6356 = vmatpush1.bf16.msra.mxu0 %v13534_v37  ;;  %v13543_v15 = vpack.c.bf16 %v13366_v6, %v13542_v30  ;;  %v13544_v0 = vpack.c.bf16 %v13370_v51, %v13369_v40  ;;  %v13545_v37 = vpack.c.bf16 %v13368_v29, %v13367_v20  ;;  %v13552_v30 = vld [vmem:[#allocation80_spill] sm:$0xff] }
 0x296   :  { %6358 = vmatprep.subr.bf16.mxu0 %v13537_v59  ;;  %v13546_v59 = vpack.c.bf16 %v13372_v39, %v13371_v46 }
 0x298   :  { %6740 = vmatpush1.bf16.msra.mxu1 %v13540_v3  ;;  %v13547_v3 = vpack.c.bf16 %v13374_v52, %v13373_v47 }
 0x299   :  { %6742 = vmatprep.subr.bf16.mxu1 %v13541_v45  ;;  %6360 = vmatpush1.bf16.msra.mxu0 %v13543_v15  ;;  %v13548_v45 = vld [vmem:[#allocation92_spill] sm:$0xff]  ;;  %v13551_v15 = vld [vmem:[#allocation86_spill] sm:$0xff] }
 0x29a   :  { %6362 = vmatprep.subr.bf16.mxu0 %v13544_v0  ;;  %v13550_v6 = vpack.c.bf16 %v13548_v45, %v13549_v53  ;;  %v13553_v51 = vpack.c.bf16 %v13551_v15, %v13552_v30  ;;  %v13554_v0 = vld [vmem:[#allocation95_spill] sm:$0xff] }
 0x29b   :  { %v13555_v29 = vpack.c.bf16 %v13420_v50, %v13554_v0 }
 0x29c   :  { %6744 = vmatpush1.bf16.msra.mxu1 %v13545_v37  ;;  %v13556_v37 = vld [vmem:[#allocation110_spill] sm:$0xff] }
 0x29d   :  { %6746 = vmatprep.subr.bf16.mxu1 %v13546_v59  ;;  %6364 = vmatpush1.bf16.msra.mxu0 %v13547_v3  ;;  %v13557_v39 = vpack.c.bf16 %v13382_v25, %v13556_v37  ;;  %v13558_v59 = vpack.c.bf16 %v13432_v56, %v13431_v49  ;;  %v13559_v3 = vld [vmem:[#allocation116_spill] sm:$0xff] }
 0x29e   :  { %6366 = vmatprep.subr.bf16.mxu0 %v13550_v6  ;;  %v13560_v45 = vpack.c.bf16 %v13384_v44, %v13559_v3  ;;  %v13561_v6 = vpack.c.bf16 %v13434_v48, %v13433_v57 }
 0x2a0   :  { %6748 = vmatpush1.bf16.msra.mxu1 %v13553_v51  ;;  %v13562_v51 = vpack.c.bf16 %v13435_v60, %v9764_v61 }
 0x2a1   :  { %6750 = vmatprep.subr.bf16.mxu1 %v13555_v29  ;;  %6368 = vmatpush1.bf16.msra.mxu0 %v13557_v39  ;;  %v13563_v29 = vpack.c.bf16 %v13393_v32, %v13392_v23  ;;  %v13564_v39 = vpack.c.bf16 %v13391_v22, %v13390_v43  ;;  %v13569_v32 = vld [vmem:[#allocation198_spill] sm:$0xff]  ;;  %v13571_v22 = vld [vmem:[#allocation111_spill] sm:$0xff] }
 0x2a2   :  { %6370 = vmatprep.subr.bf16.mxu0 %v13558_v59  ;;  %v13565_v59 = vpack.c.bf16 %v13438_v2, %v13394_v34  ;;  %v13573_v2 = vld [vmem:[#allocation197_spill] sm:$0xff] }
 0x2a4   :  { %6752 = vmatpush1.bf16.msra.mxu1 %v13560_v45  ;;  %v13566_v45 = vpack.c.bf16 %v13397_v38, %v13396_v11 }
 0x2a5   :  { %6754 = vmatprep.subr.bf16.mxu1 %v13561_v6  ;;  %6372 = vmatpush1.bf16.msra.mxu0 %v13562_v51  ;;  %v13567_v6 = vld [vmem:[#allocation105_spill] sm:$0xff]  ;;  %v13568_v51 = vpack.c.bf16 %v13399_v5, %v13398_v13  ;;  %v13578_v5 = vld [vmem:[#allocation151_spill] sm:$0xff] }
 0x2a6   :  { %6374 = vmatprep.subr.bf16.mxu0 %v13563_v29  ;;  %v13570_v29 = vld [vmem:[#allocation109_spill] sm:$0xff]  ;;  %v13582_v13 = vld [vmem:[#allocation147_spill] sm:$0xff] }
 0x2a8   :  { %6756 = vmatpush1.bf16.msra.mxu1 %v13564_v39  ;;  %v13572_v39 = vld [vmem:[#allocation124_spill] sm:$0xff] }
 0x2a9   :  { %6758 = vmatprep.subr.bf16.mxu1 %v13565_v59  ;;  %6376 = vmatpush1.bf16.msra.mxu0 %v13566_v45  ;;  %v13574_v59 = vld [vmem:[#allocation118_spill] sm:$0xff]  ;;  %v13575_v45 = vld [vmem:[#allocation127_spill] sm:$0xff] }
 0x2aa   :  { %6378 = vmatprep.subr.bf16.mxu0 %v13567_v6  ;;  %v13576_v6 = vld [vmem:[#allocation135_spill] sm:$0xff] }
 0x2ac   :  { %6760 = vmatpush1.bf16.msra.mxu1 %v13568_v51  ;;  %3572 = vmatmul.mubr.f32.vlgmr.msra.gmra.mrb[2].mxu0 %v13569_v32  ;;  %v13577_v51 = vld [vmem:[#allocation89_spill] sm:$0xff] }
 0x2ad   :  { %6762 = vmatprep.subr.bf16.mxu1 %v13570_v29  ;;  %6380 = vmatpush1.bf16.msra.mxu0 %v13571_v22  ;;  %v13579_v29 = vld [vmem:[#allocation94_spill] sm:$0xff]  ;;  %v13580_v22 = vld [vmem:[#allocation96_spill] sm:$0xff] }
 0x2ae   :  { %6382 = vmatprep.subr.bf16.mxu0 %v13572_v39  ;;  %3709 = vmatprep.mubr.f32.mxu0 %v13573_v2  ;;  %v13581_v39 = vld [vmem:[#allocation144_spill] sm:$0xff] }
 0x2af   :  { %4856 = vmatmul.mubr.f32.vlgmr.msra.gmra.mrb[2].mxu1 %v13569_v32  ;;  %v13583_v32 = vld [vmem:[#allocation153_spill] sm:$0xff] }
 0x2b0   :  { %6764 = vmatpush1.bf16.msra.mxu1 %v13574_v59  ;;  %4993 = vmatprep.mubr.f32.mxu1 %v13573_v2  ;;  %v13584_v59 = vld [vmem:[#allocation4_spill] sm:$0xff] }
 0x2b1   :  { %6766 = vmatprep.subr.bf16.mxu1 %v13575_v45  ;;  %6384 = vmatpush1.bf16.msra.mxu0 %v13576_v6  ;;  %v13585_v2 = vld [vmem:[#allocation16_spill] sm:$0xff]  ;;  %v13586_v45 = vld [vmem:[#allocation9_spill] sm:$0xff]  ;;  %v13587_v6 = vld [vmem:[#allocation18_spill] sm:$0xff] }
 0x2b2   :  { %6386 = vmatprep.subr.bf16.mxu0 %v13577_v51  ;;  %v13588_v51 = vld [vmem:[#allocation22_spill] sm:$0xff] }
 0x2b4   :  { %6768 = vmatpush1.bf16.msra.mxu1 %v13578_v5  ;;  %v13589_v5 = vld [vmem:[#allocation31_spill] sm:$0xff] }
 0x2b5   :  { %6770 = vmatprep.subr.bf16.mxu1 %v13579_v29  ;;  %6388 = vmatpush1.bf16.msra.mxu0 %v13580_v22  ;;  %v13590_v22 = vld [vmem:[#allocation23_spill] sm:$0xff] }
 0x2b6   :  { %6390 = vmatprep.subr.bf16.mxu0 %v13581_v39  ;;  %v13603_v39 = vld [vmem:[#allocation133_spill] sm:$0xff] }
 0x2b8   :  { %6772 = vmatpush1.bf16.msra.mxu1 %v13582_v13  ;;  %v13602_v13 = vld [vmem:[#allocation81_spill] sm:$0xff] }
 0x2b9   :  { %6774 = vmatprep.subr.bf16.mxu1 %v13583_v32  ;;  %6392 = vmatpush1.bf16.msra.mxu0 %v13584_v59  ;;  %v13600_v59 = vld [vmem:[#allocation73_spill] sm:$0xff] }
 0x2ba   :  { %6394 = vmatprep.subr.bf16.mxu0 %v13585_v2  ;;  %v13591_v2 = vld [vmem:[#allocation39_spill] sm:$0xff] }
 0x2bc   :  { %6776 = vmatpush1.bf16.msra.mxu1 %v13586_v45  ;;  %v13592_v45 = vld [vmem:[#allocation37_spill] sm:$0xff] }
 0x2bd   :  { %6778 = vmatprep.subr.bf16.mxu1 %v13587_v6  ;;  %6396 = vmatpush1.bf16.msra.mxu0 %v13588_v51  ;;  %v13593_v51 = vld [vmem:[#allocation52_spill] sm:$0xff] }
 0x2be   :  { %6398 = vmatprep.subr.bf16.mxu0 %v13589_v5  ;;  %v13595_v5 = vld [vmem:[#allocation53_spill] sm:$0xff] }
 0x2bf   :  { %v1548_v29 = vpop.f32.mrb[0].mxu0 }
 0x2c0   :  { %6780 = vmatpush1.bf16.msra.mxu1 %v13590_v22  ;;  %5405 = vst [vmem:[%s11315_s2] sm:$0xff] %v1548_v29  ;;  %v1550_v32 = vpop.f32.mrb[1].mxu0  ;;  %v13594_v29 = vld [vmem:[#allocation44_spill] sm:$0xff] }
 0x2c1   :  { %5406 = vst [vmem:[%s11315_s2 + $0x8] sm:$0xff] %v1550_v32  ;;  %6782 = vmatprep.subr.bf16.mxu1 %v13591_v2  ;;  %6400 = vmatpush1.bf16.msra.mxu0 %v13592_v45  ;;  %v2832_v6 = vpop.f32.mrb[0].mxu1  ;;  %v13596_v32 = vld [vmem:[#allocation58_spill] sm:$0xff]  ;;  %v13597_v2 = vld [vmem:[#allocation69_spill] sm:$0xff]  ;;  %v13598_v45 = vld [vmem:[#allocation60_spill] sm:$0xff] }
 0x2c2   :  { %6402 = vmatprep.subr.bf16.mxu0 %v13593_v51  ;;  %5407 = vst [vmem:[%s11315_s2 + $0x10] sm:$0xff] %v2832_v6  ;;  %v2834_v22 = vpop.f32.mrb[1].mxu1  ;;  %v13599_v51 = vld [vmem:[#allocation75_spill] sm:$0xff]  ;;  %v13601_v6 = vld [vmem:[#allocation136_spill] sm:$0xff] }
 0x2c3   :  { %5408 = vst [vmem:[%s11315_s2 + $0x18] sm:$0xff] %v2834_v22  ;;  %v13604_v22 = vld [vmem:[#allocation148_spill] sm:$0xff] }
 0x2c4   :  { %6784 = vmatpush1.bf16.msra.mxu1 %v13594_v29  ;;  %v13605_v29 = vld [vmem:[#allocation165_spill] sm:$0xff] }
 0x2c5   :  { %6786 = vmatprep.subr.bf16.mxu1 %v13595_v5  ;;  %6404 = vmatpush1.bf16.msra.mxu0 %v13596_v32  ;;  %v13606_v5 = vld [vmem:[#allocation160_spill] sm:$0xff]  ;;  %v13607_v32 = vld [vmem:[#allocation169_spill] sm:$0xff] }
 0x2c6   :  { %6406 = vmatprep.subr.bf16.mxu0 %v13597_v2  ;;  %v13608_v2 = vld [vmem:[#allocation173_spill] sm:$0xff] }
 0x2c8   :  { %6788 = vmatpush1.bf16.msra.mxu1 %v13598_v45  ;;  %v13609_v45 = vld [vmem:[#allocation183_spill] sm:$0xff] }
 0x2c9   :  { %6790 = vmatprep.subr.bf16.mxu1 %v13599_v51  ;;  %6408 = vmatpush1.bf16.msra.mxu0 %v13600_v59  ;;  %v13610_v51 = vld [vmem:[#allocation178_spill] sm:$0xff]  ;;  %v13611_v59 = vld [vmem:[#allocation188_spill] sm:$0xff] }
 0x2ca   :  { %6410 = vmatprep.subr.bf16.mxu0 %v13601_v6  ;;  %v13612_v6 = vld [vmem:[#allocation193_spill] sm:$0xff] }
 0x2cc   :  { %6792 = vmatpush1.bf16.msra.mxu1 %v13602_v13  ;;  %v13613_v13 = vld [vmem:[#allocation11_spill] sm:$0xff] }
 0x2cd   :  { %6794 = vmatprep.subr.bf16.mxu1 %v13603_v39  ;;  %6412 = vmatpush1.bf16.msra.mxu0 %v13604_v22  ;;  %v13614_v39 = vld [vmem:[#allocation6_spill] sm:$0xff] }
 0x2ce   :  { %6414 = vmatprep.subr.bf16.mxu0 %v13605_v29  ;;  %v13615_v22 = vld [vmem:[#allocation26_spill] sm:$0xff] }
 0x2cf   :  { %v13616_v29 = vld [vmem:[#allocation38_spill] sm:$0xff] }
 0x2d0   :  { %6796 = vmatpush1.bf16.msra.mxu1 %v13606_v5  ;;  %v13617_v5 = vld [vmem:[#allocation47_spill] sm:$0xff] }
 0x2d1   :  { %6798 = vmatprep.subr.bf16.mxu1 %v13607_v32  ;;  %6416 = vmatpush1.bf16.msra.mxu0 %v13608_v2  ;;  %v13618_v32 = vld [vmem:[#allocation41_spill] sm:$0xff]  ;;  %v13619_v2 = vld [vmem:[#allocation62_spill] sm:$0xff] }
 0x2d2   :  { %6418 = vmatprep.subr.bf16.mxu0 %v13609_v45  ;;  %v13620_v45 = vld [vmem:[#allocation68_spill] sm:$0xff] }
 0x2d4   :  { %6800 = vmatpush1.bf16.msra.mxu1 %v13610_v51  ;;  %v13621_v51 = vld [vmem:[#allocation83_spill] sm:$0xff] }
 0x2d5   :  { %6802 = vmatprep.subr.bf16.mxu1 %v13611_v59  ;;  %6420 = vmatpush1.bf16.msra.mxu0 %v13612_v6  ;;  %v13622_v59 = vld [vmem:[#allocation78_spill] sm:$0xff] }
 0x2d6   :  { %6422 = vmatprep.subr.bf16.mxu0 %v13613_v13  ;;  %v13623_v6 = vld [vmem:[#allocation98_spill] sm:$0xff]  ;;  %v13624_v13 = vld [vmem:[#allocation104_spill] sm:$0xff] }
 0x2d8   :  { %6804 = vmatpush1.bf16.msra.mxu1 %v13614_v39  ;;  %v13625_v39 = vld [vmem:[#allocation119_spill] sm:$0xff] }
 0x2d9   :  { %6806 = vmatprep.subr.bf16.mxu1 %v13615_v22  ;;  %6424 = vmatpush1.bf16.msra.mxu0 %v13616_v29  ;;  %v13626_v22 = vld [vmem:[#allocation114_spill] sm:$0xff] }
 0x2da   :  { %6426 = vmatprep.subr.bf16.mxu0 %v13617_v5  ;;  %v13627_v29 = vld [vmem:[#allocation134_spill] sm:$0xff]  ;;  %v13628_v5 = vld [vmem:[#allocation140_spill] sm:$0xff] }
 0x2dc   :  { %6808 = vmatpush1.bf16.msra.mxu1 %v13618_v32  ;;  %v13629_v32 = vld [vmem:[#allocation155_spill] sm:$0xff] }
 0x2dd   :  { %6810 = vmatprep.subr.bf16.mxu1 %v13619_v2  ;;  %6428 = vmatpush1.bf16.msra.mxu0 %v13620_v45  ;;  %v13630_v45 = vand.u32 4294901760, %v13439_v31  ;;  %v13639_v31 = vand.u32 4294901760, %v13445_v7  ;;  %v13647_v7 = vand.u32 4294901760, %v13452_v33  ;;  %v13658_v33 = vld [vmem:[#allocation99_spill] sm:$0xff] }
 0x2de   :  { %6430 = vmatprep.subr.bf16.mxu0 %v13621_v51  ;;  %v13631_v51 = vand.u32 4294901760, %v13440_v8  ;;  %v13640_v8 = vand.u32 4294901760, %v13446_v21  ;;  %v13648_v21 = vand.u32 4294901760, %v13453_v62  ;;  %v13659_v62 = vand.u32 4294901760, %v13658_v33  ;;  %v13674_v33 = vld [vmem:[#allocation156_spill] sm:$0xff] }
 0x2e0   :  { %6812 = vmatpush1.bf16.msra.mxu1 %v13622_v59  ;;  %v6441_v2 = vpack.c.bf16 %v13631_v51, %v13630_v45  ;;  %v13632_v59 = vld [vmem:[#allocation143_spill] sm:$0xff]  ;;  %v6445_v45 = vpack.c.bf16 %v13640_v8, %v13639_v31  ;;  %v13651_v31 = vld [vmem:[#allocation93_spill] sm:$0xff] }
 0x2e1   :  { %6814 = vmatprep.subr.bf16.mxu1 %v13623_v6  ;;  %6432 = vmatpush1.bf16.msra.mxu0 %v13624_v13  ;;  %v13633_v6 = vld [vmem:[#allocation164_spill] sm:$0xff]  ;;  %v13634_v13 = vld [vmem:[#allocation174_spill] sm:$0xff]  ;;  %v13641_v51 = vld [vmem:[#allocation179_spill] sm:$0xff] }
 0x2e2   :  { %6434 = vmatprep.subr.bf16.mxu0 %v13625_v39  ;;  %v13635_v39 = vand.u32 4294901760, %v13441_v26  ;;  %v13643_v26 = vand.u32 4294901760, %v13448_v54  ;;  %v13652_v54 = vand.u32 4294901760, %v13651_v31  ;;  %v13668_v31 = vld [vmem:[#allocation154_spill] sm:$0xff] }
 0x2e4   :  { %6816 = vmatpush1.bf16.msra.mxu1 %v13626_v22  ;;  %v13636_v22 = vand.u32 4294901760, %v13442_v41  ;;  %v13644_v41 = vand.u32 4294901760, %v13449_v1  ;;  %v13653_v1 = vld [vmem:[#allocation186_spill] sm:$0xff] }
 0x2e5   :  { %6818 = vmatprep.subr.bf16.mxu1 %v13627_v29  ;;  %6436 = vmatpush1.bf16.msra.mxu0 %v13628_v5  ;;  %v13637_v5 = vand.u32 4294901760, %v13443_v35  ;;  %v13645_v35 = vand.u32 4294901760, %v13450_v24 }
 0x2e6   :  { %6438 = vmatprep.subr.bf16.mxu0 %v13629_v32  ;;  %v6825_v29 = vpack.c.bf16 %v13636_v22, %v13635_v39  ;;  %v13638_v32 = vand.u32 4294901760, %v13444_v55  ;;  %v6827_v39 = vpack.c.bf16 %v13644_v41, %v13643_v26 }
 0x2e8   :  { %6820 = vmatpush1.bf16.msra.mxu1 %v13632_v59  ;;  %v6443_v38 = vpack.c.bf16 %v13638_v32, %v13637_v5  ;;  %v13646_v5 = vand.u32 4294901760, %v13451_v27  ;;  %v13649_v32 = vld [vmem:[#allocation91_spill] sm:$0xff]  ;;  %v13656_v27 = vld [vmem:[#allocation84_spill] sm:$0xff] }
 0x2e9   :  { %6822 = vmatprep.subr.bf16.mxu1 %v13633_v6  ;;  %6440 = vmatpush1.bf16.msra.mxu0 %v13634_v13  ;;  %v13642_v6 = vld [vmem:[#allocation199_spill] sm:$0xff]  ;;  %v13650_v22 = vand.u32 4294901760, %v13649_v32 }
 0x2ea   :  { %6442 = vmatprep.subr.bf16.mxu0 %v6441_v2  ;;  %v6829_v55 = vpack.c.bf16 %v13646_v5, %v13645_v35  ;;  %v6447_v2 = vpack.c.bf16 %v13648_v21, %v13647_v7  ;;  %v13662_v5 = vld [vmem:[#allocation97_spill] sm:$0xff] }
 0x2eb   :  { %v6449_v8 = vpack.c.bf16 %v13652_v54, %v13650_v22  ;;  %v13663_v7 = vand.u32 4294901760, %v13662_v5  ;;  %v13664_v21 = vld [vmem:[#allocation101_spill] sm:$0xff]  ;;  %v13669_v54 = vand.u32 4294901760, %v13668_v31 }
 0x2ec   :  { %6824 = vmatpush1.bf16.msra.mxu1 %v13641_v51  ;;  %3713 = vmatmul.mubr.f32.vlgmr.msra.gmra.mrb[2].mxu0 %v13642_v6  ;;  %v13665_v32 = vand.u32 4294901760, %v13664_v21  ;;  %v13680_v21 = vld [vmem:[#allocation7_spill] sm:$0xff]  ;;  %v13684_v31 = vld [vmem:[#allocation13_spill] sm:$0xff] }
 0x2ed   :  { %6826 = vmatprep.subr.bf16.mxu1 %v6825_v29  ;;  %6444 = vmatpush1.bf16.msra.mxu0 %v6443_v38  ;;  %v13654_v38 = vld [vmem:[#allocation87_spill] sm:$0xff]  ;;  %v13657_v29 = vand.u32 4294901760, %v13656_v27 }
 0x2ee   :  { %6446 = vmatprep.subr.bf16.mxu0 %v6445_v45  ;;  %3976 = vmatprep.mubr.f32.mxu0 %v13653_v1  ;;  %v13655_v24 = vand.u32 4294901760, %v13654_v38  ;;  %v13660_v45 = vld [vmem:[#allocation100_spill] sm:$0xff] }
 0x2ef   :  { %4997 = vmatmul.mubr.f32.vlgmr.msra.gmra.mrb[2].mxu1 %v13642_v6  ;;  %v13661_v41 = vand.u32 4294901760, %v13660_v45  ;;  %v6451_v6 = vpack.c.bf16 %v13665_v32, %v13663_v7  ;;  %v13676_v45 = vld [vmem:[#allocation3_spill] sm:$0xff]  ;;  %v13678_v7 = vld [vmem:[#allocation5_spill] sm:$0xff]  ;;  %v13681_v32 = vand.u32 4294901760, %v13680_v21  ;;  %v13696_v21 = vld [vmem:[#allocation28_spill] sm:$0xff] }
 0x2f0   :  { %6828 = vmatpush1.bf16.msra.mxu1 %v6827_v39  ;;  %v6831_v26 = vpack.c.bf16 %v13657_v29, %v13655_v24  ;;  %5260 = vmatprep.mubr.f32.mxu1 %v13653_v1  ;;  %v13666_v39 = vld [vmem:[#allocation149_spill] sm:$0xff]  ;;  %v13670_v24 = vld [vmem:[#allocation103_spill] sm:$0xff] }
 0x2f1   :  { %6830 = vmatprep.subr.bf16.mxu1 %v6829_v55  ;;  %6448 = vmatpush1.bf16.msra.mxu0 %v6447_v2  ;;  %v6833_v35 = vpack.c.bf16 %v13661_v41, %v13659_v62  ;;  %v13667_v22 = vand.u32 4294901760, %v13666_v39  ;;  %v13671_v55 = vand.u32 4294901760, %v13670_v24  ;;  %v13672_v2 = vld [vmem:[#allocation145_spill] sm:$0xff]  ;;  %v13675_v62 = vand.u32 4294901760, %v13674_v33  ;;  %v13690_v33 = vld [vmem:[#allocation19_spill] sm:$0xff] }
 0x2f2   :  { %6450 = vmatprep.subr.bf16.mxu0 %v6449_v8  ;;  %v13673_v27 = vand.u32 4294901760, %v13672_v2  ;;  %v13677_v41 = vand.u32 4294901760, %v13676_v45  ;;  %v13679_v8 = vand.u32 4294901760, %v13678_v7  ;;  %v13692_v45 = vld [vmem:[#allocation20_spill] sm:$0xff] }
 0x2f3   :  { %v6453_v38 = vpack.c.bf16 %v13669_v54, %v13667_v22  ;;  %v13682_v22 = vld [vmem:[#allocation12_spill] sm:$0xff]  ;;  %v13685_v54 = vand.u32 4294901760, %v13684_v31  ;;  %v13700_v31 = vld [vmem:[#allocation34_spill] sm:$0xff] }
 0x2f4   :  { %6832 = vmatpush1.bf16.msra.mxu1 %v6831_v26  ;;  %v6835_v29 = vpack.c.bf16 %v13673_v27, %v13671_v55  ;;  %v6837_v5 = vpack.c.bf16 %v13677_v41, %v13675_v62  ;;  %v6455_v39 = vpack.c.bf16 %v13681_v32, %v13679_v8  ;;  %v13683_v26 = vand.u32 4294901760, %v13682_v22  ;;  %v13686_v55 = vld [vmem:[#allocation10_spill] sm:$0xff]  ;;  %v13694_v8 = vld [vmem:[#allocation27_spill] sm:$0xff] }
 0x2f5   :  { %6834 = vmatprep.subr.bf16.mxu1 %v6833_v35  ;;  %6452 = vmatpush1.bf16.msra.mxu0 %v6451_v6  ;;  %v13687_v35 = vand.u32 4294901760, %v13686_v55  ;;  %v13688_v6 = vld [vmem:[#allocation14_spill] sm:$0xff]  ;;  %v13691_v62 = vand.u32 4294901760, %v13690_v33  ;;  %v13693_v41 = vand.u32 4294901760, %v13692_v45  ;;  %v13697_v32 = vand.u32 4294901760, %v13696_v21  ;;  %v13706_v33 = vld [vmem:[#allocation40_spill] sm:$0xff] }
 0x2f6   :  { %6454 = vmatprep.subr.bf16.mxu0 %v6453_v38  ;;  %v6457_v24 = vpack.c.bf16 %v13685_v54, %v13683_v26  ;;  %v13689_v2 = vand.u32 4294901760, %v13688_v6  ;;  %v13695_v38 = vand.u32 4294901760, %v13694_v8  ;;  %v13698_v26 = vld [vmem:[#allocation33_spill] sm:$0xff]  ;;  %v13701_v54 = vand.u32 4294901760, %v13700_v31  ;;  %v13708_v45 = vld [vmem:[#allocation36_spill] sm:$0xff]  ;;  %v13712_v21 = vld [vmem:[#allocation43_spill] sm:$0xff] }
 0x2f7   :  { %v6841_v7 = vpack.c.bf16 %v13693_v41, %v13691_v62  ;;  %v13707_v62 = vand.u32 4294901760, %v13706_v33  ;;  %v13709_v41 = vand.u32 4294901760, %v13708_v45  ;;  %v13716_v31 = vld [vmem:[#allocation49_spill] sm:$0xff]  ;;  %v13722_v33 = vld [vmem:[#allocation55_spill] sm:$0xff] }
 0x2f8   :  { %6836 = vmatpush1.bf16.msra.mxu1 %v6835_v29  ;;  %v6839_v27 = vpack.c.bf16 %v13689_v2, %v13687_v35  ;;  %v6459_v22 = vpack.c.bf16 %v13697_v32, %v13695_v38  ;;  %v13699_v29 = vand.u32 4294901760, %v13698_v26  ;;  %v13702_v35 = vld [vmem:[#allocation25_spill] sm:$0xff]  ;;  %v13710_v38 = vld [vmem:[#allocation42_spill] sm:$0xff]  ;;  %v13713_v32 = vand.u32 4294901760, %v13712_v21  ;;  %v13728_v21 = vld [vmem:[#allocation64_spill] sm:$0xff] }
 0x2f9   :  { %6838 = vmatprep.subr.bf16.mxu1 %v6837_v5  ;;  %6456 = vmatpush1.bf16.msra.mxu0 %v6455_v39  ;;  %v13703_v5 = vand.u32 4294901760, %v13702_v35  ;;  %v13704_v39 = vld [vmem:[#allocation30_spill] sm:$0xff]  ;;  %v6845_v8 = vpack.c.bf16 %v13709_v41, %v13707_v62  ;;  %v13723_v62 = vand.u32 4294901760, %v13722_v33  ;;  %v13724_v45 = vld [vmem:[#allocation57_spill] sm:$0xff]  ;;  %v13738_v33 = vand.u32 4294901760, %v13499_v4 }
 0x2fa   :  { %6458 = vmatprep.subr.bf16.mxu0 %v6457_v24  ;;  %v6461_v55 = vpack.c.bf16 %v13701_v54, %v13699_v29  ;;  %v13705_v6 = vand.u32 4294901760, %v13704_v39  ;;  %v13711_v24 = vand.u32 4294901760, %v13710_v38  ;;  %v13714_v29 = vld [vmem:[#allocation48_spill] sm:$0xff]  ;;  %v13717_v54 = vand.u32 4294901760, %v13716_v31  ;;  %v13732_v31 = vld [vmem:[#allocation70_spill] sm:$0xff] }
 0x2fb   :  { %v13725_v41 = vand.u32 4294901760, %v13724_v45 }
 0x2fc   :  { %6840 = vmatpush1.bf16.msra.mxu1 %v6839_v27  ;;  %v6843_v2 = vpack.c.bf16 %v13705_v6, %v13703_v5  ;;  %v6463_v26 = vpack.c.bf16 %v13713_v32, %v13711_v24  ;;  %v13715_v27 = vand.u32 4294901760, %v13714_v29  ;;  %v13718_v5 = vld [vmem:[#allocation46_spill] sm:$0xff]  ;;  %v13726_v24 = vld [vmem:[#allocation63_spill] sm:$0xff]  ;;  %v13729_v32 = vand.u32 4294901760, %v13728_v21 }
 0x2fd   :  { %6842 = vmatprep.subr.bf16.mxu1 %v6841_v7  ;;  %6460 = vmatpush1.bf16.msra.mxu0 %v6459_v22  ;;  %v13719_v7 = vand.u32 4294901760, %v13718_v5  ;;  %v13720_v22 = vld [vmem:[#allocation51_spill] sm:$0xff]  ;;  %v6849_v38 = vpack.c.bf16 %v13725_v41, %v13723_v62  ;;  %v13739_v62 = vand.u32 4294901760, %v13500_v42  ;;  %v13740_v41 = vld [vmem:[#allocation77_spill] sm:$0xff] }
 0x2fe   :  { %6462 = vmatprep.subr.bf16.mxu0 %v6461_v55  ;;  %v6465_v35 = vpack.c.bf16 %v13717_v54, %v13715_v27  ;;  %v13721_v39 = vand.u32 4294901760, %v13720_v22  ;;  %v13727_v55 = vand.u32 4294901760, %v13726_v24  ;;  %v13730_v27 = vld [vmem:[#allocation67_spill] sm:$0xff]  ;;  %v13733_v54 = vand.u32 4294901760, %v13732_v31 }
 0x2ff   :  { %v6853_v45 = vpack.c.bf16 %v13739_v62, %v13738_v33  ;;  %v13742_v24 = vld [vmem:[#allocation79_spill] sm:$0xff] }
 0x300   :  { %6844 = vmatpush1.bf16.msra.mxu1 %v6843_v2  ;;  %v6847_v6 = vpack.c.bf16 %v13721_v39, %v13719_v7  ;;  %v6467_v29 = vpack.c.bf16 %v13729_v32, %v13727_v55  ;;  %v13731_v2 = vand.u32 4294901760, %v13730_v27  ;;  %v13734_v7 = vld [vmem:[#allocation61_spill] sm:$0xff]  ;;  %v13743_v55 = vand.u32 4294901760, %v13742_v24  ;;  %v13746_v27 = vld [vmem:[#allocation132_spill] sm:$0xff]  ;;  %v13752_v42 = vld [vmem:[#allocation139_spill] sm:$0xff] }
 0x301   :  { %6846 = vmatprep.subr.bf16.mxu1 %v6845_v8  ;;  %6464 = vmatpush1.bf16.msra.mxu0 %v6463_v26  ;;  %v13735_v8 = vand.u32 4294901760, %v13734_v7  ;;  %v13736_v26 = vld [vmem:[#allocation65_spill] sm:$0xff]  ;;  %v13757_v62 = vld [vmem:[#allocation159_spill] sm:$0xff]  ;;  %v13759_v24 = vld [vmem:[#allocation166_spill] sm:$0xff] }
 0x302   :  { %6466 = vmatprep.subr.bf16.mxu0 %v6465_v35  ;;  %v6469_v5 = vpack.c.bf16 %v13733_v54, %v13731_v2  ;;  %v13737_v22 = vand.u32 4294901760, %v13736_v26  ;;  %v13741_v35 = vand.u32 4294901760, %v13740_v41  ;;  %v13744_v32 = vld [vmem:[#allocation85_spill] sm:$0xff]  ;;  %v13747_v2 = vand.u32 4294901760, %v13746_v27  ;;  %v13748_v54 = vld [vmem:[#allocation82_spill] sm:$0xff] }
 0x303   :  { %v13754_v26 = vld [vmem:[#allocation142_spill] sm:$0xff]  ;;  %v13758_v41 = vand.u32 4294901760, %v13757_v62  ;;  %v13763_v27 = vld [vmem:[#allocation161_spill] sm:$0xff] }
 0x304   :  { %6848 = vmatpush1.bf16.msra.mxu1 %v6847_v6  ;;  %v6851_v39 = vpack.c.bf16 %v13737_v22, %v13735_v8  ;;  %v6471_v21 = vpack.c.bf16 %v13743_v55, %v13741_v35  ;;  %v13745_v6 = vand.u32 4294901760, %v13744_v32  ;;  %v13753_v8 = vand.u32 4294901760, %v13752_v42  ;;  %v13761_v55 = vld [vmem:[#allocation168_spill] sm:$0xff]  ;;  %v13776_v62 = vld [vmem:[#allocation185_spill] sm:$0xff] }
 0x305   :  { %6850 = vmatprep.subr.bf16.mxu1 %v6849_v38  ;;  %6468 = vmatpush1.bf16.msra.mxu0 %v6467_v29  ;;  %v13749_v38 = vand.u32 4294901760, %v13748_v54  ;;  %v13750_v29 = vld [vmem:[#allocation88_spill] sm:$0xff]  ;;  %v13755_v22 = vand.u32 4294901760, %v13754_v26  ;;  %v13762_v32 = vand.u32 4294901760, %v13761_v55  ;;  %v13773_v26 = vld [vmem:[#allocation177_spill] sm:$0xff]  ;;  %v13780_v55 = vand.u32 4294901760, %v13530_v28 }
 0x306   :  { %6470 = vmatprep.subr.bf16.mxu0 %v6469_v5  ;;  %v6473_v31 = vpack.c.bf16 %v13747_v2, %v13745_v6  ;;  %v13751_v7 = vand.u32 4294901760, %v13750_v29  ;;  %v13756_v5 = vand.u32 4294901760, %v13509_v58  ;;  %v13769_v58 = vld [vmem:[#allocation172_spill] sm:$0xff] }
 0x307   :  { %v6857_v33 = vpack.c.bf16 %v13755_v22, %v13753_v8  ;;  %v13771_v8 = vld [vmem:[#allocation175_spill] sm:$0xff]  ;;  %v13774_v22 = vand.u32 4294901760, %v13773_v26  ;;  %v13797_v26 = vld [vmem:[#allocation56_spill] sm:$0xff] }
 0x308   :  { %6852 = vmatpush1.bf16.msra.mxu1 %v6851_v39  ;;  %v6855_v4 = vpack.c.bf16 %v13751_v7, %v13749_v38  ;;  %v6475_v35 = vpack.c.bf16 %v13758_v41, %v13756_v5  ;;  %v13760_v39 = vand.u32 4294901760, %v13759_v24  ;;  %v13767_v38 = vld [vmem:[#allocation171_spill] sm:$0xff]  ;;  %v13770_v7 = vand.u32 4294901760, %v13769_v58 }
 0x309   :  { %6854 = vmatprep.subr.bf16.mxu1 %v6853_v45  ;;  %6472 = vmatpush1.bf16.msra.mxu0 %v6471_v21  ;;  %v13764_v45 = vand.u32 4294901760, %v13763_v27  ;;  %v13765_v21 = vld [vmem:[#allocation163_spill] sm:$0xff]  ;;  %v13768_v29 = vand.u32 4294901760, %v13767_v38  ;;  %v13777_v41 = vand.u32 4294901760, %v13776_v62  ;;  %v13788_v38 = vand.u32 4294901760, %v13538_v18 }
 0x30a   :  { %6474 = vmatprep.subr.bf16.mxu0 %v6473_v31  ;;  %v6477_v6 = vpack.c.bf16 %v13762_v32, %v13760_v39  ;;  %v13766_v2 = vand.u32 4294901760, %v13765_v21  ;;  %v13772_v31 = vand.u32 4294901760, %v13771_v8  ;;  %v13781_v32 = vld [vmem:[#allocation191_spill] sm:$0xff]  ;;  %v13799_v18 = vand.u32 4294901760, %v13367_v20 }
 0x30b   :  { %v6861_v42 = vpack.c.bf16 %v13770_v7, %v13768_v29  ;;  %v13782_v27 = vand.u32 4294901760, %v13781_v32  ;;  %v13789_v29 = vand.u32 4294901760, %v13362_v19  ;;  %v13792_v7 = vld [vmem:[#allocation32_spill] sm:$0xff]  ;;  %v13794_v8 = vld [vmem:[#allocation35_spill] sm:$0xff]  ;;  %v13802_v62 = vand.u32 4294901760, %v13371_v46 }
 0x30c   :  { %6856 = vmatpush1.bf16.msra.mxu1 %v6855_v4  ;;  %v6859_v54 = vpack.c.bf16 %v13766_v2, %v13764_v45  ;;  %v6479_v5 = vpack.c.bf16 %v13774_v22, %v13772_v31  ;;  %v13775_v4 = vand.u32 4294901760, %v13524_v17  ;;  %v13784_v17 = vand.u32 4294901760, %v13532_v14  ;;  %v13808_v32 = vld [vmem:[#allocation92_spill] sm:$0xff] }
 0x30d   :  { %6858 = vmatprep.subr.bf16.mxu1 %v6857_v33  ;;  %6476 = vmatpush1.bf16.msra.mxu0 %v6475_v35  ;;  %v13778_v33 = vand.u32 4294901760, %v13527_v10  ;;  %v13779_v35 = vand.u32 4294901760, %v13526_v12  ;;  %v6865_v45 = vpack.c.bf16 %v13782_v27, %v13780_v55  ;;  %v13785_v2 = vand.u32 4294901760, %v13536_v16 }
 0x30e   :  { %6478 = vmatprep.subr.bf16.mxu0 %v6477_v6  ;;  %v6481_v24 = vpack.c.bf16 %v13777_v41, %v13775_v4  ;;  %v13783_v6 = vand.u32 4294901760, %v13533_v9  ;;  %v13786_v10 = vand.u32 4294901760, %v13535_v36  ;;  %v13787_v12 = vand.u32 4294901760, %v13539_v63  ;;  %v13790_v9 = vld [vmem:[#allocation29_spill] sm:$0xff]  ;;  %v13803_v41 = vld [vmem:[#allocation66_spill] sm:$0xff] }
 0x30f   :  { %v6863_v39 = vpack.c.bf16 %v13779_v35, %v13778_v33  ;;  %v13791_v58 = vand.u32 4294901760, %v13790_v9  ;;  %v13795_v16 = vand.u32 4294901760, %v13794_v8  ;;  %v13796_v36 = vand.u32 4294901760, %v13369_v40  ;;  %v13834_v8 = vld [vmem:[#allocation182_spill] sm:$0xff] }
 0x310   :  { %6860 = vmatpush1.bf16.msra.mxu1 %v6859_v54  ;;  %v6483_v21 = vpack.c.bf16 %v13784_v17, %v13783_v6  ;;  %v6485_v54 = vpack.c.bf16 %v13786_v10, %v13785_v2  ;;  %v6867_v28 = vpack.c.bf16 %v13788_v38, %v13787_v12  ;;  %v13798_v63 = vand.u32 4294901760, %v13797_v26 }
 0x311   :  { %6862 = vmatprep.subr.bf16.mxu1 %v6861_v42  ;;  %6480 = vmatpush1.bf16.msra.mxu0 %v6479_v5  ;;  %v6869_v14 = vpack.c.bf16 %v13791_v58, %v13789_v29  ;;  %v13793_v42 = vand.u32 4294901760, %v13792_v7  ;;  %v13800_v5 = vld [vmem:[#allocation50_spill] sm:$0xff]  ;;  %v13805_v35 = vand.u32 4294901760, %v13373_v47  ;;  %v13806_v40 = vand.u32 4294901760, %v13374_v52  ;;  %v13828_v58 = vld [vmem:[#allocation152_spill] sm:$0xff] }
 0x312   :  { %6482 = vmatprep.subr.bf16.mxu0 %v6481_v24  ;;  %v6489_v22 = vpack.c.bf16 %v13798_v63, %v13796_v36  ;;  %v13801_v4 = vand.u32 4294901760, %v13800_v5  ;;  %v13804_v24 = vand.u32 4294901760, %v13803_v41  ;;  %v13807_v55 = vand.u32 4294901760, %v13549_v53  ;;  %v13825_v29 = vld [vmem:[#allocation162_spill] sm:$0xff]  ;;  %v13844_v5 = vld [vmem:[#allocation124_spill] sm:$0xff]  ;;  %v13848_v41 = vld [vmem:[#allocation89_spill] sm:$0xff] }
 0x313   :  { %v6487_v31 = vpack.c.bf16 %v13795_v16, %v13793_v42  ;;  %v13809_v20 = vand.u32 4294901760, %v13808_v32  ;;  %v13811_v6 = vand.u32 4294901760, %v13551_v15  ;;  %v13812_v17 = vand.u32 4294901760, %v13554_v0  ;;  %v13855_v32 = vld [vmem:[#allocation4_spill] sm:$0xff] }
 0x314   :  { %6864 = vmatpush1.bf16.msra.mxu1 %v6863_v39  ;;  %v6871_v19 = vpack.c.bf16 %v13801_v4, %v13799_v18  ;;  %v6873_v33 = vpack.c.bf16 %v13804_v24, %v13802_v62  ;;  %v6491_v39 = vpack.c.bf16 %v13806_v40, %v13805_v35  ;;  %v13813_v47 = vand.u32 4294901760, %v13420_v50  ;;  %v13842_v18 = vld [vmem:[#allocation109_spill] sm:$0xff]  ;;  %v13845_v4 = vld [vmem:[#allocation118_spill] sm:$0xff]  ;;  %v13847_v62 = vld [vmem:[#allocation135_spill] sm:$0xff] }
 0x315   :  { %6866 = vmatprep.subr.bf16.mxu1 %v6865_v45  ;;  %6484 = vmatpush1.bf16.msra.mxu0 %v6483_v21  ;;  %v6493_v27 = vpack.c.bf16 %v13809_v20, %v13807_v55  ;;  %v13810_v45 = vand.u32 4294901760, %v13552_v30  ;;  %v13814_v21 = vand.u32 4294901760, %v13556_v37  ;;  %v13815_v53 = vand.u32 4294901760, %v13382_v25  ;;  %v13849_v24 = vld [vmem:[#allocation151_spill] sm:$0xff]  ;;  %v13851_v35 = vld [vmem:[#allocation96_spill] sm:$0xff]  ;;  %v13854_v55 = vld [vmem:[#allocation153_spill] sm:$0xff] }
 0x316   :  { %6486 = vmatprep.subr.bf16.mxu0 %v6485_v54  ;;  %v6877_v52 = vpack.c.bf16 %v13813_v47, %v13812_v17  ;;  %v13816_v10 = vand.u32 4294901760, %v13431_v49  ;;  %v13817_v30 = vand.u32 4294901760, %v13432_v56  ;;  %v13818_v15 = vand.u32 4294901760, %v13559_v3  ;;  %v13852_v40 = vld [vmem:[#allocation144_spill] sm:$0xff]  ;;  %v13857_v20 = vld [vmem:[#allocation9_spill] sm:$0xff]  ;;  %v13862_v17 = vld [vmem:[#allocation39_spill] sm:$0xff] }
 0x317   :  { %v6875_v46 = vpack.c.bf16 %v13811_v6, %v13810_v45  ;;  %v6495_v2 = vpack.c.bf16 %v13815_v53, %v13814_v21  ;;  %v13819_v12 = vand.u32 4294901760, %v13384_v44  ;;  %v13820_v50 = vand.u32 4294901760, %v13433_v57  ;;  %v13859_v45 = vld [vmem:[#allocation22_spill] sm:$0xff]  ;;  %v13860_v6 = vld [vmem:[#allocation31_spill] sm:$0xff]  ;;  %v13863_v47 = vld [vmem:[#allocation37_spill] sm:$0xff] }
 0x318   :  { %6868 = vmatpush1.bf16.msra.mxu1 %v6867_v28  ;;  %v6497_v54 = vpack.c.bf16 %v13817_v30, %v13816_v10  ;;  %v13821_v37 = vand.u32 4294901760, %v13434_v48  ;;  %v13822_v38 = vand.u32 4294901760, %v9764_v61  ;;  %v13823_v49 = vand.u32 4294901760, %v13435_v60  ;;  %v13831_v61 = vld [vmem:[#allocation167_spill] sm:$0xff]  ;;  %v13865_v21 = vld [vmem:[#allocation44_spill] sm:$0xff]  ;;  %v13866_v53 = vld [vmem:[#allocation53_spill] sm:$0xff] }
 0x319   :  { %6870 = vmatprep.subr.bf16.mxu1 %v6869_v14  ;;  %6488 = vmatpush1.bf16.msra.mxu0 %v6487_v31  ;;  %v6879_v0 = vpack.c.bf16 %v13819_v12, %v13818_v15  ;;  %v13824_v56 = vand.u32 4294901760, %v13392_v23  ;;  %v13826_v3 = vand.u32 4294901760, %v13825_v29  ;;  %v13827_v44 = vand.u32 4294901760, %v13390_v43  ;;  %v13836_v31 = vld [vmem:[#allocation187_spill] sm:$0xff]  ;;  %v13838_v43 = vld [vmem:[#allocation189_spill] sm:$0xff]  ;;  %v13869_v30 = vld [vmem:[#allocation60_spill] sm:$0xff] }
 0x31a   :  { %6490 = vmatprep.subr.bf16.mxu0 %v6489_v22  ;;  %v6881_v25 = vpack.c.bf16 %v13821_v37, %v13820_v50  ;;  %v6499_v28 = vpack.c.bf16 %v13823_v49, %v13822_v38  ;;  %v13829_v14 = vand.u32 4294901760, %v13828_v58  ;;  %v13830_v48 = vand.u32 4294901760, %v13394_v34  ;;  %v13840_v22 = vld [vmem:[#allocation105_spill] sm:$0xff]  ;;  %v13841_v34 = vld [vmem:[#allocation196_spill] sm:$0xff]  ;;  %v13881_v29 = vld [vmem:[#allocation178_spill] sm:$0xff] }
 0x31b   :  { %v6501_v9 = vpack.c.bf16 %v13826_v3, %v13824_v56  ;;  %v13832_v7 = vand.u32 4294901760, %v13831_v61  ;;  %v13833_v42 = vand.u32 4294901760, %v13396_v11  ;;  %v13835_v23 = vand.u32 4294901760, %v13834_v8  ;;  %v13843_v11 = vld [vmem:[#allocation111_spill] sm:$0xff]  ;;  %v13868_v10 = vld [vmem:[#allocation69_spill] sm:$0xff]  ;;  %v13872_v12 = vld [vmem:[#allocation136_spill] sm:$0xff] }
 0x31c   :  { %6872 = vmatpush1.bf16.msra.mxu1 %v6871_v19  ;;  %v6883_v57 = vpack.c.bf16 %v13829_v14, %v13827_v44  ;;  %v13837_v36 = vand.u32 4294901760, %v13836_v31  ;;  %v13839_v26 = vand.u32 4294901760, %v13838_v43  ;;  %v13846_v19 = vld [vmem:[#allocation127_spill] sm:$0xff]  ;;  %v13871_v15 = vld [vmem:[#allocation73_spill] sm:$0xff]  ;;  %v13875_v37 = vld [vmem:[#allocation148_spill] sm:$0xff] }
 0x31d   :  { %6874 = vmatprep.subr.bf16.mxu1 %v6873_v33  ;;  %6492 = vmatpush1.bf16.msra.mxu0 %v6491_v39  ;;  %v6885_v60 = vpack.c.bf16 %v13832_v7, %v13830_v48  ;;  %v6503_v16 = vpack.c.bf16 %v13835_v23, %v13833_v42  ;;  %v13850_v33 = vld [vmem:[#allocation94_spill] sm:$0xff]  ;;  %v13853_v39 = vld [vmem:[#allocation147_spill] sm:$0xff]  ;;  %v13874_v50 = vld [vmem:[#allocation133_spill] sm:$0xff] }
 0x31e   :  { %6494 = vmatprep.subr.bf16.mxu0 %v6493_v27  ;;  %v6887_v63 = vpack.c.bf16 %v13839_v26, %v13837_v36  ;;  %v13858_v27 = vld [vmem:[#allocation18_spill] sm:$0xff]  ;;  %v13877_v38 = vld [vmem:[#allocation160_spill] sm:$0xff]  ;;  %v13878_v49 = vld [vmem:[#allocation169_spill] sm:$0xff] }
 0x31f   :  { %v13880_v56 = vld [vmem:[#allocation183_spill] sm:$0xff]  ;;  %v13882_v3 = vld [vmem:[#allocation188_spill] sm:$0xff]  ;;  %v13885_v58 = vld [vmem:[#allocation6_spill] sm:$0xff] }
 0x320   :  { %6876 = vmatpush1.bf16.msra.mxu1 %v6875_v46  ;;  %v13861_v46 = vld [vmem:[#allocation23_spill] sm:$0xff]  ;;  %v13886_v14 = vld [vmem:[#allocation26_spill] sm:$0xff]  ;;  %v13889_v61 = vld [vmem:[#allocation41_spill] sm:$0xff] }
 0x321   :  { %6878 = vmatprep.subr.bf16.mxu1 %v6877_v52  ;;  %6496 = vmatpush1.bf16.msra.mxu0 %v6495_v2  ;;  %v13864_v52 = vld [vmem:[#allocation52_spill] sm:$0xff]  ;;  %v13867_v2 = vld [vmem:[#allocation58_spill] sm:$0xff]  ;;  %v13884_v44 = vld [vmem:[#allocation11_spill] sm:$0xff] }
 0x322   :  { %6498 = vmatprep.subr.bf16.mxu0 %v6497_v54  ;;  %v13870_v54 = vld [vmem:[#allocation75_spill] sm:$0xff]  ;;  %v13890_v7 = vld [vmem:[#allocation62_spill] sm:$0xff]  ;;  %v13899_v26 = vld [vmem:[#allocation140_spill] sm:$0xff] }
 0x323   :  { %v13888_v48 = vld [vmem:[#allocation47_spill] sm:$0xff]  ;;  %v13893_v8 = vld [vmem:[#allocation78_spill] sm:$0xff] }
 0x324   :  { %6880 = vmatpush1.bf16.msra.mxu1 %v6879_v0  ;;  %v13873_v0 = vld [vmem:[#allocation81_spill] sm:$0xff]  ;;  %v13892_v42 = vld [vmem:[#allocation83_spill] sm:$0xff]  ;;  %v13894_v23 = vld [vmem:[#allocation98_spill] sm:$0xff] }
 0x325   :  { %6882 = vmatprep.subr.bf16.mxu1 %v6881_v25  ;;  %6500 = vmatpush1.bf16.msra.mxu0 %v6499_v28  ;;  %v13876_v25 = vld [vmem:[#allocation165_spill] sm:$0xff]  ;;  %v13896_v31 = vld [vmem:[#allocation119_spill] sm:$0xff]  ;;  %v13897_v36 = vld [vmem:[#allocation114_spill] sm:$0xff] }
 0x326   :  { %6502 = vmatprep.subr.bf16.mxu0 %v6501_v9  ;;  %v13879_v28 = vld [vmem:[#allocation173_spill] sm:$0xff]  ;;  %v13898_v43 = vld [vmem:[#allocation134_spill] sm:$0xff] }
 0x327   :  { %v13883_v9 = vld [vmem:[#allocation193_spill] sm:$0xff] }
 0x328   :  { %6884 = vmatpush1.bf16.msra.mxu1 %v6883_v57  ;;  %v13887_v57 = vld [vmem:[#allocation38_spill] sm:$0xff] }
 0x329   :  { %6886 = vmatprep.subr.bf16.mxu1 %v6885_v60  ;;  %6504 = vmatpush1.bf16.msra.mxu0 %v6503_v16  ;;  %v13891_v60 = vld [vmem:[#allocation68_spill] sm:$0xff] }
 0x32a   :  { %6506 = vmatprep.subr.bf16.mxu0 %v13840_v22  ;;  %v13895_v16 = vld [vmem:[#allocation104_spill] sm:$0xff] }
 0x32b   :  { %v13901_v22 = vld [vmem:[#allocation164_spill] sm:$0xff] }
 0x32c   :  { %6888 = vmatpush1.bf16.msra.mxu1 %v6887_v63  ;;  %3978 = vmatmul.mubr.f32.vlgmr.msra.gmra.mrb[2].mxu0 %v13841_v34  ;;  %v13900_v63 = vld [vmem:[#allocation155_spill] sm:$0xff] }
 0x32d   :  { %6890 = vmatprep.subr.bf16.mxu1 %v13842_v18  ;;  %6508 = vmatpush1.bf16.msra.mxu0 %v13843_v11 }
 0x32e   :  { %6510 = vmatprep.subr.bf16.mxu0 %v13844_v5  ;;  %4113 = vmatprep.mubr.f32.mxu0 %v13653_v1 }
 0x32f   :  { %5262 = vmatmul.mubr.f32.vlgmr.msra.gmra.mrb[2].mxu1 %v13841_v34 }
 0x330   :  { %6892 = vmatpush1.bf16.msra.mxu1 %v13845_v4  ;;  %5397 = vmatprep.mubr.f32.mxu1 %v13653_v1  ;;  %v13856_v1 = vld [vmem:[#allocation16_spill] sm:$0xff] }
 0x331   :  { %6894 = vmatprep.subr.bf16.mxu1 %v13846_v19  ;;  %6512 = vmatpush1.bf16.msra.mxu0 %v13847_v62 }
 0x332   :  { %6514 = vmatprep.subr.bf16.mxu0 %v13848_v41 }
 0x334   :  { %6896 = vmatpush1.bf16.msra.mxu1 %v13849_v24 }
 0x335   :  { %6898 = vmatprep.subr.bf16.mxu1 %v13850_v33  ;;  %6516 = vmatpush1.bf16.msra.mxu0 %v13851_v35 }
 0x336   :  { %6518 = vmatprep.subr.bf16.mxu0 %v13852_v40 }
 0x338   :  { %6900 = vmatpush1.bf16.msra.mxu1 %v13853_v39 }
 0x339   :  { %6902 = vmatprep.subr.bf16.mxu1 %v13854_v55  ;;  %6520 = vmatpush1.bf16.msra.mxu0 %v13855_v32 }
 0x33a   :  { %6522 = vmatprep.subr.bf16.mxu0 %v13856_v1 }
 0x33c   :  { %6904 = vmatpush1.bf16.msra.mxu1 %v13857_v20 }
 0x33d   :  { %6906 = vmatprep.subr.bf16.mxu1 %v13858_v27  ;;  %6524 = vmatpush1.bf16.msra.mxu0 %v13859_v45 }
 0x33e   :  { %6526 = vmatprep.subr.bf16.mxu0 %v13860_v6 }
 0x340   :  { %6908 = vmatpush1.bf16.msra.mxu1 %v13861_v46 }
 0x341   :  { %6910 = vmatprep.subr.bf16.mxu1 %v13862_v17  ;;  %6528 = vmatpush1.bf16.msra.mxu0 %v13863_v47 }
 0x342   :  { %6530 = vmatprep.subr.bf16.mxu0 %v13864_v52 }
 0x344   :  { %6912 = vmatpush1.bf16.msra.mxu1 %v13865_v21 }
 0x345   :  { %6914 = vmatprep.subr.bf16.mxu1 %v13866_v53  ;;  %6532 = vmatpush1.bf16.msra.mxu0 %v13867_v2 }
 0x346   :  { %6534 = vmatprep.subr.bf16.mxu0 %v13868_v10 }
 0x348   :  { %6916 = vmatpush1.bf16.msra.mxu1 %v13869_v30 }
 0x349   :  { %6918 = vmatprep.subr.bf16.mxu1 %v13870_v54  ;;  %6536 = vmatpush1.bf16.msra.mxu0 %v13871_v15 }
 0x34a   :  { %6538 = vmatprep.subr.bf16.mxu0 %v13872_v12 }
 0x34c   :  { %6920 = vmatpush1.bf16.msra.mxu1 %v13873_v0 }
 0x34d   :  { %6922 = vmatprep.subr.bf16.mxu1 %v13874_v50  ;;  %6540 = vmatpush1.bf16.msra.mxu0 %v13875_v37 }
 0x34e   :  { %6542 = vmatprep.subr.bf16.mxu0 %v13876_v25 }
 0x350   :  { %6924 = vmatpush1.bf16.msra.mxu1 %v13877_v38 }
 0x351   :  { %6926 = vmatprep.subr.bf16.mxu1 %v13878_v49  ;;  %6544 = vmatpush1.bf16.msra.mxu0 %v13879_v28 }
 0x352   :  { %6546 = vmatprep.subr.bf16.mxu0 %v13880_v56 }
 0x354   :  { %6928 = vmatpush1.bf16.msra.mxu1 %v13881_v29 }
 0x355   :  { %6930 = vmatprep.subr.bf16.mxu1 %v13882_v3  ;;  %6548 = vmatpush1.bf16.msra.mxu0 %v13883_v9 }
 0x356   :  { %6550 = vmatprep.subr.bf16.mxu0 %v13884_v44 }
 0x358   :  { %6932 = vmatpush1.bf16.msra.mxu1 %v13885_v58 }
 0x359   :  { %6934 = vmatprep.subr.bf16.mxu1 %v13886_v14  ;;  %6552 = vmatpush1.bf16.msra.mxu0 %v13887_v57 }
 0x35a   :  { %6554 = vmatprep.subr.bf16.mxu0 %v13888_v48 }
 0x35c   :  { %6936 = vmatpush1.bf16.msra.mxu1 %v13889_v61 }
 0x35d   :  { %6938 = vmatprep.subr.bf16.mxu1 %v13890_v7  ;;  %6556 = vmatpush1.bf16.msra.mxu0 %v13891_v60 }
 0x35e   :  { %6558 = vmatprep.subr.bf16.mxu0 %v13892_v42 }
 0x360   :  { %6940 = vmatpush1.bf16.msra.mxu1 %v13893_v8 }
 0x361   :  { %6942 = vmatprep.subr.bf16.mxu1 %v13894_v23  ;;  %6560 = vmatpush1.bf16.msra.mxu0 %v13895_v16 }
 0x362   :  { %6562 = vmatprep.subr.bf16.mxu0 %v13896_v31 }
 0x364   :  { %6944 = vmatpush1.bf16.msra.mxu1 %v13897_v36 }
 0x365   :  { %6946 = vmatprep.subr.bf16.mxu1 %v13898_v43  ;;  %6564 = vmatpush1.bf16.msra.mxu0 %v13899_v26 }
 0x366   :  { %6566 = vmatprep.subr.bf16.mxu0 %v13900_v63 }
 0x368   :  { %6948 = vmatpush1.bf16.msra.mxu1 %v13632_v59 }
 0x369   :  { %6950 = vmatprep.subr.bf16.mxu1 %v13901_v22  ;;  %6568 = vmatpush1.bf16.msra.mxu0 %v13634_v13 }
 0x36c   :  { %6952 = vmatpush1.bf16.msra.mxu1 %v13641_v51  ;;  %4115 = vmatmul.mubr.f32.vlgmr.msra.gmra.mrb[2].mxu0 %v13841_v34 }
 0x36f   :  { %5399 = vmatmul.mubr.f32.vlgmr.msra.gmra.mrb[2].mxu1 %v13841_v34 }
 0x43f   :  { %v4116_v18 = vpop.f32.mrb[2].mxu0 }
 0x440   :  { %5409 = vst [vmem:[%s11315_s2 + $0x20] sm:$0xff] %v4116_v18  ;;  %v4118_v11 = vpop.f32.mrb[3].mxu0 }
 0x441   :  { %5410 = vst [vmem:[%s11315_s2 + $0x28] sm:$0xff] %v4118_v11 }
 0x442   :  { %v5400_v59 = vpop.f32.mrb[2].mxu1 }
 0x443   :  { %5411 = vst [vmem:[%s11315_s2 + $0x30] sm:$0xff] %v5400_v59  ;;  %v5402_v13 = vpop.f32.mrb[3].mxu1 }
 0x444   :  { %5412 = vst [vmem:[%s11315_s2 + $0x38] sm:$0xff] %v5402_v13 }

// kernel: interpolation_forward.1
= control target key start
LH: loop header
LB: loop body
LE: loop exit
PB: predicated region body
PF: predicated region fallthrough
CT: control target
= control target key end

     0   :  { %s1646_s1 = inlined_call_operand.vmem [shape: f32[256,1024], index: 1, kind: input, shape index: {}]   ;;  %s1647_s0 = inlined_call_operand.vmem [shape: f32[8,256], index: 0, kind: input, shape index: {}]   ;;  %s1648_s2 = inlined_call_operand.vmem [shape: f32[8,1024], index: 2, kind: output, shape index: {}]  }
   0x1   :  { %v14_v0 = vld [vmem:[%s1646_s1 + $0x8] sm:$0xff]  ;;  %v16_v2 = vld [vmem:[%s1646_s1 + $0x18] sm:$0xff]  ;;  %v13_v5 = vld [vmem:[%s1646_s1] sm:$0xff] }
   0x2   :  { %v22_v1 = vld [vmem:[%s1646_s1 + $0x48] sm:$0xff]  ;;  %v24_v4 = vld [vmem:[%s1646_s1 + $0x58] sm:$0xff]  ;;  %v21_v6 = vld [vmem:[%s1646_s1 + $0x40] sm:$0xff] }
   0x3   :  { %v565_v3 = vpack.c.bf16 %v22_v1, %v14_v0  ;;  %v629_v7 = vpack.c.bf16 %v24_v4, %v16_v2  ;;  %v567_v8 = vpack.c.bf16 %v21_v6, %v13_v5  ;;  %v15_v9 = vld [vmem:[%s1646_s1 + $0x10] sm:$0xff]  ;;  %v30_v11 = vld [vmem:[%s1646_s1 + $0x88] sm:$0xff]  ;;  %v32_v14 = vld [vmem:[%s1646_s1 + $0x98] sm:$0xff] }
   0x4   :  { %v23_v10 = vld [vmem:[%s1646_s1 + $0x50] sm:$0xff]  ;;  %v38_v13 = vld [vmem:[%s1646_s1 + $0xc8] sm:$0xff]  ;;  %v40_v15 = vld [vmem:[%s1646_s1 + $0xd8] sm:$0xff] }
   0x5   :  { %566 = vmatprep.subr.bf16.mxu0 %v565_v3  ;;  %v631_v12 = vpack.c.bf16 %v23_v10, %v15_v9  ;;  %630 = vmatprep.subr.bf16.mxu1 %v629_v7  ;;  %v569_v16 = vpack.c.bf16 %v38_v13, %v30_v11  ;;  %v633_v17 = vpack.c.bf16 %v40_v15, %v32_v14  ;;  %v29_v18 = vld [vmem:[%s1646_s1 + $0x80] sm:$0xff]  ;;  %v31_v20 = vld [vmem:[%s1646_s1 + $0x90] sm:$0xff]  ;;  %v46_v23 = vld [vmem:[%s1646_s1 + $0x108] sm:$0xff] }
   0x6   :  { %568 = vmatpush1.bf16.msra.mxu0 %v567_v8  ;;  %v37_v19 = vld [vmem:[%s1646_s1 + $0xc0] sm:$0xff]  ;;  %v39_v22 = vld [vmem:[%s1646_s1 + $0xd0] sm:$0xff]  ;;  %v54_v24 = vld [vmem:[%s1646_s1 + $0x148] sm:$0xff] }
   0x7   :  { %632 = vmatpush1.bf16.msra.mxu1 %v631_v12  ;;  %v571_v21 = vpack.c.bf16 %v37_v19, %v29_v18  ;;  %570 = vmatprep.subr.bf16.mxu0 %v569_v16  ;;  %v635_v25 = vpack.c.bf16 %v39_v22, %v31_v20  ;;  %v573_v26 = vpack.c.bf16 %v54_v24, %v46_v23  ;;  %v48_v27 = vld [vmem:[%s1646_s1 + $0x118] sm:$0xff]  ;;  %v45_v29 = vld [vmem:[%s1646_s1 + $0x100] sm:$0xff]  ;;  %v47_v32 = vld [vmem:[%s1646_s1 + $0x110] sm:$0xff] }
   0x8   :  { %634 = vmatprep.subr.bf16.mxu1 %v633_v17  ;;  %v56_v28 = vld [vmem:[%s1646_s1 + $0x158] sm:$0xff]  ;;  %v53_v31 = vld [vmem:[%s1646_s1 + $0x140] sm:$0xff]  ;;  %v55_v33 = vld [vmem:[%s1646_s1 + $0x150] sm:$0xff] }
   0x9   :  { %v637_v30 = vpack.c.bf16 %v56_v28, %v48_v27  ;;  %v575_v34 = vpack.c.bf16 %v53_v31, %v45_v29  ;;  %v62_v35 = vld [vmem:[%s1646_s1 + $0x188] sm:$0xff]  ;;  %v64_v37 = vld [vmem:[%s1646_s1 + $0x198] sm:$0xff]  ;;  %v639_v38 = vpack.c.bf16 %v55_v33, %v47_v32  ;;  %v61_v41 = vld [vmem:[%s1646_s1 + $0x180] sm:$0xff] }
   0xa   :  { %572 = vmatpush1.bf16.msra.mxu0 %v571_v21  ;;  %v70_v36 = vld [vmem:[%s1646_s1 + $0x1c8] sm:$0xff]  ;;  %v72_v40 = vld [vmem:[%s1646_s1 + $0x1d8] sm:$0xff]  ;;  %v69_v42 = vld [vmem:[%s1646_s1 + $0x1c0] sm:$0xff] }
   0xb   :  { %636 = vmatpush1.bf16.msra.mxu1 %v635_v25  ;;  %574 = vmatprep.subr.bf16.mxu0 %v573_v26  ;;  %v577_v39 = vpack.c.bf16 %v70_v36, %v62_v35  ;;  %v641_v43 = vpack.c.bf16 %v72_v40, %v64_v37  ;;  %v63_v44 = vld [vmem:[%s1646_s1 + $0x190] sm:$0xff]  ;;  %v78_v46 = vld [vmem:[%s1646_s1 + $0x208] sm:$0xff]  ;;  %v80_v48 = vld [vmem:[%s1646_s1 + $0x218] sm:$0xff]  ;;  %v579_v50 = vpack.c.bf16 %v69_v42, %v61_v41 }
   0xc   :  { %638 = vmatprep.subr.bf16.mxu1 %v637_v30  ;;  %v71_v45 = vld [vmem:[%s1646_s1 + $0x1d0] sm:$0xff]  ;;  %v86_v47 = vld [vmem:[%s1646_s1 + $0x248] sm:$0xff]  ;;  %v88_v49 = vld [vmem:[%s1646_s1 + $0x258] sm:$0xff] }
   0xd   :  { %v643_v51 = vpack.c.bf16 %v71_v45, %v63_v44  ;;  %v581_v52 = vpack.c.bf16 %v86_v47, %v78_v46  ;;  %v77_v53 = vld [vmem:[%s1646_s1 + $0x200] sm:$0xff]  ;;  %v79_v55 = vld [vmem:[%s1646_s1 + $0x210] sm:$0xff]  ;;  %v645_v56 = vpack.c.bf16 %v88_v49, %v80_v48  ;;  %v94_v58 = vld [vmem:[%s1646_s1 + $0x288] sm:$0xff] }
   0xe   :  { %576 = vmatpush1.bf16.msra.mxu0 %v575_v34  ;;  %v85_v54 = vld [vmem:[%s1646_s1 + $0x240] sm:$0xff]  ;;  %v87_v57 = vld [vmem:[%s1646_s1 + $0x250] sm:$0xff]  ;;  %v102_v59 = vld [vmem:[%s1646_s1 + $0x2c8] sm:$0xff] }
   0xf   :  { %640 = vmatpush1.bf16.msra.mxu1 %v639_v38  ;;  %578 = vmatprep.subr.bf16.mxu0 %v577_v39  ;;  %v96_v60 = vld [vmem:[%s1646_s1 + $0x298] sm:$0xff]  ;;  %v583_v62 = vpack.c.bf16 %v85_v54, %v77_v53  ;;  %v647_v63 = vpack.c.bf16 %v87_v57, %v79_v55  ;;  %v585_v0 = vpack.c.bf16 %v102_v59, %v94_v58  ;;  %v93_v1 = vld [vmem:[%s1646_s1 + $0x280] sm:$0xff]  ;;  %v95_v3 = vld [vmem:[%s1646_s1 + $0x290] sm:$0xff] }
  0x10   :  { %642 = vmatprep.subr.bf16.mxu1 %v641_v43  ;;  %v104_v61 = vld [vmem:[%s1646_s1 + $0x2d8] sm:$0xff]  ;;  %v101_v2 = vld [vmem:[%s1646_s1 + $0x2c0] sm:$0xff]  ;;  %v103_v5 = vld [vmem:[%s1646_s1 + $0x2d0] sm:$0xff] }
  0x11   :  { %v649_v4 = vpack.c.bf16 %v104_v61, %v96_v60  ;;  %v110_v6 = vld [vmem:[%s1646_s1 + $0x308] sm:$0xff]  ;;  %v112_v8 = vld [vmem:[%s1646_s1 + $0x318] sm:$0xff]  ;;  %v587_v10 = vpack.c.bf16 %v101_v2, %v93_v1  ;;  %v651_v11 = vpack.c.bf16 %v103_v5, %v95_v3  ;;  %v109_v13 = vld [vmem:[%s1646_s1 + $0x300] sm:$0xff] }
  0x12   :  { %580 = vmatpush1.bf16.msra.mxu0 %v579_v50  ;;  %v118_v7 = vld [vmem:[%s1646_s1 + $0x348] sm:$0xff]  ;;  %v120_v9 = vld [vmem:[%s1646_s1 + $0x358] sm:$0xff]  ;;  %v117_v14 = vld [vmem:[%s1646_s1 + $0x340] sm:$0xff] }
  0x13   :  { %644 = vmatpush1.bf16.msra.mxu1 %v643_v51  ;;  %582 = vmatprep.subr.bf16.mxu0 %v581_v52  ;;  %v589_v12 = vpack.c.bf16 %v118_v7, %v110_v6  ;;  %v111_v15 = vld [vmem:[%s1646_s1 + $0x310] sm:$0xff]  ;;  %v653_v16 = vpack.c.bf16 %v120_v9, %v112_v8  ;;  %v126_v18 = vld [vmem:[%s1646_s1 + $0x388] sm:$0xff]  ;;  %v128_v20 = vld [vmem:[%s1646_s1 + $0x398] sm:$0xff]  ;;  %v591_v22 = vpack.c.bf16 %v117_v14, %v109_v13 }
  0x14   :  { %646 = vmatprep.subr.bf16.mxu1 %v645_v56  ;;  %v119_v17 = vld [vmem:[%s1646_s1 + $0x350] sm:$0xff]  ;;  %v134_v19 = vld [vmem:[%s1646_s1 + $0x3c8] sm:$0xff]  ;;  %v136_v21 = vld [vmem:[%s1646_s1 + $0x3d8] sm:$0xff] }
  0x15   :  { %v655_v23 = vpack.c.bf16 %v119_v17, %v111_v15  ;;  %v593_v24 = vpack.c.bf16 %v134_v19, %v126_v18  ;;  %v125_v25 = vld [vmem:[%s1646_s1 + $0x380] sm:$0xff]  ;;  %v127_v27 = vld [vmem:[%s1646_s1 + $0x390] sm:$0xff]  ;;  %v657_v28 = vpack.c.bf16 %v136_v21, %v128_v20  ;;  %v142_v30 = vld [vmem:[%s1646_s1 + $0x408] sm:$0xff] }
  0x16   :  { %584 = vmatpush1.bf16.msra.mxu0 %v583_v62  ;;  %v133_v26 = vld [vmem:[%s1646_s1 + $0x3c0] sm:$0xff]  ;;  %v135_v29 = vld [vmem:[%s1646_s1 + $0x3d0] sm:$0xff]  ;;  %v150_v31 = vld [vmem:[%s1646_s1 + $0x448] sm:$0xff] }
  0x17   :  { %648 = vmatpush1.bf16.msra.mxu1 %v647_v63  ;;  %586 = vmatprep.subr.bf16.mxu0 %v585_v0  ;;  %v144_v32 = vld [vmem:[%s1646_s1 + $0x418] sm:$0xff]  ;;  %v595_v34 = vpack.c.bf16 %v133_v26, %v125_v25  ;;  %v659_v35 = vpack.c.bf16 %v135_v29, %v127_v27  ;;  %v597_v36 = vpack.c.bf16 %v150_v31, %v142_v30  ;;  %v141_v37 = vld [vmem:[%s1646_s1 + $0x400] sm:$0xff]  ;;  %v143_v39 = vld [vmem:[%s1646_s1 + $0x410] sm:$0xff] }
  0x18   :  { %650 = vmatprep.subr.bf16.mxu1 %v649_v4  ;;  %v152_v33 = vld [vmem:[%s1646_s1 + $0x458] sm:$0xff]  ;;  %v149_v38 = vld [vmem:[%s1646_s1 + $0x440] sm:$0xff]  ;;  %v151_v41 = vld [vmem:[%s1646_s1 + $0x450] sm:$0xff] }
  0x19   :  { %v661_v40 = vpack.c.bf16 %v152_v33, %v144_v32  ;;  %v158_v42 = vld [vmem:[%s1646_s1 + $0x488] sm:$0xff]  ;;  %v160_v44 = vld [vmem:[%s1646_s1 + $0x498] sm:$0xff]  ;;  %v599_v46 = vpack.c.bf16 %v149_v38, %v141_v37  ;;  %v663_v47 = vpack.c.bf16 %v151_v41, %v143_v39  ;;  %v157_v49 = vld [vmem:[%s1646_s1 + $0x480] sm:$0xff] }
  0x1a   :  { %588 = vmatpush1.bf16.msra.mxu0 %v587_v10  ;;  %v166_v43 = vld [vmem:[%s1646_s1 + $0x4c8] sm:$0xff]  ;;  %v168_v45 = vld [vmem:[%s1646_s1 + $0x4d8] sm:$0xff]  ;;  %v165_v50 = vld [vmem:[%s1646_s1 + $0x4c0] sm:$0xff] }
  0x1b   :  { %652 = vmatpush1.bf16.msra.mxu1 %v651_v11  ;;  %590 = vmatprep.subr.bf16.mxu0 %v589_v12  ;;  %v601_v48 = vpack.c.bf16 %v166_v43, %v158_v42  ;;  %v159_v51 = vld [vmem:[%s1646_s1 + $0x490] sm:$0xff]  ;;  %v665_v52 = vpack.c.bf16 %v168_v45, %v160_v44  ;;  %v174_v54 = vld [vmem:[%s1646_s1 + $0x508] sm:$0xff]  ;;  %v176_v56 = vld [vmem:[%s1646_s1 + $0x518] sm:$0xff]  ;;  %v603_v58 = vpack.c.bf16 %v165_v50, %v157_v49 }
  0x1c   :  { %654 = vmatprep.subr.bf16.mxu1 %v653_v16  ;;  %v167_v53 = vld [vmem:[%s1646_s1 + $0x4d0] sm:$0xff]  ;;  %v182_v55 = vld [vmem:[%s1646_s1 + $0x548] sm:$0xff]  ;;  %v184_v57 = vld [vmem:[%s1646_s1 + $0x558] sm:$0xff] }
  0x1d   :  { %v667_v59 = vpack.c.bf16 %v167_v53, %v159_v51  ;;  %v605_v60 = vpack.c.bf16 %v182_v55, %v174_v54  ;;  %v173_v61 = vld [vmem:[%s1646_s1 + $0x500] sm:$0xff]  ;;  %v175_v63 = vld [vmem:[%s1646_s1 + $0x510] sm:$0xff]  ;;  %v669_v0 = vpack.c.bf16 %v184_v57, %v176_v56  ;;  %v190_v2 = vld [vmem:[%s1646_s1 + $0x588] sm:$0xff] }
  0x1e   :  { %592 = vmatpush1.bf16.msra.mxu0 %v591_v22  ;;  %v181_v62 = vld [vmem:[%s1646_s1 + $0x540] sm:$0xff]  ;;  %v183_v1 = vld [vmem:[%s1646_s1 + $0x550] sm:$0xff]  ;;  %v198_v3 = vld [vmem:[%s1646_s1 + $0x5c8] sm:$0xff] }
  0x1f   :  { %656 = vmatpush1.bf16.msra.mxu1 %v655_v23  ;;  %594 = vmatprep.subr.bf16.mxu0 %v593_v24  ;;  %v192_v4 = vld [vmem:[%s1646_s1 + $0x598] sm:$0xff]  ;;  %v607_v6 = vpack.c.bf16 %v181_v62, %v173_v61  ;;  %v189_v7 = vld [vmem:[%s1646_s1 + $0x580] sm:$0xff]  ;;  %v671_v8 = vpack.c.bf16 %v183_v1, %v175_v63  ;;  %v609_v9 = vpack.c.bf16 %v198_v3, %v190_v2  ;;  %v191_v11 = vld [vmem:[%s1646_s1 + $0x590] sm:$0xff] }
  0x20   :  { %658 = vmatprep.subr.bf16.mxu1 %v657_v28  ;;  %v200_v5 = vld [vmem:[%s1646_s1 + $0x5d8] sm:$0xff]  ;;  %v197_v10 = vld [vmem:[%s1646_s1 + $0x5c0] sm:$0xff]  ;;  %v199_v12 = vld [vmem:[%s1646_s1 + $0x5d0] sm:$0xff] }
  0x21   :  { %v673_v13 = vpack.c.bf16 %v200_v5, %v192_v4  ;;  %v206_v14 = vld [vmem:[%s1646_s1 + $0x608] sm:$0xff]  ;;  %v208_v17 = vld [vmem:[%s1646_s1 + $0x618] sm:$0xff]  ;;  %v611_v19 = vpack.c.bf16 %v197_v10, %v189_v7  ;;  %v675_v20 = vpack.c.bf16 %v199_v12, %v191_v11  ;;  %v205_v22 = vld [vmem:[%s1646_s1 + $0x600] sm:$0xff] }
  0x22   :  { %596 = vmatpush1.bf16.msra.mxu0 %v595_v34  ;;  %v214_v15 = vld [vmem:[%s1646_s1 + $0x648] sm:$0xff]  ;;  %v216_v18 = vld [vmem:[%s1646_s1 + $0x658] sm:$0xff]  ;;  %v213_v23 = vld [vmem:[%s1646_s1 + $0x640] sm:$0xff] }
  0x23   :  { %660 = vmatpush1.bf16.msra.mxu1 %v659_v35  ;;  %598 = vmatprep.subr.bf16.mxu0 %v597_v36  ;;  %v1133_v16 = vld [vmem:[%s1647_s0 + $0x8] sm:$0xff]  ;;  %v613_v21 = vpack.c.bf16 %v214_v15, %v206_v14  ;;  %v207_v24 = vld [vmem:[%s1646_s1 + $0x610] sm:$0xff]  ;;  %v677_v25 = vpack.c.bf16 %v216_v18, %v208_v17  ;;  %v224_v29 = vld [vmem:[%s1646_s1 + $0x698] sm:$0xff]  ;;  %v615_v31 = vpack.c.bf16 %v213_v23, %v205_v22 }
  0x24   :  { %662 = vmatprep.subr.bf16.mxu1 %v661_v40  ;;  %333 = vmatprep.mubr.f32.mxu0 %v1133_v16  ;;  %v215_v26 = vld [vmem:[%s1646_s1 + $0x650] sm:$0xff]  ;;  %v222_v27 = vld [vmem:[%s1646_s1 + $0x688] sm:$0xff]  ;;  %v232_v30 = vld [vmem:[%s1646_s1 + $0x6d8] sm:$0xff] }
  0x25   :  { %404 = vmatprep.mubr.f32.mxu1 %v1133_v16  ;;  %v230_v28 = vld [vmem:[%s1646_s1 + $0x6c8] sm:$0xff]  ;;  %v679_v32 = vpack.c.bf16 %v215_v26, %v207_v24  ;;  %v221_v34 = vld [vmem:[%s1646_s1 + $0x680] sm:$0xff]  ;;  %v223_v36 = vld [vmem:[%s1646_s1 + $0x690] sm:$0xff]  ;;  %v681_v37 = vpack.c.bf16 %v232_v30, %v224_v29 }
  0x26   :  { %600 = vmatpush1.bf16.msra.mxu0 %v599_v46  ;;  %v617_v33 = vpack.c.bf16 %v230_v28, %v222_v27  ;;  %v229_v35 = vld [vmem:[%s1646_s1 + $0x6c0] sm:$0xff]  ;;  %v231_v38 = vld [vmem:[%s1646_s1 + $0x6d0] sm:$0xff]  ;;  %v238_v39 = vld [vmem:[%s1646_s1 + $0x708] sm:$0xff] }
  0x27   :  { %664 = vmatpush1.bf16.msra.mxu1 %v663_v47  ;;  %602 = vmatprep.subr.bf16.mxu0 %v601_v48  ;;  %v246_v40 = vld [vmem:[%s1646_s1 + $0x748] sm:$0xff]  ;;  %v240_v41 = vld [vmem:[%s1646_s1 + $0x718] sm:$0xff]  ;;  %v619_v43 = vpack.c.bf16 %v229_v35, %v221_v34  ;;  %v683_v44 = vpack.c.bf16 %v231_v38, %v223_v36  ;;  %v237_v46 = vld [vmem:[%s1646_s1 + $0x700] sm:$0xff] }
  0x28   :  { %666 = vmatprep.subr.bf16.mxu1 %v665_v52  ;;  %v248_v42 = vld [vmem:[%s1646_s1 + $0x758] sm:$0xff]  ;;  %v621_v45 = vpack.c.bf16 %v246_v40, %v238_v39  ;;  %v245_v47 = vld [vmem:[%s1646_s1 + $0x740] sm:$0xff]  ;;  %v239_v48 = vld [vmem:[%s1646_s1 + $0x710] sm:$0xff] }
  0x29   :  { %v685_v49 = vpack.c.bf16 %v248_v42, %v240_v41  ;;  %v247_v50 = vld [vmem:[%s1646_s1 + $0x750] sm:$0xff]  ;;  %v254_v51 = vld [vmem:[%s1646_s1 + $0x788] sm:$0xff]  ;;  %v256_v53 = vld [vmem:[%s1646_s1 + $0x798] sm:$0xff]  ;;  %v623_v55 = vpack.c.bf16 %v245_v47, %v237_v46 }
  0x2a   :  { %604 = vmatpush1.bf16.msra.mxu0 %v603_v58  ;;  %v262_v52 = vld [vmem:[%s1646_s1 + $0x7c8] sm:$0xff]  ;;  %v264_v54 = vld [vmem:[%s1646_s1 + $0x7d8] sm:$0xff]  ;;  %v687_v56 = vpack.c.bf16 %v247_v50, %v239_v48  ;;  %v253_v58 = vld [vmem:[%s1646_s1 + $0x780] sm:$0xff] }
  0x2b   :  { %668 = vmatpush1.bf16.msra.mxu1 %v667_v59  ;;  %606 = vmatprep.subr.bf16.mxu0 %v605_v60  ;;  %v625_v57 = vpack.c.bf16 %v262_v52, %v254_v51  ;;  %v261_v59 = vld [vmem:[%s1646_s1 + $0x7c0] sm:$0xff]  ;;  %v255_v60 = vld [vmem:[%s1646_s1 + $0x790] sm:$0xff]  ;;  %v689_v61 = vpack.c.bf16 %v264_v54, %v256_v53  ;;  %v18_v63 = vld [vmem:[%s1646_s1 + $0x28] sm:$0xff] }
  0x2c   :  { %670 = vmatprep.subr.bf16.mxu1 %v669_v0  ;;  %v263_v62 = vld [vmem:[%s1646_s1 + $0x7d0] sm:$0xff]  ;;  %v26_v0 = vld [vmem:[%s1646_s1 + $0x68] sm:$0xff]  ;;  %v20_v1 = vld [vmem:[%s1646_s1 + $0x38] sm:$0xff]  ;;  %v627_v3 = vpack.c.bf16 %v261_v59, %v253_v58 }
  0x2d   :  { %v28_v2 = vld [vmem:[%s1646_s1 + $0x78] sm:$0xff]  ;;  %v691_v4 = vpack.c.bf16 %v263_v62, %v255_v60  ;;  %v693_v5 = vpack.c.bf16 %v26_v0, %v18_v63  ;;  %v25_v7 = vld [vmem:[%s1646_s1 + $0x60] sm:$0xff]  ;;  %v27_v10 = vld [vmem:[%s1646_s1 + $0x70] sm:$0xff] }
  0x2e   :  { %608 = vmatpush1.bf16.msra.mxu0 %v607_v6  ;;  %v17_v6 = vld [vmem:[%s1646_s1 + $0x20] sm:$0xff]  ;;  %v34_v11 = vld [vmem:[%s1646_s1 + $0xa8] sm:$0xff]  ;;  %v44_v14 = vld [vmem:[%s1646_s1 + $0xf8] sm:$0xff] }
  0x2f   :  { %672 = vmatpush1.bf16.msra.mxu1 %v671_v8  ;;  %610 = vmatprep.subr.bf16.mxu0 %v609_v9  ;;  %v19_v8 = vld [vmem:[%s1646_s1 + $0x30] sm:$0xff]  ;;  %v757_v9 = vpack.c.bf16 %v28_v2, %v20_v1  ;;  %v42_v12 = vld [vmem:[%s1646_s1 + $0xe8] sm:$0xff]  ;;  %v1266_v15 = vld [vmem:[%s1647_s0] sm:$0xff]  ;;  %v695_v17 = vpack.c.bf16 %v25_v7, %v17_v6 }
  0x30   :  { %674 = vmatprep.subr.bf16.mxu1 %v673_v13  ;;  %v36_v13 = vld [vmem:[%s1646_s1 + $0xb8] sm:$0xff]  ;;  %v759_v18 = vpack.c.bf16 %v27_v10, %v19_v8  ;;  %v35_v22 = vld [vmem:[%s1646_s1 + $0xb0] sm:$0xff]  ;;  %v58_v26 = vld [vmem:[%s1646_s1 + $0x168] sm:$0xff] }
  0x31   :  { %v761_v23 = vpack.c.bf16 %v44_v14, %v36_v13  ;;  %v43_v24 = vld [vmem:[%s1646_s1 + $0xf0] sm:$0xff]  ;;  %v52_v27 = vld [vmem:[%s1646_s1 + $0x138] sm:$0xff]  ;;  %v74_v38 = vld [vmem:[%s1646_s1 + $0x1e8] sm:$0xff] }
  0x32   :  { %612 = vmatpush1.bf16.msra.mxu0 %v611_v19  ;;  %v697_v19 = vpack.c.bf16 %v42_v12, %v34_v11  ;;  %v60_v28 = vld [vmem:[%s1646_s1 + $0x178] sm:$0xff]  ;;  %v763_v30 = vpack.c.bf16 %v43_v24, %v35_v22  ;;  %v51_v34 = vld [vmem:[%s1646_s1 + $0x130] sm:$0xff]  ;;  %v82_v48 = vld [vmem:[%s1646_s1 + $0x228] sm:$0xff] }
  0x33   :  { %676 = vmatpush1.bf16.msra.mxu1 %v675_v20  ;;  %614 = vmatprep.subr.bf16.mxu0 %v613_v21  ;;  %v33_v20 = vld [vmem:[%s1646_s1 + $0xa0] sm:$0xff]  ;;  %v765_v35 = vpack.c.bf16 %v60_v28, %v52_v27  ;;  %v59_v36 = vld [vmem:[%s1646_s1 + $0x170] sm:$0xff]  ;;  %v68_v39 = vld [vmem:[%s1646_s1 + $0x1b8] sm:$0xff] }
  0x34   :  { %678 = vmatprep.subr.bf16.mxu1 %v677_v25  ;;  %v41_v21 = vld [vmem:[%s1646_s1 + $0xe0] sm:$0xff]  ;;  %v50_v25 = vld [vmem:[%s1646_s1 + $0x128] sm:$0xff]  ;;  %v76_v40 = vld [vmem:[%s1646_s1 + $0x1f8] sm:$0xff]  ;;  %v767_v42 = vpack.c.bf16 %v59_v36, %v51_v34 }
  0x35   :  { %v699_v29 = vpack.c.bf16 %v41_v21, %v33_v20  ;;  %v67_v46 = vld [vmem:[%s1646_s1 + $0x1b0] sm:$0xff]  ;;  %v84_v50 = vld [vmem:[%s1646_s1 + $0x238] sm:$0xff]  ;;  %v98_v60 = vld [vmem:[%s1646_s1 + $0x2a8] sm:$0xff] }
  0x36   :  { %616 = vmatpush1.bf16.msra.mxu0 %v615_v31  ;;  %v701_v31 = vpack.c.bf16 %v58_v26, %v50_v25  ;;  %v75_v47 = vld [vmem:[%s1646_s1 + $0x1f0] sm:$0xff]  ;;  %v92_v51 = vld [vmem:[%s1646_s1 + $0x278] sm:$0xff]  ;;  %v114_v8 = vld [vmem:[%s1646_s1 + $0x328] sm:$0xff] }
  0x37   :  { %680 = vmatpush1.bf16.msra.mxu1 %v679_v32  ;;  %618 = vmatprep.subr.bf16.mxu0 %v617_v33  ;;  %v49_v32 = vld [vmem:[%s1646_s1 + $0x120] sm:$0xff]  ;;  %v771_v53 = vpack.c.bf16 %v75_v47, %v67_v46  ;;  %v773_v58 = vpack.c.bf16 %v92_v51, %v84_v50  ;;  %v91_v59 = vld [vmem:[%s1646_s1 + $0x270] sm:$0xff]  ;;  %v100_v62 = vld [vmem:[%s1646_s1 + $0x2b8] sm:$0xff] }
  0x38   :  { %682 = vmatprep.subr.bf16.mxu1 %v681_v37  ;;  %v57_v33 = vld [vmem:[%s1646_s1 + $0x160] sm:$0xff]  ;;  %v66_v37 = vld [vmem:[%s1646_s1 + $0x1a8] sm:$0xff]  ;;  %v108_v63 = vld [vmem:[%s1646_s1 + $0x2f8] sm:$0xff] }
  0x39   :  { %v703_v41 = vpack.c.bf16 %v57_v33, %v49_v32  ;;  %v777_v6 = vpack.c.bf16 %v108_v63, %v100_v62  ;;  %v107_v7 = vld [vmem:[%s1646_s1 + $0x2f0] sm:$0xff]  ;;  %v116_v10 = vld [vmem:[%s1646_s1 + $0x338] sm:$0xff]  ;;  %v130_v22 = vld [vmem:[%s1646_s1 + $0x3a8] sm:$0xff] }
  0x3a   :  { %620 = vmatpush1.bf16.msra.mxu0 %v619_v43  ;;  %v705_v43 = vpack.c.bf16 %v74_v38, %v66_v37  ;;  %v124_v11 = vld [vmem:[%s1646_s1 + $0x378] sm:$0xff]  ;;  %v123_v21 = vld [vmem:[%s1646_s1 + $0x370] sm:$0xff]  ;;  %v146_v34 = vld [vmem:[%s1646_s1 + $0x428] sm:$0xff] }
  0x3b   :  { %684 = vmatpush1.bf16.msra.mxu1 %v683_v44  ;;  %622 = vmatprep.subr.bf16.mxu0 %v621_v45  ;;  %v65_v44 = vld [vmem:[%s1646_s1 + $0x1a0] sm:$0xff]  ;;  %v781_v20 = vpack.c.bf16 %v124_v11, %v116_v10  ;;  %v132_v24 = vld [vmem:[%s1646_s1 + $0x3b8] sm:$0xff]  ;;  %v139_v33 = vld [vmem:[%s1646_s1 + $0x3f0] sm:$0xff] }
  0x3c   :  { %686 = vmatprep.subr.bf16.mxu1 %v685_v49  ;;  %v73_v45 = vld [vmem:[%s1646_s1 + $0x1e0] sm:$0xff]  ;;  %v90_v49 = vld [vmem:[%s1646_s1 + $0x268] sm:$0xff]  ;;  %v140_v25 = vld [vmem:[%s1646_s1 + $0x3f8] sm:$0xff] }
  0x3d   :  { %v707_v52 = vpack.c.bf16 %v73_v45, %v65_v44  ;;  %v709_v54 = vpack.c.bf16 %v90_v49, %v82_v48  ;;  %v785_v32 = vpack.c.bf16 %v140_v25, %v132_v24  ;;  %v148_v36 = vld [vmem:[%s1646_s1 + $0x438] sm:$0xff]  ;;  %v155_v45 = vld [vmem:[%s1646_s1 + $0x470] sm:$0xff]  ;;  %v162_v46 = vld [vmem:[%s1646_s1 + $0x4a8] sm:$0xff] }
  0x3e   :  { %624 = vmatpush1.bf16.msra.mxu0 %v623_v55  ;;  %v81_v55 = vld [vmem:[%s1646_s1 + $0x220] sm:$0xff]  ;;  %v156_v37 = vld [vmem:[%s1646_s1 + $0x478] sm:$0xff] }
  0x3f   :  { %688 = vmatpush1.bf16.msra.mxu1 %v687_v56  ;;  %626 = vmatprep.subr.bf16.mxu0 %v625_v57  ;;  %v89_v56 = vld [vmem:[%s1646_s1 + $0x260] sm:$0xff]  ;;  %v83_v57 = vld [vmem:[%s1646_s1 + $0x230] sm:$0xff]  ;;  %v789_v44 = vpack.c.bf16 %v156_v37, %v148_v36  ;;  %v164_v47 = vld [vmem:[%s1646_s1 + $0x4b8] sm:$0xff] }
  0x40   :  { %690 = vmatprep.subr.bf16.mxu1 %v689_v61  ;;  %v106_v61 = vld [vmem:[%s1646_s1 + $0x2e8] sm:$0xff]  ;;  %v711_v0 = vpack.c.bf16 %v89_v56, %v81_v55  ;;  %v775_v1 = vpack.c.bf16 %v91_v59, %v83_v57  ;;  %v172_v48 = vld [vmem:[%s1646_s1 + $0x4f8] sm:$0xff]  ;;  %v171_v56 = vld [vmem:[%s1646_s1 + $0x4f0] sm:$0xff] }
  0x41   :  { %v713_v2 = vpack.c.bf16 %v106_v61, %v98_v60  ;;  %v793_v55 = vpack.c.bf16 %v172_v48, %v164_v47  ;;  %v178_v57 = vld [vmem:[%s1646_s1 + $0x528] sm:$0xff]  ;;  %v180_v59 = vld [vmem:[%s1646_s1 + $0x538] sm:$0xff] }
  0x42   :  { %628 = vmatpush1.bf16.msra.mxu0 %v627_v3  ;;  %v97_v3 = vld [vmem:[%s1646_s1 + $0x2a0] sm:$0xff]  ;;  %v188_v60 = vld [vmem:[%s1646_s1 + $0x578] sm:$0xff] }
  0x43   :  { %692 = vmatpush1.bf16.msra.mxu1 %v691_v4  ;;  %694 = vmatprep.subr.bf16.mxu0 %v693_v5  ;;  %v105_v4 = vld [vmem:[%s1646_s1 + $0x2e0] sm:$0xff]  ;;  %v99_v5 = vld [vmem:[%s1646_s1 + $0x2b0] sm:$0xff] }
  0x44   :  { %758 = vmatprep.subr.bf16.mxu1 %v757_v9  ;;  %v122_v9 = vld [vmem:[%s1646_s1 + $0x368] sm:$0xff]  ;;  %v715_v12 = vpack.c.bf16 %v105_v4, %v97_v3  ;;  %v779_v13 = vpack.c.bf16 %v107_v7, %v99_v5  ;;  %v797_v3 = vpack.c.bf16 %v188_v60, %v180_v59  ;;  %v187_v4 = vld [vmem:[%s1646_s1 + $0x570] sm:$0xff]  ;;  %v196_v7 = vld [vmem:[%s1646_s1 + $0x5b8] sm:$0xff] }
  0x45   :  { %334 = vmatmul.mubr.f32.vlgmr.msra.gmra.mrb[0].mxu0 %v1266_v15  ;;  %v717_v14 = vpack.c.bf16 %v122_v9, %v114_v8  ;;  %v194_v5 = vld [vmem:[%s1646_s1 + $0x5a8] sm:$0xff]  ;;  %v204_v8 = vld [vmem:[%s1646_s1 + $0x5f8] sm:$0xff] }
  0x46   :  { %405 = vmatmul.mubr.f32.vlgmr.msra.gmra.mrb[0].mxu1 %v1266_v15  ;;  %696 = vmatpush1.bf16.msra.mxu0 %v695_v17  ;;  %v113_v17 = vld [vmem:[%s1646_s1 + $0x320] sm:$0xff] }
  0x47   :  { %760 = vmatpush1.bf16.msra.mxu1 %v759_v18  ;;  %698 = vmatprep.subr.bf16.mxu0 %v697_v19  ;;  %v121_v18 = vld [vmem:[%s1646_s1 + $0x360] sm:$0xff]  ;;  %v115_v19 = vld [vmem:[%s1646_s1 + $0x330] sm:$0xff] }
  0x48   :  { %762 = vmatprep.subr.bf16.mxu1 %v761_v23  ;;  %475 = vmatprep.mubr.f32.mxu0 %v1133_v16  ;;  %v138_v23 = vld [vmem:[%s1646_s1 + $0x3e8] sm:$0xff]  ;;  %v719_v26 = vpack.c.bf16 %v121_v18, %v113_v17  ;;  %v783_v27 = vpack.c.bf16 %v123_v21, %v115_v19  ;;  %v801_v17 = vpack.c.bf16 %v204_v8, %v196_v7  ;;  %v203_v18 = vld [vmem:[%s1646_s1 + $0x5f0] sm:$0xff]  ;;  %v212_v21 = vld [vmem:[%s1646_s1 + $0x638] sm:$0xff] }
  0x49   :  { %546 = vmatprep.mubr.f32.mxu1 %v1133_v16  ;;  %v769_v16 = vpack.c.bf16 %v76_v40, %v68_v39  ;;  %v721_v28 = vpack.c.bf16 %v138_v23, %v130_v22  ;;  %v210_v19 = vld [vmem:[%s1646_s1 + $0x628] sm:$0xff]  ;;  %v220_v22 = vld [vmem:[%s1646_s1 + $0x678] sm:$0xff] }
  0x4a   :  { %700 = vmatpush1.bf16.msra.mxu0 %v699_v29  ;;  %v129_v29 = vld [vmem:[%s1646_s1 + $0x3a0] sm:$0xff] }
  0x4b   :  { %764 = vmatpush1.bf16.msra.mxu1 %v763_v30  ;;  %702 = vmatprep.subr.bf16.mxu0 %v701_v31  ;;  %v137_v30 = vld [vmem:[%s1646_s1 + $0x3e0] sm:$0xff]  ;;  %v131_v31 = vld [vmem:[%s1646_s1 + $0x3b0] sm:$0xff] }
  0x4c   :  { %766 = vmatprep.subr.bf16.mxu1 %v765_v35  ;;  %v154_v35 = vld [vmem:[%s1646_s1 + $0x468] sm:$0xff]  ;;  %v723_v38 = vpack.c.bf16 %v137_v30, %v129_v29  ;;  %v787_v39 = vpack.c.bf16 %v139_v33, %v131_v31  ;;  %v805_v29 = vpack.c.bf16 %v220_v22, %v212_v21  ;;  %v219_v30 = vld [vmem:[%s1646_s1 + $0x670] sm:$0xff]  ;;  %v228_v33 = vld [vmem:[%s1646_s1 + $0x6b8] sm:$0xff] }
  0x4d   :  { %v725_v40 = vpack.c.bf16 %v154_v35, %v146_v34  ;;  %v226_v31 = vld [vmem:[%s1646_s1 + $0x6a8] sm:$0xff]  ;;  %v236_v34 = vld [vmem:[%s1646_s1 + $0x6f8] sm:$0xff] }
  0x4e   :  { %704 = vmatpush1.bf16.msra.mxu0 %v703_v41  ;;  %v145_v41 = vld [vmem:[%s1646_s1 + $0x420] sm:$0xff] }
  0x4f   :  { %768 = vmatpush1.bf16.msra.mxu1 %v767_v42  ;;  %706 = vmatprep.subr.bf16.mxu0 %v705_v43  ;;  %v153_v42 = vld [vmem:[%s1646_s1 + $0x460] sm:$0xff]  ;;  %v147_v43 = vld [vmem:[%s1646_s1 + $0x430] sm:$0xff] }
  0x50   :  { %770 = vmatprep.subr.bf16.mxu1 %v769_v16  ;;  %v170_v16 = vld [vmem:[%s1646_s1 + $0x4e8] sm:$0xff]  ;;  %v727_v49 = vpack.c.bf16 %v153_v42, %v145_v41  ;;  %v791_v50 = vpack.c.bf16 %v155_v45, %v147_v43  ;;  %v809_v41 = vpack.c.bf16 %v236_v34, %v228_v33  ;;  %v235_v42 = vld [vmem:[%s1646_s1 + $0x6f0] sm:$0xff]  ;;  %v244_v45 = vld [vmem:[%s1646_s1 + $0x738] sm:$0xff] }
  0x51   :  { %v729_v51 = vpack.c.bf16 %v170_v16, %v162_v46  ;;  %v242_v43 = vld [vmem:[%s1646_s1 + $0x728] sm:$0xff]  ;;  %v252_v46 = vld [vmem:[%s1646_s1 + $0x778] sm:$0xff] }
  0x52   :  { %708 = vmatpush1.bf16.msra.mxu0 %v707_v52  ;;  %v161_v52 = vld [vmem:[%s1646_s1 + $0x4a0] sm:$0xff] }
  0x53   :  { %772 = vmatpush1.bf16.msra.mxu1 %v771_v53  ;;  %710 = vmatprep.subr.bf16.mxu0 %v709_v54  ;;  %v169_v53 = vld [vmem:[%s1646_s1 + $0x4e0] sm:$0xff]  ;;  %v163_v54 = vld [vmem:[%s1646_s1 + $0x4b0] sm:$0xff] }
  0x54   :  { %774 = vmatprep.subr.bf16.mxu1 %v773_v58  ;;  %v186_v58 = vld [vmem:[%s1646_s1 + $0x568] sm:$0xff]  ;;  %v731_v61 = vpack.c.bf16 %v169_v53, %v161_v52  ;;  %v795_v62 = vpack.c.bf16 %v171_v56, %v163_v54  ;;  %v813_v52 = vpack.c.bf16 %v252_v46, %v244_v45  ;;  %v251_v53 = vld [vmem:[%s1646_s1 + $0x770] sm:$0xff]  ;;  %v260_v56 = vld [vmem:[%s1646_s1 + $0x7b8] sm:$0xff] }
  0x55   :  { %v733_v63 = vpack.c.bf16 %v186_v58, %v178_v57  ;;  %v258_v54 = vld [vmem:[%s1646_s1 + $0x7a8] sm:$0xff]  ;;  %v268_v57 = vld [vmem:[%s1646_s1 + $0x7f8] sm:$0xff] }
  0x56   :  { %712 = vmatpush1.bf16.msra.mxu0 %v711_v0  ;;  %v177_v0 = vld [vmem:[%s1646_s1 + $0x520] sm:$0xff] }
  0x57   :  { %776 = vmatpush1.bf16.msra.mxu1 %v775_v1  ;;  %714 = vmatprep.subr.bf16.mxu0 %v713_v2  ;;  %v185_v1 = vld [vmem:[%s1646_s1 + $0x560] sm:$0xff]  ;;  %v179_v2 = vld [vmem:[%s1646_s1 + $0x530] sm:$0xff] }
  0x58   :  { %778 = vmatprep.subr.bf16.mxu1 %v777_v6  ;;  %v202_v6 = vld [vmem:[%s1646_s1 + $0x5e8] sm:$0xff]  ;;  %v735_v9 = vpack.c.bf16 %v185_v1, %v177_v0  ;;  %v799_v10 = vpack.c.bf16 %v187_v4, %v179_v2  ;;  %v259_v0 = vld [vmem:[%s1646_s1 + $0x7b0] sm:$0xff] }
  0x59   :  { %v737_v11 = vpack.c.bf16 %v202_v6, %v194_v5  ;;  %v267_v1 = vld [vmem:[%s1646_s1 + $0x7f0] sm:$0xff] }
  0x5a   :  { %716 = vmatpush1.bf16.msra.mxu0 %v715_v12  ;;  %v193_v12 = vld [vmem:[%s1646_s1 + $0x5a0] sm:$0xff] }
  0x5b   :  { %780 = vmatpush1.bf16.msra.mxu1 %v779_v13  ;;  %718 = vmatprep.subr.bf16.mxu0 %v717_v14  ;;  %v201_v13 = vld [vmem:[%s1646_s1 + $0x5e0] sm:$0xff]  ;;  %v195_v14 = vld [vmem:[%s1646_s1 + $0x5b0] sm:$0xff] }
  0x5c   :  { %782 = vmatprep.subr.bf16.mxu1 %v781_v20  ;;  %v218_v20 = vld [vmem:[%s1646_s1 + $0x668] sm:$0xff]  ;;  %v739_v23 = vpack.c.bf16 %v201_v13, %v193_v12  ;;  %v803_v24 = vpack.c.bf16 %v203_v18, %v195_v14 }
  0x5d   :  { %v741_v25 = vpack.c.bf16 %v218_v20, %v210_v19 }
  0x5e   :  { %720 = vmatpush1.bf16.msra.mxu0 %v719_v26  ;;  %v209_v26 = vld [vmem:[%s1646_s1 + $0x620] sm:$0xff] }
  0x5f   :  { %784 = vmatpush1.bf16.msra.mxu1 %v783_v27  ;;  %722 = vmatprep.subr.bf16.mxu0 %v721_v28  ;;  %v217_v27 = vld [vmem:[%s1646_s1 + $0x660] sm:$0xff]  ;;  %v211_v28 = vld [vmem:[%s1646_s1 + $0x630] sm:$0xff] }
  0x60   :  { %786 = vmatprep.subr.bf16.mxu1 %v785_v32  ;;  %v234_v32 = vld [vmem:[%s1646_s1 + $0x6e8] sm:$0xff]  ;;  %v743_v35 = vpack.c.bf16 %v217_v27, %v209_v26  ;;  %v807_v36 = vpack.c.bf16 %v219_v30, %v211_v28 }
  0x61   :  { %v745_v37 = vpack.c.bf16 %v234_v32, %v226_v31 }
  0x62   :  { %724 = vmatpush1.bf16.msra.mxu0 %v723_v38  ;;  %v225_v38 = vld [vmem:[%s1646_s1 + $0x6a0] sm:$0xff] }
  0x63   :  { %788 = vmatpush1.bf16.msra.mxu1 %v787_v39  ;;  %726 = vmatprep.subr.bf16.mxu0 %v725_v40  ;;  %v233_v39 = vld [vmem:[%s1646_s1 + $0x6e0] sm:$0xff]  ;;  %v227_v40 = vld [vmem:[%s1646_s1 + $0x6b0] sm:$0xff] }
  0x64   :  { %790 = vmatprep.subr.bf16.mxu1 %v789_v44  ;;  %v250_v44 = vld [vmem:[%s1646_s1 + $0x768] sm:$0xff]  ;;  %v747_v16 = vpack.c.bf16 %v233_v39, %v225_v38  ;;  %v811_v47 = vpack.c.bf16 %v235_v42, %v227_v40 }
  0x65   :  { %v749_v48 = vpack.c.bf16 %v250_v44, %v242_v43 }
  0x66   :  { %728 = vmatpush1.bf16.msra.mxu0 %v727_v49  ;;  %v241_v49 = vld [vmem:[%s1646_s1 + $0x720] sm:$0xff] }
  0x67   :  { %792 = vmatpush1.bf16.msra.mxu1 %v791_v50  ;;  %730 = vmatprep.subr.bf16.mxu0 %v729_v51  ;;  %v249_v50 = vld [vmem:[%s1646_s1 + $0x760] sm:$0xff]  ;;  %v243_v51 = vld [vmem:[%s1646_s1 + $0x730] sm:$0xff] }
  0x68   :  { %794 = vmatprep.subr.bf16.mxu1 %v793_v55  ;;  %v266_v55 = vld [vmem:[%s1646_s1 + $0x7e8] sm:$0xff]  ;;  %v751_v58 = vpack.c.bf16 %v249_v50, %v241_v49  ;;  %v815_v59 = vpack.c.bf16 %v251_v53, %v243_v51 }
  0x69   :  { %v753_v60 = vpack.c.bf16 %v266_v55, %v258_v54 }
  0x6a   :  { %732 = vmatpush1.bf16.msra.mxu0 %v731_v61  ;;  %v257_v61 = vld [vmem:[%s1646_s1 + $0x7a0] sm:$0xff] }
  0x6b   :  { %796 = vmatpush1.bf16.msra.mxu1 %v795_v62  ;;  %734 = vmatprep.subr.bf16.mxu0 %v733_v63  ;;  %v265_v62 = vld [vmem:[%s1646_s1 + $0x7e0] sm:$0xff]  ;;  %v817_v63 = vpack.c.bf16 %v268_v57, %v260_v56 }
  0x6c   :  { %798 = vmatprep.subr.bf16.mxu1 %v797_v3  ;;  %v755_v2 = vpack.c.bf16 %v265_v62, %v257_v61  ;;  %v819_v3 = vpack.c.bf16 %v267_v1, %v259_v0 }
  0x6e   :  { %736 = vmatpush1.bf16.msra.mxu0 %v735_v9 }
  0x6f   :  { %800 = vmatpush1.bf16.msra.mxu1 %v799_v10  ;;  %738 = vmatprep.subr.bf16.mxu0 %v737_v11 }
  0x70   :  { %802 = vmatprep.subr.bf16.mxu1 %v801_v17 }
  0x72   :  { %740 = vmatpush1.bf16.msra.mxu0 %v739_v23 }
  0x73   :  { %804 = vmatpush1.bf16.msra.mxu1 %v803_v24  ;;  %742 = vmatprep.subr.bf16.mxu0 %v741_v25 }
  0x74   :  { %806 = vmatprep.subr.bf16.mxu1 %v805_v29 }
  0x76   :  { %744 = vmatpush1.bf16.msra.mxu0 %v743_v35 }
  0x77   :  { %808 = vmatpush1.bf16.msra.mxu1 %v807_v36  ;;  %746 = vmatprep.subr.bf16.mxu0 %v745_v37 }
  0x78   :  { %810 = vmatprep.subr.bf16.mxu1 %v809_v41 }
  0x7a   :  { %748 = vmatpush1.bf16.msra.mxu0 %v747_v16 }
  0x7b   :  { %812 = vmatpush1.bf16.msra.mxu1 %v811_v47  ;;  %750 = vmatprep.subr.bf16.mxu0 %v749_v48 }
  0x7c   :  { %814 = vmatprep.subr.bf16.mxu1 %v813_v52 }
  0x7e   :  { %752 = vmatpush1.bf16.msra.mxu0 %v751_v58 }
  0x7f   :  { %816 = vmatpush1.bf16.msra.mxu1 %v815_v59  ;;  %754 = vmatprep.subr.bf16.mxu0 %v753_v60 }
  0x80   :  { %818 = vmatprep.subr.bf16.mxu1 %v817_v63 }
  0x82   :  { %756 = vmatpush1.bf16.msra.mxu0 %v755_v2 }
  0x83   :  { %820 = vmatpush1.bf16.msra.mxu1 %v819_v3 }
  0x85   :  { %476 = vmatmul.mubr.f32.vlgmr.msra.gmra.mrb[2].mxu0 %v1266_v15 }
  0x86   :  { %547 = vmatmul.mubr.f32.vlgmr.msra.gmra.mrb[2].mxu1 %v1266_v15 }
 0x118   :  { %v335_v4 = vpop.f32.mrb[0].mxu0 }
 0x119   :  { %553 = vst [vmem:[%s1648_s2] sm:$0xff] %v335_v4  ;;  %v406_v5 = vpop.f32.mrb[0].mxu1  ;;  %v337_v6 = vpop.f32.mrb[1].mxu0 }
 0x11a   :  { %555 = vst [vmem:[%s1648_s2 + $0x10] sm:$0xff] %v406_v5  ;;  %554 = vst [vmem:[%s1648_s2 + $0x8] sm:$0xff] %v337_v6  ;;  %v408_v7 = vpop.f32.mrb[1].mxu1 }
 0x11b   :  { %556 = vst [vmem:[%s1648_s2 + $0x18] sm:$0xff] %v408_v7 }
 0x158   :  { %v477_v15 = vpop.f32.mrb[2].mxu0 }
 0x159   :  { %557 = vst [vmem:[%s1648_s2 + $0x20] sm:$0xff] %v477_v15  ;;  %v548_v8 = vpop.f32.mrb[2].mxu1  ;;  %v479_v9 = vpop.f32.mrb[3].mxu0 }
 0x15a   :  { %559 = vst [vmem:[%s1648_s2 + $0x30] sm:$0xff] %v548_v8  ;;  %558 = vst [vmem:[%s1648_s2 + $0x28] sm:$0xff] %v479_v9  ;;  %v550_v10 = vpop.f32.mrb[3].mxu1 }
 0x15b   :  { %560 = vst [vmem:[%s1648_s2 + $0x38] sm:$0xff] %v550_v10 }

</bundles_post_ra>
